<compile_context>
chip_gen: v7x
topology: tpu7x:2x2x1
jax: 0.10.0
libtpu: 0.0.40
codegen_flags: <defaults>
</compile_context>

<pallas_src>
import functools

import jax
import jax.numpy as jnp
from jax import lax
from jax.experimental import pallas as pl
from jax.experimental.pallas import tpu as pltpu


def _recurrent_block_kernel(w_ref, g_ref, bt_ref, m_ref, x_ref, out_ref, *,
                            t, n, c, W, eps):
    """Whole recurrent block in one invocation (tiny shapes, all resident).

    w_ref  : (9*C*C,)     f32 SMEM  conv weight, flat index [(k*C + cin)*C + cout]
    g_ref  : (C,)         f32 SMEM  BN gamma
    bt_ref : (C,)         f32 SMEM  BN beta
    m_ref  : (9, HW)      f32 VMEM  0/1 boundary mask per tap (dest coords)
    x_ref  : (C*N, N*HW?) -> actually (C*N, HW) per-plane rows, channel-major
    out_ref: (C*N, HW)    f32 VMEM  output (same layout); doubles as x1 state
    """
    _, HW = x_ref.shape
    inv_cnt = 1.0 / float(n * HW)

    # Tap order matches the flattened weight layout: k = (dy+1)*3 + (dx+1).
    # result[s] = input[s + dy*W + dx]  ->  roll by (-(dy*W + dx)) mod HW.
    shifts = []
    for dy in (-1, 0, 1):
        for dx in (-1, 0, 1):
            shifts.append((-(dy * W + dx)) % HW)

    # Hoist once: scalar weights / BN params from SMEM, boundary mask rows.
    wv = [w_ref[j] for j in range(9 * c * c)]
    gv = [g_ref[o] for o in range(c)]
    bv = [bt_ref[o] for o in range(c)]
    mrow = [m_ref[k:k + 1, :] for k in range(9)]            # (1, HW) each

    def conv_bn_relu(z):
        # z: (C*N, HW), rows ordered channel-major (row = ch*N + batch).
        # Build the 9 shifted+masked taps once on the fully packed block;
        # shared by all output channels.
        taps = []
        for k in range(9):
            v = z if shifts[k] == 0 else pltpu.roll(z, shifts[k], 1)
            if k != 4:                                      # center tap: no mask
                v = v * mrow[k]                             # (1,HW) bcast over rows
            taps.append(v)                                  # (C*N, HW)
        for o in range(c):
            acc = None                                      # init from first tap
            for k in range(9):
                tk = taps[k]
                for i in range(c):
                    term = tk[i * n:(i + 1) * n, :] * wv[(k * c + i) * c + o]
                    acc = term if acc is None else acc + term
            # acc: (N, HW) conv output for out-channel o over the whole batch.
            # Fused one-pass BatchNorm2d (training-mode batch stats) + ReLU.
            # (conv bias omitted: cancelled exactly by the mean subtraction)
            mean = jnp.sum(acc) * inv_cnt
            var = jnp.sum(acc * acc) * inv_cnt - mean * mean
            scale = gv[o] * lax.rsqrt(var + eps)
            shift = bv[o] - mean * scale
            out_ref[o * n:(o + 1) * n, :] = jnp.maximum(acc * scale + shift, 0.0)

    x_full = x_ref[...]                                     # read input once
    conv_bn_relu(x_full)                                    # i == 0: x1 = conv(x)
    for _ in range(t):                                      # x1 = conv(x + x1)
        conv_bn_relu(x_full + out_ref[...])


def recurrent_block(x_nchw, w, b, gamma, beta, t=2, eps=1e-5):
    """x_nchw: (N,C,H,W); w: (Cout,Cin,3,3) PyTorch layout; b is unused inside
    the kernel (exactly cancelled by train-mode BatchNorm)."""
    del b
    N, C, H, W = x_nchw.shape
    HW = H * W
    # Channel-major packed layout: rows = c*N + n (fills all 8 sublanes for
    # N*C = 8), lanes = H*W (multiple of 128 -> lane-dense).
    x_cm = jnp.transpose(x_nchw, (1, 0, 2, 3)).reshape(C * N, HW).astype(jnp.float32)

    # (Cout, Cin, kh, kw) -> (kh, kw, Cin, Cout) -> flat [(k*C + cin)*C + cout]
    w_flat = jnp.transpose(w, (2, 3, 1, 0)).reshape(-1).astype(jnp.float32)
    g1 = gamma.reshape(C).astype(jnp.float32)
    bt1 = beta.reshape(C).astype(jnp.float32)

    # 0/1 boundary masks per tap, evaluated at destination coordinates.
    ys = jnp.arange(HW, dtype=jnp.int32) // W
    xs = jnp.arange(HW, dtype=jnp.int32) % W
    mask_rows = []
    for dy in (-1, 0, 1):
        for dx in (-1, 0, 1):
            ok = ((ys + dy >= 0) & (ys + dy <= H - 1) &
                  (xs + dx >= 0) & (xs + dx <= W - 1))
            mask_rows.append(ok)
    masks = jnp.stack(mask_rows).astype(jnp.float32)        # (9, HW)

    out_cm = pl.pallas_call(
        functools.partial(_recurrent_block_kernel, t=t, n=N, c=C, W=W, eps=eps),
        out_shape=jax.ShapeDtypeStruct((C * N, HW), jnp.float32),
        in_specs=[
            pl.BlockSpec(memory_space=pltpu.MemorySpace.SMEM),     # w_flat
            pl.BlockSpec(memory_space=pltpu.MemorySpace.SMEM),     # gamma
            pl.BlockSpec(memory_space=pltpu.MemorySpace.SMEM),     # beta
            pl.BlockSpec(memory_space=pltpu.MemorySpace.VMEM),     # masks
            pl.BlockSpec(memory_space=pltpu.MemorySpace.VMEM),     # x (packed)
        ],
        out_specs=pl.BlockSpec(memory_space=pltpu.MemorySpace.VMEM),
    )(w_flat, g1, bt1, masks, x_cm)
    # Layout plumbing back to NCHW (free for these sizes, done by XLA outside).
    return jnp.transpose(out_cm.reshape(C, N, H, W), (1, 0, 2, 3))


def _reference(x_nchw, w, b, gamma, beta, t=2, eps=1e-5):
    """Pure-JAX reference (same semantics as the PyTorch module in train mode,
    including the conv bias)."""
    x = jnp.transpose(x_nchw, (0, 2, 3, 1)).astype(jnp.float32)
    w_hwio = jnp.transpose(w, (2, 3, 1, 0)).astype(jnp.float32)

    def conv(z):
        y = lax.conv_general_dilated(
            z, w_hwio, (1, 1), 'SAME',
            dimension_numbers=('NHWC', 'HWIO', 'NHWC')) + b
        mean = y.mean(axis=(0, 1, 2))
        var = ((y - mean) ** 2).mean(axis=(0, 1, 2))
        y = (y - mean) * lax.rsqrt(var + eps) * gamma + beta
        return jnp.maximum(y, 0.0)

    x1 = conv(x)
    for _ in range(t):
        x1 = conv(x + x1)
    return jnp.transpose(x1, (0, 3, 1, 2))


if __name__ == "__main__":
    N, C, H, W, T = 2, 4, 16, 16, 2

    key = jax.random.PRNGKey(0)
    kx, kw, kb = jax.random.split(key, 3)

    # Deterministic synthetic parameters (shapes from Recurrent_block.__init__).
    x = jax.random.normal(kx, (N, C, H, W), jnp.float32)
    w = jax.random.normal(kw, (C, C, 3, 3), jnp.float32) * (1.0 / (9 * C) ** 0.5)
    b = jax.random.normal(kb, (C,), jnp.float32) * 0.1
    gamma = jnp.ones((C,), jnp.float32)   # BatchNorm default affine init
    beta = jnp.zeros((C,), jnp.float32)
    # TODO(synk): BatchNorm running-stat updates are stateful training side
    # effects and are not reproduced (they do not affect the returned tensor).

    out = recurrent_block(x, w, b, gamma, beta, t=T)
    out = jax.block_until_ready(out)

    ref = jax.block_until_ready(_reference(x, w, b, gamma, beta, t=T))
    assert out.shape == (N, C, H, W)
    assert jnp.allclose(out, ref, atol=1e-3, rtol=1e-3)

    print("KERNEL_OK")
</pallas_src>

<mosaic_0001>
module attributes {stable_mosaic.version = 11 : i64} {
  func.func @_recurrent_block_kernel(%arg0: memref<144xf32, #tpu.memory_space<smem>>, %arg1: memref<4xf32, #tpu.memory_space<smem>>, %arg2: memref<4xf32, #tpu.memory_space<smem>>, %arg3: memref<9x256xf32, #tpu.memory_space<vmem>>, %arg4: memref<8x256xf32, #tpu.memory_space<vmem>>, %arg5: memref<8x256xf32, #tpu.memory_space<vmem>>) attributes {dimension_semantics = [], scalar_prefetch = 0 : i64, scratch_operands = 0 : i64, tpu.core_type = #tpu.core_type<tc>} {
    %c0 = arith.constant 0 : index
    %0 = memref.load %arg0[%c0] : memref<144xf32, #tpu.memory_space<smem>>
    %c1 = arith.constant 1 : index
    %1 = memref.load %arg0[%c1] : memref<144xf32, #tpu.memory_space<smem>>
    %c2 = arith.constant 2 : index
    %2 = memref.load %arg0[%c2] : memref<144xf32, #tpu.memory_space<smem>>
    %c3 = arith.constant 3 : index
    %3 = memref.load %arg0[%c3] : memref<144xf32, #tpu.memory_space<smem>>
    %c4 = arith.constant 4 : index
    %4 = memref.load %arg0[%c4] : memref<144xf32, #tpu.memory_space<smem>>
    %c5 = arith.constant 5 : index
    %5 = memref.load %arg0[%c5] : memref<144xf32, #tpu.memory_space<smem>>
    %c6 = arith.constant 6 : index
    %6 = memref.load %arg0[%c6] : memref<144xf32, #tpu.memory_space<smem>>
    %c7 = arith.constant 7 : index
    %7 = memref.load %arg0[%c7] : memref<144xf32, #tpu.memory_space<smem>>
    %c8 = arith.constant 8 : index
    %8 = memref.load %arg0[%c8] : memref<144xf32, #tpu.memory_space<smem>>
    %c9 = arith.constant 9 : index
    %9 = memref.load %arg0[%c9] : memref<144xf32, #tpu.memory_space<smem>>
    %c10 = arith.constant 10 : index
    %10 = memref.load %arg0[%c10] : memref<144xf32, #tpu.memory_space<smem>>
    %c11 = arith.constant 11 : index
    %11 = memref.load %arg0[%c11] : memref<144xf32, #tpu.memory_space<smem>>
    %c12 = arith.constant 12 : index
    %12 = memref.load %arg0[%c12] : memref<144xf32, #tpu.memory_space<smem>>
    %c13 = arith.constant 13 : index
    %13 = memref.load %arg0[%c13] : memref<144xf32, #tpu.memory_space<smem>>
    %c14 = arith.constant 14 : index
    %14 = memref.load %arg0[%c14] : memref<144xf32, #tpu.memory_space<smem>>
    %c15 = arith.constant 15 : index
    %15 = memref.load %arg0[%c15] : memref<144xf32, #tpu.memory_space<smem>>
    %c16 = arith.constant 16 : index
    %16 = memref.load %arg0[%c16] : memref<144xf32, #tpu.memory_space<smem>>
    %c17 = arith.constant 17 : index
    %17 = memref.load %arg0[%c17] : memref<144xf32, #tpu.memory_space<smem>>
    %c18 = arith.constant 18 : index
    %18 = memref.load %arg0[%c18] : memref<144xf32, #tpu.memory_space<smem>>
    %c19 = arith.constant 19 : index
    %19 = memref.load %arg0[%c19] : memref<144xf32, #tpu.memory_space<smem>>
    %c20 = arith.constant 20 : index
    %20 = memref.load %arg0[%c20] : memref<144xf32, #tpu.memory_space<smem>>
    %c21 = arith.constant 21 : index
    %21 = memref.load %arg0[%c21] : memref<144xf32, #tpu.memory_space<smem>>
    %c22 = arith.constant 22 : index
    %22 = memref.load %arg0[%c22] : memref<144xf32, #tpu.memory_space<smem>>
    %c23 = arith.constant 23 : index
    %23 = memref.load %arg0[%c23] : memref<144xf32, #tpu.memory_space<smem>>
    %c24 = arith.constant 24 : index
    %24 = memref.load %arg0[%c24] : memref<144xf32, #tpu.memory_space<smem>>
    %c25 = arith.constant 25 : index
    %25 = memref.load %arg0[%c25] : memref<144xf32, #tpu.memory_space<smem>>
    %c26 = arith.constant 26 : index
    %26 = memref.load %arg0[%c26] : memref<144xf32, #tpu.memory_space<smem>>
    %c27 = arith.constant 27 : index
    %27 = memref.load %arg0[%c27] : memref<144xf32, #tpu.memory_space<smem>>
    %c28 = arith.constant 28 : index
    %28 = memref.load %arg0[%c28] : memref<144xf32, #tpu.memory_space<smem>>
    %c29 = arith.constant 29 : index
    %29 = memref.load %arg0[%c29] : memref<144xf32, #tpu.memory_space<smem>>
    %c30 = arith.constant 30 : index
    %30 = memref.load %arg0[%c30] : memref<144xf32, #tpu.memory_space<smem>>
    %c31 = arith.constant 31 : index
    %31 = memref.load %arg0[%c31] : memref<144xf32, #tpu.memory_space<smem>>
    %c32 = arith.constant 32 : index
    %32 = memref.load %arg0[%c32] : memref<144xf32, #tpu.memory_space<smem>>
    %c33 = arith.constant 33 : index
    %33 = memref.load %arg0[%c33] : memref<144xf32, #tpu.memory_space<smem>>
    %c34 = arith.constant 34 : index
    %34 = memref.load %arg0[%c34] : memref<144xf32, #tpu.memory_space<smem>>
    %c35 = arith.constant 35 : index
    %35 = memref.load %arg0[%c35] : memref<144xf32, #tpu.memory_space<smem>>
    %c36 = arith.constant 36 : index
    %36 = memref.load %arg0[%c36] : memref<144xf32, #tpu.memory_space<smem>>
    %c37 = arith.constant 37 : index
    %37 = memref.load %arg0[%c37] : memref<144xf32, #tpu.memory_space<smem>>
    %c38 = arith.constant 38 : index
    %38 = memref.load %arg0[%c38] : memref<144xf32, #tpu.memory_space<smem>>
    %c39 = arith.constant 39 : index
    %39 = memref.load %arg0[%c39] : memref<144xf32, #tpu.memory_space<smem>>
    %c40 = arith.constant 40 : index
    %40 = memref.load %arg0[%c40] : memref<144xf32, #tpu.memory_space<smem>>
    %c41 = arith.constant 41 : index
    %41 = memref.load %arg0[%c41] : memref<144xf32, #tpu.memory_space<smem>>
    %c42 = arith.constant 42 : index
    %42 = memref.load %arg0[%c42] : memref<144xf32, #tpu.memory_space<smem>>
    %c43 = arith.constant 43 : index
    %43 = memref.load %arg0[%c43] : memref<144xf32, #tpu.memory_space<smem>>
    %c44 = arith.constant 44 : index
    %44 = memref.load %arg0[%c44] : memref<144xf32, #tpu.memory_space<smem>>
    %c45 = arith.constant 45 : index
    %45 = memref.load %arg0[%c45] : memref<144xf32, #tpu.memory_space<smem>>
    %c46 = arith.constant 46 : index
    %46 = memref.load %arg0[%c46] : memref<144xf32, #tpu.memory_space<smem>>
    %c47 = arith.constant 47 : index
    %47 = memref.load %arg0[%c47] : memref<144xf32, #tpu.memory_space<smem>>
    %c48 = arith.constant 48 : index
    %48 = memref.load %arg0[%c48] : memref<144xf32, #tpu.memory_space<smem>>
    %c49 = arith.constant 49 : index
    %49 = memref.load %arg0[%c49] : memref<144xf32, #tpu.memory_space<smem>>
    %c50 = arith.constant 50 : index
    %50 = memref.load %arg0[%c50] : memref<144xf32, #tpu.memory_space<smem>>
    %c51 = arith.constant 51 : index
    %51 = memref.load %arg0[%c51] : memref<144xf32, #tpu.memory_space<smem>>
    %c52 = arith.constant 52 : index
    %52 = memref.load %arg0[%c52] : memref<144xf32, #tpu.memory_space<smem>>
    %c53 = arith.constant 53 : index
    %53 = memref.load %arg0[%c53] : memref<144xf32, #tpu.memory_space<smem>>
    %c54 = arith.constant 54 : index
    %54 = memref.load %arg0[%c54] : memref<144xf32, #tpu.memory_space<smem>>
    %c55 = arith.constant 55 : index
    %55 = memref.load %arg0[%c55] : memref<144xf32, #tpu.memory_space<smem>>
    %c56 = arith.constant 56 : index
    %56 = memref.load %arg0[%c56] : memref<144xf32, #tpu.memory_space<smem>>
    %c57 = arith.constant 57 : index
    %57 = memref.load %arg0[%c57] : memref<144xf32, #tpu.memory_space<smem>>
    %c58 = arith.constant 58 : index
    %58 = memref.load %arg0[%c58] : memref<144xf32, #tpu.memory_space<smem>>
    %c59 = arith.constant 59 : index
    %59 = memref.load %arg0[%c59] : memref<144xf32, #tpu.memory_space<smem>>
    %c60 = arith.constant 60 : index
    %60 = memref.load %arg0[%c60] : memref<144xf32, #tpu.memory_space<smem>>
    %c61 = arith.constant 61 : index
    %61 = memref.load %arg0[%c61] : memref<144xf32, #tpu.memory_space<smem>>
    %c62 = arith.constant 62 : index
    %62 = memref.load %arg0[%c62] : memref<144xf32, #tpu.memory_space<smem>>
    %c63 = arith.constant 63 : index
    %63 = memref.load %arg0[%c63] : memref<144xf32, #tpu.memory_space<smem>>
    %c64 = arith.constant 64 : index
    %64 = memref.load %arg0[%c64] : memref<144xf32, #tpu.memory_space<smem>>
    %c65 = arith.constant 65 : index
    %65 = memref.load %arg0[%c65] : memref<144xf32, #tpu.memory_space<smem>>
    %c66 = arith.constant 66 : index
    %66 = memref.load %arg0[%c66] : memref<144xf32, #tpu.memory_space<smem>>
    %c67 = arith.constant 67 : index
    %67 = memref.load %arg0[%c67] : memref<144xf32, #tpu.memory_space<smem>>
    %c68 = arith.constant 68 : index
    %68 = memref.load %arg0[%c68] : memref<144xf32, #tpu.memory_space<smem>>
    %c69 = arith.constant 69 : index
    %69 = memref.load %arg0[%c69] : memref<144xf32, #tpu.memory_space<smem>>
    %c70 = arith.constant 70 : index
    %70 = memref.load %arg0[%c70] : memref<144xf32, #tpu.memory_space<smem>>
    %c71 = arith.constant 71 : index
    %71 = memref.load %arg0[%c71] : memref<144xf32, #tpu.memory_space<smem>>
    %c72 = arith.constant 72 : index
    %72 = memref.load %arg0[%c72] : memref<144xf32, #tpu.memory_space<smem>>
    %c73 = arith.constant 73 : index
    %73 = memref.load %arg0[%c73] : memref<144xf32, #tpu.memory_space<smem>>
    %c74 = arith.constant 74 : index
    %74 = memref.load %arg0[%c74] : memref<144xf32, #tpu.memory_space<smem>>
    %c75 = arith.constant 75 : index
    %75 = memref.load %arg0[%c75] : memref<144xf32, #tpu.memory_space<smem>>
    %c76 = arith.constant 76 : index
    %76 = memref.load %arg0[%c76] : memref<144xf32, #tpu.memory_space<smem>>
    %c77 = arith.constant 77 : index
    %77 = memref.load %arg0[%c77] : memref<144xf32, #tpu.memory_space<smem>>
    %c78 = arith.constant 78 : index
    %78 = memref.load %arg0[%c78] : memref<144xf32, #tpu.memory_space<smem>>
    %c79 = arith.constant 79 : index
    %79 = memref.load %arg0[%c79] : memref<144xf32, #tpu.memory_space<smem>>
    %c80 = arith.constant 80 : index
    %80 = memref.load %arg0[%c80] : memref<144xf32, #tpu.memory_space<smem>>
    %c81 = arith.constant 81 : index
    %81 = memref.load %arg0[%c81] : memref<144xf32, #tpu.memory_space<smem>>
    %c82 = arith.constant 82 : index
    %82 = memref.load %arg0[%c82] : memref<144xf32, #tpu.memory_space<smem>>
    %c83 = arith.constant 83 : index
    %83 = memref.load %arg0[%c83] : memref<144xf32, #tpu.memory_space<smem>>
    %c84 = arith.constant 84 : index
    %84 = memref.load %arg0[%c84] : memref<144xf32, #tpu.memory_space<smem>>
    %c85 = arith.constant 85 : index
    %85 = memref.load %arg0[%c85] : memref<144xf32, #tpu.memory_space<smem>>
    %c86 = arith.constant 86 : index
    %86 = memref.load %arg0[%c86] : memref<144xf32, #tpu.memory_space<smem>>
    %c87 = arith.constant 87 : index
    %87 = memref.load %arg0[%c87] : memref<144xf32, #tpu.memory_space<smem>>
    %c88 = arith.constant 88 : index
    %88 = memref.load %arg0[%c88] : memref<144xf32, #tpu.memory_space<smem>>
    %c89 = arith.constant 89 : index
    %89 = memref.load %arg0[%c89] : memref<144xf32, #tpu.memory_space<smem>>
    %c90 = arith.constant 90 : index
    %90 = memref.load %arg0[%c90] : memref<144xf32, #tpu.memory_space<smem>>
    %c91 = arith.constant 91 : index
    %91 = memref.load %arg0[%c91] : memref<144xf32, #tpu.memory_space<smem>>
    %c92 = arith.constant 92 : index
    %92 = memref.load %arg0[%c92] : memref<144xf32, #tpu.memory_space<smem>>
    %c93 = arith.constant 93 : index
    %93 = memref.load %arg0[%c93] : memref<144xf32, #tpu.memory_space<smem>>
    %c94 = arith.constant 94 : index
    %94 = memref.load %arg0[%c94] : memref<144xf32, #tpu.memory_space<smem>>
    %c95 = arith.constant 95 : index
    %95 = memref.load %arg0[%c95] : memref<144xf32, #tpu.memory_space<smem>>
    %c96 = arith.constant 96 : index
    %96 = memref.load %arg0[%c96] : memref<144xf32, #tpu.memory_space<smem>>
    %c97 = arith.constant 97 : index
    %97 = memref.load %arg0[%c97] : memref<144xf32, #tpu.memory_space<smem>>
    %c98 = arith.constant 98 : index
    %98 = memref.load %arg0[%c98] : memref<144xf32, #tpu.memory_space<smem>>
    %c99 = arith.constant 99 : index
    %99 = memref.load %arg0[%c99] : memref<144xf32, #tpu.memory_space<smem>>
    %c100 = arith.constant 100 : index
    %100 = memref.load %arg0[%c100] : memref<144xf32, #tpu.memory_space<smem>>
    %c101 = arith.constant 101 : index
    %101 = memref.load %arg0[%c101] : memref<144xf32, #tpu.memory_space<smem>>
    %c102 = arith.constant 102 : index
    %102 = memref.load %arg0[%c102] : memref<144xf32, #tpu.memory_space<smem>>
    %c103 = arith.constant 103 : index
    %103 = memref.load %arg0[%c103] : memref<144xf32, #tpu.memory_space<smem>>
    %c104 = arith.constant 104 : index
    %104 = memref.load %arg0[%c104] : memref<144xf32, #tpu.memory_space<smem>>
    %c105 = arith.constant 105 : index
    %105 = memref.load %arg0[%c105] : memref<144xf32, #tpu.memory_space<smem>>
    %c106 = arith.constant 106 : index
    %106 = memref.load %arg0[%c106] : memref<144xf32, #tpu.memory_space<smem>>
    %c107 = arith.constant 107 : index
    %107 = memref.load %arg0[%c107] : memref<144xf32, #tpu.memory_space<smem>>
    %c108 = arith.constant 108 : index
    %108 = memref.load %arg0[%c108] : memref<144xf32, #tpu.memory_space<smem>>
    %c109 = arith.constant 109 : index
    %109 = memref.load %arg0[%c109] : memref<144xf32, #tpu.memory_space<smem>>
    %c110 = arith.constant 110 : index
    %110 = memref.load %arg0[%c110] : memref<144xf32, #tpu.memory_space<smem>>
    %c111 = arith.constant 111 : index
    %111 = memref.load %arg0[%c111] : memref<144xf32, #tpu.memory_space<smem>>
    %c112 = arith.constant 112 : index
    %112 = memref.load %arg0[%c112] : memref<144xf32, #tpu.memory_space<smem>>
    %c113 = arith.constant 113 : index
    %113 = memref.load %arg0[%c113] : memref<144xf32, #tpu.memory_space<smem>>
    %c114 = arith.constant 114 : index
    %114 = memref.load %arg0[%c114] : memref<144xf32, #tpu.memory_space<smem>>
    %c115 = arith.constant 115 : index
    %115 = memref.load %arg0[%c115] : memref<144xf32, #tpu.memory_space<smem>>
    %c116 = arith.constant 116 : index
    %116 = memref.load %arg0[%c116] : memref<144xf32, #tpu.memory_space<smem>>
    %c117 = arith.constant 117 : index
    %117 = memref.load %arg0[%c117] : memref<144xf32, #tpu.memory_space<smem>>
    %c118 = arith.constant 118 : index
    %118 = memref.load %arg0[%c118] : memref<144xf32, #tpu.memory_space<smem>>
    %c119 = arith.constant 119 : index
    %119 = memref.load %arg0[%c119] : memref<144xf32, #tpu.memory_space<smem>>
    %c120 = arith.constant 120 : index
    %120 = memref.load %arg0[%c120] : memref<144xf32, #tpu.memory_space<smem>>
    %c121 = arith.constant 121 : index
    %121 = memref.load %arg0[%c121] : memref<144xf32, #tpu.memory_space<smem>>
    %c122 = arith.constant 122 : index
    %122 = memref.load %arg0[%c122] : memref<144xf32, #tpu.memory_space<smem>>
    %c123 = arith.constant 123 : index
    %123 = memref.load %arg0[%c123] : memref<144xf32, #tpu.memory_space<smem>>
    %c124 = arith.constant 124 : index
    %124 = memref.load %arg0[%c124] : memref<144xf32, #tpu.memory_space<smem>>
    %c125 = arith.constant 125 : index
    %125 = memref.load %arg0[%c125] : memref<144xf32, #tpu.memory_space<smem>>
    %c126 = arith.constant 126 : index
    %126 = memref.load %arg0[%c126] : memref<144xf32, #tpu.memory_space<smem>>
    %c127 = arith.constant 127 : index
    %127 = memref.load %arg0[%c127] : memref<144xf32, #tpu.memory_space<smem>>
    %c128 = arith.constant 128 : index
    %128 = memref.load %arg0[%c128] : memref<144xf32, #tpu.memory_space<smem>>
    %c129 = arith.constant 129 : index
    %129 = memref.load %arg0[%c129] : memref<144xf32, #tpu.memory_space<smem>>
    %c130 = arith.constant 130 : index
    %130 = memref.load %arg0[%c130] : memref<144xf32, #tpu.memory_space<smem>>
    %c131 = arith.constant 131 : index
    %131 = memref.load %arg0[%c131] : memref<144xf32, #tpu.memory_space<smem>>
    %c132 = arith.constant 132 : index
    %132 = memref.load %arg0[%c132] : memref<144xf32, #tpu.memory_space<smem>>
    %c133 = arith.constant 133 : index
    %133 = memref.load %arg0[%c133] : memref<144xf32, #tpu.memory_space<smem>>
    %c134 = arith.constant 134 : index
    %134 = memref.load %arg0[%c134] : memref<144xf32, #tpu.memory_space<smem>>
    %c135 = arith.constant 135 : index
    %135 = memref.load %arg0[%c135] : memref<144xf32, #tpu.memory_space<smem>>
    %c136 = arith.constant 136 : index
    %136 = memref.load %arg0[%c136] : memref<144xf32, #tpu.memory_space<smem>>
    %c137 = arith.constant 137 : index
    %137 = memref.load %arg0[%c137] : memref<144xf32, #tpu.memory_space<smem>>
    %c138 = arith.constant 138 : index
    %138 = memref.load %arg0[%c138] : memref<144xf32, #tpu.memory_space<smem>>
    %c139 = arith.constant 139 : index
    %139 = memref.load %arg0[%c139] : memref<144xf32, #tpu.memory_space<smem>>
    %c140 = arith.constant 140 : index
    %140 = memref.load %arg0[%c140] : memref<144xf32, #tpu.memory_space<smem>>
    %c141 = arith.constant 141 : index
    %141 = memref.load %arg0[%c141] : memref<144xf32, #tpu.memory_space<smem>>
    %c142 = arith.constant 142 : index
    %142 = memref.load %arg0[%c142] : memref<144xf32, #tpu.memory_space<smem>>
    %c143 = arith.constant 143 : index
    %143 = memref.load %arg0[%c143] : memref<144xf32, #tpu.memory_space<smem>>
    %c0_0 = arith.constant 0 : index
    %144 = memref.load %arg1[%c0_0] : memref<4xf32, #tpu.memory_space<smem>>
    %c1_1 = arith.constant 1 : index
    %145 = memref.load %arg1[%c1_1] : memref<4xf32, #tpu.memory_space<smem>>
    %c2_2 = arith.constant 2 : index
    %146 = memref.load %arg1[%c2_2] : memref<4xf32, #tpu.memory_space<smem>>
    %c3_3 = arith.constant 3 : index
    %147 = memref.load %arg1[%c3_3] : memref<4xf32, #tpu.memory_space<smem>>
    %c0_4 = arith.constant 0 : index
    %148 = memref.load %arg2[%c0_4] : memref<4xf32, #tpu.memory_space<smem>>
    %c1_5 = arith.constant 1 : index
    %149 = memref.load %arg2[%c1_5] : memref<4xf32, #tpu.memory_space<smem>>
    %c2_6 = arith.constant 2 : index
    %150 = memref.load %arg2[%c2_6] : memref<4xf32, #tpu.memory_space<smem>>
    %c3_7 = arith.constant 3 : index
    %151 = memref.load %arg2[%c3_7] : memref<4xf32, #tpu.memory_space<smem>>
    %c0_8 = arith.constant 0 : index
    %c0_9 = arith.constant 0 : index
    %152 = vector.load %arg3[%c0_8, %c0_9] : memref<9x256xf32, #tpu.memory_space<vmem>>, vector<1x256xf32>
    %c1_10 = arith.constant 1 : index
    %c0_11 = arith.constant 0 : index
    %153 = vector.load %arg3[%c1_10, %c0_11] : memref<9x256xf32, #tpu.memory_space<vmem>>, vector<1x256xf32>
    %c2_12 = arith.constant 2 : index
    %c0_13 = arith.constant 0 : index
    %154 = vector.load %arg3[%c2_12, %c0_13] : memref<9x256xf32, #tpu.memory_space<vmem>>, vector<1x256xf32>
    %c3_14 = arith.constant 3 : index
    %c0_15 = arith.constant 0 : index
    %155 = vector.load %arg3[%c3_14, %c0_15] : memref<9x256xf32, #tpu.memory_space<vmem>>, vector<1x256xf32>
    %c5_16 = arith.constant 5 : index
    %c0_17 = arith.constant 0 : index
    %156 = vector.load %arg3[%c5_16, %c0_17] : memref<9x256xf32, #tpu.memory_space<vmem>>, vector<1x256xf32>
    %c6_18 = arith.constant 6 : index
    %c0_19 = arith.constant 0 : index
    %157 = vector.load %arg3[%c6_18, %c0_19] : memref<9x256xf32, #tpu.memory_space<vmem>>, vector<1x256xf32>
    %c7_20 = arith.constant 7 : index
    %c0_21 = arith.constant 0 : index
    %158 = vector.load %arg3[%c7_20, %c0_21] : memref<9x256xf32, #tpu.memory_space<vmem>>, vector<1x256xf32>
    %c8_22 = arith.constant 8 : index
    %c0_23 = arith.constant 0 : index
    %159 = vector.load %arg3[%c8_22, %c0_23] : memref<9x256xf32, #tpu.memory_space<vmem>>, vector<1x256xf32>
    %c0_24 = arith.constant 0 : index
    %c0_25 = arith.constant 0 : index
    %160 = vector.load %arg4[%c0_24, %c0_25] : memref<8x256xf32, #tpu.memory_space<vmem>>, vector<8x256xf32>
    %c17_i32 = arith.constant 17 : i32
    %161 = tpu.dynamic_rotate %160 by %c17_i32 dim 1 : vector<8x256xf32>, i32 -> vector<8x256xf32>
    %162 = vector.broadcast %152 : vector<1x256xf32> to vector<8x256xf32>
    %163 = arith.mulf %161, %162 : vector<8x256xf32>
    %c16_i32 = arith.constant 16 : i32
    %164 = tpu.dynamic_rotate %160 by %c16_i32 dim 1 : vector<8x256xf32>, i32 -> vector<8x256xf32>
    %165 = vector.broadcast %153 : vector<1x256xf32> to vector<8x256xf32>
    %166 = arith.mulf %164, %165 : vector<8x256xf32>
    %c15_i32 = arith.constant 15 : i32
    %167 = tpu.dynamic_rotate %160 by %c15_i32 dim 1 : vector<8x256xf32>, i32 -> vector<8x256xf32>
    %168 = vector.broadcast %154 : vector<1x256xf32> to vector<8x256xf32>
    %169 = arith.mulf %167, %168 : vector<8x256xf32>
    %c1_i32 = arith.constant 1 : i32
    %170 = tpu.dynamic_rotate %160 by %c1_i32 dim 1 : vector<8x256xf32>, i32 -> vector<8x256xf32>
    %171 = vector.broadcast %155 : vector<1x256xf32> to vector<8x256xf32>
    %172 = arith.mulf %170, %171 : vector<8x256xf32>
    %c255_i32 = arith.constant 255 : i32
    %173 = tpu.dynamic_rotate %160 by %c255_i32 dim 1 : vector<8x256xf32>, i32 -> vector<8x256xf32>
    %174 = vector.broadcast %156 : vector<1x256xf32> to vector<8x256xf32>
    %175 = arith.mulf %173, %174 : vector<8x256xf32>
    %c241_i32 = arith.constant 241 : i32
    %176 = tpu.dynamic_rotate %160 by %c241_i32 dim 1 : vector<8x256xf32>, i32 -> vector<8x256xf32>
    %177 = vector.broadcast %157 : vector<1x256xf32> to vector<8x256xf32>
    %178 = arith.mulf %176, %177 : vector<8x256xf32>
    %c240_i32 = arith.constant 240 : i32
    %179 = tpu.dynamic_rotate %160 by %c240_i32 dim 1 : vector<8x256xf32>, i32 -> vector<8x256xf32>
    %180 = vector.broadcast %158 : vector<1x256xf32> to vector<8x256xf32>
    %181 = arith.mulf %179, %180 : vector<8x256xf32>
    %c239_i32 = arith.constant 239 : i32
    %182 = tpu.dynamic_rotate %160 by %c239_i32 dim 1 : vector<8x256xf32>, i32 -> vector<8x256xf32>
    %183 = vector.broadcast %159 : vector<1x256xf32> to vector<8x256xf32>
    %184 = arith.mulf %182, %183 : vector<8x256xf32>
    %185 = vector.extract_strided_slice %163 {offsets = [0, 0], sizes = [2, 256], strides = [1, 1]} : vector<8x256xf32> to vector<2x256xf32>
    %186 = vector.broadcast %0 : f32 to vector<2x256xf32>
    %187 = arith.mulf %185, %186 : vector<2x256xf32>
    %188 = vector.extract_strided_slice %163 {offsets = [2, 0], sizes = [2, 256], strides = [1, 1]} : vector<8x256xf32> to vector<2x256xf32>
    %189 = vector.broadcast %4 : f32 to vector<2x256xf32>
    %190 = arith.mulf %188, %189 : vector<2x256xf32>
    %191 = arith.addf %187, %190 : vector<2x256xf32>
    %192 = vector.extract_strided_slice %163 {offsets = [4, 0], sizes = [2, 256], strides = [1, 1]} : vector<8x256xf32> to vector<2x256xf32>
    %193 = vector.broadcast %8 : f32 to vector<2x256xf32>
    %194 = arith.mulf %192, %193 : vector<2x256xf32>
    %195 = arith.addf %191, %194 : vector<2x256xf32>
    %196 = vector.extract_strided_slice %163 {offsets = [6, 0], sizes = [2, 256], strides = [1, 1]} : vector<8x256xf32> to vector<2x256xf32>
    %197 = vector.broadcast %12 : f32 to vector<2x256xf32>
    %198 = arith.mulf %196, %197 : vector<2x256xf32>
    %199 = arith.addf %195, %198 : vector<2x256xf32>
    %200 = vector.extract_strided_slice %166 {offsets = [0, 0], sizes = [2, 256], strides = [1, 1]} : vector<8x256xf32> to vector<2x256xf32>
    %201 = vector.broadcast %16 : f32 to vector<2x256xf32>
    %202 = arith.mulf %200, %201 : vector<2x256xf32>
    %203 = arith.addf %199, %202 : vector<2x256xf32>
    %204 = vector.extract_strided_slice %166 {offsets = [2, 0], sizes = [2, 256], strides = [1, 1]} : vector<8x256xf32> to vector<2x256xf32>
    %205 = vector.broadcast %20 : f32 to vector<2x256xf32>
    %206 = arith.mulf %204, %205 : vector<2x256xf32>
    %207 = arith.addf %203, %206 : vector<2x256xf32>
    %208 = vector.extract_strided_slice %166 {offsets = [4, 0], sizes = [2, 256], strides = [1, 1]} : vector<8x256xf32> to vector<2x256xf32>
    %209 = vector.broadcast %24 : f32 to vector<2x256xf32>
    %210 = arith.mulf %208, %209 : vector<2x256xf32>
    %211 = arith.addf %207, %210 : vector<2x256xf32>
    %212 = vector.extract_strided_slice %166 {offsets = [6, 0], sizes = [2, 256], strides = [1, 1]} : vector<8x256xf32> to vector<2x256xf32>
    %213 = vector.broadcast %28 : f32 to vector<2x256xf32>
    %214 = arith.mulf %212, %213 : vector<2x256xf32>
    %215 = arith.addf %211, %214 : vector<2x256xf32>
    %216 = vector.extract_strided_slice %169 {offsets = [0, 0], sizes = [2, 256], strides = [1, 1]} : vector<8x256xf32> to vector<2x256xf32>
    %217 = vector.broadcast %32 : f32 to vector<2x256xf32>
    %218 = arith.mulf %216, %217 : vector<2x256xf32>
    %219 = arith.addf %215, %218 : vector<2x256xf32>
    %220 = vector.extract_strided_slice %169 {offsets = [2, 0], sizes = [2, 256], strides = [1, 1]} : vector<8x256xf32> to vector<2x256xf32>
    %221 = vector.broadcast %36 : f32 to vector<2x256xf32>
    %222 = arith.mulf %220, %221 : vector<2x256xf32>
    %223 = arith.addf %219, %222 : vector<2x256xf32>
    %224 = vector.extract_strided_slice %169 {offsets = [4, 0], sizes = [2, 256], strides = [1, 1]} : vector<8x256xf32> to vector<2x256xf32>
    %225 = vector.broadcast %40 : f32 to vector<2x256xf32>
    %226 = arith.mulf %224, %225 : vector<2x256xf32>
    %227 = arith.addf %223, %226 : vector<2x256xf32>
    %228 = vector.extract_strided_slice %169 {offsets = [6, 0], sizes = [2, 256], strides = [1, 1]} : vector<8x256xf32> to vector<2x256xf32>
    %229 = vector.broadcast %44 : f32 to vector<2x256xf32>
    %230 = arith.mulf %228, %229 : vector<2x256xf32>
    %231 = arith.addf %227, %230 : vector<2x256xf32>
    %232 = vector.extract_strided_slice %172 {offsets = [0, 0], sizes = [2, 256], strides = [1, 1]} : vector<8x256xf32> to vector<2x256xf32>
    %233 = vector.broadcast %48 : f32 to vector<2x256xf32>
    %234 = arith.mulf %232, %233 : vector<2x256xf32>
    %235 = arith.addf %231, %234 : vector<2x256xf32>
    %236 = vector.extract_strided_slice %172 {offsets = [2, 0], sizes = [2, 256], strides = [1, 1]} : vector<8x256xf32> to vector<2x256xf32>
    %237 = vector.broadcast %52 : f32 to vector<2x256xf32>
    %238 = arith.mulf %236, %237 : vector<2x256xf32>
    %239 = arith.addf %235, %238 : vector<2x256xf32>
    %240 = vector.extract_strided_slice %172 {offsets = [4, 0], sizes = [2, 256], strides = [1, 1]} : vector<8x256xf32> to vector<2x256xf32>
    %241 = vector.broadcast %56 : f32 to vector<2x256xf32>
    %242 = arith.mulf %240, %241 : vector<2x256xf32>
    %243 = arith.addf %239, %242 : vector<2x256xf32>
    %244 = vector.extract_strided_slice %172 {offsets = [6, 0], sizes = [2, 256], strides = [1, 1]} : vector<8x256xf32> to vector<2x256xf32>
    %245 = vector.broadcast %60 : f32 to vector<2x256xf32>
    %246 = arith.mulf %244, %245 : vector<2x256xf32>
    %247 = arith.addf %243, %246 : vector<2x256xf32>
    %248 = vector.extract_strided_slice %160 {offsets = [0, 0], sizes = [2, 256], strides = [1, 1]} : vector<8x256xf32> to vector<2x256xf32>
    %249 = vector.broadcast %64 : f32 to vector<2x256xf32>
    %250 = arith.mulf %248, %249 : vector<2x256xf32>
    %251 = arith.addf %247, %250 : vector<2x256xf32>
    %252 = vector.extract_strided_slice %160 {offsets = [2, 0], sizes = [2, 256], strides = [1, 1]} : vector<8x256xf32> to vector<2x256xf32>
    %253 = vector.broadcast %68 : f32 to vector<2x256xf32>
    %254 = arith.mulf %252, %253 : vector<2x256xf32>
    %255 = arith.addf %251, %254 : vector<2x256xf32>
    %256 = vector.extract_strided_slice %160 {offsets = [4, 0], sizes = [2, 256], strides = [1, 1]} : vector<8x256xf32> to vector<2x256xf32>
    %257 = vector.broadcast %72 : f32 to vector<2x256xf32>
    %258 = arith.mulf %256, %257 : vector<2x256xf32>
    %259 = arith.addf %255, %258 : vector<2x256xf32>
    %260 = vector.extract_strided_slice %160 {offsets = [6, 0], sizes = [2, 256], strides = [1, 1]} : vector<8x256xf32> to vector<2x256xf32>
    %261 = vector.broadcast %76 : f32 to vector<2x256xf32>
    %262 = arith.mulf %260, %261 : vector<2x256xf32>
    %263 = arith.addf %259, %262 : vector<2x256xf32>
    %264 = vector.extract_strided_slice %175 {offsets = [0, 0], sizes = [2, 256], strides = [1, 1]} : vector<8x256xf32> to vector<2x256xf32>
    %265 = vector.broadcast %80 : f32 to vector<2x256xf32>
    %266 = arith.mulf %264, %265 : vector<2x256xf32>
    %267 = arith.addf %263, %266 : vector<2x256xf32>
    %268 = vector.extract_strided_slice %175 {offsets = [2, 0], sizes = [2, 256], strides = [1, 1]} : vector<8x256xf32> to vector<2x256xf32>
    %269 = vector.broadcast %84 : f32 to vector<2x256xf32>
    %270 = arith.mulf %268, %269 : vector<2x256xf32>
    %271 = arith.addf %267, %270 : vector<2x256xf32>
    %272 = vector.extract_strided_slice %175 {offsets = [4, 0], sizes = [2, 256], strides = [1, 1]} : vector<8x256xf32> to vector<2x256xf32>
    %273 = vector.broadcast %88 : f32 to vector<2x256xf32>
    %274 = arith.mulf %272, %273 : vector<2x256xf32>
    %275 = arith.addf %271, %274 : vector<2x256xf32>
    %276 = vector.extract_strided_slice %175 {offsets = [6, 0], sizes = [2, 256], strides = [1, 1]} : vector<8x256xf32> to vector<2x256xf32>
    %277 = vector.broadcast %92 : f32 to vector<2x256xf32>
    %278 = arith.mulf %276, %277 : vector<2x256xf32>
    %279 = arith.addf %275, %278 : vector<2x256xf32>
    %280 = vector.extract_strided_slice %178 {offsets = [0, 0], sizes = [2, 256], strides = [1, 1]} : vector<8x256xf32> to vector<2x256xf32>
    %281 = vector.broadcast %96 : f32 to vector<2x256xf32>
    %282 = arith.mulf %280, %281 : vector<2x256xf32>
    %283 = arith.addf %279, %282 : vector<2x256xf32>
    %284 = vector.extract_strided_slice %178 {offsets = [2, 0], sizes = [2, 256], strides = [1, 1]} : vector<8x256xf32> to vector<2x256xf32>
    %285 = vector.broadcast %100 : f32 to vector<2x256xf32>
    %286 = arith.mulf %284, %285 : vector<2x256xf32>
    %287 = arith.addf %283, %286 : vector<2x256xf32>
    %288 = vector.extract_strided_slice %178 {offsets = [4, 0], sizes = [2, 256], strides = [1, 1]} : vector<8x256xf32> to vector<2x256xf32>
    %289 = vector.broadcast %104 : f32 to vector<2x256xf32>
    %290 = arith.mulf %288, %289 : vector<2x256xf32>
    %291 = arith.addf %287, %290 : vector<2x256xf32>
    %292 = vector.extract_strided_slice %178 {offsets = [6, 0], sizes = [2, 256], strides = [1, 1]} : vector<8x256xf32> to vector<2x256xf32>
    %293 = vector.broadcast %108 : f32 to vector<2x256xf32>
    %294 = arith.mulf %292, %293 : vector<2x256xf32>
    %295 = arith.addf %291, %294 : vector<2x256xf32>
    %296 = vector.extract_strided_slice %181 {offsets = [0, 0], sizes = [2, 256], strides = [1, 1]} : vector<8x256xf32> to vector<2x256xf32>
    %297 = vector.broadcast %112 : f32 to vector<2x256xf32>
    %298 = arith.mulf %296, %297 : vector<2x256xf32>
    %299 = arith.addf %295, %298 : vector<2x256xf32>
    %300 = vector.extract_strided_slice %181 {offsets = [2, 0], sizes = [2, 256], strides = [1, 1]} : vector<8x256xf32> to vector<2x256xf32>
    %301 = vector.broadcast %116 : f32 to vector<2x256xf32>
    %302 = arith.mulf %300, %301 : vector<2x256xf32>
    %303 = arith.addf %299, %302 : vector<2x256xf32>
    %304 = vector.extract_strided_slice %181 {offsets = [4, 0], sizes = [2, 256], strides = [1, 1]} : vector<8x256xf32> to vector<2x256xf32>
    %305 = vector.broadcast %120 : f32 to vector<2x256xf32>
    %306 = arith.mulf %304, %305 : vector<2x256xf32>
    %307 = arith.addf %303, %306 : vector<2x256xf32>
    %308 = vector.extract_strided_slice %181 {offsets = [6, 0], sizes = [2, 256], strides = [1, 1]} : vector<8x256xf32> to vector<2x256xf32>
    %309 = vector.broadcast %124 : f32 to vector<2x256xf32>
    %310 = arith.mulf %308, %309 : vector<2x256xf32>
    %311 = arith.addf %307, %310 : vector<2x256xf32>
    %312 = vector.extract_strided_slice %184 {offsets = [0, 0], sizes = [2, 256], strides = [1, 1]} : vector<8x256xf32> to vector<2x256xf32>
    %313 = vector.broadcast %128 : f32 to vector<2x256xf32>
    %314 = arith.mulf %312, %313 : vector<2x256xf32>
    %315 = arith.addf %311, %314 : vector<2x256xf32>
    %316 = vector.extract_strided_slice %184 {offsets = [2, 0], sizes = [2, 256], strides = [1, 1]} : vector<8x256xf32> to vector<2x256xf32>
    %317 = vector.broadcast %132 : f32 to vector<2x256xf32>
    %318 = arith.mulf %316, %317 : vector<2x256xf32>
    %319 = arith.addf %315, %318 : vector<2x256xf32>
    %320 = vector.extract_strided_slice %184 {offsets = [4, 0], sizes = [2, 256], strides = [1, 1]} : vector<8x256xf32> to vector<2x256xf32>
    %321 = vector.broadcast %136 : f32 to vector<2x256xf32>
    %322 = arith.mulf %320, %321 : vector<2x256xf32>
    %323 = arith.addf %319, %322 : vector<2x256xf32>
    %324 = vector.extract_strided_slice %184 {offsets = [6, 0], sizes = [2, 256], strides = [1, 1]} : vector<8x256xf32> to vector<2x256xf32>
    %325 = vector.broadcast %140 : f32 to vector<2x256xf32>
    %326 = arith.mulf %324, %325 : vector<2x256xf32>
    %327 = arith.addf %323, %326 : vector<2x256xf32>
    %328 = vector.shape_cast %327 : vector<2x256xf32> to vector<1x2x256xf32>
    %cst = arith.constant dense<0.000000e+00> : vector<1xf32>
    %329 = vector.multi_reduction <add>, %328, %cst [1, 2] : vector<1x2x256xf32> to vector<1xf32>
    %330 = vector.shape_cast %329 : vector<1xf32> to vector<1x1x1xf32>
    %331 = vector.extract %330[0, 0, 0] : f32 from vector<1x1x1xf32>
    %cst_26 = arith.constant 0.001953125 : f32
    %332 = arith.mulf %331, %cst_26 : f32
    %333 = arith.mulf %327, %327 : vector<2x256xf32>
    %334 = vector.shape_cast %333 : vector<2x256xf32> to vector<1x2x256xf32>
    %cst_27 = arith.constant dense<0.000000e+00> : vector<1xf32>
    %335 = vector.multi_reduction <add>, %334, %cst_27 [1, 2] : vector<1x2x256xf32> to vector<1xf32>
    %336 = vector.shape_cast %335 : vector<1xf32> to vector<1x1x1xf32>
    %337 = vector.extract %336[0, 0, 0] : f32 from vector<1x1x1xf32>
    %cst_28 = arith.constant 0.001953125 : f32
    %338 = arith.mulf %337, %cst_28 : f32
    %339 = arith.mulf %332, %332 : f32
    %340 = arith.subf %338, %339 : f32
    %cst_29 = arith.constant 9.99999974E-6 : f32
    %341 = arith.addf %340, %cst_29 : f32
    %342 = math.rsqrt %341 : f32
    %343 = arith.mulf %144, %342 : f32
    %344 = arith.mulf %332, %343 : f32
    %345 = arith.subf %148, %344 : f32
    %346 = vector.broadcast %343 : f32 to vector<2x256xf32>
    %347 = arith.mulf %327, %346 : vector<2x256xf32>
    %348 = vector.broadcast %345 : f32 to vector<2x256xf32>
    %349 = arith.addf %347, %348 : vector<2x256xf32>
    %cst_30 = arith.constant 0.000000e+00 : f32
    %350 = vector.broadcast %cst_30 : f32 to vector<2x256xf32>
    %351 = arith.maximumf %349, %350 : vector<2x256xf32>
    %c0_31 = arith.constant 0 : index
    %c0_32 = arith.constant 0 : index
    %352 = vector.load %arg5[%c0_31, %c0_32] : memref<8x256xf32, #tpu.memory_space<vmem>>, vector<2x256xf32>
    tpu.vector_store %arg5[%c0_31, %c0_32], %351 {strides = array<i32>} : memref<8x256xf32, #tpu.memory_space<vmem>>, vector<2x256xf32>,
    %353 = vector.extract_strided_slice %163 {offsets = [0, 0], sizes = [2, 256], strides = [1, 1]} : vector<8x256xf32> to vector<2x256xf32>
    %354 = vector.broadcast %1 : f32 to vector<2x256xf32>
    %355 = arith.mulf %353, %354 : vector<2x256xf32>
    %356 = vector.extract_strided_slice %163 {offsets = [2, 0], sizes = [2, 256], strides = [1, 1]} : vector<8x256xf32> to vector<2x256xf32>
    %357 = vector.broadcast %5 : f32 to vector<2x256xf32>
    %358 = arith.mulf %356, %357 : vector<2x256xf32>
    %359 = arith.addf %355, %358 : vector<2x256xf32>
    %360 = vector.extract_strided_slice %163 {offsets = [4, 0], sizes = [2, 256], strides = [1, 1]} : vector<8x256xf32> to vector<2x256xf32>
    %361 = vector.broadcast %9 : f32 to vector<2x256xf32>
    %362 = arith.mulf %360, %361 : vector<2x256xf32>
    %363 = arith.addf %359, %362 : vector<2x256xf32>
    %364 = vector.extract_strided_slice %163 {offsets = [6, 0], sizes = [2, 256], strides = [1, 1]} : vector<8x256xf32> to vector<2x256xf32>
    %365 = vector.broadcast %13 : f32 to vector<2x256xf32>
    %366 = arith.mulf %364, %365 : vector<2x256xf32>
    %367 = arith.addf %363, %366 : vector<2x256xf32>
    %368 = vector.extract_strided_slice %166 {offsets = [0, 0], sizes = [2, 256], strides = [1, 1]} : vector<8x256xf32> to vector<2x256xf32>
    %369 = vector.broadcast %17 : f32 to vector<2x256xf32>
    %370 = arith.mulf %368, %369 : vector<2x256xf32>
    %371 = arith.addf %367, %370 : vector<2x256xf32>
    %372 = vector.extract_strided_slice %166 {offsets = [2, 0], sizes = [2, 256], strides = [1, 1]} : vector<8x256xf32> to vector<2x256xf32>
    %373 = vector.broadcast %21 : f32 to vector<2x256xf32>
    %374 = arith.mulf %372, %373 : vector<2x256xf32>
    %375 = arith.addf %371, %374 : vector<2x256xf32>
    %376 = vector.extract_strided_slice %166 {offsets = [4, 0], sizes = [2, 256], strides = [1, 1]} : vector<8x256xf32> to vector<2x256xf32>
    %377 = vector.broadcast %25 : f32 to vector<2x256xf32>
    %378 = arith.mulf %376, %377 : vector<2x256xf32>
    %379 = arith.addf %375, %378 : vector<2x256xf32>
    %380 = vector.extract_strided_slice %166 {offsets = [6, 0], sizes = [2, 256], strides = [1, 1]} : vector<8x256xf32> to vector<2x256xf32>
    %381 = vector.broadcast %29 : f32 to vector<2x256xf32>
    %382 = arith.mulf %380, %381 : vector<2x256xf32>
    %383 = arith.addf %379, %382 : vector<2x256xf32>
    %384 = vector.extract_strided_slice %169 {offsets = [0, 0], sizes = [2, 256], strides = [1, 1]} : vector<8x256xf32> to vector<2x256xf32>
    %385 = vector.broadcast %33 : f32 to vector<2x256xf32>
    %386 = arith.mulf %384, %385 : vector<2x256xf32>
    %387 = arith.addf %383, %386 : vector<2x256xf32>
    %388 = vector.extract_strided_slice %169 {offsets = [2, 0], sizes = [2, 256], strides = [1, 1]} : vector<8x256xf32> to vector<2x256xf32>
    %389 = vector.broadcast %37 : f32 to vector<2x256xf32>
    %390 = arith.mulf %388, %389 : vector<2x256xf32>
    %391 = arith.addf %387, %390 : vector<2x256xf32>
    %392 = vector.extract_strided_slice %169 {offsets = [4, 0], sizes = [2, 256], strides = [1, 1]} : vector<8x256xf32> to vector<2x256xf32>
    %393 = vector.broadcast %41 : f32 to vector<2x256xf32>
    %394 = arith.mulf %392, %393 : vector<2x256xf32>
    %395 = arith.addf %391, %394 : vector<2x256xf32>
    %396 = vector.extract_strided_slice %169 {offsets = [6, 0], sizes = [2, 256], strides = [1, 1]} : vector<8x256xf32> to vector<2x256xf32>
    %397 = vector.broadcast %45 : f32 to vector<2x256xf32>
    %398 = arith.mulf %396, %397 : vector<2x256xf32>
    %399 = arith.addf %395, %398 : vector<2x256xf32>
    %400 = vector.extract_strided_slice %172 {offsets = [0, 0], sizes = [2, 256], strides = [1, 1]} : vector<8x256xf32> to vector<2x256xf32>
    %401 = vector.broadcast %49 : f32 to vector<2x256xf32>
    %402 = arith.mulf %400, %401 : vector<2x256xf32>
    %403 = arith.addf %399, %402 : vector<2x256xf32>
    %404 = vector.extract_strided_slice %172 {offsets = [2, 0], sizes = [2, 256], strides = [1, 1]} : vector<8x256xf32> to vector<2x256xf32>
    %405 = vector.broadcast %53 : f32 to vector<2x256xf32>
    %406 = arith.mulf %404, %405 : vector<2x256xf32>
    %407 = arith.addf %403, %406 : vector<2x256xf32>
    %408 = vector.extract_strided_slice %172 {offsets = [4, 0], sizes = [2, 256], strides = [1, 1]} : vector<8x256xf32> to vector<2x256xf32>
    %409 = vector.broadcast %57 : f32 to vector<2x256xf32>
    %410 = arith.mulf %408, %409 : vector<2x256xf32>
    %411 = arith.addf %407, %410 : vector<2x256xf32>
    %412 = vector.extract_strided_slice %172 {offsets = [6, 0], sizes = [2, 256], strides = [1, 1]} : vector<8x256xf32> to vector<2x256xf32>
    %413 = vector.broadcast %61 : f32 to vector<2x256xf32>
    %414 = arith.mulf %412, %413 : vector<2x256xf32>
    %415 = arith.addf %411, %414 : vector<2x256xf32>
    %416 = vector.extract_strided_slice %160 {offsets = [0, 0], sizes = [2, 256], strides = [1, 1]} : vector<8x256xf32> to vector<2x256xf32>
    %417 = vector.broadcast %65 : f32 to vector<2x256xf32>
    %418 = arith.mulf %416, %417 : vector<2x256xf32>
    %419 = arith.addf %415, %418 : vector<2x256xf32>
    %420 = vector.extract_strided_slice %160 {offsets = [2, 0], sizes = [2, 256], strides = [1, 1]} : vector<8x256xf32> to vector<2x256xf32>
    %421 = vector.broadcast %69 : f32 to vector<2x256xf32>
    %422 = arith.mulf %420, %421 : vector<2x256xf32>
    %423 = arith.addf %419, %422 : vector<2x256xf32>
    %424 = vector.extract_strided_slice %160 {offsets = [4, 0], sizes = [2, 256], strides = [1, 1]} : vector<8x256xf32> to vector<2x256xf32>
    %425 = vector.broadcast %73 : f32 to vector<2x256xf32>
    %426 = arith.mulf %424, %425 : vector<2x256xf32>
    %427 = arith.addf %423, %426 : vector<2x256xf32>
    %428 = vector.extract_strided_slice %160 {offsets = [6, 0], sizes = [2, 256], strides = [1, 1]} : vector<8x256xf32> to vector<2x256xf32>
    %429 = vector.broadcast %77 : f32 to vector<2x256xf32>
    %430 = arith.mulf %428, %429 : vector<2x256xf32>
    %431 = arith.addf %427, %430 : vector<2x256xf32>
    %432 = vector.extract_strided_slice %175 {offsets = [0, 0], sizes = [2, 256], strides = [1, 1]} : vector<8x256xf32> to vector<2x256xf32>
    %433 = vector.broadcast %81 : f32 to vector<2x256xf32>
    %434 = arith.mulf %432, %433 : vector<2x256xf32>
    %435 = arith.addf %431, %434 : vector<2x256xf32>
    %436 = vector.extract_strided_slice %175 {offsets = [2, 0], sizes = [2, 256], strides = [1, 1]} : vector<8x256xf32> to vector<2x256xf32>
    %437 = vector.broadcast %85 : f32 to vector<2x256xf32>
    %438 = arith.mulf %436, %437 : vector<2x256xf32>
    %439 = arith.addf %435, %438 : vector<2x256xf32>
    %440 = vector.extract_strided_slice %175 {offsets = [4, 0], sizes = [2, 256], strides = [1, 1]} : vector<8x256xf32> to vector<2x256xf32>
    %441 = vector.broadcast %89 : f32 to vector<2x256xf32>
    %442 = arith.mulf %440, %441 : vector<2x256xf32>
    %443 = arith.addf %439, %442 : vector<2x256xf32>
    %444 = vector.extract_strided_slice %175 {offsets = [6, 0], sizes = [2, 256], strides = [1, 1]} : vector<8x256xf32> to vector<2x256xf32>
    %445 = vector.broadcast %93 : f32 to vector<2x256xf32>
    %446 = arith.mulf %444, %445 : vector<2x256xf32>
    %447 = arith.addf %443, %446 : vector<2x256xf32>
    %448 = vector.extract_strided_slice %178 {offsets = [0, 0], sizes = [2, 256], strides = [1, 1]} : vector<8x256xf32> to vector<2x256xf32>
    %449 = vector.broadcast %97 : f32 to vector<2x256xf32>
    %450 = arith.mulf %448, %449 : vector<2x256xf32>
    %451 = arith.addf %447, %450 : vector<2x256xf32>
    %452 = vector.extract_strided_slice %178 {offsets = [2, 0], sizes = [2, 256], strides = [1, 1]} : vector<8x256xf32> to vector<2x256xf32>
    %453 = vector.broadcast %101 : f32 to vector<2x256xf32>
    %454 = arith.mulf %452, %453 : vector<2x256xf32>
    %455 = arith.addf %451, %454 : vector<2x256xf32>
    %456 = vector.extract_strided_slice %178 {offsets = [4, 0], sizes = [2, 256], strides = [1, 1]} : vector<8x256xf32> to vector<2x256xf32>
    %457 = vector.broadcast %105 : f32 to vector<2x256xf32>
    %458 = arith.mulf %456, %457 : vector<2x256xf32>
    %459 = arith.addf %455, %458 : vector<2x256xf32>
    %460 = vector.extract_strided_slice %178 {offsets = [6, 0], sizes = [2, 256], strides = [1, 1]} : vector<8x256xf32> to vector<2x256xf32>
    %461 = vector.broadcast %109 : f32 to vector<2x256xf32>
    %462 = arith.mulf %460, %461 : vector<2x256xf32>
    %463 = arith.addf %459, %462 : vector<2x256xf32>
    %464 = vector.extract_strided_slice %181 {offsets = [0, 0], sizes = [2, 256], strides = [1, 1]} : vector<8x256xf32> to vector<2x256xf32>
    %465 = vector.broadcast %113 : f32 to vector<2x256xf32>
    %466 = arith.mulf %464, %465 : vector<2x256xf32>
    %467 = arith.addf %463, %466 : vector<2x256xf32>
    %468 = vector.extract_strided_slice %181 {offsets = [2, 0], sizes = [2, 256], strides = [1, 1]} : vector<8x256xf32> to vector<2x256xf32>
    %469 = vector.broadcast %117 : f32 to vector<2x256xf32>
    %470 = arith.mulf %468, %469 : vector<2x256xf32>
    %471 = arith.addf %467, %470 : vector<2x256xf32>
    %472 = vector.extract_strided_slice %181 {offsets = [4, 0], sizes = [2, 256], strides = [1, 1]} : vector<8x256xf32> to vector<2x256xf32>
    %473 = vector.broadcast %121 : f32 to vector<2x256xf32>
    %474 = arith.mulf %472, %473 : vector<2x256xf32>
    %475 = arith.addf %471, %474 : vector<2x256xf32>
    %476 = vector.extract_strided_slice %181 {offsets = [6, 0], sizes = [2, 256], strides = [1, 1]} : vector<8x256xf32> to vector<2x256xf32>
    %477 = vector.broadcast %125 : f32 to vector<2x256xf32>
    %478 = arith.mulf %476, %477 : vector<2x256xf32>
    %479 = arith.addf %475, %478 : vector<2x256xf32>
    %480 = vector.extract_strided_slice %184 {offsets = [0, 0], sizes = [2, 256], strides = [1, 1]} : vector<8x256xf32> to vector<2x256xf32>
    %481 = vector.broadcast %129 : f32 to vector<2x256xf32>
    %482 = arith.mulf %480, %481 : vector<2x256xf32>
    %483 = arith.addf %479, %482 : vector<2x256xf32>
    %484 = vector.extract_strided_slice %184 {offsets = [2, 0], sizes = [2, 256], strides = [1, 1]} : vector<8x256xf32> to vector<2x256xf32>
    %485 = vector.broadcast %133 : f32 to vector<2x256xf32>
    %486 = arith.mulf %484, %485 : vector<2x256xf32>
    %487 = arith.addf %483, %486 : vector<2x256xf32>
    %488 = vector.extract_strided_slice %184 {offsets = [4, 0], sizes = [2, 256], strides = [1, 1]} : vector<8x256xf32> to vector<2x256xf32>
    %489 = vector.broadcast %137 : f32 to vector<2x256xf32>
    %490 = arith.mulf %488, %489 : vector<2x256xf32>
    %491 = arith.addf %487, %490 : vector<2x256xf32>
    %492 = vector.extract_strided_slice %184 {offsets = [6, 0], sizes = [2, 256], strides = [1, 1]} : vector<8x256xf32> to vector<2x256xf32>
    %493 = vector.broadcast %141 : f32 to vector<2x256xf32>
    %494 = arith.mulf %492, %493 : vector<2x256xf32>
    %495 = arith.addf %491, %494 : vector<2x256xf32>
    %496 = vector.shape_cast %495 : vector<2x256xf32> to vector<1x2x256xf32>
    %cst_33 = arith.constant dense<0.000000e+00> : vector<1xf32>
    %497 = vector.multi_reduction <add>, %496, %cst_33 [1, 2] : vector<1x2x256xf32> to vector<1xf32>
    %498 = vector.shape_cast %497 : vector<1xf32> to vector<1x1x1xf32>
    %499 = vector.extract %498[0, 0, 0] : f32 from vector<1x1x1xf32>
    %cst_34 = arith.constant 0.001953125 : f32
    %500 = arith.mulf %499, %cst_34 : f32
    %501 = arith.mulf %495, %495 : vector<2x256xf32>
    %502 = vector.shape_cast %501 : vector<2x256xf32> to vector<1x2x256xf32>
    %cst_35 = arith.constant dense<0.000000e+00> : vector<1xf32>
    %503 = vector.multi_reduction <add>, %502, %cst_35 [1, 2] : vector<1x2x256xf32> to vector<1xf32>
    %504 = vector.shape_cast %503 : vector<1xf32> to vector<1x1x1xf32>
    %505 = vector.extract %504[0, 0, 0] : f32 from vector<1x1x1xf32>
    %cst_36 = arith.constant 0.001953125 : f32
    %506 = arith.mulf %505, %cst_36 : f32
    %507 = arith.mulf %500, %500 : f32
    %508 = arith.subf %506, %507 : f32
    %cst_37 = arith.constant 9.99999974E-6 : f32
    %509 = arith.addf %508, %cst_37 : f32
    %510 = math.rsqrt %509 : f32
    %511 = arith.mulf %145, %510 : f32
    %512 = arith.mulf %500, %511 : f32
    %513 = arith.subf %149, %512 : f32
    %514 = vector.broadcast %511 : f32 to vector<2x256xf32>
    %515 = arith.mulf %495, %514 : vector<2x256xf32>
    %516 = vector.broadcast %513 : f32 to vector<2x256xf32>
    %517 = arith.addf %515, %516 : vector<2x256xf32>
    %cst_38 = arith.constant 0.000000e+00 : f32
    %518 = vector.broadcast %cst_38 : f32 to vector<2x256xf32>
    %519 = arith.maximumf %517, %518 : vector<2x256xf32>
    %c2_39 = arith.constant 2 : index
    %c0_40 = arith.constant 0 : index
    %520 = vector.load %arg5[%c2_39, %c0_40] : memref<8x256xf32, #tpu.memory_space<vmem>>, vector<2x256xf32>
    tpu.vector_store %arg5[%c2_39, %c0_40], %519 {strides = array<i32>} : memref<8x256xf32, #tpu.memory_space<vmem>>, vector<2x256xf32>,
    %521 = vector.extract_strided_slice %163 {offsets = [0, 0], sizes = [2, 256], strides = [1, 1]} : vector<8x256xf32> to vector<2x256xf32>
    %522 = vector.broadcast %2 : f32 to vector<2x256xf32>
    %523 = arith.mulf %521, %522 : vector<2x256xf32>
    %524 = vector.extract_strided_slice %163 {offsets = [2, 0], sizes = [2, 256], strides = [1, 1]} : vector<8x256xf32> to vector<2x256xf32>
    %525 = vector.broadcast %6 : f32 to vector<2x256xf32>
    %526 = arith.mulf %524, %525 : vector<2x256xf32>
    %527 = arith.addf %523, %526 : vector<2x256xf32>
    %528 = vector.extract_strided_slice %163 {offsets = [4, 0], sizes = [2, 256], strides = [1, 1]} : vector<8x256xf32> to vector<2x256xf32>
    %529 = vector.broadcast %10 : f32 to vector<2x256xf32>
    %530 = arith.mulf %528, %529 : vector<2x256xf32>
    %531 = arith.addf %527, %530 : vector<2x256xf32>
    %532 = vector.extract_strided_slice %163 {offsets = [6, 0], sizes = [2, 256], strides = [1, 1]} : vector<8x256xf32> to vector<2x256xf32>
    %533 = vector.broadcast %14 : f32 to vector<2x256xf32>
    %534 = arith.mulf %532, %533 : vector<2x256xf32>
    %535 = arith.addf %531, %534 : vector<2x256xf32>
    %536 = vector.extract_strided_slice %166 {offsets = [0, 0], sizes = [2, 256], strides = [1, 1]} : vector<8x256xf32> to vector<2x256xf32>
    %537 = vector.broadcast %18 : f32 to vector<2x256xf32>
    %538 = arith.mulf %536, %537 : vector<2x256xf32>
    %539 = arith.addf %535, %538 : vector<2x256xf32>
    %540 = vector.extract_strided_slice %166 {offsets = [2, 0], sizes = [2, 256], strides = [1, 1]} : vector<8x256xf32> to vector<2x256xf32>
    %541 = vector.broadcast %22 : f32 to vector<2x256xf32>
    %542 = arith.mulf %540, %541 : vector<2x256xf32>
    %543 = arith.addf %539, %542 : vector<2x256xf32>
    %544 = vector.extract_strided_slice %166 {offsets = [4, 0], sizes = [2, 256], strides = [1, 1]} : vector<8x256xf32> to vector<2x256xf32>
    %545 = vector.broadcast %26 : f32 to vector<2x256xf32>
    %546 = arith.mulf %544, %545 : vector<2x256xf32>
    %547 = arith.addf %543, %546 : vector<2x256xf32>
    %548 = vector.extract_strided_slice %166 {offsets = [6, 0], sizes = [2, 256], strides = [1, 1]} : vector<8x256xf32> to vector<2x256xf32>
    %549 = vector.broadcast %30 : f32 to vector<2x256xf32>
    %550 = arith.mulf %548, %549 : vector<2x256xf32>
    %551 = arith.addf %547, %550 : vector<2x256xf32>
    %552 = vector.extract_strided_slice %169 {offsets = [0, 0], sizes = [2, 256], strides = [1, 1]} : vector<8x256xf32> to vector<2x256xf32>
    %553 = vector.broadcast %34 : f32 to vector<2x256xf32>
    %554 = arith.mulf %552, %553 : vector<2x256xf32>
    %555 = arith.addf %551, %554 : vector<2x256xf32>
    %556 = vector.extract_strided_slice %169 {offsets = [2, 0], sizes = [2, 256], strides = [1, 1]} : vector<8x256xf32> to vector<2x256xf32>
    %557 = vector.broadcast %38 : f32 to vector<2x256xf32>
    %558 = arith.mulf %556, %557 : vector<2x256xf32>
    %559 = arith.addf %555, %558 : vector<2x256xf32>
    %560 = vector.extract_strided_slice %169 {offsets = [4, 0], sizes = [2, 256], strides = [1, 1]} : vector<8x256xf32> to vector<2x256xf32>
    %561 = vector.broadcast %42 : f32 to vector<2x256xf32>
    %562 = arith.mulf %560, %561 : vector<2x256xf32>
    %563 = arith.addf %559, %562 : vector<2x256xf32>
    %564 = vector.extract_strided_slice %169 {offsets = [6, 0], sizes = [2, 256], strides = [1, 1]} : vector<8x256xf32> to vector<2x256xf32>
    %565 = vector.broadcast %46 : f32 to vector<2x256xf32>
    %566 = arith.mulf %564, %565 : vector<2x256xf32>
    %567 = arith.addf %563, %566 : vector<2x256xf32>
    %568 = vector.extract_strided_slice %172 {offsets = [0, 0], sizes = [2, 256], strides = [1, 1]} : vector<8x256xf32> to vector<2x256xf32>
    %569 = vector.broadcast %50 : f32 to vector<2x256xf32>
    %570 = arith.mulf %568, %569 : vector<2x256xf32>
    %571 = arith.addf %567, %570 : vector<2x256xf32>
    %572 = vector.extract_strided_slice %172 {offsets = [2, 0], sizes = [2, 256], strides = [1, 1]} : vector<8x256xf32> to vector<2x256xf32>
    %573 = vector.broadcast %54 : f32 to vector<2x256xf32>
    %574 = arith.mulf %572, %573 : vector<2x256xf32>
    %575 = arith.addf %571, %574 : vector<2x256xf32>
    %576 = vector.extract_strided_slice %172 {offsets = [4, 0], sizes = [2, 256], strides = [1, 1]} : vector<8x256xf32> to vector<2x256xf32>
    %577 = vector.broadcast %58 : f32 to vector<2x256xf32>
    %578 = arith.mulf %576, %577 : vector<2x256xf32>
    %579 = arith.addf %575, %578 : vector<2x256xf32>
    %580 = vector.extract_strided_slice %172 {offsets = [6, 0], sizes = [2, 256], strides = [1, 1]} : vector<8x256xf32> to vector<2x256xf32>
    %581 = vector.broadcast %62 : f32 to vector<2x256xf32>
    %582 = arith.mulf %580, %581 : vector<2x256xf32>
    %583 = arith.addf %579, %582 : vector<2x256xf32>
    %584 = vector.extract_strided_slice %160 {offsets = [0, 0], sizes = [2, 256], strides = [1, 1]} : vector<8x256xf32> to vector<2x256xf32>
    %585 = vector.broadcast %66 : f32 to vector<2x256xf32>
    %586 = arith.mulf %584, %585 : vector<2x256xf32>
    %587 = arith.addf %583, %586 : vector<2x256xf32>
    %588 = vector.extract_strided_slice %160 {offsets = [2, 0], sizes = [2, 256], strides = [1, 1]} : vector<8x256xf32> to vector<2x256xf32>
    %589 = vector.broadcast %70 : f32 to vector<2x256xf32>
    %590 = arith.mulf %588, %589 : vector<2x256xf32>
    %591 = arith.addf %587, %590 : vector<2x256xf32>
    %592 = vector.extract_strided_slice %160 {offsets = [4, 0], sizes = [2, 256], strides = [1, 1]} : vector<8x256xf32> to vector<2x256xf32>
    %593 = vector.broadcast %74 : f32 to vector<2x256xf32>
    %594 = arith.mulf %592, %593 : vector<2x256xf32>
    %595 = arith.addf %591, %594 : vector<2x256xf32>
    %596 = vector.extract_strided_slice %160 {offsets = [6, 0], sizes = [2, 256], strides = [1, 1]} : vector<8x256xf32> to vector<2x256xf32>
    %597 = vector.broadcast %78 : f32 to vector<2x256xf32>
    %598 = arith.mulf %596, %597 : vector<2x256xf32>
    %599 = arith.addf %595, %598 : vector<2x256xf32>
    %600 = vector.extract_strided_slice %175 {offsets = [0, 0], sizes = [2, 256], strides = [1, 1]} : vector<8x256xf32> to vector<2x256xf32>
    %601 = vector.broadcast %82 : f32 to vector<2x256xf32>
    %602 = arith.mulf %600, %601 : vector<2x256xf32>
    %603 = arith.addf %599, %602 : vector<2x256xf32>
    %604 = vector.extract_strided_slice %175 {offsets = [2, 0], sizes = [2, 256], strides = [1, 1]} : vector<8x256xf32> to vector<2x256xf32>
    %605 = vector.broadcast %86 : f32 to vector<2x256xf32>
    %606 = arith.mulf %604, %605 : vector<2x256xf32>
    %607 = arith.addf %603, %606 : vector<2x256xf32>
    %608 = vector.extract_strided_slice %175 {offsets = [4, 0], sizes = [2, 256], strides = [1, 1]} : vector<8x256xf32> to vector<2x256xf32>
    %609 = vector.broadcast %90 : f32 to vector<2x256xf32>
    %610 = arith.mulf %608, %609 : vector<2x256xf32>
    %611 = arith.addf %607, %610 : vector<2x256xf32>
    %612 = vector.extract_strided_slice %175 {offsets = [6, 0], sizes = [2, 256], strides = [1, 1]} : vector<8x256xf32> to vector<2x256xf32>
    %613 = vector.broadcast %94 : f32 to vector<2x256xf32>
    %614 = arith.mulf %612, %613 : vector<2x256xf32>
    %615 = arith.addf %611, %614 : vector<2x256xf32>
    %616 = vector.extract_strided_slice %178 {offsets = [0, 0], sizes = [2, 256], strides = [1, 1]} : vector<8x256xf32> to vector<2x256xf32>
    %617 = vector.broadcast %98 : f32 to vector<2x256xf32>
    %618 = arith.mulf %616, %617 : vector<2x256xf32>
    %619 = arith.addf %615, %618 : vector<2x256xf32>
    %620 = vector.extract_strided_slice %178 {offsets = [2, 0], sizes = [2, 256], strides = [1, 1]} : vector<8x256xf32> to vector<2x256xf32>
    %621 = vector.broadcast %102 : f32 to vector<2x256xf32>
    %622 = arith.mulf %620, %621 : vector<2x256xf32>
    %623 = arith.addf %619, %622 : vector<2x256xf32>
    %624 = vector.extract_strided_slice %178 {offsets = [4, 0], sizes = [2, 256], strides = [1, 1]} : vector<8x256xf32> to vector<2x256xf32>
    %625 = vector.broadcast %106 : f32 to vector<2x256xf32>
    %626 = arith.mulf %624, %625 : vector<2x256xf32>
    %627 = arith.addf %623, %626 : vector<2x256xf32>
    %628 = vector.extract_strided_slice %178 {offsets = [6, 0], sizes = [2, 256], strides = [1, 1]} : vector<8x256xf32> to vector<2x256xf32>
    %629 = vector.broadcast %110 : f32 to vector<2x256xf32>
    %630 = arith.mulf %628, %629 : vector<2x256xf32>
    %631 = arith.addf %627, %630 : vector<2x256xf32>
    %632 = vector.extract_strided_slice %181 {offsets = [0, 0], sizes = [2, 256], strides = [1, 1]} : vector<8x256xf32> to vector<2x256xf32>
    %633 = vector.broadcast %114 : f32 to vector<2x256xf32>
    %634 = arith.mulf %632, %633 : vector<2x256xf32>
    %635 = arith.addf %631, %634 : vector<2x256xf32>
    %636 = vector.extract_strided_slice %181 {offsets = [2, 0], sizes = [2, 256], strides = [1, 1]} : vector<8x256xf32> to vector<2x256xf32>
    %637 = vector.broadcast %118 : f32 to vector<2x256xf32>
    %638 = arith.mulf %636, %637 : vector<2x256xf32>
    %639 = arith.addf %635, %638 : vector<2x256xf32>
    %640 = vector.extract_strided_slice %181 {offsets = [4, 0], sizes = [2, 256], strides = [1, 1]} : vector<8x256xf32> to vector<2x256xf32>
    %641 = vector.broadcast %122 : f32 to vector<2x256xf32>
    %642 = arith.mulf %640, %641 : vector<2x256xf32>
    %643 = arith.addf %639, %642 : vector<2x256xf32>
    %644 = vector.extract_strided_slice %181 {offsets = [6, 0], sizes = [2, 256], strides = [1, 1]} : vector<8x256xf32> to vector<2x256xf32>
    %645 = vector.broadcast %126 : f32 to vector<2x256xf32>
    %646 = arith.mulf %644, %645 : vector<2x256xf32>
    %647 = arith.addf %643, %646 : vector<2x256xf32>
    %648 = vector.extract_strided_slice %184 {offsets = [0, 0], sizes = [2, 256], strides = [1, 1]} : vector<8x256xf32> to vector<2x256xf32>
    %649 = vector.broadcast %130 : f32 to vector<2x256xf32>
    %650 = arith.mulf %648, %649 : vector<2x256xf32>
    %651 = arith.addf %647, %650 : vector<2x256xf32>
    %652 = vector.extract_strided_slice %184 {offsets = [2, 0], sizes = [2, 256], strides = [1, 1]} : vector<8x256xf32> to vector<2x256xf32>
    %653 = vector.broadcast %134 : f32 to vector<2x256xf32>
    %654 = arith.mulf %652, %653 : vector<2x256xf32>
    %655 = arith.addf %651, %654 : vector<2x256xf32>
    %656 = vector.extract_strided_slice %184 {offsets = [4, 0], sizes = [2, 256], strides = [1, 1]} : vector<8x256xf32> to vector<2x256xf32>
    %657 = vector.broadcast %138 : f32 to vector<2x256xf32>
    %658 = arith.mulf %656, %657 : vector<2x256xf32>
    %659 = arith.addf %655, %658 : vector<2x256xf32>
    %660 = vector.extract_strided_slice %184 {offsets = [6, 0], sizes = [2, 256], strides = [1, 1]} : vector<8x256xf32> to vector<2x256xf32>
    %661 = vector.broadcast %142 : f32 to vector<2x256xf32>
    %662 = arith.mulf %660, %661 : vector<2x256xf32>
    %663 = arith.addf %659, %662 : vector<2x256xf32>
    %664 = vector.shape_cast %663 : vector<2x256xf32> to vector<1x2x256xf32>
    %cst_41 = arith.constant dense<0.000000e+00> : vector<1xf32>
    %665 = vector.multi_reduction <add>, %664, %cst_41 [1, 2] : vector<1x2x256xf32> to vector<1xf32>
    %666 = vector.shape_cast %665 : vector<1xf32> to vector<1x1x1xf32>
    %667 = vector.extract %666[0, 0, 0] : f32 from vector<1x1x1xf32>
    %cst_42 = arith.constant 0.001953125 : f32
    %668 = arith.mulf %667, %cst_42 : f32
    %669 = arith.mulf %663, %663 : vector<2x256xf32>
    %670 = vector.shape_cast %669 : vector<2x256xf32> to vector<1x2x256xf32>
    %cst_43 = arith.constant dense<0.000000e+00> : vector<1xf32>
    %671 = vector.multi_reduction <add>, %670, %cst_43 [1, 2] : vector<1x2x256xf32> to vector<1xf32>
    %672 = vector.shape_cast %671 : vector<1xf32> to vector<1x1x1xf32>
    %673 = vector.extract %672[0, 0, 0] : f32 from vector<1x1x1xf32>
    %cst_44 = arith.constant 0.001953125 : f32
    %674 = arith.mulf %673, %cst_44 : f32
    %675 = arith.mulf %668, %668 : f32
    %676 = arith.subf %674, %675 : f32
    %cst_45 = arith.constant 9.99999974E-6 : f32
    %677 = arith.addf %676, %cst_45 : f32
    %678 = math.rsqrt %677 : f32
    %679 = arith.mulf %146, %678 : f32
    %680 = arith.mulf %668, %679 : f32
    %681 = arith.subf %150, %680 : f32
    %682 = vector.broadcast %679 : f32 to vector<2x256xf32>
    %683 = arith.mulf %663, %682 : vector<2x256xf32>
    %684 = vector.broadcast %681 : f32 to vector<2x256xf32>
    %685 = arith.addf %683, %684 : vector<2x256xf32>
    %cst_46 = arith.constant 0.000000e+00 : f32
    %686 = vector.broadcast %cst_46 : f32 to vector<2x256xf32>
    %687 = arith.maximumf %685, %686 : vector<2x256xf32>
    %c4_47 = arith.constant 4 : index
    %c0_48 = arith.constant 0 : index
    %688 = vector.load %arg5[%c4_47, %c0_48] : memref<8x256xf32, #tpu.memory_space<vmem>>, vector<2x256xf32>
    tpu.vector_store %arg5[%c4_47, %c0_48], %687 {strides = array<i32>} : memref<8x256xf32, #tpu.memory_space<vmem>>, vector<2x256xf32>,
    %689 = vector.extract_strided_slice %163 {offsets = [0, 0], sizes = [2, 256], strides = [1, 1]} : vector<8x256xf32> to vector<2x256xf32>
    %690 = vector.broadcast %3 : f32 to vector<2x256xf32>
    %691 = arith.mulf %689, %690 : vector<2x256xf32>
    %692 = vector.extract_strided_slice %163 {offsets = [2, 0], sizes = [2, 256], strides = [1, 1]} : vector<8x256xf32> to vector<2x256xf32>
    %693 = vector.broadcast %7 : f32 to vector<2x256xf32>
    %694 = arith.mulf %692, %693 : vector<2x256xf32>
    %695 = arith.addf %691, %694 : vector<2x256xf32>
    %696 = vector.extract_strided_slice %163 {offsets = [4, 0], sizes = [2, 256], strides = [1, 1]} : vector<8x256xf32> to vector<2x256xf32>
    %697 = vector.broadcast %11 : f32 to vector<2x256xf32>
    %698 = arith.mulf %696, %697 : vector<2x256xf32>
    %699 = arith.addf %695, %698 : vector<2x256xf32>
    %700 = vector.extract_strided_slice %163 {offsets = [6, 0], sizes = [2, 256], strides = [1, 1]} : vector<8x256xf32> to vector<2x256xf32>
    %701 = vector.broadcast %15 : f32 to vector<2x256xf32>
    %702 = arith.mulf %700, %701 : vector<2x256xf32>
    %703 = arith.addf %699, %702 : vector<2x256xf32>
    %704 = vector.extract_strided_slice %166 {offsets = [0, 0], sizes = [2, 256], strides = [1, 1]} : vector<8x256xf32> to vector<2x256xf32>
    %705 = vector.broadcast %19 : f32 to vector<2x256xf32>
    %706 = arith.mulf %704, %705 : vector<2x256xf32>
    %707 = arith.addf %703, %706 : vector<2x256xf32>
    %708 = vector.extract_strided_slice %166 {offsets = [2, 0], sizes = [2, 256], strides = [1, 1]} : vector<8x256xf32> to vector<2x256xf32>
    %709 = vector.broadcast %23 : f32 to vector<2x256xf32>
    %710 = arith.mulf %708, %709 : vector<2x256xf32>
    %711 = arith.addf %707, %710 : vector<2x256xf32>
    %712 = vector.extract_strided_slice %166 {offsets = [4, 0], sizes = [2, 256], strides = [1, 1]} : vector<8x256xf32> to vector<2x256xf32>
    %713 = vector.broadcast %27 : f32 to vector<2x256xf32>
    %714 = arith.mulf %712, %713 : vector<2x256xf32>
    %715 = arith.addf %711, %714 : vector<2x256xf32>
    %716 = vector.extract_strided_slice %166 {offsets = [6, 0], sizes = [2, 256], strides = [1, 1]} : vector<8x256xf32> to vector<2x256xf32>
    %717 = vector.broadcast %31 : f32 to vector<2x256xf32>
    %718 = arith.mulf %716, %717 : vector<2x256xf32>
    %719 = arith.addf %715, %718 : vector<2x256xf32>
    %720 = vector.extract_strided_slice %169 {offsets = [0, 0], sizes = [2, 256], strides = [1, 1]} : vector<8x256xf32> to vector<2x256xf32>
    %721 = vector.broadcast %35 : f32 to vector<2x256xf32>
    %722 = arith.mulf %720, %721 : vector<2x256xf32>
    %723 = arith.addf %719, %722 : vector<2x256xf32>
    %724 = vector.extract_strided_slice %169 {offsets = [2, 0], sizes = [2, 256], strides = [1, 1]} : vector<8x256xf32> to vector<2x256xf32>
    %725 = vector.broadcast %39 : f32 to vector<2x256xf32>
    %726 = arith.mulf %724, %725 : vector<2x256xf32>
    %727 = arith.addf %723, %726 : vector<2x256xf32>
    %728 = vector.extract_strided_slice %169 {offsets = [4, 0], sizes = [2, 256], strides = [1, 1]} : vector<8x256xf32> to vector<2x256xf32>
    %729 = vector.broadcast %43 : f32 to vector<2x256xf32>
    %730 = arith.mulf %728, %729 : vector<2x256xf32>
    %731 = arith.addf %727, %730 : vector<2x256xf32>
    %732 = vector.extract_strided_slice %169 {offsets = [6, 0], sizes = [2, 256], strides = [1, 1]} : vector<8x256xf32> to vector<2x256xf32>
    %733 = vector.broadcast %47 : f32 to vector<2x256xf32>
    %734 = arith.mulf %732, %733 : vector<2x256xf32>
    %735 = arith.addf %731, %734 : vector<2x256xf32>
    %736 = vector.extract_strided_slice %172 {offsets = [0, 0], sizes = [2, 256], strides = [1, 1]} : vector<8x256xf32> to vector<2x256xf32>
    %737 = vector.broadcast %51 : f32 to vector<2x256xf32>
    %738 = arith.mulf %736, %737 : vector<2x256xf32>
    %739 = arith.addf %735, %738 : vector<2x256xf32>
    %740 = vector.extract_strided_slice %172 {offsets = [2, 0], sizes = [2, 256], strides = [1, 1]} : vector<8x256xf32> to vector<2x256xf32>
    %741 = vector.broadcast %55 : f32 to vector<2x256xf32>
    %742 = arith.mulf %740, %741 : vector<2x256xf32>
    %743 = arith.addf %739, %742 : vector<2x256xf32>
    %744 = vector.extract_strided_slice %172 {offsets = [4, 0], sizes = [2, 256], strides = [1, 1]} : vector<8x256xf32> to vector<2x256xf32>
    %745 = vector.broadcast %59 : f32 to vector<2x256xf32>
    %746 = arith.mulf %744, %745 : vector<2x256xf32>
    %747 = arith.addf %743, %746 : vector<2x256xf32>
    %748 = vector.extract_strided_slice %172 {offsets = [6, 0], sizes = [2, 256], strides = [1, 1]} : vector<8x256xf32> to vector<2x256xf32>
    %749 = vector.broadcast %63 : f32 to vector<2x256xf32>
    %750 = arith.mulf %748, %749 : vector<2x256xf32>
    %751 = arith.addf %747, %750 : vector<2x256xf32>
    %752 = vector.extract_strided_slice %160 {offsets = [0, 0], sizes = [2, 256], strides = [1, 1]} : vector<8x256xf32> to vector<2x256xf32>
    %753 = vector.broadcast %67 : f32 to vector<2x256xf32>
    %754 = arith.mulf %752, %753 : vector<2x256xf32>
    %755 = arith.addf %751, %754 : vector<2x256xf32>
    %756 = vector.extract_strided_slice %160 {offsets = [2, 0], sizes = [2, 256], strides = [1, 1]} : vector<8x256xf32> to vector<2x256xf32>
    %757 = vector.broadcast %71 : f32 to vector<2x256xf32>
    %758 = arith.mulf %756, %757 : vector<2x256xf32>
    %759 = arith.addf %755, %758 : vector<2x256xf32>
    %760 = vector.extract_strided_slice %160 {offsets = [4, 0], sizes = [2, 256], strides = [1, 1]} : vector<8x256xf32> to vector<2x256xf32>
    %761 = vector.broadcast %75 : f32 to vector<2x256xf32>
    %762 = arith.mulf %760, %761 : vector<2x256xf32>
    %763 = arith.addf %759, %762 : vector<2x256xf32>
    %764 = vector.extract_strided_slice %160 {offsets = [6, 0], sizes = [2, 256], strides = [1, 1]} : vector<8x256xf32> to vector<2x256xf32>
    %765 = vector.broadcast %79 : f32 to vector<2x256xf32>
    %766 = arith.mulf %764, %765 : vector<2x256xf32>
    %767 = arith.addf %763, %766 : vector<2x256xf32>
    %768 = vector.extract_strided_slice %175 {offsets = [0, 0], sizes = [2, 256], strides = [1, 1]} : vector<8x256xf32> to vector<2x256xf32>
    %769 = vector.broadcast %83 : f32 to vector<2x256xf32>
    %770 = arith.mulf %768, %769 : vector<2x256xf32>
    %771 = arith.addf %767, %770 : vector<2x256xf32>
    %772 = vector.extract_strided_slice %175 {offsets = [2, 0], sizes = [2, 256], strides = [1, 1]} : vector<8x256xf32> to vector<2x256xf32>
    %773 = vector.broadcast %87 : f32 to vector<2x256xf32>
    %774 = arith.mulf %772, %773 : vector<2x256xf32>
    %775 = arith.addf %771, %774 : vector<2x256xf32>
    %776 = vector.extract_strided_slice %175 {offsets = [4, 0], sizes = [2, 256], strides = [1, 1]} : vector<8x256xf32> to vector<2x256xf32>
    %777 = vector.broadcast %91 : f32 to vector<2x256xf32>
    %778 = arith.mulf %776, %777 : vector<2x256xf32>
    %779 = arith.addf %775, %778 : vector<2x256xf32>
    %780 = vector.extract_strided_slice %175 {offsets = [6, 0], sizes = [2, 256], strides = [1, 1]} : vector<8x256xf32> to vector<2x256xf32>
    %781 = vector.broadcast %95 : f32 to vector<2x256xf32>
    %782 = arith.mulf %780, %781 : vector<2x256xf32>
    %783 = arith.addf %779, %782 : vector<2x256xf32>
    %784 = vector.extract_strided_slice %178 {offsets = [0, 0], sizes = [2, 256], strides = [1, 1]} : vector<8x256xf32> to vector<2x256xf32>
    %785 = vector.broadcast %99 : f32 to vector<2x256xf32>
    %786 = arith.mulf %784, %785 : vector<2x256xf32>
    %787 = arith.addf %783, %786 : vector<2x256xf32>
    %788 = vector.extract_strided_slice %178 {offsets = [2, 0], sizes = [2, 256], strides = [1, 1]} : vector<8x256xf32> to vector<2x256xf32>
    %789 = vector.broadcast %103 : f32 to vector<2x256xf32>
    %790 = arith.mulf %788, %789 : vector<2x256xf32>
    %791 = arith.addf %787, %790 : vector<2x256xf32>
    %792 = vector.extract_strided_slice %178 {offsets = [4, 0], sizes = [2, 256], strides = [1, 1]} : vector<8x256xf32> to vector<2x256xf32>
    %793 = vector.broadcast %107 : f32 to vector<2x256xf32>
    %794 = arith.mulf %792, %793 : vector<2x256xf32>
    %795 = arith.addf %791, %794 : vector<2x256xf32>
    %796 = vector.extract_strided_slice %178 {offsets = [6, 0], sizes = [2, 256], strides = [1, 1]} : vector<8x256xf32> to vector<2x256xf32>
    %797 = vector.broadcast %111 : f32 to vector<2x256xf32>
    %798 = arith.mulf %796, %797 : vector<2x256xf32>
    %799 = arith.addf %795, %798 : vector<2x256xf32>
    %800 = vector.extract_strided_slice %181 {offsets = [0, 0], sizes = [2, 256], strides = [1, 1]} : vector<8x256xf32> to vector<2x256xf32>
    %801 = vector.broadcast %115 : f32 to vector<2x256xf32>
    %802 = arith.mulf %800, %801 : vector<2x256xf32>
    %803 = arith.addf %799, %802 : vector<2x256xf32>
    %804 = vector.extract_strided_slice %181 {offsets = [2, 0], sizes = [2, 256], strides = [1, 1]} : vector<8x256xf32> to vector<2x256xf32>
    %805 = vector.broadcast %119 : f32 to vector<2x256xf32>
    %806 = arith.mulf %804, %805 : vector<2x256xf32>
    %807 = arith.addf %803, %806 : vector<2x256xf32>
    %808 = vector.extract_strided_slice %181 {offsets = [4, 0], sizes = [2, 256], strides = [1, 1]} : vector<8x256xf32> to vector<2x256xf32>
    %809 = vector.broadcast %123 : f32 to vector<2x256xf32>
    %810 = arith.mulf %808, %809 : vector<2x256xf32>
    %811 = arith.addf %807, %810 : vector<2x256xf32>
    %812 = vector.extract_strided_slice %181 {offsets = [6, 0], sizes = [2, 256], strides = [1, 1]} : vector<8x256xf32> to vector<2x256xf32>
    %813 = vector.broadcast %127 : f32 to vector<2x256xf32>
    %814 = arith.mulf %812, %813 : vector<2x256xf32>
    %815 = arith.addf %811, %814 : vector<2x256xf32>
    %816 = vector.extract_strided_slice %184 {offsets = [0, 0], sizes = [2, 256], strides = [1, 1]} : vector<8x256xf32> to vector<2x256xf32>
    %817 = vector.broadcast %131 : f32 to vector<2x256xf32>
    %818 = arith.mulf %816, %817 : vector<2x256xf32>
    %819 = arith.addf %815, %818 : vector<2x256xf32>
    %820 = vector.extract_strided_slice %184 {offsets = [2, 0], sizes = [2, 256], strides = [1, 1]} : vector<8x256xf32> to vector<2x256xf32>
    %821 = vector.broadcast %135 : f32 to vector<2x256xf32>
    %822 = arith.mulf %820, %821 : vector<2x256xf32>
    %823 = arith.addf %819, %822 : vector<2x256xf32>
    %824 = vector.extract_strided_slice %184 {offsets = [4, 0], sizes = [2, 256], strides = [1, 1]} : vector<8x256xf32> to vector<2x256xf32>
    %825 = vector.broadcast %139 : f32 to vector<2x256xf32>
    %826 = arith.mulf %824, %825 : vector<2x256xf32>
    %827 = arith.addf %823, %826 : vector<2x256xf32>
    %828 = vector.extract_strided_slice %184 {offsets = [6, 0], sizes = [2, 256], strides = [1, 1]} : vector<8x256xf32> to vector<2x256xf32>
    %829 = vector.broadcast %143 : f32 to vector<2x256xf32>
    %830 = arith.mulf %828, %829 : vector<2x256xf32>
    %831 = arith.addf %827, %830 : vector<2x256xf32>
    %832 = vector.shape_cast %831 : vector<2x256xf32> to vector<1x2x256xf32>
    %cst_49 = arith.constant dense<0.000000e+00> : vector<1xf32>
    %833 = vector.multi_reduction <add>, %832, %cst_49 [1, 2] : vector<1x2x256xf32> to vector<1xf32>
    %834 = vector.shape_cast %833 : vector<1xf32> to vector<1x1x1xf32>
    %835 = vector.extract %834[0, 0, 0] : f32 from vector<1x1x1xf32>
    %cst_50 = arith.constant 0.001953125 : f32
    %836 = arith.mulf %835, %cst_50 : f32
    %837 = arith.mulf %831, %831 : vector<2x256xf32>
    %838 = vector.shape_cast %837 : vector<2x256xf32> to vector<1x2x256xf32>
    %cst_51 = arith.constant dense<0.000000e+00> : vector<1xf32>
    %839 = vector.multi_reduction <add>, %838, %cst_51 [1, 2] : vector<1x2x256xf32> to vector<1xf32>
    %840 = vector.shape_cast %839 : vector<1xf32> to vector<1x1x1xf32>
    %841 = vector.extract %840[0, 0, 0] : f32 from vector<1x1x1xf32>
    %cst_52 = arith.constant 0.001953125 : f32
    %842 = arith.mulf %841, %cst_52 : f32
    %843 = arith.mulf %836, %836 : f32
    %844 = arith.subf %842, %843 : f32
    %cst_53 = arith.constant 9.99999974E-6 : f32
    %845 = arith.addf %844, %cst_53 : f32
    %846 = math.rsqrt %845 : f32
    %847 = arith.mulf %147, %846 : f32
    %848 = arith.mulf %836, %847 : f32
    %849 = arith.subf %151, %848 : f32
    %850 = vector.broadcast %847 : f32 to vector<2x256xf32>
    %851 = arith.mulf %831, %850 : vector<2x256xf32>
    %852 = vector.broadcast %849 : f32 to vector<2x256xf32>
    %853 = arith.addf %851, %852 : vector<2x256xf32>
    %cst_54 = arith.constant 0.000000e+00 : f32
    %854 = vector.broadcast %cst_54 : f32 to vector<2x256xf32>
    %855 = arith.maximumf %853, %854 : vector<2x256xf32>
    %c6_55 = arith.constant 6 : index
    %c0_56 = arith.constant 0 : index
    %856 = vector.load %arg5[%c6_55, %c0_56] : memref<8x256xf32, #tpu.memory_space<vmem>>, vector<2x256xf32>
    tpu.vector_store %arg5[%c6_55, %c0_56], %855 {strides = array<i32>} : memref<8x256xf32, #tpu.memory_space<vmem>>, vector<2x256xf32>,
    %c0_57 = arith.constant 0 : index
    %c0_58 = arith.constant 0 : index
    %857 = vector.load %arg5[%c0_57, %c0_58] : memref<8x256xf32, #tpu.memory_space<vmem>>, vector<8x256xf32>
    %858 = arith.addf %160, %857 : vector<8x256xf32>
    %c17_i32_59 = arith.constant 17 : i32
    %859 = tpu.dynamic_rotate %858 by %c17_i32_59 dim 1 : vector<8x256xf32>, i32 -> vector<8x256xf32>
    %860 = vector.broadcast %152 : vector<1x256xf32> to vector<8x256xf32>
    %861 = arith.mulf %859, %860 : vector<8x256xf32>
    %c16_i32_60 = arith.constant 16 : i32
    %862 = tpu.dynamic_rotate %858 by %c16_i32_60 dim 1 : vector<8x256xf32>, i32 -> vector<8x256xf32>
    %863 = vector.broadcast %153 : vector<1x256xf32> to vector<8x256xf32>
    %864 = arith.mulf %862, %863 : vector<8x256xf32>
    %c15_i32_61 = arith.constant 15 : i32
    %865 = tpu.dynamic_rotate %858 by %c15_i32_61 dim 1 : vector<8x256xf32>, i32 -> vector<8x256xf32>
    %866 = vector.broadcast %154 : vector<1x256xf32> to vector<8x256xf32>
    %867 = arith.mulf %865, %866 : vector<8x256xf32>
    %c1_i32_62 = arith.constant 1 : i32
    %868 = tpu.dynamic_rotate %858 by %c1_i32_62 dim 1 : vector<8x256xf32>, i32 -> vector<8x256xf32>
    %869 = vector.broadcast %155 : vector<1x256xf32> to vector<8x256xf32>
    %870 = arith.mulf %868, %869 : vector<8x256xf32>
    %c255_i32_63 = arith.constant 255 : i32
    %871 = tpu.dynamic_rotate %858 by %c255_i32_63 dim 1 : vector<8x256xf32>, i32 -> vector<8x256xf32>
    %872 = vector.broadcast %156 : vector<1x256xf32> to vector<8x256xf32>
    %873 = arith.mulf %871, %872 : vector<8x256xf32>
    %c241_i32_64 = arith.constant 241 : i32
    %874 = tpu.dynamic_rotate %858 by %c241_i32_64 dim 1 : vector<8x256xf32>, i32 -> vector<8x256xf32>
    %875 = vector.broadcast %157 : vector<1x256xf32> to vector<8x256xf32>
    %876 = arith.mulf %874, %875 : vector<8x256xf32>
    %c240_i32_65 = arith.constant 240 : i32
    %877 = tpu.dynamic_rotate %858 by %c240_i32_65 dim 1 : vector<8x256xf32>, i32 -> vector<8x256xf32>
    %878 = vector.broadcast %158 : vector<1x256xf32> to vector<8x256xf32>
    %879 = arith.mulf %877, %878 : vector<8x256xf32>
    %c239_i32_66 = arith.constant 239 : i32
    %880 = tpu.dynamic_rotate %858 by %c239_i32_66 dim 1 : vector<8x256xf32>, i32 -> vector<8x256xf32>
    %881 = vector.broadcast %159 : vector<1x256xf32> to vector<8x256xf32>
    %882 = arith.mulf %880, %881 : vector<8x256xf32>
    %883 = vector.extract_strided_slice %861 {offsets = [0, 0], sizes = [2, 256], strides = [1, 1]} : vector<8x256xf32> to vector<2x256xf32>
    %884 = vector.broadcast %0 : f32 to vector<2x256xf32>
    %885 = arith.mulf %883, %884 : vector<2x256xf32>
    %886 = vector.extract_strided_slice %861 {offsets = [2, 0], sizes = [2, 256], strides = [1, 1]} : vector<8x256xf32> to vector<2x256xf32>
    %887 = vector.broadcast %4 : f32 to vector<2x256xf32>
    %888 = arith.mulf %886, %887 : vector<2x256xf32>
    %889 = arith.addf %885, %888 : vector<2x256xf32>
    %890 = vector.extract_strided_slice %861 {offsets = [4, 0], sizes = [2, 256], strides = [1, 1]} : vector<8x256xf32> to vector<2x256xf32>
    %891 = vector.broadcast %8 : f32 to vector<2x256xf32>
    %892 = arith.mulf %890, %891 : vector<2x256xf32>
    %893 = arith.addf %889, %892 : vector<2x256xf32>
    %894 = vector.extract_strided_slice %861 {offsets = [6, 0], sizes = [2, 256], strides = [1, 1]} : vector<8x256xf32> to vector<2x256xf32>
    %895 = vector.broadcast %12 : f32 to vector<2x256xf32>
    %896 = arith.mulf %894, %895 : vector<2x256xf32>
    %897 = arith.addf %893, %896 : vector<2x256xf32>
    %898 = vector.extract_strided_slice %864 {offsets = [0, 0], sizes = [2, 256], strides = [1, 1]} : vector<8x256xf32> to vector<2x256xf32>
    %899 = vector.broadcast %16 : f32 to vector<2x256xf32>
    %900 = arith.mulf %898, %899 : vector<2x256xf32>
    %901 = arith.addf %897, %900 : vector<2x256xf32>
    %902 = vector.extract_strided_slice %864 {offsets = [2, 0], sizes = [2, 256], strides = [1, 1]} : vector<8x256xf32> to vector<2x256xf32>
    %903 = vector.broadcast %20 : f32 to vector<2x256xf32>
    %904 = arith.mulf %902, %903 : vector<2x256xf32>
    %905 = arith.addf %901, %904 : vector<2x256xf32>
    %906 = vector.extract_strided_slice %864 {offsets = [4, 0], sizes = [2, 256], strides = [1, 1]} : vector<8x256xf32> to vector<2x256xf32>
    %907 = vector.broadcast %24 : f32 to vector<2x256xf32>
    %908 = arith.mulf %906, %907 : vector<2x256xf32>
    %909 = arith.addf %905, %908 : vector<2x256xf32>
    %910 = vector.extract_strided_slice %864 {offsets = [6, 0], sizes = [2, 256], strides = [1, 1]} : vector<8x256xf32> to vector<2x256xf32>
    %911 = vector.broadcast %28 : f32 to vector<2x256xf32>
    %912 = arith.mulf %910, %911 : vector<2x256xf32>
    %913 = arith.addf %909, %912 : vector<2x256xf32>
    %914 = vector.extract_strided_slice %867 {offsets = [0, 0], sizes = [2, 256], strides = [1, 1]} : vector<8x256xf32> to vector<2x256xf32>
    %915 = vector.broadcast %32 : f32 to vector<2x256xf32>
    %916 = arith.mulf %914, %915 : vector<2x256xf32>
    %917 = arith.addf %913, %916 : vector<2x256xf32>
    %918 = vector.extract_strided_slice %867 {offsets = [2, 0], sizes = [2, 256], strides = [1, 1]} : vector<8x256xf32> to vector<2x256xf32>
    %919 = vector.broadcast %36 : f32 to vector<2x256xf32>
    %920 = arith.mulf %918, %919 : vector<2x256xf32>
    %921 = arith.addf %917, %920 : vector<2x256xf32>
    %922 = vector.extract_strided_slice %867 {offsets = [4, 0], sizes = [2, 256], strides = [1, 1]} : vector<8x256xf32> to vector<2x256xf32>
    %923 = vector.broadcast %40 : f32 to vector<2x256xf32>
    %924 = arith.mulf %922, %923 : vector<2x256xf32>
    %925 = arith.addf %921, %924 : vector<2x256xf32>
    %926 = vector.extract_strided_slice %867 {offsets = [6, 0], sizes = [2, 256], strides = [1, 1]} : vector<8x256xf32> to vector<2x256xf32>
    %927 = vector.broadcast %44 : f32 to vector<2x256xf32>
    %928 = arith.mulf %926, %927 : vector<2x256xf32>
    %929 = arith.addf %925, %928 : vector<2x256xf32>
    %930 = vector.extract_strided_slice %870 {offsets = [0, 0], sizes = [2, 256], strides = [1, 1]} : vector<8x256xf32> to vector<2x256xf32>
    %931 = vector.broadcast %48 : f32 to vector<2x256xf32>
    %932 = arith.mulf %930, %931 : vector<2x256xf32>
    %933 = arith.addf %929, %932 : vector<2x256xf32>
    %934 = vector.extract_strided_slice %870 {offsets = [2, 0], sizes = [2, 256], strides = [1, 1]} : vector<8x256xf32> to vector<2x256xf32>
    %935 = vector.broadcast %52 : f32 to vector<2x256xf32>
    %936 = arith.mulf %934, %935 : vector<2x256xf32>
    %937 = arith.addf %933, %936 : vector<2x256xf32>
    %938 = vector.extract_strided_slice %870 {offsets = [4, 0], sizes = [2, 256], strides = [1, 1]} : vector<8x256xf32> to vector<2x256xf32>
    %939 = vector.broadcast %56 : f32 to vector<2x256xf32>
    %940 = arith.mulf %938, %939 : vector<2x256xf32>
    %941 = arith.addf %937, %940 : vector<2x256xf32>
    %942 = vector.extract_strided_slice %870 {offsets = [6, 0], sizes = [2, 256], strides = [1, 1]} : vector<8x256xf32> to vector<2x256xf32>
    %943 = vector.broadcast %60 : f32 to vector<2x256xf32>
    %944 = arith.mulf %942, %943 : vector<2x256xf32>
    %945 = arith.addf %941, %944 : vector<2x256xf32>
    %946 = vector.extract_strided_slice %858 {offsets = [0, 0], sizes = [2, 256], strides = [1, 1]} : vector<8x256xf32> to vector<2x256xf32>
    %947 = vector.broadcast %64 : f32 to vector<2x256xf32>
    %948 = arith.mulf %946, %947 : vector<2x256xf32>
    %949 = arith.addf %945, %948 : vector<2x256xf32>
    %950 = vector.extract_strided_slice %858 {offsets = [2, 0], sizes = [2, 256], strides = [1, 1]} : vector<8x256xf32> to vector<2x256xf32>
    %951 = vector.broadcast %68 : f32 to vector<2x256xf32>
    %952 = arith.mulf %950, %951 : vector<2x256xf32>
    %953 = arith.addf %949, %952 : vector<2x256xf32>
    %954 = vector.extract_strided_slice %858 {offsets = [4, 0], sizes = [2, 256], strides = [1, 1]} : vector<8x256xf32> to vector<2x256xf32>
    %955 = vector.broadcast %72 : f32 to vector<2x256xf32>
    %956 = arith.mulf %954, %955 : vector<2x256xf32>
    %957 = arith.addf %953, %956 : vector<2x256xf32>
    %958 = vector.extract_strided_slice %858 {offsets = [6, 0], sizes = [2, 256], strides = [1, 1]} : vector<8x256xf32> to vector<2x256xf32>
    %959 = vector.broadcast %76 : f32 to vector<2x256xf32>
    %960 = arith.mulf %958, %959 : vector<2x256xf32>
    %961 = arith.addf %957, %960 : vector<2x256xf32>
    %962 = vector.extract_strided_slice %873 {offsets = [0, 0], sizes = [2, 256], strides = [1, 1]} : vector<8x256xf32> to vector<2x256xf32>
    %963 = vector.broadcast %80 : f32 to vector<2x256xf32>
    %964 = arith.mulf %962, %963 : vector<2x256xf32>
    %965 = arith.addf %961, %964 : vector<2x256xf32>
    %966 = vector.extract_strided_slice %873 {offsets = [2, 0], sizes = [2, 256], strides = [1, 1]} : vector<8x256xf32> to vector<2x256xf32>
    %967 = vector.broadcast %84 : f32 to vector<2x256xf32>
    %968 = arith.mulf %966, %967 : vector<2x256xf32>
    %969 = arith.addf %965, %968 : vector<2x256xf32>
    %970 = vector.extract_strided_slice %873 {offsets = [4, 0], sizes = [2, 256], strides = [1, 1]} : vector<8x256xf32> to vector<2x256xf32>
    %971 = vector.broadcast %88 : f32 to vector<2x256xf32>
    %972 = arith.mulf %970, %971 : vector<2x256xf32>
    %973 = arith.addf %969, %972 : vector<2x256xf32>
    %974 = vector.extract_strided_slice %873 {offsets = [6, 0], sizes = [2, 256], strides = [1, 1]} : vector<8x256xf32> to vector<2x256xf32>
    %975 = vector.broadcast %92 : f32 to vector<2x256xf32>
    %976 = arith.mulf %974, %975 : vector<2x256xf32>
    %977 = arith.addf %973, %976 : vector<2x256xf32>
    %978 = vector.extract_strided_slice %876 {offsets = [0, 0], sizes = [2, 256], strides = [1, 1]} : vector<8x256xf32> to vector<2x256xf32>
    %979 = vector.broadcast %96 : f32 to vector<2x256xf32>
    %980 = arith.mulf %978, %979 : vector<2x256xf32>
    %981 = arith.addf %977, %980 : vector<2x256xf32>
    %982 = vector.extract_strided_slice %876 {offsets = [2, 0], sizes = [2, 256], strides = [1, 1]} : vector<8x256xf32> to vector<2x256xf32>
    %983 = vector.broadcast %100 : f32 to vector<2x256xf32>
    %984 = arith.mulf %982, %983 : vector<2x256xf32>
    %985 = arith.addf %981, %984 : vector<2x256xf32>
    %986 = vector.extract_strided_slice %876 {offsets = [4, 0], sizes = [2, 256], strides = [1, 1]} : vector<8x256xf32> to vector<2x256xf32>
    %987 = vector.broadcast %104 : f32 to vector<2x256xf32>
    %988 = arith.mulf %986, %987 : vector<2x256xf32>
    %989 = arith.addf %985, %988 : vector<2x256xf32>
    %990 = vector.extract_strided_slice %876 {offsets = [6, 0], sizes = [2, 256], strides = [1, 1]} : vector<8x256xf32> to vector<2x256xf32>
    %991 = vector.broadcast %108 : f32 to vector<2x256xf32>
    %992 = arith.mulf %990, %991 : vector<2x256xf32>
    %993 = arith.addf %989, %992 : vector<2x256xf32>
    %994 = vector.extract_strided_slice %879 {offsets = [0, 0], sizes = [2, 256], strides = [1, 1]} : vector<8x256xf32> to vector<2x256xf32>
    %995 = vector.broadcast %112 : f32 to vector<2x256xf32>
    %996 = arith.mulf %994, %995 : vector<2x256xf32>
    %997 = arith.addf %993, %996 : vector<2x256xf32>
    %998 = vector.extract_strided_slice %879 {offsets = [2, 0], sizes = [2, 256], strides = [1, 1]} : vector<8x256xf32> to vector<2x256xf32>
    %999 = vector.broadcast %116 : f32 to vector<2x256xf32>
    %1000 = arith.mulf %998, %999 : vector<2x256xf32>
    %1001 = arith.addf %997, %1000 : vector<2x256xf32>
    %1002 = vector.extract_strided_slice %879 {offsets = [4, 0], sizes = [2, 256], strides = [1, 1]} : vector<8x256xf32> to vector<2x256xf32>
    %1003 = vector.broadcast %120 : f32 to vector<2x256xf32>
    %1004 = arith.mulf %1002, %1003 : vector<2x256xf32>
    %1005 = arith.addf %1001, %1004 : vector<2x256xf32>
    %1006 = vector.extract_strided_slice %879 {offsets = [6, 0], sizes = [2, 256], strides = [1, 1]} : vector<8x256xf32> to vector<2x256xf32>
    %1007 = vector.broadcast %124 : f32 to vector<2x256xf32>
    %1008 = arith.mulf %1006, %1007 : vector<2x256xf32>
    %1009 = arith.addf %1005, %1008 : vector<2x256xf32>
    %1010 = vector.extract_strided_slice %882 {offsets = [0, 0], sizes = [2, 256], strides = [1, 1]} : vector<8x256xf32> to vector<2x256xf32>
    %1011 = vector.broadcast %128 : f32 to vector<2x256xf32>
    %1012 = arith.mulf %1010, %1011 : vector<2x256xf32>
    %1013 = arith.addf %1009, %1012 : vector<2x256xf32>
    %1014 = vector.extract_strided_slice %882 {offsets = [2, 0], sizes = [2, 256], strides = [1, 1]} : vector<8x256xf32> to vector<2x256xf32>
    %1015 = vector.broadcast %132 : f32 to vector<2x256xf32>
    %1016 = arith.mulf %1014, %1015 : vector<2x256xf32>
    %1017 = arith.addf %1013, %1016 : vector<2x256xf32>
    %1018 = vector.extract_strided_slice %882 {offsets = [4, 0], sizes = [2, 256], strides = [1, 1]} : vector<8x256xf32> to vector<2x256xf32>
    %1019 = vector.broadcast %136 : f32 to vector<2x256xf32>
    %1020 = arith.mulf %1018, %1019 : vector<2x256xf32>
    %1021 = arith.addf %1017, %1020 : vector<2x256xf32>
    %1022 = vector.extract_strided_slice %882 {offsets = [6, 0], sizes = [2, 256], strides = [1, 1]} : vector<8x256xf32> to vector<2x256xf32>
    %1023 = vector.broadcast %140 : f32 to vector<2x256xf32>
    %1024 = arith.mulf %1022, %1023 : vector<2x256xf32>
    %1025 = arith.addf %1021, %1024 : vector<2x256xf32>
    %1026 = vector.shape_cast %1025 : vector<2x256xf32> to vector<1x2x256xf32>
    %cst_67 = arith.constant dense<0.000000e+00> : vector<1xf32>
    %1027 = vector.multi_reduction <add>, %1026, %cst_67 [1, 2] : vector<1x2x256xf32> to vector<1xf32>
    %1028 = vector.shape_cast %1027 : vector<1xf32> to vector<1x1x1xf32>
    %1029 = vector.extract %1028[0, 0, 0] : f32 from vector<1x1x1xf32>
    %cst_68 = arith.constant 0.001953125 : f32
    %1030 = arith.mulf %1029, %cst_68 : f32
    %1031 = arith.mulf %1025, %1025 : vector<2x256xf32>
    %1032 = vector.shape_cast %1031 : vector<2x256xf32> to vector<1x2x256xf32>
    %cst_69 = arith.constant dense<0.000000e+00> : vector<1xf32>
    %1033 = vector.multi_reduction <add>, %1032, %cst_69 [1, 2] : vector<1x2x256xf32> to vector<1xf32>
    %1034 = vector.shape_cast %1033 : vector<1xf32> to vector<1x1x1xf32>
    %1035 = vector.extract %1034[0, 0, 0] : f32 from vector<1x1x1xf32>
    %cst_70 = arith.constant 0.001953125 : f32
    %1036 = arith.mulf %1035, %cst_70 : f32
    %1037 = arith.mulf %1030, %1030 : f32
    %1038 = arith.subf %1036, %1037 : f32
    %cst_71 = arith.constant 9.99999974E-6 : f32
    %1039 = arith.addf %1038, %cst_71 : f32
    %1040 = math.rsqrt %1039 : f32
    %1041 = arith.mulf %144, %1040 : f32
    %1042 = arith.mulf %1030, %1041 : f32
    %1043 = arith.subf %148, %1042 : f32
    %1044 = vector.broadcast %1041 : f32 to vector<2x256xf32>
    %1045 = arith.mulf %1025, %1044 : vector<2x256xf32>
    %1046 = vector.broadcast %1043 : f32 to vector<2x256xf32>
    %1047 = arith.addf %1045, %1046 : vector<2x256xf32>
    %cst_72 = arith.constant 0.000000e+00 : f32
    %1048 = vector.broadcast %cst_72 : f32 to vector<2x256xf32>
    %1049 = arith.maximumf %1047, %1048 : vector<2x256xf32>
    %c0_73 = arith.constant 0 : index
    %c0_74 = arith.constant 0 : index
    %1050 = vector.load %arg5[%c0_73, %c0_74] : memref<8x256xf32, #tpu.memory_space<vmem>>, vector<2x256xf32>
    tpu.vector_store %arg5[%c0_73, %c0_74], %1049 {strides = array<i32>} : memref<8x256xf32, #tpu.memory_space<vmem>>, vector<2x256xf32>,
    %1051 = vector.extract_strided_slice %861 {offsets = [0, 0], sizes = [2, 256], strides = [1, 1]} : vector<8x256xf32> to vector<2x256xf32>
    %1052 = vector.broadcast %1 : f32 to vector<2x256xf32>
    %1053 = arith.mulf %1051, %1052 : vector<2x256xf32>
    %1054 = vector.extract_strided_slice %861 {offsets = [2, 0], sizes = [2, 256], strides = [1, 1]} : vector<8x256xf32> to vector<2x256xf32>
    %1055 = vector.broadcast %5 : f32 to vector<2x256xf32>
    %1056 = arith.mulf %1054, %1055 : vector<2x256xf32>
    %1057 = arith.addf %1053, %1056 : vector<2x256xf32>
    %1058 = vector.extract_strided_slice %861 {offsets = [4, 0], sizes = [2, 256], strides = [1, 1]} : vector<8x256xf32> to vector<2x256xf32>
    %1059 = vector.broadcast %9 : f32 to vector<2x256xf32>
    %1060 = arith.mulf %1058, %1059 : vector<2x256xf32>
    %1061 = arith.addf %1057, %1060 : vector<2x256xf32>
    %1062 = vector.extract_strided_slice %861 {offsets = [6, 0], sizes = [2, 256], strides = [1, 1]} : vector<8x256xf32> to vector<2x256xf32>
    %1063 = vector.broadcast %13 : f32 to vector<2x256xf32>
    %1064 = arith.mulf %1062, %1063 : vector<2x256xf32>
    %1065 = arith.addf %1061, %1064 : vector<2x256xf32>
    %1066 = vector.extract_strided_slice %864 {offsets = [0, 0], sizes = [2, 256], strides = [1, 1]} : vector<8x256xf32> to vector<2x256xf32>
    %1067 = vector.broadcast %17 : f32 to vector<2x256xf32>
    %1068 = arith.mulf %1066, %1067 : vector<2x256xf32>
    %1069 = arith.addf %1065, %1068 : vector<2x256xf32>
    %1070 = vector.extract_strided_slice %864 {offsets = [2, 0], sizes = [2, 256], strides = [1, 1]} : vector<8x256xf32> to vector<2x256xf32>
    %1071 = vector.broadcast %21 : f32 to vector<2x256xf32>
    %1072 = arith.mulf %1070, %1071 : vector<2x256xf32>
    %1073 = arith.addf %1069, %1072 : vector<2x256xf32>
    %1074 = vector.extract_strided_slice %864 {offsets = [4, 0], sizes = [2, 256], strides = [1, 1]} : vector<8x256xf32> to vector<2x256xf32>
    %1075 = vector.broadcast %25 : f32 to vector<2x256xf32>
    %1076 = arith.mulf %1074, %1075 : vector<2x256xf32>
    %1077 = arith.addf %1073, %1076 : vector<2x256xf32>
    %1078 = vector.extract_strided_slice %864 {offsets = [6, 0], sizes = [2, 256], strides = [1, 1]} : vector<8x256xf32> to vector<2x256xf32>
    %1079 = vector.broadcast %29 : f32 to vector<2x256xf32>
    %1080 = arith.mulf %1078, %1079 : vector<2x256xf32>
    %1081 = arith.addf %1077, %1080 : vector<2x256xf32>
    %1082 = vector.extract_strided_slice %867 {offsets = [0, 0], sizes = [2, 256], strides = [1, 1]} : vector<8x256xf32> to vector<2x256xf32>
    %1083 = vector.broadcast %33 : f32 to vector<2x256xf32>
    %1084 = arith.mulf %1082, %1083 : vector<2x256xf32>
    %1085 = arith.addf %1081, %1084 : vector<2x256xf32>
    %1086 = vector.extract_strided_slice %867 {offsets = [2, 0], sizes = [2, 256], strides = [1, 1]} : vector<8x256xf32> to vector<2x256xf32>
    %1087 = vector.broadcast %37 : f32 to vector<2x256xf32>
    %1088 = arith.mulf %1086, %1087 : vector<2x256xf32>
    %1089 = arith.addf %1085, %1088 : vector<2x256xf32>
    %1090 = vector.extract_strided_slice %867 {offsets = [4, 0], sizes = [2, 256], strides = [1, 1]} : vector<8x256xf32> to vector<2x256xf32>
    %1091 = vector.broadcast %41 : f32 to vector<2x256xf32>
    %1092 = arith.mulf %1090, %1091 : vector<2x256xf32>
    %1093 = arith.addf %1089, %1092 : vector<2x256xf32>
    %1094 = vector.extract_strided_slice %867 {offsets = [6, 0], sizes = [2, 256], strides = [1, 1]} : vector<8x256xf32> to vector<2x256xf32>
    %1095 = vector.broadcast %45 : f32 to vector<2x256xf32>
    %1096 = arith.mulf %1094, %1095 : vector<2x256xf32>
    %1097 = arith.addf %1093, %1096 : vector<2x256xf32>
    %1098 = vector.extract_strided_slice %870 {offsets = [0, 0], sizes = [2, 256], strides = [1, 1]} : vector<8x256xf32> to vector<2x256xf32>
    %1099 = vector.broadcast %49 : f32 to vector<2x256xf32>
    %1100 = arith.mulf %1098, %1099 : vector<2x256xf32>
    %1101 = arith.addf %1097, %1100 : vector<2x256xf32>
    %1102 = vector.extract_strided_slice %870 {offsets = [2, 0], sizes = [2, 256], strides = [1, 1]} : vector<8x256xf32> to vector<2x256xf32>
    %1103 = vector.broadcast %53 : f32 to vector<2x256xf32>
    %1104 = arith.mulf %1102, %1103 : vector<2x256xf32>
    %1105 = arith.addf %1101, %1104 : vector<2x256xf32>
    %1106 = vector.extract_strided_slice %870 {offsets = [4, 0], sizes = [2, 256], strides = [1, 1]} : vector<8x256xf32> to vector<2x256xf32>
    %1107 = vector.broadcast %57 : f32 to vector<2x256xf32>
    %1108 = arith.mulf %1106, %1107 : vector<2x256xf32>
    %1109 = arith.addf %1105, %1108 : vector<2x256xf32>
    %1110 = vector.extract_strided_slice %870 {offsets = [6, 0], sizes = [2, 256], strides = [1, 1]} : vector<8x256xf32> to vector<2x256xf32>
    %1111 = vector.broadcast %61 : f32 to vector<2x256xf32>
    %1112 = arith.mulf %1110, %1111 : vector<2x256xf32>
    %1113 = arith.addf %1109, %1112 : vector<2x256xf32>
    %1114 = vector.extract_strided_slice %858 {offsets = [0, 0], sizes = [2, 256], strides = [1, 1]} : vector<8x256xf32> to vector<2x256xf32>
    %1115 = vector.broadcast %65 : f32 to vector<2x256xf32>
    %1116 = arith.mulf %1114, %1115 : vector<2x256xf32>
    %1117 = arith.addf %1113, %1116 : vector<2x256xf32>
    %1118 = vector.extract_strided_slice %858 {offsets = [2, 0], sizes = [2, 256], strides = [1, 1]} : vector<8x256xf32> to vector<2x256xf32>
    %1119 = vector.broadcast %69 : f32 to vector<2x256xf32>
    %1120 = arith.mulf %1118, %1119 : vector<2x256xf32>
    %1121 = arith.addf %1117, %1120 : vector<2x256xf32>
    %1122 = vector.extract_strided_slice %858 {offsets = [4, 0], sizes = [2, 256], strides = [1, 1]} : vector<8x256xf32> to vector<2x256xf32>
    %1123 = vector.broadcast %73 : f32 to vector<2x256xf32>
    %1124 = arith.mulf %1122, %1123 : vector<2x256xf32>
    %1125 = arith.addf %1121, %1124 : vector<2x256xf32>
    %1126 = vector.extract_strided_slice %858 {offsets = [6, 0], sizes = [2, 256], strides = [1, 1]} : vector<8x256xf32> to vector<2x256xf32>
    %1127 = vector.broadcast %77 : f32 to vector<2x256xf32>
    %1128 = arith.mulf %1126, %1127 : vector<2x256xf32>
    %1129 = arith.addf %1125, %1128 : vector<2x256xf32>
    %1130 = vector.extract_strided_slice %873 {offsets = [0, 0], sizes = [2, 256], strides = [1, 1]} : vector<8x256xf32> to vector<2x256xf32>
    %1131 = vector.broadcast %81 : f32 to vector<2x256xf32>
    %1132 = arith.mulf %1130, %1131 : vector<2x256xf32>
    %1133 = arith.addf %1129, %1132 : vector<2x256xf32>
    %1134 = vector.extract_strided_slice %873 {offsets = [2, 0], sizes = [2, 256], strides = [1, 1]} : vector<8x256xf32> to vector<2x256xf32>
    %1135 = vector.broadcast %85 : f32 to vector<2x256xf32>
    %1136 = arith.mulf %1134, %1135 : vector<2x256xf32>
    %1137 = arith.addf %1133, %1136 : vector<2x256xf32>
    %1138 = vector.extract_strided_slice %873 {offsets = [4, 0], sizes = [2, 256], strides = [1, 1]} : vector<8x256xf32> to vector<2x256xf32>
    %1139 = vector.broadcast %89 : f32 to vector<2x256xf32>
    %1140 = arith.mulf %1138, %1139 : vector<2x256xf32>
    %1141 = arith.addf %1137, %1140 : vector<2x256xf32>
    %1142 = vector.extract_strided_slice %873 {offsets = [6, 0], sizes = [2, 256], strides = [1, 1]} : vector<8x256xf32> to vector<2x256xf32>
    %1143 = vector.broadcast %93 : f32 to vector<2x256xf32>
    %1144 = arith.mulf %1142, %1143 : vector<2x256xf32>
    %1145 = arith.addf %1141, %1144 : vector<2x256xf32>
    %1146 = vector.extract_strided_slice %876 {offsets = [0, 0], sizes = [2, 256], strides = [1, 1]} : vector<8x256xf32> to vector<2x256xf32>
    %1147 = vector.broadcast %97 : f32 to vector<2x256xf32>
    %1148 = arith.mulf %1146, %1147 : vector<2x256xf32>
    %1149 = arith.addf %1145, %1148 : vector<2x256xf32>
    %1150 = vector.extract_strided_slice %876 {offsets = [2, 0], sizes = [2, 256], strides = [1, 1]} : vector<8x256xf32> to vector<2x256xf32>
    %1151 = vector.broadcast %101 : f32 to vector<2x256xf32>
    %1152 = arith.mulf %1150, %1151 : vector<2x256xf32>
    %1153 = arith.addf %1149, %1152 : vector<2x256xf32>
    %1154 = vector.extract_strided_slice %876 {offsets = [4, 0], sizes = [2, 256], strides = [1, 1]} : vector<8x256xf32> to vector<2x256xf32>
    %1155 = vector.broadcast %105 : f32 to vector<2x256xf32>
    %1156 = arith.mulf %1154, %1155 : vector<2x256xf32>
    %1157 = arith.addf %1153, %1156 : vector<2x256xf32>
    %1158 = vector.extract_strided_slice %876 {offsets = [6, 0], sizes = [2, 256], strides = [1, 1]} : vector<8x256xf32> to vector<2x256xf32>
    %1159 = vector.broadcast %109 : f32 to vector<2x256xf32>
    %1160 = arith.mulf %1158, %1159 : vector<2x256xf32>
    %1161 = arith.addf %1157, %1160 : vector<2x256xf32>
    %1162 = vector.extract_strided_slice %879 {offsets = [0, 0], sizes = [2, 256], strides = [1, 1]} : vector<8x256xf32> to vector<2x256xf32>
    %1163 = vector.broadcast %113 : f32 to vector<2x256xf32>
    %1164 = arith.mulf %1162, %1163 : vector<2x256xf32>
    %1165 = arith.addf %1161, %1164 : vector<2x256xf32>
    %1166 = vector.extract_strided_slice %879 {offsets = [2, 0], sizes = [2, 256], strides = [1, 1]} : vector<8x256xf32> to vector<2x256xf32>
    %1167 = vector.broadcast %117 : f32 to vector<2x256xf32>
    %1168 = arith.mulf %1166, %1167 : vector<2x256xf32>
    %1169 = arith.addf %1165, %1168 : vector<2x256xf32>
    %1170 = vector.extract_strided_slice %879 {offsets = [4, 0], sizes = [2, 256], strides = [1, 1]} : vector<8x256xf32> to vector<2x256xf32>
    %1171 = vector.broadcast %121 : f32 to vector<2x256xf32>
    %1172 = arith.mulf %1170, %1171 : vector<2x256xf32>
    %1173 = arith.addf %1169, %1172 : vector<2x256xf32>
    %1174 = vector.extract_strided_slice %879 {offsets = [6, 0], sizes = [2, 256], strides = [1, 1]} : vector<8x256xf32> to vector<2x256xf32>
    %1175 = vector.broadcast %125 : f32 to vector<2x256xf32>
    %1176 = arith.mulf %1174, %1175 : vector<2x256xf32>
    %1177 = arith.addf %1173, %1176 : vector<2x256xf32>
    %1178 = vector.extract_strided_slice %882 {offsets = [0, 0], sizes = [2, 256], strides = [1, 1]} : vector<8x256xf32> to vector<2x256xf32>
    %1179 = vector.broadcast %129 : f32 to vector<2x256xf32>
    %1180 = arith.mulf %1178, %1179 : vector<2x256xf32>
    %1181 = arith.addf %1177, %1180 : vector<2x256xf32>
    %1182 = vector.extract_strided_slice %882 {offsets = [2, 0], sizes = [2, 256], strides = [1, 1]} : vector<8x256xf32> to vector<2x256xf32>
    %1183 = vector.broadcast %133 : f32 to vector<2x256xf32>
    %1184 = arith.mulf %1182, %1183 : vector<2x256xf32>
    %1185 = arith.addf %1181, %1184 : vector<2x256xf32>
    %1186 = vector.extract_strided_slice %882 {offsets = [4, 0], sizes = [2, 256], strides = [1, 1]} : vector<8x256xf32> to vector<2x256xf32>
    %1187 = vector.broadcast %137 : f32 to vector<2x256xf32>
    %1188 = arith.mulf %1186, %1187 : vector<2x256xf32>
    %1189 = arith.addf %1185, %1188 : vector<2x256xf32>
    %1190 = vector.extract_strided_slice %882 {offsets = [6, 0], sizes = [2, 256], strides = [1, 1]} : vector<8x256xf32> to vector<2x256xf32>
    %1191 = vector.broadcast %141 : f32 to vector<2x256xf32>
    %1192 = arith.mulf %1190, %1191 : vector<2x256xf32>
    %1193 = arith.addf %1189, %1192 : vector<2x256xf32>
    %1194 = vector.shape_cast %1193 : vector<2x256xf32> to vector<1x2x256xf32>
    %cst_75 = arith.constant dense<0.000000e+00> : vector<1xf32>
    %1195 = vector.multi_reduction <add>, %1194, %cst_75 [1, 2] : vector<1x2x256xf32> to vector<1xf32>
    %1196 = vector.shape_cast %1195 : vector<1xf32> to vector<1x1x1xf32>
    %1197 = vector.extract %1196[0, 0, 0] : f32 from vector<1x1x1xf32>
    %cst_76 = arith.constant 0.001953125 : f32
    %1198 = arith.mulf %1197, %cst_76 : f32
    %1199 = arith.mulf %1193, %1193 : vector<2x256xf32>
    %1200 = vector.shape_cast %1199 : vector<2x256xf32> to vector<1x2x256xf32>
    %cst_77 = arith.constant dense<0.000000e+00> : vector<1xf32>
    %1201 = vector.multi_reduction <add>, %1200, %cst_77 [1, 2] : vector<1x2x256xf32> to vector<1xf32>
    %1202 = vector.shape_cast %1201 : vector<1xf32> to vector<1x1x1xf32>
    %1203 = vector.extract %1202[0, 0, 0] : f32 from vector<1x1x1xf32>
    %cst_78 = arith.constant 0.001953125 : f32
    %1204 = arith.mulf %1203, %cst_78 : f32
    %1205 = arith.mulf %1198, %1198 : f32
    %1206 = arith.subf %1204, %1205 : f32
    %cst_79 = arith.constant 9.99999974E-6 : f32
    %1207 = arith.addf %1206, %cst_79 : f32
    %1208 = math.rsqrt %1207 : f32
    %1209 = arith.mulf %145, %1208 : f32
    %1210 = arith.mulf %1198, %1209 : f32
    %1211 = arith.subf %149, %1210 : f32
    %1212 = vector.broadcast %1209 : f32 to vector<2x256xf32>
    %1213 = arith.mulf %1193, %1212 : vector<2x256xf32>
    %1214 = vector.broadcast %1211 : f32 to vector<2x256xf32>
    %1215 = arith.addf %1213, %1214 : vector<2x256xf32>
    %cst_80 = arith.constant 0.000000e+00 : f32
    %1216 = vector.broadcast %cst_80 : f32 to vector<2x256xf32>
    %1217 = arith.maximumf %1215, %1216 : vector<2x256xf32>
    %c2_81 = arith.constant 2 : index
    %c0_82 = arith.constant 0 : index
    %1218 = vector.load %arg5[%c2_81, %c0_82] : memref<8x256xf32, #tpu.memory_space<vmem>>, vector<2x256xf32>
    tpu.vector_store %arg5[%c2_81, %c0_82], %1217 {strides = array<i32>} : memref<8x256xf32, #tpu.memory_space<vmem>>, vector<2x256xf32>,
    %1219 = vector.extract_strided_slice %861 {offsets = [0, 0], sizes = [2, 256], strides = [1, 1]} : vector<8x256xf32> to vector<2x256xf32>
    %1220 = vector.broadcast %2 : f32 to vector<2x256xf32>
    %1221 = arith.mulf %1219, %1220 : vector<2x256xf32>
    %1222 = vector.extract_strided_slice %861 {offsets = [2, 0], sizes = [2, 256], strides = [1, 1]} : vector<8x256xf32> to vector<2x256xf32>
    %1223 = vector.broadcast %6 : f32 to vector<2x256xf32>
    %1224 = arith.mulf %1222, %1223 : vector<2x256xf32>
    %1225 = arith.addf %1221, %1224 : vector<2x256xf32>
    %1226 = vector.extract_strided_slice %861 {offsets = [4, 0], sizes = [2, 256], strides = [1, 1]} : vector<8x256xf32> to vector<2x256xf32>
    %1227 = vector.broadcast %10 : f32 to vector<2x256xf32>
    %1228 = arith.mulf %1226, %1227 : vector<2x256xf32>
    %1229 = arith.addf %1225, %1228 : vector<2x256xf32>
    %1230 = vector.extract_strided_slice %861 {offsets = [6, 0], sizes = [2, 256], strides = [1, 1]} : vector<8x256xf32> to vector<2x256xf32>
    %1231 = vector.broadcast %14 : f32 to vector<2x256xf32>
    %1232 = arith.mulf %1230, %1231 : vector<2x256xf32>
    %1233 = arith.addf %1229, %1232 : vector<2x256xf32>
    %1234 = vector.extract_strided_slice %864 {offsets = [0, 0], sizes = [2, 256], strides = [1, 1]} : vector<8x256xf32> to vector<2x256xf32>
    %1235 = vector.broadcast %18 : f32 to vector<2x256xf32>
    %1236 = arith.mulf %1234, %1235 : vector<2x256xf32>
    %1237 = arith.addf %1233, %1236 : vector<2x256xf32>
    %1238 = vector.extract_strided_slice %864 {offsets = [2, 0], sizes = [2, 256], strides = [1, 1]} : vector<8x256xf32> to vector<2x256xf32>
    %1239 = vector.broadcast %22 : f32 to vector<2x256xf32>
    %1240 = arith.mulf %1238, %1239 : vector<2x256xf32>
    %1241 = arith.addf %1237, %1240 : vector<2x256xf32>
    %1242 = vector.extract_strided_slice %864 {offsets = [4, 0], sizes = [2, 256], strides = [1, 1]} : vector<8x256xf32> to vector<2x256xf32>
    %1243 = vector.broadcast %26 : f32 to vector<2x256xf32>
    %1244 = arith.mulf %1242, %1243 : vector<2x256xf32>
    %1245 = arith.addf %1241, %1244 : vector<2x256xf32>
    %1246 = vector.extract_strided_slice %864 {offsets = [6, 0], sizes = [2, 256], strides = [1, 1]} : vector<8x256xf32> to vector<2x256xf32>
    %1247 = vector.broadcast %30 : f32 to vector<2x256xf32>
    %1248 = arith.mulf %1246, %1247 : vector<2x256xf32>
    %1249 = arith.addf %1245, %1248 : vector<2x256xf32>
    %1250 = vector.extract_strided_slice %867 {offsets = [0, 0], sizes = [2, 256], strides = [1, 1]} : vector<8x256xf32> to vector<2x256xf32>
    %1251 = vector.broadcast %34 : f32 to vector<2x256xf32>
    %1252 = arith.mulf %1250, %1251 : vector<2x256xf32>
    %1253 = arith.addf %1249, %1252 : vector<2x256xf32>
    %1254 = vector.extract_strided_slice %867 {offsets = [2, 0], sizes = [2, 256], strides = [1, 1]} : vector<8x256xf32> to vector<2x256xf32>
    %1255 = vector.broadcast %38 : f32 to vector<2x256xf32>
    %1256 = arith.mulf %1254, %1255 : vector<2x256xf32>
    %1257 = arith.addf %1253, %1256 : vector<2x256xf32>
    %1258 = vector.extract_strided_slice %867 {offsets = [4, 0], sizes = [2, 256], strides = [1, 1]} : vector<8x256xf32> to vector<2x256xf32>
    %1259 = vector.broadcast %42 : f32 to vector<2x256xf32>
    %1260 = arith.mulf %1258, %1259 : vector<2x256xf32>
    %1261 = arith.addf %1257, %1260 : vector<2x256xf32>
    %1262 = vector.extract_strided_slice %867 {offsets = [6, 0], sizes = [2, 256], strides = [1, 1]} : vector<8x256xf32> to vector<2x256xf32>
    %1263 = vector.broadcast %46 : f32 to vector<2x256xf32>
    %1264 = arith.mulf %1262, %1263 : vector<2x256xf32>
    %1265 = arith.addf %1261, %1264 : vector<2x256xf32>
    %1266 = vector.extract_strided_slice %870 {offsets = [0, 0], sizes = [2, 256], strides = [1, 1]} : vector<8x256xf32> to vector<2x256xf32>
    %1267 = vector.broadcast %50 : f32 to vector<2x256xf32>
    %1268 = arith.mulf %1266, %1267 : vector<2x256xf32>
    %1269 = arith.addf %1265, %1268 : vector<2x256xf32>
    %1270 = vector.extract_strided_slice %870 {offsets = [2, 0], sizes = [2, 256], strides = [1, 1]} : vector<8x256xf32> to vector<2x256xf32>
    %1271 = vector.broadcast %54 : f32 to vector<2x256xf32>
    %1272 = arith.mulf %1270, %1271 : vector<2x256xf32>
    %1273 = arith.addf %1269, %1272 : vector<2x256xf32>
    %1274 = vector.extract_strided_slice %870 {offsets = [4, 0], sizes = [2, 256], strides = [1, 1]} : vector<8x256xf32> to vector<2x256xf32>
    %1275 = vector.broadcast %58 : f32 to vector<2x256xf32>
    %1276 = arith.mulf %1274, %1275 : vector<2x256xf32>
    %1277 = arith.addf %1273, %1276 : vector<2x256xf32>
    %1278 = vector.extract_strided_slice %870 {offsets = [6, 0], sizes = [2, 256], strides = [1, 1]} : vector<8x256xf32> to vector<2x256xf32>
    %1279 = vector.broadcast %62 : f32 to vector<2x256xf32>
    %1280 = arith.mulf %1278, %1279 : vector<2x256xf32>
    %1281 = arith.addf %1277, %1280 : vector<2x256xf32>
    %1282 = vector.extract_strided_slice %858 {offsets = [0, 0], sizes = [2, 256], strides = [1, 1]} : vector<8x256xf32> to vector<2x256xf32>
    %1283 = vector.broadcast %66 : f32 to vector<2x256xf32>
    %1284 = arith.mulf %1282, %1283 : vector<2x256xf32>
    %1285 = arith.addf %1281, %1284 : vector<2x256xf32>
    %1286 = vector.extract_strided_slice %858 {offsets = [2, 0], sizes = [2, 256], strides = [1, 1]} : vector<8x256xf32> to vector<2x256xf32>
    %1287 = vector.broadcast %70 : f32 to vector<2x256xf32>
    %1288 = arith.mulf %1286, %1287 : vector<2x256xf32>
    %1289 = arith.addf %1285, %1288 : vector<2x256xf32>
    %1290 = vector.extract_strided_slice %858 {offsets = [4, 0], sizes = [2, 256], strides = [1, 1]} : vector<8x256xf32> to vector<2x256xf32>
    %1291 = vector.broadcast %74 : f32 to vector<2x256xf32>
    %1292 = arith.mulf %1290, %1291 : vector<2x256xf32>
    %1293 = arith.addf %1289, %1292 : vector<2x256xf32>
    %1294 = vector.extract_strided_slice %858 {offsets = [6, 0], sizes = [2, 256], strides = [1, 1]} : vector<8x256xf32> to vector<2x256xf32>
    %1295 = vector.broadcast %78 : f32 to vector<2x256xf32>
    %1296 = arith.mulf %1294, %1295 : vector<2x256xf32>
    %1297 = arith.addf %1293, %1296 : vector<2x256xf32>
    %1298 = vector.extract_strided_slice %873 {offsets = [0, 0], sizes = [2, 256], strides = [1, 1]} : vector<8x256xf32> to vector<2x256xf32>
    %1299 = vector.broadcast %82 : f32 to vector<2x256xf32>
    %1300 = arith.mulf %1298, %1299 : vector<2x256xf32>
    %1301 = arith.addf %1297, %1300 : vector<2x256xf32>
    %1302 = vector.extract_strided_slice %873 {offsets = [2, 0], sizes = [2, 256], strides = [1, 1]} : vector<8x256xf32> to vector<2x256xf32>
    %1303 = vector.broadcast %86 : f32 to vector<2x256xf32>
    %1304 = arith.mulf %1302, %1303 : vector<2x256xf32>
    %1305 = arith.addf %1301, %1304 : vector<2x256xf32>
    %1306 = vector.extract_strided_slice %873 {offsets = [4, 0], sizes = [2, 256], strides = [1, 1]} : vector<8x256xf32> to vector<2x256xf32>
    %1307 = vector.broadcast %90 : f32 to vector<2x256xf32>
    %1308 = arith.mulf %1306, %1307 : vector<2x256xf32>
    %1309 = arith.addf %1305, %1308 : vector<2x256xf32>
    %1310 = vector.extract_strided_slice %873 {offsets = [6, 0], sizes = [2, 256], strides = [1, 1]} : vector<8x256xf32> to vector<2x256xf32>
    %1311 = vector.broadcast %94 : f32 to vector<2x256xf32>
    %1312 = arith.mulf %1310, %1311 : vector<2x256xf32>
    %1313 = arith.addf %1309, %1312 : vector<2x256xf32>
    %1314 = vector.extract_strided_slice %876 {offsets = [0, 0], sizes = [2, 256], strides = [1, 1]} : vector<8x256xf32> to vector<2x256xf32>
    %1315 = vector.broadcast %98 : f32 to vector<2x256xf32>
    %1316 = arith.mulf %1314, %1315 : vector<2x256xf32>
    %1317 = arith.addf %1313, %1316 : vector<2x256xf32>
    %1318 = vector.extract_strided_slice %876 {offsets = [2, 0], sizes = [2, 256], strides = [1, 1]} : vector<8x256xf32> to vector<2x256xf32>
    %1319 = vector.broadcast %102 : f32 to vector<2x256xf32>
    %1320 = arith.mulf %1318, %1319 : vector<2x256xf32>
    %1321 = arith.addf %1317, %1320 : vector<2x256xf32>
    %1322 = vector.extract_strided_slice %876 {offsets = [4, 0], sizes = [2, 256], strides = [1, 1]} : vector<8x256xf32> to vector<2x256xf32>
    %1323 = vector.broadcast %106 : f32 to vector<2x256xf32>
    %1324 = arith.mulf %1322, %1323 : vector<2x256xf32>
    %1325 = arith.addf %1321, %1324 : vector<2x256xf32>
    %1326 = vector.extract_strided_slice %876 {offsets = [6, 0], sizes = [2, 256], strides = [1, 1]} : vector<8x256xf32> to vector<2x256xf32>
    %1327 = vector.broadcast %110 : f32 to vector<2x256xf32>
    %1328 = arith.mulf %1326, %1327 : vector<2x256xf32>
    %1329 = arith.addf %1325, %1328 : vector<2x256xf32>
    %1330 = vector.extract_strided_slice %879 {offsets = [0, 0], sizes = [2, 256], strides = [1, 1]} : vector<8x256xf32> to vector<2x256xf32>
    %1331 = vector.broadcast %114 : f32 to vector<2x256xf32>
    %1332 = arith.mulf %1330, %1331 : vector<2x256xf32>
    %1333 = arith.addf %1329, %1332 : vector<2x256xf32>
    %1334 = vector.extract_strided_slice %879 {offsets = [2, 0], sizes = [2, 256], strides = [1, 1]} : vector<8x256xf32> to vector<2x256xf32>
    %1335 = vector.broadcast %118 : f32 to vector<2x256xf32>
    %1336 = arith.mulf %1334, %1335 : vector<2x256xf32>
    %1337 = arith.addf %1333, %1336 : vector<2x256xf32>
    %1338 = vector.extract_strided_slice %879 {offsets = [4, 0], sizes = [2, 256], strides = [1, 1]} : vector<8x256xf32> to vector<2x256xf32>
    %1339 = vector.broadcast %122 : f32 to vector<2x256xf32>
    %1340 = arith.mulf %1338, %1339 : vector<2x256xf32>
    %1341 = arith.addf %1337, %1340 : vector<2x256xf32>
    %1342 = vector.extract_strided_slice %879 {offsets = [6, 0], sizes = [2, 256], strides = [1, 1]} : vector<8x256xf32> to vector<2x256xf32>
    %1343 = vector.broadcast %126 : f32 to vector<2x256xf32>
    %1344 = arith.mulf %1342, %1343 : vector<2x256xf32>
    %1345 = arith.addf %1341, %1344 : vector<2x256xf32>
    %1346 = vector.extract_strided_slice %882 {offsets = [0, 0], sizes = [2, 256], strides = [1, 1]} : vector<8x256xf32> to vector<2x256xf32>
    %1347 = vector.broadcast %130 : f32 to vector<2x256xf32>
    %1348 = arith.mulf %1346, %1347 : vector<2x256xf32>
    %1349 = arith.addf %1345, %1348 : vector<2x256xf32>
    %1350 = vector.extract_strided_slice %882 {offsets = [2, 0], sizes = [2, 256], strides = [1, 1]} : vector<8x256xf32> to vector<2x256xf32>
    %1351 = vector.broadcast %134 : f32 to vector<2x256xf32>
    %1352 = arith.mulf %1350, %1351 : vector<2x256xf32>
    %1353 = arith.addf %1349, %1352 : vector<2x256xf32>
    %1354 = vector.extract_strided_slice %882 {offsets = [4, 0], sizes = [2, 256], strides = [1, 1]} : vector<8x256xf32> to vector<2x256xf32>
    %1355 = vector.broadcast %138 : f32 to vector<2x256xf32>
    %1356 = arith.mulf %1354, %1355 : vector<2x256xf32>
    %1357 = arith.addf %1353, %1356 : vector<2x256xf32>
    %1358 = vector.extract_strided_slice %882 {offsets = [6, 0], sizes = [2, 256], strides = [1, 1]} : vector<8x256xf32> to vector<2x256xf32>
    %1359 = vector.broadcast %142 : f32 to vector<2x256xf32>
    %1360 = arith.mulf %1358, %1359 : vector<2x256xf32>
    %1361 = arith.addf %1357, %1360 : vector<2x256xf32>
    %1362 = vector.shape_cast %1361 : vector<2x256xf32> to vector<1x2x256xf32>
    %cst_83 = arith.constant dense<0.000000e+00> : vector<1xf32>
    %1363 = vector.multi_reduction <add>, %1362, %cst_83 [1, 2] : vector<1x2x256xf32> to vector<1xf32>
    %1364 = vector.shape_cast %1363 : vector<1xf32> to vector<1x1x1xf32>
    %1365 = vector.extract %1364[0, 0, 0] : f32 from vector<1x1x1xf32>
    %cst_84 = arith.constant 0.001953125 : f32
    %1366 = arith.mulf %1365, %cst_84 : f32
    %1367 = arith.mulf %1361, %1361 : vector<2x256xf32>
    %1368 = vector.shape_cast %1367 : vector<2x256xf32> to vector<1x2x256xf32>
    %cst_85 = arith.constant dense<0.000000e+00> : vector<1xf32>
    %1369 = vector.multi_reduction <add>, %1368, %cst_85 [1, 2] : vector<1x2x256xf32> to vector<1xf32>
    %1370 = vector.shape_cast %1369 : vector<1xf32> to vector<1x1x1xf32>
    %1371 = vector.extract %1370[0, 0, 0] : f32 from vector<1x1x1xf32>
    %cst_86 = arith.constant 0.001953125 : f32
    %1372 = arith.mulf %1371, %cst_86 : f32
    %1373 = arith.mulf %1366, %1366 : f32
    %1374 = arith.subf %1372, %1373 : f32
    %cst_87 = arith.constant 9.99999974E-6 : f32
    %1375 = arith.addf %1374, %cst_87 : f32
    %1376 = math.rsqrt %1375 : f32
    %1377 = arith.mulf %146, %1376 : f32
    %1378 = arith.mulf %1366, %1377 : f32
    %1379 = arith.subf %150, %1378 : f32
    %1380 = vector.broadcast %1377 : f32 to vector<2x256xf32>
    %1381 = arith.mulf %1361, %1380 : vector<2x256xf32>
    %1382 = vector.broadcast %1379 : f32 to vector<2x256xf32>
    %1383 = arith.addf %1381, %1382 : vector<2x256xf32>
    %cst_88 = arith.constant 0.000000e+00 : f32
    %1384 = vector.broadcast %cst_88 : f32 to vector<2x256xf32>
    %1385 = arith.maximumf %1383, %1384 : vector<2x256xf32>
    %c4_89 = arith.constant 4 : index
    %c0_90 = arith.constant 0 : index
    %1386 = vector.load %arg5[%c4_89, %c0_90] : memref<8x256xf32, #tpu.memory_space<vmem>>, vector<2x256xf32>
    tpu.vector_store %arg5[%c4_89, %c0_90], %1385 {strides = array<i32>} : memref<8x256xf32, #tpu.memory_space<vmem>>, vector<2x256xf32>,
    %1387 = vector.extract_strided_slice %861 {offsets = [0, 0], sizes = [2, 256], strides = [1, 1]} : vector<8x256xf32> to vector<2x256xf32>
    %1388 = vector.broadcast %3 : f32 to vector<2x256xf32>
    %1389 = arith.mulf %1387, %1388 : vector<2x256xf32>
    %1390 = vector.extract_strided_slice %861 {offsets = [2, 0], sizes = [2, 256], strides = [1, 1]} : vector<8x256xf32> to vector<2x256xf32>
    %1391 = vector.broadcast %7 : f32 to vector<2x256xf32>
    %1392 = arith.mulf %1390, %1391 : vector<2x256xf32>
    %1393 = arith.addf %1389, %1392 : vector<2x256xf32>
    %1394 = vector.extract_strided_slice %861 {offsets = [4, 0], sizes = [2, 256], strides = [1, 1]} : vector<8x256xf32> to vector<2x256xf32>
    %1395 = vector.broadcast %11 : f32 to vector<2x256xf32>
    %1396 = arith.mulf %1394, %1395 : vector<2x256xf32>
    %1397 = arith.addf %1393, %1396 : vector<2x256xf32>
    %1398 = vector.extract_strided_slice %861 {offsets = [6, 0], sizes = [2, 256], strides = [1, 1]} : vector<8x256xf32> to vector<2x256xf32>
    %1399 = vector.broadcast %15 : f32 to vector<2x256xf32>
    %1400 = arith.mulf %1398, %1399 : vector<2x256xf32>
    %1401 = arith.addf %1397, %1400 : vector<2x256xf32>
    %1402 = vector.extract_strided_slice %864 {offsets = [0, 0], sizes = [2, 256], strides = [1, 1]} : vector<8x256xf32> to vector<2x256xf32>
    %1403 = vector.broadcast %19 : f32 to vector<2x256xf32>
    %1404 = arith.mulf %1402, %1403 : vector<2x256xf32>
    %1405 = arith.addf %1401, %1404 : vector<2x256xf32>
    %1406 = vector.extract_strided_slice %864 {offsets = [2, 0], sizes = [2, 256], strides = [1, 1]} : vector<8x256xf32> to vector<2x256xf32>
    %1407 = vector.broadcast %23 : f32 to vector<2x256xf32>
    %1408 = arith.mulf %1406, %1407 : vector<2x256xf32>
    %1409 = arith.addf %1405, %1408 : vector<2x256xf32>
    %1410 = vector.extract_strided_slice %864 {offsets = [4, 0], sizes = [2, 256], strides = [1, 1]} : vector<8x256xf32> to vector<2x256xf32>
    %1411 = vector.broadcast %27 : f32 to vector<2x256xf32>
    %1412 = arith.mulf %1410, %1411 : vector<2x256xf32>
    %1413 = arith.addf %1409, %1412 : vector<2x256xf32>
    %1414 = vector.extract_strided_slice %864 {offsets = [6, 0], sizes = [2, 256], strides = [1, 1]} : vector<8x256xf32> to vector<2x256xf32>
    %1415 = vector.broadcast %31 : f32 to vector<2x256xf32>
    %1416 = arith.mulf %1414, %1415 : vector<2x256xf32>
    %1417 = arith.addf %1413, %1416 : vector<2x256xf32>
    %1418 = vector.extract_strided_slice %867 {offsets = [0, 0], sizes = [2, 256], strides = [1, 1]} : vector<8x256xf32> to vector<2x256xf32>
    %1419 = vector.broadcast %35 : f32 to vector<2x256xf32>
    %1420 = arith.mulf %1418, %1419 : vector<2x256xf32>
    %1421 = arith.addf %1417, %1420 : vector<2x256xf32>
    %1422 = vector.extract_strided_slice %867 {offsets = [2, 0], sizes = [2, 256], strides = [1, 1]} : vector<8x256xf32> to vector<2x256xf32>
    %1423 = vector.broadcast %39 : f32 to vector<2x256xf32>
    %1424 = arith.mulf %1422, %1423 : vector<2x256xf32>
    %1425 = arith.addf %1421, %1424 : vector<2x256xf32>
    %1426 = vector.extract_strided_slice %867 {offsets = [4, 0], sizes = [2, 256], strides = [1, 1]} : vector<8x256xf32> to vector<2x256xf32>
    %1427 = vector.broadcast %43 : f32 to vector<2x256xf32>
    %1428 = arith.mulf %1426, %1427 : vector<2x256xf32>
    %1429 = arith.addf %1425, %1428 : vector<2x256xf32>
    %1430 = vector.extract_strided_slice %867 {offsets = [6, 0], sizes = [2, 256], strides = [1, 1]} : vector<8x256xf32> to vector<2x256xf32>
    %1431 = vector.broadcast %47 : f32 to vector<2x256xf32>
    %1432 = arith.mulf %1430, %1431 : vector<2x256xf32>
    %1433 = arith.addf %1429, %1432 : vector<2x256xf32>
    %1434 = vector.extract_strided_slice %870 {offsets = [0, 0], sizes = [2, 256], strides = [1, 1]} : vector<8x256xf32> to vector<2x256xf32>
    %1435 = vector.broadcast %51 : f32 to vector<2x256xf32>
    %1436 = arith.mulf %1434, %1435 : vector<2x256xf32>
    %1437 = arith.addf %1433, %1436 : vector<2x256xf32>
    %1438 = vector.extract_strided_slice %870 {offsets = [2, 0], sizes = [2, 256], strides = [1, 1]} : vector<8x256xf32> to vector<2x256xf32>
    %1439 = vector.broadcast %55 : f32 to vector<2x256xf32>
    %1440 = arith.mulf %1438, %1439 : vector<2x256xf32>
    %1441 = arith.addf %1437, %1440 : vector<2x256xf32>
    %1442 = vector.extract_strided_slice %870 {offsets = [4, 0], sizes = [2, 256], strides = [1, 1]} : vector<8x256xf32> to vector<2x256xf32>
    %1443 = vector.broadcast %59 : f32 to vector<2x256xf32>
    %1444 = arith.mulf %1442, %1443 : vector<2x256xf32>
    %1445 = arith.addf %1441, %1444 : vector<2x256xf32>
    %1446 = vector.extract_strided_slice %870 {offsets = [6, 0], sizes = [2, 256], strides = [1, 1]} : vector<8x256xf32> to vector<2x256xf32>
    %1447 = vector.broadcast %63 : f32 to vector<2x256xf32>
    %1448 = arith.mulf %1446, %1447 : vector<2x256xf32>
    %1449 = arith.addf %1445, %1448 : vector<2x256xf32>
    %1450 = vector.extract_strided_slice %858 {offsets = [0, 0], sizes = [2, 256], strides = [1, 1]} : vector<8x256xf32> to vector<2x256xf32>
    %1451 = vector.broadcast %67 : f32 to vector<2x256xf32>
    %1452 = arith.mulf %1450, %1451 : vector<2x256xf32>
    %1453 = arith.addf %1449, %1452 : vector<2x256xf32>
    %1454 = vector.extract_strided_slice %858 {offsets = [2, 0], sizes = [2, 256], strides = [1, 1]} : vector<8x256xf32> to vector<2x256xf32>
    %1455 = vector.broadcast %71 : f32 to vector<2x256xf32>
    %1456 = arith.mulf %1454, %1455 : vector<2x256xf32>
    %1457 = arith.addf %1453, %1456 : vector<2x256xf32>
    %1458 = vector.extract_strided_slice %858 {offsets = [4, 0], sizes = [2, 256], strides = [1, 1]} : vector<8x256xf32> to vector<2x256xf32>
    %1459 = vector.broadcast %75 : f32 to vector<2x256xf32>
    %1460 = arith.mulf %1458, %1459 : vector<2x256xf32>
    %1461 = arith.addf %1457, %1460 : vector<2x256xf32>
    %1462 = vector.extract_strided_slice %858 {offsets = [6, 0], sizes = [2, 256], strides = [1, 1]} : vector<8x256xf32> to vector<2x256xf32>
    %1463 = vector.broadcast %79 : f32 to vector<2x256xf32>
    %1464 = arith.mulf %1462, %1463 : vector<2x256xf32>
    %1465 = arith.addf %1461, %1464 : vector<2x256xf32>
    %1466 = vector.extract_strided_slice %873 {offsets = [0, 0], sizes = [2, 256], strides = [1, 1]} : vector<8x256xf32> to vector<2x256xf32>
    %1467 = vector.broadcast %83 : f32 to vector<2x256xf32>
    %1468 = arith.mulf %1466, %1467 : vector<2x256xf32>
    %1469 = arith.addf %1465, %1468 : vector<2x256xf32>
    %1470 = vector.extract_strided_slice %873 {offsets = [2, 0], sizes = [2, 256], strides = [1, 1]} : vector<8x256xf32> to vector<2x256xf32>
    %1471 = vector.broadcast %87 : f32 to vector<2x256xf32>
    %1472 = arith.mulf %1470, %1471 : vector<2x256xf32>
    %1473 = arith.addf %1469, %1472 : vector<2x256xf32>
    %1474 = vector.extract_strided_slice %873 {offsets = [4, 0], sizes = [2, 256], strides = [1, 1]} : vector<8x256xf32> to vector<2x256xf32>
    %1475 = vector.broadcast %91 : f32 to vector<2x256xf32>
    %1476 = arith.mulf %1474, %1475 : vector<2x256xf32>
    %1477 = arith.addf %1473, %1476 : vector<2x256xf32>
    %1478 = vector.extract_strided_slice %873 {offsets = [6, 0], sizes = [2, 256], strides = [1, 1]} : vector<8x256xf32> to vector<2x256xf32>
    %1479 = vector.broadcast %95 : f32 to vector<2x256xf32>
    %1480 = arith.mulf %1478, %1479 : vector<2x256xf32>
    %1481 = arith.addf %1477, %1480 : vector<2x256xf32>
    %1482 = vector.extract_strided_slice %876 {offsets = [0, 0], sizes = [2, 256], strides = [1, 1]} : vector<8x256xf32> to vector<2x256xf32>
    %1483 = vector.broadcast %99 : f32 to vector<2x256xf32>
    %1484 = arith.mulf %1482, %1483 : vector<2x256xf32>
    %1485 = arith.addf %1481, %1484 : vector<2x256xf32>
    %1486 = vector.extract_strided_slice %876 {offsets = [2, 0], sizes = [2, 256], strides = [1, 1]} : vector<8x256xf32> to vector<2x256xf32>
    %1487 = vector.broadcast %103 : f32 to vector<2x256xf32>
    %1488 = arith.mulf %1486, %1487 : vector<2x256xf32>
    %1489 = arith.addf %1485, %1488 : vector<2x256xf32>
    %1490 = vector.extract_strided_slice %876 {offsets = [4, 0], sizes = [2, 256], strides = [1, 1]} : vector<8x256xf32> to vector<2x256xf32>
    %1491 = vector.broadcast %107 : f32 to vector<2x256xf32>
    %1492 = arith.mulf %1490, %1491 : vector<2x256xf32>
    %1493 = arith.addf %1489, %1492 : vector<2x256xf32>
    %1494 = vector.extract_strided_slice %876 {offsets = [6, 0], sizes = [2, 256], strides = [1, 1]} : vector<8x256xf32> to vector<2x256xf32>
    %1495 = vector.broadcast %111 : f32 to vector<2x256xf32>
    %1496 = arith.mulf %1494, %1495 : vector<2x256xf32>
    %1497 = arith.addf %1493, %1496 : vector<2x256xf32>
    %1498 = vector.extract_strided_slice %879 {offsets = [0, 0], sizes = [2, 256], strides = [1, 1]} : vector<8x256xf32> to vector<2x256xf32>
    %1499 = vector.broadcast %115 : f32 to vector<2x256xf32>
    %1500 = arith.mulf %1498, %1499 : vector<2x256xf32>
    %1501 = arith.addf %1497, %1500 : vector<2x256xf32>
    %1502 = vector.extract_strided_slice %879 {offsets = [2, 0], sizes = [2, 256], strides = [1, 1]} : vector<8x256xf32> to vector<2x256xf32>
    %1503 = vector.broadcast %119 : f32 to vector<2x256xf32>
    %1504 = arith.mulf %1502, %1503 : vector<2x256xf32>
    %1505 = arith.addf %1501, %1504 : vector<2x256xf32>
    %1506 = vector.extract_strided_slice %879 {offsets = [4, 0], sizes = [2, 256], strides = [1, 1]} : vector<8x256xf32> to vector<2x256xf32>
    %1507 = vector.broadcast %123 : f32 to vector<2x256xf32>
    %1508 = arith.mulf %1506, %1507 : vector<2x256xf32>
    %1509 = arith.addf %1505, %1508 : vector<2x256xf32>
    %1510 = vector.extract_strided_slice %879 {offsets = [6, 0], sizes = [2, 256], strides = [1, 1]} : vector<8x256xf32> to vector<2x256xf32>
    %1511 = vector.broadcast %127 : f32 to vector<2x256xf32>
    %1512 = arith.mulf %1510, %1511 : vector<2x256xf32>
    %1513 = arith.addf %1509, %1512 : vector<2x256xf32>
    %1514 = vector.extract_strided_slice %882 {offsets = [0, 0], sizes = [2, 256], strides = [1, 1]} : vector<8x256xf32> to vector<2x256xf32>
    %1515 = vector.broadcast %131 : f32 to vector<2x256xf32>
    %1516 = arith.mulf %1514, %1515 : vector<2x256xf32>
    %1517 = arith.addf %1513, %1516 : vector<2x256xf32>
    %1518 = vector.extract_strided_slice %882 {offsets = [2, 0], sizes = [2, 256], strides = [1, 1]} : vector<8x256xf32> to vector<2x256xf32>
    %1519 = vector.broadcast %135 : f32 to vector<2x256xf32>
    %1520 = arith.mulf %1518, %1519 : vector<2x256xf32>
    %1521 = arith.addf %1517, %1520 : vector<2x256xf32>
    %1522 = vector.extract_strided_slice %882 {offsets = [4, 0], sizes = [2, 256], strides = [1, 1]} : vector<8x256xf32> to vector<2x256xf32>
    %1523 = vector.broadcast %139 : f32 to vector<2x256xf32>
    %1524 = arith.mulf %1522, %1523 : vector<2x256xf32>
    %1525 = arith.addf %1521, %1524 : vector<2x256xf32>
    %1526 = vector.extract_strided_slice %882 {offsets = [6, 0], sizes = [2, 256], strides = [1, 1]} : vector<8x256xf32> to vector<2x256xf32>
    %1527 = vector.broadcast %143 : f32 to vector<2x256xf32>
    %1528 = arith.mulf %1526, %1527 : vector<2x256xf32>
    %1529 = arith.addf %1525, %1528 : vector<2x256xf32>
    %1530 = vector.shape_cast %1529 : vector<2x256xf32> to vector<1x2x256xf32>
    %cst_91 = arith.constant dense<0.000000e+00> : vector<1xf32>
    %1531 = vector.multi_reduction <add>, %1530, %cst_91 [1, 2] : vector<1x2x256xf32> to vector<1xf32>
    %1532 = vector.shape_cast %1531 : vector<1xf32> to vector<1x1x1xf32>
    %1533 = vector.extract %1532[0, 0, 0] : f32 from vector<1x1x1xf32>
    %cst_92 = arith.constant 0.001953125 : f32
    %1534 = arith.mulf %1533, %cst_92 : f32
    %1535 = arith.mulf %1529, %1529 : vector<2x256xf32>
    %1536 = vector.shape_cast %1535 : vector<2x256xf32> to vector<1x2x256xf32>
    %cst_93 = arith.constant dense<0.000000e+00> : vector<1xf32>
    %1537 = vector.multi_reduction <add>, %1536, %cst_93 [1, 2] : vector<1x2x256xf32> to vector<1xf32>
    %1538 = vector.shape_cast %1537 : vector<1xf32> to vector<1x1x1xf32>
    %1539 = vector.extract %1538[0, 0, 0] : f32 from vector<1x1x1xf32>
    %cst_94 = arith.constant 0.001953125 : f32
    %1540 = arith.mulf %1539, %cst_94 : f32
    %1541 = arith.mulf %1534, %1534 : f32
    %1542 = arith.subf %1540, %1541 : f32
    %cst_95 = arith.constant 9.99999974E-6 : f32
    %1543 = arith.addf %1542, %cst_95 : f32
    %1544 = math.rsqrt %1543 : f32
    %1545 = arith.mulf %147, %1544 : f32
    %1546 = arith.mulf %1534, %1545 : f32
    %1547 = arith.subf %151, %1546 : f32
    %1548 = vector.broadcast %1545 : f32 to vector<2x256xf32>
    %1549 = arith.mulf %1529, %1548 : vector<2x256xf32>
    %1550 = vector.broadcast %1547 : f32 to vector<2x256xf32>
    %1551 = arith.addf %1549, %1550 : vector<2x256xf32>
    %cst_96 = arith.constant 0.000000e+00 : f32
    %1552 = vector.broadcast %cst_96 : f32 to vector<2x256xf32>
    %1553 = arith.maximumf %1551, %1552 : vector<2x256xf32>
    %c6_97 = arith.constant 6 : index
    %c0_98 = arith.constant 0 : index
    %1554 = vector.load %arg5[%c6_97, %c0_98] : memref<8x256xf32, #tpu.memory_space<vmem>>, vector<2x256xf32>
    tpu.vector_store %arg5[%c6_97, %c0_98], %1553 {strides = array<i32>} : memref<8x256xf32, #tpu.memory_space<vmem>>, vector<2x256xf32>,
    %c0_99 = arith.constant 0 : index
    %c0_100 = arith.constant 0 : index
    %1555 = vector.load %arg5[%c0_99, %c0_100] : memref<8x256xf32, #tpu.memory_space<vmem>>, vector<8x256xf32>
    %1556 = arith.addf %160, %1555 : vector<8x256xf32>
    %c17_i32_101 = arith.constant 17 : i32
    %1557 = tpu.dynamic_rotate %1556 by %c17_i32_101 dim 1 : vector<8x256xf32>, i32 -> vector<8x256xf32>
    %1558 = vector.broadcast %152 : vector<1x256xf32> to vector<8x256xf32>
    %1559 = arith.mulf %1557, %1558 : vector<8x256xf32>
    %c16_i32_102 = arith.constant 16 : i32
    %1560 = tpu.dynamic_rotate %1556 by %c16_i32_102 dim 1 : vector<8x256xf32>, i32 -> vector<8x256xf32>
    %1561 = vector.broadcast %153 : vector<1x256xf32> to vector<8x256xf32>
    %1562 = arith.mulf %1560, %1561 : vector<8x256xf32>
    %c15_i32_103 = arith.constant 15 : i32
    %1563 = tpu.dynamic_rotate %1556 by %c15_i32_103 dim 1 : vector<8x256xf32>, i32 -> vector<8x256xf32>
    %1564 = vector.broadcast %154 : vector<1x256xf32> to vector<8x256xf32>
    %1565 = arith.mulf %1563, %1564 : vector<8x256xf32>
    %c1_i32_104 = arith.constant 1 : i32
    %1566 = tpu.dynamic_rotate %1556 by %c1_i32_104 dim 1 : vector<8x256xf32>, i32 -> vector<8x256xf32>
    %1567 = vector.broadcast %155 : vector<1x256xf32> to vector<8x256xf32>
    %1568 = arith.mulf %1566, %1567 : vector<8x256xf32>
    %c255_i32_105 = arith.constant 255 : i32
    %1569 = tpu.dynamic_rotate %1556 by %c255_i32_105 dim 1 : vector<8x256xf32>, i32 -> vector<8x256xf32>
    %1570 = vector.broadcast %156 : vector<1x256xf32> to vector<8x256xf32>
    %1571 = arith.mulf %1569, %1570 : vector<8x256xf32>
    %c241_i32_106 = arith.constant 241 : i32
    %1572 = tpu.dynamic_rotate %1556 by %c241_i32_106 dim 1 : vector<8x256xf32>, i32 -> vector<8x256xf32>
    %1573 = vector.broadcast %157 : vector<1x256xf32> to vector<8x256xf32>
    %1574 = arith.mulf %1572, %1573 : vector<8x256xf32>
    %c240_i32_107 = arith.constant 240 : i32
    %1575 = tpu.dynamic_rotate %1556 by %c240_i32_107 dim 1 : vector<8x256xf32>, i32 -> vector<8x256xf32>
    %1576 = vector.broadcast %158 : vector<1x256xf32> to vector<8x256xf32>
    %1577 = arith.mulf %1575, %1576 : vector<8x256xf32>
    %c239_i32_108 = arith.constant 239 : i32
    %1578 = tpu.dynamic_rotate %1556 by %c239_i32_108 dim 1 : vector<8x256xf32>, i32 -> vector<8x256xf32>
    %1579 = vector.broadcast %159 : vector<1x256xf32> to vector<8x256xf32>
    %1580 = arith.mulf %1578, %1579 : vector<8x256xf32>
    %1581 = vector.extract_strided_slice %1559 {offsets = [0, 0], sizes = [2, 256], strides = [1, 1]} : vector<8x256xf32> to vector<2x256xf32>
    %1582 = vector.broadcast %0 : f32 to vector<2x256xf32>
    %1583 = arith.mulf %1581, %1582 : vector<2x256xf32>
    %1584 = vector.extract_strided_slice %1559 {offsets = [2, 0], sizes = [2, 256], strides = [1, 1]} : vector<8x256xf32> to vector<2x256xf32>
    %1585 = vector.broadcast %4 : f32 to vector<2x256xf32>
    %1586 = arith.mulf %1584, %1585 : vector<2x256xf32>
    %1587 = arith.addf %1583, %1586 : vector<2x256xf32>
    %1588 = vector.extract_strided_slice %1559 {offsets = [4, 0], sizes = [2, 256], strides = [1, 1]} : vector<8x256xf32> to vector<2x256xf32>
    %1589 = vector.broadcast %8 : f32 to vector<2x256xf32>
    %1590 = arith.mulf %1588, %1589 : vector<2x256xf32>
    %1591 = arith.addf %1587, %1590 : vector<2x256xf32>
    %1592 = vector.extract_strided_slice %1559 {offsets = [6, 0], sizes = [2, 256], strides = [1, 1]} : vector<8x256xf32> to vector<2x256xf32>
    %1593 = vector.broadcast %12 : f32 to vector<2x256xf32>
    %1594 = arith.mulf %1592, %1593 : vector<2x256xf32>
    %1595 = arith.addf %1591, %1594 : vector<2x256xf32>
    %1596 = vector.extract_strided_slice %1562 {offsets = [0, 0], sizes = [2, 256], strides = [1, 1]} : vector<8x256xf32> to vector<2x256xf32>
    %1597 = vector.broadcast %16 : f32 to vector<2x256xf32>
    %1598 = arith.mulf %1596, %1597 : vector<2x256xf32>
    %1599 = arith.addf %1595, %1598 : vector<2x256xf32>
    %1600 = vector.extract_strided_slice %1562 {offsets = [2, 0], sizes = [2, 256], strides = [1, 1]} : vector<8x256xf32> to vector<2x256xf32>
    %1601 = vector.broadcast %20 : f32 to vector<2x256xf32>
    %1602 = arith.mulf %1600, %1601 : vector<2x256xf32>
    %1603 = arith.addf %1599, %1602 : vector<2x256xf32>
    %1604 = vector.extract_strided_slice %1562 {offsets = [4, 0], sizes = [2, 256], strides = [1, 1]} : vector<8x256xf32> to vector<2x256xf32>
    %1605 = vector.broadcast %24 : f32 to vector<2x256xf32>
    %1606 = arith.mulf %1604, %1605 : vector<2x256xf32>
    %1607 = arith.addf %1603, %1606 : vector<2x256xf32>
    %1608 = vector.extract_strided_slice %1562 {offsets = [6, 0], sizes = [2, 256], strides = [1, 1]} : vector<8x256xf32> to vector<2x256xf32>
    %1609 = vector.broadcast %28 : f32 to vector<2x256xf32>
    %1610 = arith.mulf %1608, %1609 : vector<2x256xf32>
    %1611 = arith.addf %1607, %1610 : vector<2x256xf32>
    %1612 = vector.extract_strided_slice %1565 {offsets = [0, 0], sizes = [2, 256], strides = [1, 1]} : vector<8x256xf32> to vector<2x256xf32>
    %1613 = vector.broadcast %32 : f32 to vector<2x256xf32>
    %1614 = arith.mulf %1612, %1613 : vector<2x256xf32>
    %1615 = arith.addf %1611, %1614 : vector<2x256xf32>
    %1616 = vector.extract_strided_slice %1565 {offsets = [2, 0], sizes = [2, 256], strides = [1, 1]} : vector<8x256xf32> to vector<2x256xf32>
    %1617 = vector.broadcast %36 : f32 to vector<2x256xf32>
    %1618 = arith.mulf %1616, %1617 : vector<2x256xf32>
    %1619 = arith.addf %1615, %1618 : vector<2x256xf32>
    %1620 = vector.extract_strided_slice %1565 {offsets = [4, 0], sizes = [2, 256], strides = [1, 1]} : vector<8x256xf32> to vector<2x256xf32>
    %1621 = vector.broadcast %40 : f32 to vector<2x256xf32>
    %1622 = arith.mulf %1620, %1621 : vector<2x256xf32>
    %1623 = arith.addf %1619, %1622 : vector<2x256xf32>
    %1624 = vector.extract_strided_slice %1565 {offsets = [6, 0], sizes = [2, 256], strides = [1, 1]} : vector<8x256xf32> to vector<2x256xf32>
    %1625 = vector.broadcast %44 : f32 to vector<2x256xf32>
    %1626 = arith.mulf %1624, %1625 : vector<2x256xf32>
    %1627 = arith.addf %1623, %1626 : vector<2x256xf32>
    %1628 = vector.extract_strided_slice %1568 {offsets = [0, 0], sizes = [2, 256], strides = [1, 1]} : vector<8x256xf32> to vector<2x256xf32>
    %1629 = vector.broadcast %48 : f32 to vector<2x256xf32>
    %1630 = arith.mulf %1628, %1629 : vector<2x256xf32>
    %1631 = arith.addf %1627, %1630 : vector<2x256xf32>
    %1632 = vector.extract_strided_slice %1568 {offsets = [2, 0], sizes = [2, 256], strides = [1, 1]} : vector<8x256xf32> to vector<2x256xf32>
    %1633 = vector.broadcast %52 : f32 to vector<2x256xf32>
    %1634 = arith.mulf %1632, %1633 : vector<2x256xf32>
    %1635 = arith.addf %1631, %1634 : vector<2x256xf32>
    %1636 = vector.extract_strided_slice %1568 {offsets = [4, 0], sizes = [2, 256], strides = [1, 1]} : vector<8x256xf32> to vector<2x256xf32>
    %1637 = vector.broadcast %56 : f32 to vector<2x256xf32>
    %1638 = arith.mulf %1636, %1637 : vector<2x256xf32>
    %1639 = arith.addf %1635, %1638 : vector<2x256xf32>
    %1640 = vector.extract_strided_slice %1568 {offsets = [6, 0], sizes = [2, 256], strides = [1, 1]} : vector<8x256xf32> to vector<2x256xf32>
    %1641 = vector.broadcast %60 : f32 to vector<2x256xf32>
    %1642 = arith.mulf %1640, %1641 : vector<2x256xf32>
    %1643 = arith.addf %1639, %1642 : vector<2x256xf32>
    %1644 = vector.extract_strided_slice %1556 {offsets = [0, 0], sizes = [2, 256], strides = [1, 1]} : vector<8x256xf32> to vector<2x256xf32>
    %1645 = vector.broadcast %64 : f32 to vector<2x256xf32>
    %1646 = arith.mulf %1644, %1645 : vector<2x256xf32>
    %1647 = arith.addf %1643, %1646 : vector<2x256xf32>
    %1648 = vector.extract_strided_slice %1556 {offsets = [2, 0], sizes = [2, 256], strides = [1, 1]} : vector<8x256xf32> to vector<2x256xf32>
    %1649 = vector.broadcast %68 : f32 to vector<2x256xf32>
    %1650 = arith.mulf %1648, %1649 : vector<2x256xf32>
    %1651 = arith.addf %1647, %1650 : vector<2x256xf32>
    %1652 = vector.extract_strided_slice %1556 {offsets = [4, 0], sizes = [2, 256], strides = [1, 1]} : vector<8x256xf32> to vector<2x256xf32>
    %1653 = vector.broadcast %72 : f32 to vector<2x256xf32>
    %1654 = arith.mulf %1652, %1653 : vector<2x256xf32>
    %1655 = arith.addf %1651, %1654 : vector<2x256xf32>
    %1656 = vector.extract_strided_slice %1556 {offsets = [6, 0], sizes = [2, 256], strides = [1, 1]} : vector<8x256xf32> to vector<2x256xf32>
    %1657 = vector.broadcast %76 : f32 to vector<2x256xf32>
    %1658 = arith.mulf %1656, %1657 : vector<2x256xf32>
    %1659 = arith.addf %1655, %1658 : vector<2x256xf32>
    %1660 = vector.extract_strided_slice %1571 {offsets = [0, 0], sizes = [2, 256], strides = [1, 1]} : vector<8x256xf32> to vector<2x256xf32>
    %1661 = vector.broadcast %80 : f32 to vector<2x256xf32>
    %1662 = arith.mulf %1660, %1661 : vector<2x256xf32>
    %1663 = arith.addf %1659, %1662 : vector<2x256xf32>
    %1664 = vector.extract_strided_slice %1571 {offsets = [2, 0], sizes = [2, 256], strides = [1, 1]} : vector<8x256xf32> to vector<2x256xf32>
    %1665 = vector.broadcast %84 : f32 to vector<2x256xf32>
    %1666 = arith.mulf %1664, %1665 : vector<2x256xf32>
    %1667 = arith.addf %1663, %1666 : vector<2x256xf32>
    %1668 = vector.extract_strided_slice %1571 {offsets = [4, 0], sizes = [2, 256], strides = [1, 1]} : vector<8x256xf32> to vector<2x256xf32>
    %1669 = vector.broadcast %88 : f32 to vector<2x256xf32>
    %1670 = arith.mulf %1668, %1669 : vector<2x256xf32>
    %1671 = arith.addf %1667, %1670 : vector<2x256xf32>
    %1672 = vector.extract_strided_slice %1571 {offsets = [6, 0], sizes = [2, 256], strides = [1, 1]} : vector<8x256xf32> to vector<2x256xf32>
    %1673 = vector.broadcast %92 : f32 to vector<2x256xf32>
    %1674 = arith.mulf %1672, %1673 : vector<2x256xf32>
    %1675 = arith.addf %1671, %1674 : vector<2x256xf32>
    %1676 = vector.extract_strided_slice %1574 {offsets = [0, 0], sizes = [2, 256], strides = [1, 1]} : vector<8x256xf32> to vector<2x256xf32>
    %1677 = vector.broadcast %96 : f32 to vector<2x256xf32>
    %1678 = arith.mulf %1676, %1677 : vector<2x256xf32>
    %1679 = arith.addf %1675, %1678 : vector<2x256xf32>
    %1680 = vector.extract_strided_slice %1574 {offsets = [2, 0], sizes = [2, 256], strides = [1, 1]} : vector<8x256xf32> to vector<2x256xf32>
    %1681 = vector.broadcast %100 : f32 to vector<2x256xf32>
    %1682 = arith.mulf %1680, %1681 : vector<2x256xf32>
    %1683 = arith.addf %1679, %1682 : vector<2x256xf32>
    %1684 = vector.extract_strided_slice %1574 {offsets = [4, 0], sizes = [2, 256], strides = [1, 1]} : vector<8x256xf32> to vector<2x256xf32>
    %1685 = vector.broadcast %104 : f32 to vector<2x256xf32>
    %1686 = arith.mulf %1684, %1685 : vector<2x256xf32>
    %1687 = arith.addf %1683, %1686 : vector<2x256xf32>
    %1688 = vector.extract_strided_slice %1574 {offsets = [6, 0], sizes = [2, 256], strides = [1, 1]} : vector<8x256xf32> to vector<2x256xf32>
    %1689 = vector.broadcast %108 : f32 to vector<2x256xf32>
    %1690 = arith.mulf %1688, %1689 : vector<2x256xf32>
    %1691 = arith.addf %1687, %1690 : vector<2x256xf32>
    %1692 = vector.extract_strided_slice %1577 {offsets = [0, 0], sizes = [2, 256], strides = [1, 1]} : vector<8x256xf32> to vector<2x256xf32>
    %1693 = vector.broadcast %112 : f32 to vector<2x256xf32>
    %1694 = arith.mulf %1692, %1693 : vector<2x256xf32>
    %1695 = arith.addf %1691, %1694 : vector<2x256xf32>
    %1696 = vector.extract_strided_slice %1577 {offsets = [2, 0], sizes = [2, 256], strides = [1, 1]} : vector<8x256xf32> to vector<2x256xf32>
    %1697 = vector.broadcast %116 : f32 to vector<2x256xf32>
    %1698 = arith.mulf %1696, %1697 : vector<2x256xf32>
    %1699 = arith.addf %1695, %1698 : vector<2x256xf32>
    %1700 = vector.extract_strided_slice %1577 {offsets = [4, 0], sizes = [2, 256], strides = [1, 1]} : vector<8x256xf32> to vector<2x256xf32>
    %1701 = vector.broadcast %120 : f32 to vector<2x256xf32>
    %1702 = arith.mulf %1700, %1701 : vector<2x256xf32>
    %1703 = arith.addf %1699, %1702 : vector<2x256xf32>
    %1704 = vector.extract_strided_slice %1577 {offsets = [6, 0], sizes = [2, 256], strides = [1, 1]} : vector<8x256xf32> to vector<2x256xf32>
    %1705 = vector.broadcast %124 : f32 to vector<2x256xf32>
    %1706 = arith.mulf %1704, %1705 : vector<2x256xf32>
    %1707 = arith.addf %1703, %1706 : vector<2x256xf32>
    %1708 = vector.extract_strided_slice %1580 {offsets = [0, 0], sizes = [2, 256], strides = [1, 1]} : vector<8x256xf32> to vector<2x256xf32>
    %1709 = vector.broadcast %128 : f32 to vector<2x256xf32>
    %1710 = arith.mulf %1708, %1709 : vector<2x256xf32>
    %1711 = arith.addf %1707, %1710 : vector<2x256xf32>
    %1712 = vector.extract_strided_slice %1580 {offsets = [2, 0], sizes = [2, 256], strides = [1, 1]} : vector<8x256xf32> to vector<2x256xf32>
    %1713 = vector.broadcast %132 : f32 to vector<2x256xf32>
    %1714 = arith.mulf %1712, %1713 : vector<2x256xf32>
    %1715 = arith.addf %1711, %1714 : vector<2x256xf32>
    %1716 = vector.extract_strided_slice %1580 {offsets = [4, 0], sizes = [2, 256], strides = [1, 1]} : vector<8x256xf32> to vector<2x256xf32>
    %1717 = vector.broadcast %136 : f32 to vector<2x256xf32>
    %1718 = arith.mulf %1716, %1717 : vector<2x256xf32>
    %1719 = arith.addf %1715, %1718 : vector<2x256xf32>
    %1720 = vector.extract_strided_slice %1580 {offsets = [6, 0], sizes = [2, 256], strides = [1, 1]} : vector<8x256xf32> to vector<2x256xf32>
    %1721 = vector.broadcast %140 : f32 to vector<2x256xf32>
    %1722 = arith.mulf %1720, %1721 : vector<2x256xf32>
    %1723 = arith.addf %1719, %1722 : vector<2x256xf32>
    %1724 = vector.shape_cast %1723 : vector<2x256xf32> to vector<1x2x256xf32>
    %cst_109 = arith.constant dense<0.000000e+00> : vector<1xf32>
    %1725 = vector.multi_reduction <add>, %1724, %cst_109 [1, 2] : vector<1x2x256xf32> to vector<1xf32>
    %1726 = vector.shape_cast %1725 : vector<1xf32> to vector<1x1x1xf32>
    %1727 = vector.extract %1726[0, 0, 0] : f32 from vector<1x1x1xf32>
    %cst_110 = arith.constant 0.001953125 : f32
    %1728 = arith.mulf %1727, %cst_110 : f32
    %1729 = arith.mulf %1723, %1723 : vector<2x256xf32>
    %1730 = vector.shape_cast %1729 : vector<2x256xf32> to vector<1x2x256xf32>
    %cst_111 = arith.constant dense<0.000000e+00> : vector<1xf32>
    %1731 = vector.multi_reduction <add>, %1730, %cst_111 [1, 2] : vector<1x2x256xf32> to vector<1xf32>
    %1732 = vector.shape_cast %1731 : vector<1xf32> to vector<1x1x1xf32>
    %1733 = vector.extract %1732[0, 0, 0] : f32 from vector<1x1x1xf32>
    %cst_112 = arith.constant 0.001953125 : f32
    %1734 = arith.mulf %1733, %cst_112 : f32
    %1735 = arith.mulf %1728, %1728 : f32
    %1736 = arith.subf %1734, %1735 : f32
    %cst_113 = arith.constant 9.99999974E-6 : f32
    %1737 = arith.addf %1736, %cst_113 : f32
    %1738 = math.rsqrt %1737 : f32
    %1739 = arith.mulf %144, %1738 : f32
    %1740 = arith.mulf %1728, %1739 : f32
    %1741 = arith.subf %148, %1740 : f32
    %1742 = vector.broadcast %1739 : f32 to vector<2x256xf32>
    %1743 = arith.mulf %1723, %1742 : vector<2x256xf32>
    %1744 = vector.broadcast %1741 : f32 to vector<2x256xf32>
    %1745 = arith.addf %1743, %1744 : vector<2x256xf32>
    %cst_114 = arith.constant 0.000000e+00 : f32
    %1746 = vector.broadcast %cst_114 : f32 to vector<2x256xf32>
    %1747 = arith.maximumf %1745, %1746 : vector<2x256xf32>
    %c0_115 = arith.constant 0 : index
    %c0_116 = arith.constant 0 : index
    %1748 = vector.load %arg5[%c0_115, %c0_116] : memref<8x256xf32, #tpu.memory_space<vmem>>, vector<2x256xf32>
    tpu.vector_store %arg5[%c0_115, %c0_116], %1747 {strides = array<i32>} : memref<8x256xf32, #tpu.memory_space<vmem>>, vector<2x256xf32>,
    %1749 = vector.extract_strided_slice %1559 {offsets = [0, 0], sizes = [2, 256], strides = [1, 1]} : vector<8x256xf32> to vector<2x256xf32>
    %1750 = vector.broadcast %1 : f32 to vector<2x256xf32>
    %1751 = arith.mulf %1749, %1750 : vector<2x256xf32>
    %1752 = vector.extract_strided_slice %1559 {offsets = [2, 0], sizes = [2, 256], strides = [1, 1]} : vector<8x256xf32> to vector<2x256xf32>
    %1753 = vector.broadcast %5 : f32 to vector<2x256xf32>
    %1754 = arith.mulf %1752, %1753 : vector<2x256xf32>
    %1755 = arith.addf %1751, %1754 : vector<2x256xf32>
    %1756 = vector.extract_strided_slice %1559 {offsets = [4, 0], sizes = [2, 256], strides = [1, 1]} : vector<8x256xf32> to vector<2x256xf32>
    %1757 = vector.broadcast %9 : f32 to vector<2x256xf32>
    %1758 = arith.mulf %1756, %1757 : vector<2x256xf32>
    %1759 = arith.addf %1755, %1758 : vector<2x256xf32>
    %1760 = vector.extract_strided_slice %1559 {offsets = [6, 0], sizes = [2, 256], strides = [1, 1]} : vector<8x256xf32> to vector<2x256xf32>
    %1761 = vector.broadcast %13 : f32 to vector<2x256xf32>
    %1762 = arith.mulf %1760, %1761 : vector<2x256xf32>
    %1763 = arith.addf %1759, %1762 : vector<2x256xf32>
    %1764 = vector.extract_strided_slice %1562 {offsets = [0, 0], sizes = [2, 256], strides = [1, 1]} : vector<8x256xf32> to vector<2x256xf32>
    %1765 = vector.broadcast %17 : f32 to vector<2x256xf32>
    %1766 = arith.mulf %1764, %1765 : vector<2x256xf32>
    %1767 = arith.addf %1763, %1766 : vector<2x256xf32>
    %1768 = vector.extract_strided_slice %1562 {offsets = [2, 0], sizes = [2, 256], strides = [1, 1]} : vector<8x256xf32> to vector<2x256xf32>
    %1769 = vector.broadcast %21 : f32 to vector<2x256xf32>
    %1770 = arith.mulf %1768, %1769 : vector<2x256xf32>
    %1771 = arith.addf %1767, %1770 : vector<2x256xf32>
    %1772 = vector.extract_strided_slice %1562 {offsets = [4, 0], sizes = [2, 256], strides = [1, 1]} : vector<8x256xf32> to vector<2x256xf32>
    %1773 = vector.broadcast %25 : f32 to vector<2x256xf32>
    %1774 = arith.mulf %1772, %1773 : vector<2x256xf32>
    %1775 = arith.addf %1771, %1774 : vector<2x256xf32>
    %1776 = vector.extract_strided_slice %1562 {offsets = [6, 0], sizes = [2, 256], strides = [1, 1]} : vector<8x256xf32> to vector<2x256xf32>
    %1777 = vector.broadcast %29 : f32 to vector<2x256xf32>
    %1778 = arith.mulf %1776, %1777 : vector<2x256xf32>
    %1779 = arith.addf %1775, %1778 : vector<2x256xf32>
    %1780 = vector.extract_strided_slice %1565 {offsets = [0, 0], sizes = [2, 256], strides = [1, 1]} : vector<8x256xf32> to vector<2x256xf32>
    %1781 = vector.broadcast %33 : f32 to vector<2x256xf32>
    %1782 = arith.mulf %1780, %1781 : vector<2x256xf32>
    %1783 = arith.addf %1779, %1782 : vector<2x256xf32>
    %1784 = vector.extract_strided_slice %1565 {offsets = [2, 0], sizes = [2, 256], strides = [1, 1]} : vector<8x256xf32> to vector<2x256xf32>
    %1785 = vector.broadcast %37 : f32 to vector<2x256xf32>
    %1786 = arith.mulf %1784, %1785 : vector<2x256xf32>
    %1787 = arith.addf %1783, %1786 : vector<2x256xf32>
    %1788 = vector.extract_strided_slice %1565 {offsets = [4, 0], sizes = [2, 256], strides = [1, 1]} : vector<8x256xf32> to vector<2x256xf32>
    %1789 = vector.broadcast %41 : f32 to vector<2x256xf32>
    %1790 = arith.mulf %1788, %1789 : vector<2x256xf32>
    %1791 = arith.addf %1787, %1790 : vector<2x256xf32>
    %1792 = vector.extract_strided_slice %1565 {offsets = [6, 0], sizes = [2, 256], strides = [1, 1]} : vector<8x256xf32> to vector<2x256xf32>
    %1793 = vector.broadcast %45 : f32 to vector<2x256xf32>
    %1794 = arith.mulf %1792, %1793 : vector<2x256xf32>
    %1795 = arith.addf %1791, %1794 : vector<2x256xf32>
    %1796 = vector.extract_strided_slice %1568 {offsets = [0, 0], sizes = [2, 256], strides = [1, 1]} : vector<8x256xf32> to vector<2x256xf32>
    %1797 = vector.broadcast %49 : f32 to vector<2x256xf32>
    %1798 = arith.mulf %1796, %1797 : vector<2x256xf32>
    %1799 = arith.addf %1795, %1798 : vector<2x256xf32>
    %1800 = vector.extract_strided_slice %1568 {offsets = [2, 0], sizes = [2, 256], strides = [1, 1]} : vector<8x256xf32> to vector<2x256xf32>
    %1801 = vector.broadcast %53 : f32 to vector<2x256xf32>
    %1802 = arith.mulf %1800, %1801 : vector<2x256xf32>
    %1803 = arith.addf %1799, %1802 : vector<2x256xf32>
    %1804 = vector.extract_strided_slice %1568 {offsets = [4, 0], sizes = [2, 256], strides = [1, 1]} : vector<8x256xf32> to vector<2x256xf32>
    %1805 = vector.broadcast %57 : f32 to vector<2x256xf32>
    %1806 = arith.mulf %1804, %1805 : vector<2x256xf32>
    %1807 = arith.addf %1803, %1806 : vector<2x256xf32>
    %1808 = vector.extract_strided_slice %1568 {offsets = [6, 0], sizes = [2, 256], strides = [1, 1]} : vector<8x256xf32> to vector<2x256xf32>
    %1809 = vector.broadcast %61 : f32 to vector<2x256xf32>
    %1810 = arith.mulf %1808, %1809 : vector<2x256xf32>
    %1811 = arith.addf %1807, %1810 : vector<2x256xf32>
    %1812 = vector.extract_strided_slice %1556 {offsets = [0, 0], sizes = [2, 256], strides = [1, 1]} : vector<8x256xf32> to vector<2x256xf32>
    %1813 = vector.broadcast %65 : f32 to vector<2x256xf32>
    %1814 = arith.mulf %1812, %1813 : vector<2x256xf32>
    %1815 = arith.addf %1811, %1814 : vector<2x256xf32>
    %1816 = vector.extract_strided_slice %1556 {offsets = [2, 0], sizes = [2, 256], strides = [1, 1]} : vector<8x256xf32> to vector<2x256xf32>
    %1817 = vector.broadcast %69 : f32 to vector<2x256xf32>
    %1818 = arith.mulf %1816, %1817 : vector<2x256xf32>
    %1819 = arith.addf %1815, %1818 : vector<2x256xf32>
    %1820 = vector.extract_strided_slice %1556 {offsets = [4, 0], sizes = [2, 256], strides = [1, 1]} : vector<8x256xf32> to vector<2x256xf32>
    %1821 = vector.broadcast %73 : f32 to vector<2x256xf32>
    %1822 = arith.mulf %1820, %1821 : vector<2x256xf32>
    %1823 = arith.addf %1819, %1822 : vector<2x256xf32>
    %1824 = vector.extract_strided_slice %1556 {offsets = [6, 0], sizes = [2, 256], strides = [1, 1]} : vector<8x256xf32> to vector<2x256xf32>
    %1825 = vector.broadcast %77 : f32 to vector<2x256xf32>
    %1826 = arith.mulf %1824, %1825 : vector<2x256xf32>
    %1827 = arith.addf %1823, %1826 : vector<2x256xf32>
    %1828 = vector.extract_strided_slice %1571 {offsets = [0, 0], sizes = [2, 256], strides = [1, 1]} : vector<8x256xf32> to vector<2x256xf32>
    %1829 = vector.broadcast %81 : f32 to vector<2x256xf32>
    %1830 = arith.mulf %1828, %1829 : vector<2x256xf32>
    %1831 = arith.addf %1827, %1830 : vector<2x256xf32>
    %1832 = vector.extract_strided_slice %1571 {offsets = [2, 0], sizes = [2, 256], strides = [1, 1]} : vector<8x256xf32> to vector<2x256xf32>
    %1833 = vector.broadcast %85 : f32 to vector<2x256xf32>
    %1834 = arith.mulf %1832, %1833 : vector<2x256xf32>
    %1835 = arith.addf %1831, %1834 : vector<2x256xf32>
    %1836 = vector.extract_strided_slice %1571 {offsets = [4, 0], sizes = [2, 256], strides = [1, 1]} : vector<8x256xf32> to vector<2x256xf32>
    %1837 = vector.broadcast %89 : f32 to vector<2x256xf32>
    %1838 = arith.mulf %1836, %1837 : vector<2x256xf32>
    %1839 = arith.addf %1835, %1838 : vector<2x256xf32>
    %1840 = vector.extract_strided_slice %1571 {offsets = [6, 0], sizes = [2, 256], strides = [1, 1]} : vector<8x256xf32> to vector<2x256xf32>
    %1841 = vector.broadcast %93 : f32 to vector<2x256xf32>
    %1842 = arith.mulf %1840, %1841 : vector<2x256xf32>
    %1843 = arith.addf %1839, %1842 : vector<2x256xf32>
    %1844 = vector.extract_strided_slice %1574 {offsets = [0, 0], sizes = [2, 256], strides = [1, 1]} : vector<8x256xf32> to vector<2x256xf32>
    %1845 = vector.broadcast %97 : f32 to vector<2x256xf32>
    %1846 = arith.mulf %1844, %1845 : vector<2x256xf32>
    %1847 = arith.addf %1843, %1846 : vector<2x256xf32>
    %1848 = vector.extract_strided_slice %1574 {offsets = [2, 0], sizes = [2, 256], strides = [1, 1]} : vector<8x256xf32> to vector<2x256xf32>
    %1849 = vector.broadcast %101 : f32 to vector<2x256xf32>
    %1850 = arith.mulf %1848, %1849 : vector<2x256xf32>
    %1851 = arith.addf %1847, %1850 : vector<2x256xf32>
    %1852 = vector.extract_strided_slice %1574 {offsets = [4, 0], sizes = [2, 256], strides = [1, 1]} : vector<8x256xf32> to vector<2x256xf32>
    %1853 = vector.broadcast %105 : f32 to vector<2x256xf32>
    %1854 = arith.mulf %1852, %1853 : vector<2x256xf32>
    %1855 = arith.addf %1851, %1854 : vector<2x256xf32>
    %1856 = vector.extract_strided_slice %1574 {offsets = [6, 0], sizes = [2, 256], strides = [1, 1]} : vector<8x256xf32> to vector<2x256xf32>
    %1857 = vector.broadcast %109 : f32 to vector<2x256xf32>
    %1858 = arith.mulf %1856, %1857 : vector<2x256xf32>
    %1859 = arith.addf %1855, %1858 : vector<2x256xf32>
    %1860 = vector.extract_strided_slice %1577 {offsets = [0, 0], sizes = [2, 256], strides = [1, 1]} : vector<8x256xf32> to vector<2x256xf32>
    %1861 = vector.broadcast %113 : f32 to vector<2x256xf32>
    %1862 = arith.mulf %1860, %1861 : vector<2x256xf32>
    %1863 = arith.addf %1859, %1862 : vector<2x256xf32>
    %1864 = vector.extract_strided_slice %1577 {offsets = [2, 0], sizes = [2, 256], strides = [1, 1]} : vector<8x256xf32> to vector<2x256xf32>
    %1865 = vector.broadcast %117 : f32 to vector<2x256xf32>
    %1866 = arith.mulf %1864, %1865 : vector<2x256xf32>
    %1867 = arith.addf %1863, %1866 : vector<2x256xf32>
    %1868 = vector.extract_strided_slice %1577 {offsets = [4, 0], sizes = [2, 256], strides = [1, 1]} : vector<8x256xf32> to vector<2x256xf32>
    %1869 = vector.broadcast %121 : f32 to vector<2x256xf32>
    %1870 = arith.mulf %1868, %1869 : vector<2x256xf32>
    %1871 = arith.addf %1867, %1870 : vector<2x256xf32>
    %1872 = vector.extract_strided_slice %1577 {offsets = [6, 0], sizes = [2, 256], strides = [1, 1]} : vector<8x256xf32> to vector<2x256xf32>
    %1873 = vector.broadcast %125 : f32 to vector<2x256xf32>
    %1874 = arith.mulf %1872, %1873 : vector<2x256xf32>
    %1875 = arith.addf %1871, %1874 : vector<2x256xf32>
    %1876 = vector.extract_strided_slice %1580 {offsets = [0, 0], sizes = [2, 256], strides = [1, 1]} : vector<8x256xf32> to vector<2x256xf32>
    %1877 = vector.broadcast %129 : f32 to vector<2x256xf32>
    %1878 = arith.mulf %1876, %1877 : vector<2x256xf32>
    %1879 = arith.addf %1875, %1878 : vector<2x256xf32>
    %1880 = vector.extract_strided_slice %1580 {offsets = [2, 0], sizes = [2, 256], strides = [1, 1]} : vector<8x256xf32> to vector<2x256xf32>
    %1881 = vector.broadcast %133 : f32 to vector<2x256xf32>
    %1882 = arith.mulf %1880, %1881 : vector<2x256xf32>
    %1883 = arith.addf %1879, %1882 : vector<2x256xf32>
    %1884 = vector.extract_strided_slice %1580 {offsets = [4, 0], sizes = [2, 256], strides = [1, 1]} : vector<8x256xf32> to vector<2x256xf32>
    %1885 = vector.broadcast %137 : f32 to vector<2x256xf32>
    %1886 = arith.mulf %1884, %1885 : vector<2x256xf32>
    %1887 = arith.addf %1883, %1886 : vector<2x256xf32>
    %1888 = vector.extract_strided_slice %1580 {offsets = [6, 0], sizes = [2, 256], strides = [1, 1]} : vector<8x256xf32> to vector<2x256xf32>
    %1889 = vector.broadcast %141 : f32 to vector<2x256xf32>
    %1890 = arith.mulf %1888, %1889 : vector<2x256xf32>
    %1891 = arith.addf %1887, %1890 : vector<2x256xf32>
    %1892 = vector.shape_cast %1891 : vector<2x256xf32> to vector<1x2x256xf32>
    %cst_117 = arith.constant dense<0.000000e+00> : vector<1xf32>
    %1893 = vector.multi_reduction <add>, %1892, %cst_117 [1, 2] : vector<1x2x256xf32> to vector<1xf32>
    %1894 = vector.shape_cast %1893 : vector<1xf32> to vector<1x1x1xf32>
    %1895 = vector.extract %1894[0, 0, 0] : f32 from vector<1x1x1xf32>
    %cst_118 = arith.constant 0.001953125 : f32
    %1896 = arith.mulf %1895, %cst_118 : f32
    %1897 = arith.mulf %1891, %1891 : vector<2x256xf32>
    %1898 = vector.shape_cast %1897 : vector<2x256xf32> to vector<1x2x256xf32>
    %cst_119 = arith.constant dense<0.000000e+00> : vector<1xf32>
    %1899 = vector.multi_reduction <add>, %1898, %cst_119 [1, 2] : vector<1x2x256xf32> to vector<1xf32>
    %1900 = vector.shape_cast %1899 : vector<1xf32> to vector<1x1x1xf32>
    %1901 = vector.extract %1900[0, 0, 0] : f32 from vector<1x1x1xf32>
    %cst_120 = arith.constant 0.001953125 : f32
    %1902 = arith.mulf %1901, %cst_120 : f32
    %1903 = arith.mulf %1896, %1896 : f32
    %1904 = arith.subf %1902, %1903 : f32
    %cst_121 = arith.constant 9.99999974E-6 : f32
    %1905 = arith.addf %1904, %cst_121 : f32
    %1906 = math.rsqrt %1905 : f32
    %1907 = arith.mulf %145, %1906 : f32
    %1908 = arith.mulf %1896, %1907 : f32
    %1909 = arith.subf %149, %1908 : f32
    %1910 = vector.broadcast %1907 : f32 to vector<2x256xf32>
    %1911 = arith.mulf %1891, %1910 : vector<2x256xf32>
    %1912 = vector.broadcast %1909 : f32 to vector<2x256xf32>
    %1913 = arith.addf %1911, %1912 : vector<2x256xf32>
    %cst_122 = arith.constant 0.000000e+00 : f32
    %1914 = vector.broadcast %cst_122 : f32 to vector<2x256xf32>
    %1915 = arith.maximumf %1913, %1914 : vector<2x256xf32>
    %c2_123 = arith.constant 2 : index
    %c0_124 = arith.constant 0 : index
    %1916 = vector.load %arg5[%c2_123, %c0_124] : memref<8x256xf32, #tpu.memory_space<vmem>>, vector<2x256xf32>
    tpu.vector_store %arg5[%c2_123, %c0_124], %1915 {strides = array<i32>} : memref<8x256xf32, #tpu.memory_space<vmem>>, vector<2x256xf32>,
    %1917 = vector.extract_strided_slice %1559 {offsets = [0, 0], sizes = [2, 256], strides = [1, 1]} : vector<8x256xf32> to vector<2x256xf32>
    %1918 = vector.broadcast %2 : f32 to vector<2x256xf32>
    %1919 = arith.mulf %1917, %1918 : vector<2x256xf32>
    %1920 = vector.extract_strided_slice %1559 {offsets = [2, 0], sizes = [2, 256], strides = [1, 1]} : vector<8x256xf32> to vector<2x256xf32>
    %1921 = vector.broadcast %6 : f32 to vector<2x256xf32>
    %1922 = arith.mulf %1920, %1921 : vector<2x256xf32>
    %1923 = arith.addf %1919, %1922 : vector<2x256xf32>
    %1924 = vector.extract_strided_slice %1559 {offsets = [4, 0], sizes = [2, 256], strides = [1, 1]} : vector<8x256xf32> to vector<2x256xf32>
    %1925 = vector.broadcast %10 : f32 to vector<2x256xf32>
    %1926 = arith.mulf %1924, %1925 : vector<2x256xf32>
    %1927 = arith.addf %1923, %1926 : vector<2x256xf32>
    %1928 = vector.extract_strided_slice %1559 {offsets = [6, 0], sizes = [2, 256], strides = [1, 1]} : vector<8x256xf32> to vector<2x256xf32>
    %1929 = vector.broadcast %14 : f32 to vector<2x256xf32>
    %1930 = arith.mulf %1928, %1929 : vector<2x256xf32>
    %1931 = arith.addf %1927, %1930 : vector<2x256xf32>
    %1932 = vector.extract_strided_slice %1562 {offsets = [0, 0], sizes = [2, 256], strides = [1, 1]} : vector<8x256xf32> to vector<2x256xf32>
    %1933 = vector.broadcast %18 : f32 to vector<2x256xf32>
    %1934 = arith.mulf %1932, %1933 : vector<2x256xf32>
    %1935 = arith.addf %1931, %1934 : vector<2x256xf32>
    %1936 = vector.extract_strided_slice %1562 {offsets = [2, 0], sizes = [2, 256], strides = [1, 1]} : vector<8x256xf32> to vector<2x256xf32>
    %1937 = vector.broadcast %22 : f32 to vector<2x256xf32>
    %1938 = arith.mulf %1936, %1937 : vector<2x256xf32>
    %1939 = arith.addf %1935, %1938 : vector<2x256xf32>
    %1940 = vector.extract_strided_slice %1562 {offsets = [4, 0], sizes = [2, 256], strides = [1, 1]} : vector<8x256xf32> to vector<2x256xf32>
    %1941 = vector.broadcast %26 : f32 to vector<2x256xf32>
    %1942 = arith.mulf %1940, %1941 : vector<2x256xf32>
    %1943 = arith.addf %1939, %1942 : vector<2x256xf32>
    %1944 = vector.extract_strided_slice %1562 {offsets = [6, 0], sizes = [2, 256], strides = [1, 1]} : vector<8x256xf32> to vector<2x256xf32>
    %1945 = vector.broadcast %30 : f32 to vector<2x256xf32>
    %1946 = arith.mulf %1944, %1945 : vector<2x256xf32>
    %1947 = arith.addf %1943, %1946 : vector<2x256xf32>
    %1948 = vector.extract_strided_slice %1565 {offsets = [0, 0], sizes = [2, 256], strides = [1, 1]} : vector<8x256xf32> to vector<2x256xf32>
    %1949 = vector.broadcast %34 : f32 to vector<2x256xf32>
    %1950 = arith.mulf %1948, %1949 : vector<2x256xf32>
    %1951 = arith.addf %1947, %1950 : vector<2x256xf32>
    %1952 = vector.extract_strided_slice %1565 {offsets = [2, 0], sizes = [2, 256], strides = [1, 1]} : vector<8x256xf32> to vector<2x256xf32>
    %1953 = vector.broadcast %38 : f32 to vector<2x256xf32>
    %1954 = arith.mulf %1952, %1953 : vector<2x256xf32>
    %1955 = arith.addf %1951, %1954 : vector<2x256xf32>
    %1956 = vector.extract_strided_slice %1565 {offsets = [4, 0], sizes = [2, 256], strides = [1, 1]} : vector<8x256xf32> to vector<2x256xf32>
    %1957 = vector.broadcast %42 : f32 to vector<2x256xf32>
    %1958 = arith.mulf %1956, %1957 : vector<2x256xf32>
    %1959 = arith.addf %1955, %1958 : vector<2x256xf32>
    %1960 = vector.extract_strided_slice %1565 {offsets = [6, 0], sizes = [2, 256], strides = [1, 1]} : vector<8x256xf32> to vector<2x256xf32>
    %1961 = vector.broadcast %46 : f32 to vector<2x256xf32>
    %1962 = arith.mulf %1960, %1961 : vector<2x256xf32>
    %1963 = arith.addf %1959, %1962 : vector<2x256xf32>
    %1964 = vector.extract_strided_slice %1568 {offsets = [0, 0], sizes = [2, 256], strides = [1, 1]} : vector<8x256xf32> to vector<2x256xf32>
    %1965 = vector.broadcast %50 : f32 to vector<2x256xf32>
    %1966 = arith.mulf %1964, %1965 : vector<2x256xf32>
    %1967 = arith.addf %1963, %1966 : vector<2x256xf32>
    %1968 = vector.extract_strided_slice %1568 {offsets = [2, 0], sizes = [2, 256], strides = [1, 1]} : vector<8x256xf32> to vector<2x256xf32>
    %1969 = vector.broadcast %54 : f32 to vector<2x256xf32>
    %1970 = arith.mulf %1968, %1969 : vector<2x256xf32>
    %1971 = arith.addf %1967, %1970 : vector<2x256xf32>
    %1972 = vector.extract_strided_slice %1568 {offsets = [4, 0], sizes = [2, 256], strides = [1, 1]} : vector<8x256xf32> to vector<2x256xf32>
    %1973 = vector.broadcast %58 : f32 to vector<2x256xf32>
    %1974 = arith.mulf %1972, %1973 : vector<2x256xf32>
    %1975 = arith.addf %1971, %1974 : vector<2x256xf32>
    %1976 = vector.extract_strided_slice %1568 {offsets = [6, 0], sizes = [2, 256], strides = [1, 1]} : vector<8x256xf32> to vector<2x256xf32>
    %1977 = vector.broadcast %62 : f32 to vector<2x256xf32>
    %1978 = arith.mulf %1976, %1977 : vector<2x256xf32>
    %1979 = arith.addf %1975, %1978 : vector<2x256xf32>
    %1980 = vector.extract_strided_slice %1556 {offsets = [0, 0], sizes = [2, 256], strides = [1, 1]} : vector<8x256xf32> to vector<2x256xf32>
    %1981 = vector.broadcast %66 : f32 to vector<2x256xf32>
    %1982 = arith.mulf %1980, %1981 : vector<2x256xf32>
    %1983 = arith.addf %1979, %1982 : vector<2x256xf32>
    %1984 = vector.extract_strided_slice %1556 {offsets = [2, 0], sizes = [2, 256], strides = [1, 1]} : vector<8x256xf32> to vector<2x256xf32>
    %1985 = vector.broadcast %70 : f32 to vector<2x256xf32>
    %1986 = arith.mulf %1984, %1985 : vector<2x256xf32>
    %1987 = arith.addf %1983, %1986 : vector<2x256xf32>
    %1988 = vector.extract_strided_slice %1556 {offsets = [4, 0], sizes = [2, 256], strides = [1, 1]} : vector<8x256xf32> to vector<2x256xf32>
    %1989 = vector.broadcast %74 : f32 to vector<2x256xf32>
    %1990 = arith.mulf %1988, %1989 : vector<2x256xf32>
    %1991 = arith.addf %1987, %1990 : vector<2x256xf32>
    %1992 = vector.extract_strided_slice %1556 {offsets = [6, 0], sizes = [2, 256], strides = [1, 1]} : vector<8x256xf32> to vector<2x256xf32>
    %1993 = vector.broadcast %78 : f32 to vector<2x256xf32>
    %1994 = arith.mulf %1992, %1993 : vector<2x256xf32>
    %1995 = arith.addf %1991, %1994 : vector<2x256xf32>
    %1996 = vector.extract_strided_slice %1571 {offsets = [0, 0], sizes = [2, 256], strides = [1, 1]} : vector<8x256xf32> to vector<2x256xf32>
    %1997 = vector.broadcast %82 : f32 to vector<2x256xf32>
    %1998 = arith.mulf %1996, %1997 : vector<2x256xf32>
    %1999 = arith.addf %1995, %1998 : vector<2x256xf32>
    %2000 = vector.extract_strided_slice %1571 {offsets = [2, 0], sizes = [2, 256], strides = [1, 1]} : vector<8x256xf32> to vector<2x256xf32>
    %2001 = vector.broadcast %86 : f32 to vector<2x256xf32>
    %2002 = arith.mulf %2000, %2001 : vector<2x256xf32>
    %2003 = arith.addf %1999, %2002 : vector<2x256xf32>
    %2004 = vector.extract_strided_slice %1571 {offsets = [4, 0], sizes = [2, 256], strides = [1, 1]} : vector<8x256xf32> to vector<2x256xf32>
    %2005 = vector.broadcast %90 : f32 to vector<2x256xf32>
    %2006 = arith.mulf %2004, %2005 : vector<2x256xf32>
    %2007 = arith.addf %2003, %2006 : vector<2x256xf32>
    %2008 = vector.extract_strided_slice %1571 {offsets = [6, 0], sizes = [2, 256], strides = [1, 1]} : vector<8x256xf32> to vector<2x256xf32>
    %2009 = vector.broadcast %94 : f32 to vector<2x256xf32>
    %2010 = arith.mulf %2008, %2009 : vector<2x256xf32>
    %2011 = arith.addf %2007, %2010 : vector<2x256xf32>
    %2012 = vector.extract_strided_slice %1574 {offsets = [0, 0], sizes = [2, 256], strides = [1, 1]} : vector<8x256xf32> to vector<2x256xf32>
    %2013 = vector.broadcast %98 : f32 to vector<2x256xf32>
    %2014 = arith.mulf %2012, %2013 : vector<2x256xf32>
    %2015 = arith.addf %2011, %2014 : vector<2x256xf32>
    %2016 = vector.extract_strided_slice %1574 {offsets = [2, 0], sizes = [2, 256], strides = [1, 1]} : vector<8x256xf32> to vector<2x256xf32>
    %2017 = vector.broadcast %102 : f32 to vector<2x256xf32>
    %2018 = arith.mulf %2016, %2017 : vector<2x256xf32>
    %2019 = arith.addf %2015, %2018 : vector<2x256xf32>
    %2020 = vector.extract_strided_slice %1574 {offsets = [4, 0], sizes = [2, 256], strides = [1, 1]} : vector<8x256xf32> to vector<2x256xf32>
    %2021 = vector.broadcast %106 : f32 to vector<2x256xf32>
    %2022 = arith.mulf %2020, %2021 : vector<2x256xf32>
    %2023 = arith.addf %2019, %2022 : vector<2x256xf32>
    %2024 = vector.extract_strided_slice %1574 {offsets = [6, 0], sizes = [2, 256], strides = [1, 1]} : vector<8x256xf32> to vector<2x256xf32>
    %2025 = vector.broadcast %110 : f32 to vector<2x256xf32>
    %2026 = arith.mulf %2024, %2025 : vector<2x256xf32>
    %2027 = arith.addf %2023, %2026 : vector<2x256xf32>
    %2028 = vector.extract_strided_slice %1577 {offsets = [0, 0], sizes = [2, 256], strides = [1, 1]} : vector<8x256xf32> to vector<2x256xf32>
    %2029 = vector.broadcast %114 : f32 to vector<2x256xf32>
    %2030 = arith.mulf %2028, %2029 : vector<2x256xf32>
    %2031 = arith.addf %2027, %2030 : vector<2x256xf32>
    %2032 = vector.extract_strided_slice %1577 {offsets = [2, 0], sizes = [2, 256], strides = [1, 1]} : vector<8x256xf32> to vector<2x256xf32>
    %2033 = vector.broadcast %118 : f32 to vector<2x256xf32>
    %2034 = arith.mulf %2032, %2033 : vector<2x256xf32>
    %2035 = arith.addf %2031, %2034 : vector<2x256xf32>
    %2036 = vector.extract_strided_slice %1577 {offsets = [4, 0], sizes = [2, 256], strides = [1, 1]} : vector<8x256xf32> to vector<2x256xf32>
    %2037 = vector.broadcast %122 : f32 to vector<2x256xf32>
    %2038 = arith.mulf %2036, %2037 : vector<2x256xf32>
    %2039 = arith.addf %2035, %2038 : vector<2x256xf32>
    %2040 = vector.extract_strided_slice %1577 {offsets = [6, 0], sizes = [2, 256], strides = [1, 1]} : vector<8x256xf32> to vector<2x256xf32>
    %2041 = vector.broadcast %126 : f32 to vector<2x256xf32>
    %2042 = arith.mulf %2040, %2041 : vector<2x256xf32>
    %2043 = arith.addf %2039, %2042 : vector<2x256xf32>
    %2044 = vector.extract_strided_slice %1580 {offsets = [0, 0], sizes = [2, 256], strides = [1, 1]} : vector<8x256xf32> to vector<2x256xf32>
    %2045 = vector.broadcast %130 : f32 to vector<2x256xf32>
    %2046 = arith.mulf %2044, %2045 : vector<2x256xf32>
    %2047 = arith.addf %2043, %2046 : vector<2x256xf32>
    %2048 = vector.extract_strided_slice %1580 {offsets = [2, 0], sizes = [2, 256], strides = [1, 1]} : vector<8x256xf32> to vector<2x256xf32>
    %2049 = vector.broadcast %134 : f32 to vector<2x256xf32>
    %2050 = arith.mulf %2048, %2049 : vector<2x256xf32>
    %2051 = arith.addf %2047, %2050 : vector<2x256xf32>
    %2052 = vector.extract_strided_slice %1580 {offsets = [4, 0], sizes = [2, 256], strides = [1, 1]} : vector<8x256xf32> to vector<2x256xf32>
    %2053 = vector.broadcast %138 : f32 to vector<2x256xf32>
    %2054 = arith.mulf %2052, %2053 : vector<2x256xf32>
    %2055 = arith.addf %2051, %2054 : vector<2x256xf32>
    %2056 = vector.extract_strided_slice %1580 {offsets = [6, 0], sizes = [2, 256], strides = [1, 1]} : vector<8x256xf32> to vector<2x256xf32>
    %2057 = vector.broadcast %142 : f32 to vector<2x256xf32>
    %2058 = arith.mulf %2056, %2057 : vector<2x256xf32>
    %2059 = arith.addf %2055, %2058 : vector<2x256xf32>
    %2060 = vector.shape_cast %2059 : vector<2x256xf32> to vector<1x2x256xf32>
    %cst_125 = arith.constant dense<0.000000e+00> : vector<1xf32>
    %2061 = vector.multi_reduction <add>, %2060, %cst_125 [1, 2] : vector<1x2x256xf32> to vector<1xf32>
    %2062 = vector.shape_cast %2061 : vector<1xf32> to vector<1x1x1xf32>
    %2063 = vector.extract %2062[0, 0, 0] : f32 from vector<1x1x1xf32>
    %cst_126 = arith.constant 0.001953125 : f32
    %2064 = arith.mulf %2063, %cst_126 : f32
    %2065 = arith.mulf %2059, %2059 : vector<2x256xf32>
    %2066 = vector.shape_cast %2065 : vector<2x256xf32> to vector<1x2x256xf32>
    %cst_127 = arith.constant dense<0.000000e+00> : vector<1xf32>
    %2067 = vector.multi_reduction <add>, %2066, %cst_127 [1, 2] : vector<1x2x256xf32> to vector<1xf32>
    %2068 = vector.shape_cast %2067 : vector<1xf32> to vector<1x1x1xf32>
    %2069 = vector.extract %2068[0, 0, 0] : f32 from vector<1x1x1xf32>
    %cst_128 = arith.constant 0.001953125 : f32
    %2070 = arith.mulf %2069, %cst_128 : f32
    %2071 = arith.mulf %2064, %2064 : f32
    %2072 = arith.subf %2070, %2071 : f32
    %cst_129 = arith.constant 9.99999974E-6 : f32
    %2073 = arith.addf %2072, %cst_129 : f32
    %2074 = math.rsqrt %2073 : f32
    %2075 = arith.mulf %146, %2074 : f32
    %2076 = arith.mulf %2064, %2075 : f32
    %2077 = arith.subf %150, %2076 : f32
    %2078 = vector.broadcast %2075 : f32 to vector<2x256xf32>
    %2079 = arith.mulf %2059, %2078 : vector<2x256xf32>
    %2080 = vector.broadcast %2077 : f32 to vector<2x256xf32>
    %2081 = arith.addf %2079, %2080 : vector<2x256xf32>
    %cst_130 = arith.constant 0.000000e+00 : f32
    %2082 = vector.broadcast %cst_130 : f32 to vector<2x256xf32>
    %2083 = arith.maximumf %2081, %2082 : vector<2x256xf32>
    %c4_131 = arith.constant 4 : index
    %c0_132 = arith.constant 0 : index
    %2084 = vector.load %arg5[%c4_131, %c0_132] : memref<8x256xf32, #tpu.memory_space<vmem>>, vector<2x256xf32>
    tpu.vector_store %arg5[%c4_131, %c0_132], %2083 {strides = array<i32>} : memref<8x256xf32, #tpu.memory_space<vmem>>, vector<2x256xf32>,
    %2085 = vector.extract_strided_slice %1559 {offsets = [0, 0], sizes = [2, 256], strides = [1, 1]} : vector<8x256xf32> to vector<2x256xf32>
    %2086 = vector.broadcast %3 : f32 to vector<2x256xf32>
    %2087 = arith.mulf %2085, %2086 : vector<2x256xf32>
    %2088 = vector.extract_strided_slice %1559 {offsets = [2, 0], sizes = [2, 256], strides = [1, 1]} : vector<8x256xf32> to vector<2x256xf32>
    %2089 = vector.broadcast %7 : f32 to vector<2x256xf32>
    %2090 = arith.mulf %2088, %2089 : vector<2x256xf32>
    %2091 = arith.addf %2087, %2090 : vector<2x256xf32>
    %2092 = vector.extract_strided_slice %1559 {offsets = [4, 0], sizes = [2, 256], strides = [1, 1]} : vector<8x256xf32> to vector<2x256xf32>
    %2093 = vector.broadcast %11 : f32 to vector<2x256xf32>
    %2094 = arith.mulf %2092, %2093 : vector<2x256xf32>
    %2095 = arith.addf %2091, %2094 : vector<2x256xf32>
    %2096 = vector.extract_strided_slice %1559 {offsets = [6, 0], sizes = [2, 256], strides = [1, 1]} : vector<8x256xf32> to vector<2x256xf32>
    %2097 = vector.broadcast %15 : f32 to vector<2x256xf32>
    %2098 = arith.mulf %2096, %2097 : vector<2x256xf32>
    %2099 = arith.addf %2095, %2098 : vector<2x256xf32>
    %2100 = vector.extract_strided_slice %1562 {offsets = [0, 0], sizes = [2, 256], strides = [1, 1]} : vector<8x256xf32> to vector<2x256xf32>
    %2101 = vector.broadcast %19 : f32 to vector<2x256xf32>
    %2102 = arith.mulf %2100, %2101 : vector<2x256xf32>
    %2103 = arith.addf %2099, %2102 : vector<2x256xf32>
    %2104 = vector.extract_strided_slice %1562 {offsets = [2, 0], sizes = [2, 256], strides = [1, 1]} : vector<8x256xf32> to vector<2x256xf32>
    %2105 = vector.broadcast %23 : f32 to vector<2x256xf32>
    %2106 = arith.mulf %2104, %2105 : vector<2x256xf32>
    %2107 = arith.addf %2103, %2106 : vector<2x256xf32>
    %2108 = vector.extract_strided_slice %1562 {offsets = [4, 0], sizes = [2, 256], strides = [1, 1]} : vector<8x256xf32> to vector<2x256xf32>
    %2109 = vector.broadcast %27 : f32 to vector<2x256xf32>
    %2110 = arith.mulf %2108, %2109 : vector<2x256xf32>
    %2111 = arith.addf %2107, %2110 : vector<2x256xf32>
    %2112 = vector.extract_strided_slice %1562 {offsets = [6, 0], sizes = [2, 256], strides = [1, 1]} : vector<8x256xf32> to vector<2x256xf32>
    %2113 = vector.broadcast %31 : f32 to vector<2x256xf32>
    %2114 = arith.mulf %2112, %2113 : vector<2x256xf32>
    %2115 = arith.addf %2111, %2114 : vector<2x256xf32>
    %2116 = vector.extract_strided_slice %1565 {offsets = [0, 0], sizes = [2, 256], strides = [1, 1]} : vector<8x256xf32> to vector<2x256xf32>
    %2117 = vector.broadcast %35 : f32 to vector<2x256xf32>
    %2118 = arith.mulf %2116, %2117 : vector<2x256xf32>
    %2119 = arith.addf %2115, %2118 : vector<2x256xf32>
    %2120 = vector.extract_strided_slice %1565 {offsets = [2, 0], sizes = [2, 256], strides = [1, 1]} : vector<8x256xf32> to vector<2x256xf32>
    %2121 = vector.broadcast %39 : f32 to vector<2x256xf32>
    %2122 = arith.mulf %2120, %2121 : vector<2x256xf32>
    %2123 = arith.addf %2119, %2122 : vector<2x256xf32>
    %2124 = vector.extract_strided_slice %1565 {offsets = [4, 0], sizes = [2, 256], strides = [1, 1]} : vector<8x256xf32> to vector<2x256xf32>
    %2125 = vector.broadcast %43 : f32 to vector<2x256xf32>
    %2126 = arith.mulf %2124, %2125 : vector<2x256xf32>
    %2127 = arith.addf %2123, %2126 : vector<2x256xf32>
    %2128 = vector.extract_strided_slice %1565 {offsets = [6, 0], sizes = [2, 256], strides = [1, 1]} : vector<8x256xf32> to vector<2x256xf32>
    %2129 = vector.broadcast %47 : f32 to vector<2x256xf32>
    %2130 = arith.mulf %2128, %2129 : vector<2x256xf32>
    %2131 = arith.addf %2127, %2130 : vector<2x256xf32>
    %2132 = vector.extract_strided_slice %1568 {offsets = [0, 0], sizes = [2, 256], strides = [1, 1]} : vector<8x256xf32> to vector<2x256xf32>
    %2133 = vector.broadcast %51 : f32 to vector<2x256xf32>
    %2134 = arith.mulf %2132, %2133 : vector<2x256xf32>
    %2135 = arith.addf %2131, %2134 : vector<2x256xf32>
    %2136 = vector.extract_strided_slice %1568 {offsets = [2, 0], sizes = [2, 256], strides = [1, 1]} : vector<8x256xf32> to vector<2x256xf32>
    %2137 = vector.broadcast %55 : f32 to vector<2x256xf32>
    %2138 = arith.mulf %2136, %2137 : vector<2x256xf32>
    %2139 = arith.addf %2135, %2138 : vector<2x256xf32>
    %2140 = vector.extract_strided_slice %1568 {offsets = [4, 0], sizes = [2, 256], strides = [1, 1]} : vector<8x256xf32> to vector<2x256xf32>
    %2141 = vector.broadcast %59 : f32 to vector<2x256xf32>
    %2142 = arith.mulf %2140, %2141 : vector<2x256xf32>
    %2143 = arith.addf %2139, %2142 : vector<2x256xf32>
    %2144 = vector.extract_strided_slice %1568 {offsets = [6, 0], sizes = [2, 256], strides = [1, 1]} : vector<8x256xf32> to vector<2x256xf32>
    %2145 = vector.broadcast %63 : f32 to vector<2x256xf32>
    %2146 = arith.mulf %2144, %2145 : vector<2x256xf32>
    %2147 = arith.addf %2143, %2146 : vector<2x256xf32>
    %2148 = vector.extract_strided_slice %1556 {offsets = [0, 0], sizes = [2, 256], strides = [1, 1]} : vector<8x256xf32> to vector<2x256xf32>
    %2149 = vector.broadcast %67 : f32 to vector<2x256xf32>
    %2150 = arith.mulf %2148, %2149 : vector<2x256xf32>
    %2151 = arith.addf %2147, %2150 : vector<2x256xf32>
    %2152 = vector.extract_strided_slice %1556 {offsets = [2, 0], sizes = [2, 256], strides = [1, 1]} : vector<8x256xf32> to vector<2x256xf32>
    %2153 = vector.broadcast %71 : f32 to vector<2x256xf32>
    %2154 = arith.mulf %2152, %2153 : vector<2x256xf32>
    %2155 = arith.addf %2151, %2154 : vector<2x256xf32>
    %2156 = vector.extract_strided_slice %1556 {offsets = [4, 0], sizes = [2, 256], strides = [1, 1]} : vector<8x256xf32> to vector<2x256xf32>
    %2157 = vector.broadcast %75 : f32 to vector<2x256xf32>
    %2158 = arith.mulf %2156, %2157 : vector<2x256xf32>
    %2159 = arith.addf %2155, %2158 : vector<2x256xf32>
    %2160 = vector.extract_strided_slice %1556 {offsets = [6, 0], sizes = [2, 256], strides = [1, 1]} : vector<8x256xf32> to vector<2x256xf32>
    %2161 = vector.broadcast %79 : f32 to vector<2x256xf32>
    %2162 = arith.mulf %2160, %2161 : vector<2x256xf32>
    %2163 = arith.addf %2159, %2162 : vector<2x256xf32>
    %2164 = vector.extract_strided_slice %1571 {offsets = [0, 0], sizes = [2, 256], strides = [1, 1]} : vector<8x256xf32> to vector<2x256xf32>
    %2165 = vector.broadcast %83 : f32 to vector<2x256xf32>
    %2166 = arith.mulf %2164, %2165 : vector<2x256xf32>
    %2167 = arith.addf %2163, %2166 : vector<2x256xf32>
    %2168 = vector.extract_strided_slice %1571 {offsets = [2, 0], sizes = [2, 256], strides = [1, 1]} : vector<8x256xf32> to vector<2x256xf32>
    %2169 = vector.broadcast %87 : f32 to vector<2x256xf32>
    %2170 = arith.mulf %2168, %2169 : vector<2x256xf32>
    %2171 = arith.addf %2167, %2170 : vector<2x256xf32>
    %2172 = vector.extract_strided_slice %1571 {offsets = [4, 0], sizes = [2, 256], strides = [1, 1]} : vector<8x256xf32> to vector<2x256xf32>
    %2173 = vector.broadcast %91 : f32 to vector<2x256xf32>
    %2174 = arith.mulf %2172, %2173 : vector<2x256xf32>
    %2175 = arith.addf %2171, %2174 : vector<2x256xf32>
    %2176 = vector.extract_strided_slice %1571 {offsets = [6, 0], sizes = [2, 256], strides = [1, 1]} : vector<8x256xf32> to vector<2x256xf32>
    %2177 = vector.broadcast %95 : f32 to vector<2x256xf32>
    %2178 = arith.mulf %2176, %2177 : vector<2x256xf32>
    %2179 = arith.addf %2175, %2178 : vector<2x256xf32>
    %2180 = vector.extract_strided_slice %1574 {offsets = [0, 0], sizes = [2, 256], strides = [1, 1]} : vector<8x256xf32> to vector<2x256xf32>
    %2181 = vector.broadcast %99 : f32 to vector<2x256xf32>
    %2182 = arith.mulf %2180, %2181 : vector<2x256xf32>
    %2183 = arith.addf %2179, %2182 : vector<2x256xf32>
    %2184 = vector.extract_strided_slice %1574 {offsets = [2, 0], sizes = [2, 256], strides = [1, 1]} : vector<8x256xf32> to vector<2x256xf32>
    %2185 = vector.broadcast %103 : f32 to vector<2x256xf32>
    %2186 = arith.mulf %2184, %2185 : vector<2x256xf32>
    %2187 = arith.addf %2183, %2186 : vector<2x256xf32>
    %2188 = vector.extract_strided_slice %1574 {offsets = [4, 0], sizes = [2, 256], strides = [1, 1]} : vector<8x256xf32> to vector<2x256xf32>
    %2189 = vector.broadcast %107 : f32 to vector<2x256xf32>
    %2190 = arith.mulf %2188, %2189 : vector<2x256xf32>
    %2191 = arith.addf %2187, %2190 : vector<2x256xf32>
    %2192 = vector.extract_strided_slice %1574 {offsets = [6, 0], sizes = [2, 256], strides = [1, 1]} : vector<8x256xf32> to vector<2x256xf32>
    %2193 = vector.broadcast %111 : f32 to vector<2x256xf32>
    %2194 = arith.mulf %2192, %2193 : vector<2x256xf32>
    %2195 = arith.addf %2191, %2194 : vector<2x256xf32>
    %2196 = vector.extract_strided_slice %1577 {offsets = [0, 0], sizes = [2, 256], strides = [1, 1]} : vector<8x256xf32> to vector<2x256xf32>
    %2197 = vector.broadcast %115 : f32 to vector<2x256xf32>
    %2198 = arith.mulf %2196, %2197 : vector<2x256xf32>
    %2199 = arith.addf %2195, %2198 : vector<2x256xf32>
    %2200 = vector.extract_strided_slice %1577 {offsets = [2, 0], sizes = [2, 256], strides = [1, 1]} : vector<8x256xf32> to vector<2x256xf32>
    %2201 = vector.broadcast %119 : f32 to vector<2x256xf32>
    %2202 = arith.mulf %2200, %2201 : vector<2x256xf32>
    %2203 = arith.addf %2199, %2202 : vector<2x256xf32>
    %2204 = vector.extract_strided_slice %1577 {offsets = [4, 0], sizes = [2, 256], strides = [1, 1]} : vector<8x256xf32> to vector<2x256xf32>
    %2205 = vector.broadcast %123 : f32 to vector<2x256xf32>
    %2206 = arith.mulf %2204, %2205 : vector<2x256xf32>
    %2207 = arith.addf %2203, %2206 : vector<2x256xf32>
    %2208 = vector.extract_strided_slice %1577 {offsets = [6, 0], sizes = [2, 256], strides = [1, 1]} : vector<8x256xf32> to vector<2x256xf32>
    %2209 = vector.broadcast %127 : f32 to vector<2x256xf32>
    %2210 = arith.mulf %2208, %2209 : vector<2x256xf32>
    %2211 = arith.addf %2207, %2210 : vector<2x256xf32>
    %2212 = vector.extract_strided_slice %1580 {offsets = [0, 0], sizes = [2, 256], strides = [1, 1]} : vector<8x256xf32> to vector<2x256xf32>
    %2213 = vector.broadcast %131 : f32 to vector<2x256xf32>
    %2214 = arith.mulf %2212, %2213 : vector<2x256xf32>
    %2215 = arith.addf %2211, %2214 : vector<2x256xf32>
    %2216 = vector.extract_strided_slice %1580 {offsets = [2, 0], sizes = [2, 256], strides = [1, 1]} : vector<8x256xf32> to vector<2x256xf32>
    %2217 = vector.broadcast %135 : f32 to vector<2x256xf32>
    %2218 = arith.mulf %2216, %2217 : vector<2x256xf32>
    %2219 = arith.addf %2215, %2218 : vector<2x256xf32>
    %2220 = vector.extract_strided_slice %1580 {offsets = [4, 0], sizes = [2, 256], strides = [1, 1]} : vector<8x256xf32> to vector<2x256xf32>
    %2221 = vector.broadcast %139 : f32 to vector<2x256xf32>
    %2222 = arith.mulf %2220, %2221 : vector<2x256xf32>
    %2223 = arith.addf %2219, %2222 : vector<2x256xf32>
    %2224 = vector.extract_strided_slice %1580 {offsets = [6, 0], sizes = [2, 256], strides = [1, 1]} : vector<8x256xf32> to vector<2x256xf32>
    %2225 = vector.broadcast %143 : f32 to vector<2x256xf32>
    %2226 = arith.mulf %2224, %2225 : vector<2x256xf32>
    %2227 = arith.addf %2223, %2226 : vector<2x256xf32>
    %2228 = vector.shape_cast %2227 : vector<2x256xf32> to vector<1x2x256xf32>
    %cst_133 = arith.constant dense<0.000000e+00> : vector<1xf32>
    %2229 = vector.multi_reduction <add>, %2228, %cst_133 [1, 2] : vector<1x2x256xf32> to vector<1xf32>
    %2230 = vector.shape_cast %2229 : vector<1xf32> to vector<1x1x1xf32>
    %2231 = vector.extract %2230[0, 0, 0] : f32 from vector<1x1x1xf32>
    %cst_134 = arith.constant 0.001953125 : f32
    %2232 = arith.mulf %2231, %cst_134 : f32
    %2233 = arith.mulf %2227, %2227 : vector<2x256xf32>
    %2234 = vector.shape_cast %2233 : vector<2x256xf32> to vector<1x2x256xf32>
    %cst_135 = arith.constant dense<0.000000e+00> : vector<1xf32>
    %2235 = vector.multi_reduction <add>, %2234, %cst_135 [1, 2] : vector<1x2x256xf32> to vector<1xf32>
    %2236 = vector.shape_cast %2235 : vector<1xf32> to vector<1x1x1xf32>
    %2237 = vector.extract %2236[0, 0, 0] : f32 from vector<1x1x1xf32>
    %cst_136 = arith.constant 0.001953125 : f32
    %2238 = arith.mulf %2237, %cst_136 : f32
    %2239 = arith.mulf %2232, %2232 : f32
    %2240 = arith.subf %2238, %2239 : f32
    %cst_137 = arith.constant 9.99999974E-6 : f32
    %2241 = arith.addf %2240, %cst_137 : f32
    %2242 = math.rsqrt %2241 : f32
    %2243 = arith.mulf %147, %2242 : f32
    %2244 = arith.mulf %2232, %2243 : f32
    %2245 = arith.subf %151, %2244 : f32
    %2246 = vector.broadcast %2243 : f32 to vector<2x256xf32>
    %2247 = arith.mulf %2227, %2246 : vector<2x256xf32>
    %2248 = vector.broadcast %2245 : f32 to vector<2x256xf32>
    %2249 = arith.addf %2247, %2248 : vector<2x256xf32>
    %cst_138 = arith.constant 0.000000e+00 : f32
    %2250 = vector.broadcast %cst_138 : f32 to vector<2x256xf32>
    %2251 = arith.maximumf %2249, %2250 : vector<2x256xf32>
    %c6_139 = arith.constant 6 : index
    %c0_140 = arith.constant 0 : index
    %2252 = vector.load %arg5[%c6_139, %c0_140] : memref<8x256xf32, #tpu.memory_space<vmem>>, vector<2x256xf32>
    tpu.vector_store %arg5[%c6_139, %c0_140], %2251 {strides = array<i32>} : memref<8x256xf32, #tpu.memory_space<vmem>>, vector<2x256xf32>,
    return
  }
}

</mosaic_0001>

<bundles_post_ra>
// kernel: tpu_custom_call.1
= control target key start
LH: loop header
LB: loop body
LE: loop exit
PB: predicated region body
PF: predicated region fallthrough
CT: control target
= control target key end

     0   :  { %s9869_s0 = inlined_call_operand.hbm [shape: f32[144], index: 0, kind: input, shape index: {}]   ;;  %s9870_s1 = inlined_call_operand.vmem [shape: f32[4], index: 1, kind: input, shape index: {}]   ;;  %s9871_s2 = inlined_call_operand.vmem [shape: f32[4], index: 2, kind: input, shape index: {}]   ;;  %s9872_s3 = inlined_call_operand.hbm [shape: f32[9,256], index: 3, kind: input, shape index: {}]   ;;  %s9873_s4 = inlined_call_operand.hbm [shape: f32[8,256], index: 4, kind: input, shape index: {}]   ;;  %s9874_s5 = inlined_call_operand.hbm [shape: f32[8,256], index: 5, kind: output, shape index: {}]  }
   0x1   :  { %10449 = sst [smem:[#allocation223_spill]] %s9874_s5 }
   0x2   :  { %10 = vsyncpa [#allocation5], 0 }
   0x3   :  { %11 = vsyncpa [#allocation6], 0 }
   0x4   :  { %12 = vsyncpa [#allocation9], 0 }
   0x5   :  { %13 = vsyncpa [#allocation3], 0 }
   0x6   :  { %14 = vsyncpa [#allocation12], 0 }
   0x7   :  { %15 = vsyncpa [#allocation4], 0  ;;  %s30_s20 = sshll.u32 %s9870_s1, 4  ;;  %s5245_s23 = scalar_lea.hbm %s9869_s0, 32  ;;  %s31_s20 = int_to_ptr.vmem [resolvable:$true] %s30_s20 }
   0x8   :  { %p5246_p0 = scmp.ne.s32.totalorder %s9869_s0, %s5245_s23  ;;  %p5249_p1 = scmp.lt.u32.totalorder %s5245_s23, %s9869_s0 }
   0xa   :  { %p5251_p2 = pnand %p5249_p1, %p5246_p0 }
   0xc   :  { %5254 = shalt.err (!%p5251_p2)
}
   0xd   :  { %s5357_s28 = smov [#allocation2]   ;;  %s5255_s1 = scalar_lea.vmem %s31_s20, 16 }
   0xe   :  { %23 = dma.hbm_to_smem %s9869_s0, 32, %s5357_s28, [#allocation5]  }
   0xf   :  { %p5256_p3 = scmp.ne.s32.totalorder %s31_s20, %s5255_s1  ;;  %p5260_p4 = scmp.lt.s32.totalorder %s31_s20, %s31_s20 }
  0x10   :  { %p5261_p5 = scmp.lt.s32.totalorder %s5255_s1, %s5255_s1 }
  0x12   :  { %p5262_p6 = por %p5261_p5, %p5260_p4 }
  0x14   :  { %p5263_p7 = pnand %p5262_p6, %p5256_p3 }
  0x16   :  { %5266 = shalt.err (!%p5263_p7)
}
  0x17   :  { %s5358_s6 = smov [#allocation7]   ;;  %s40_s9 = sshll.u32 %s9871_s2, 4  ;;  %s41_s9 = int_to_ptr.vmem [resolvable:$true] %s40_s9 }
  0x18   :  { %33 = dma.vmem_to_smem %s31_s20, 16, %s5358_s6, [#allocation6]  }
  0x19   :  { %s5267_s10 = scalar_lea.vmem %s41_s9, 16  ;;  %p5272_p9 = scmp.lt.s32.totalorder %s41_s9, %s41_s9 }
  0x1a   :  { %p5268_p8 = scmp.ne.s32.totalorder %s41_s9, %s5267_s10  ;;  %p5273_p10 = scmp.lt.s32.totalorder %s5267_s10, %s5267_s10 }
  0x1c   :  { %p5274_p11 = por %p5273_p10, %p5272_p9 }
  0x1e   :  { %p5275_p12 = pnand %p5274_p11, %p5268_p8 }
  0x20   :  { %5278 = shalt.err (!%p5275_p12)
}
  0x21   :  { %s5359_s0 = smov [#allocation8]   ;;  %s5360_s11 = smov [#allocation10]  }
  0x22   :  { %43 = dma.vmem_to_smem %s41_s9, 16, %s5359_s0, [#allocation9]  }
  0x23   :  { %s49_s12 = sshll.u32 %s5360_s11, 4  ;;  %s5279_s15 = scalar_lea.hbm %s9872_s3, 512  ;;  %s50_s12 = int_to_ptr.vmem [resolvable:$true] %s49_s12 }
  0x24   :  { %p5280_p13 = scmp.ne.s32.totalorder %s9872_s3, %s5279_s15  ;;  %p5283_p0 = scmp.lt.u32.totalorder %s5279_s15, %s9872_s3 }
  0x26   :  { %p5285_p1 = pnand %p5283_p0, %p5280_p13 }
  0x28   :  { %5288 = shalt.err (!%p5285_p1)
}
  0x29   :  { %s5289_s19 = scalar_lea.vmem %s50_s12, 512  ;;  %p5294_p3 = scmp.lt.s32.totalorder %s50_s12, %s50_s12 }
  0x2a   :  { %p5290_p2 = scmp.ne.s32.totalorder %s50_s12, %s5289_s19  ;;  %p5295_p4 = scmp.lt.s32.totalorder %s5289_s19, %s5289_s19 }
  0x2c   :  { %p5296_p5 = por %p5295_p4, %p5294_p3 }
  0x2e   :  { %p5297_p6 = pnand %p5296_p5, %p5290_p2 }
  0x30   :  { %5300 = shalt.err (!%p5297_p6)
}
  0x31   :  { %s5361_s20 = smov 256   ;;  %s9885_s21 = smov 16  }
  0x32   :  { %55 = dma.hbm_to_vmem [thread:$0]  %s9872_s3, 512, %s50_s12, [#allocation3], %s5361_s20, %s5361_s20, %s9885_s21  }
  0x33   :  { %s5363_s24 = smov [#allocation11]   ;;  %s5301_s28 = scalar_lea.hbm %s9873_s4, 256 }
  0x34   :  { %s62_s25 = sshll.u32 %s5363_s24, 4  ;;  %p5302_p7 = scmp.ne.s32.totalorder %s9873_s4, %s5301_s28  ;;  %s63_s25 = int_to_ptr.vmem [resolvable:$true] %s62_s25 }
  0x35   :  { %p5305_p8 = scmp.lt.u32.totalorder %s5301_s28, %s9873_s4 }
  0x37   :  { %p5307_p9 = pnand %p5305_p8, %p5302_p7 }
  0x39   :  { %5310 = shalt.err (!%p5307_p9)
}
  0x3a   :  { %s5311_s7 = scalar_lea.vmem %s63_s25, 256  ;;  %p5316_p11 = scmp.lt.s32.totalorder %s63_s25, %s63_s25 }
  0x3b   :  { %p5312_p10 = scmp.ne.s32.totalorder %s63_s25, %s5311_s7  ;;  %p5317_p12 = scmp.lt.s32.totalorder %s5311_s7, %s5311_s7 }
  0x3d   :  { %p5318_p13 = por %p5317_p12, %p5316_p11 }
  0x3f   :  { %p5319_p0 = pnand %p5318_p13, %p5312_p10 }
  0x41   :  { %5322 = shalt.err (!%p5319_p0)
}
  0x42   :  { %65 = dma.hbm_to_vmem [thread:$0]  %s9873_s4, 256, %s63_s25, [#allocation12]  }
  0x43   :  { %5345 = dma.done.wait [#allocation5], 32  }
  0x44   :  { %5346 = vsyncadd [#allocation5], 4294967264 }
  0x45   :  { %5347 = dma.done.wait [#allocation6], 16  }
  0x46   :  { %5348 = vsyncadd [#allocation6], 4294967280 }
  0x47   :  { %5349 = dma.done.wait [#allocation9], 16  }
  0x48   :  { %5350 = vsyncadd [#allocation9], 4294967280 }
  0x49   :  { %5351 = dma.done.wait [#allocation3], 512  }
  0x4a   :  { %5352 = vsyncadd [#allocation3], 4294966784 }
  0x4b   :  { %5353 = dma.done.wait [#allocation12], 256  }
  0x4c   :  { %5354 = vsyncadd [#allocation12], 4294967040 }
  0x4d   :  { %81 = sfence }
  0x4e   :  { %v5445_v0 = vld [vmem:[#allocation11] sm:$0xff]  ;;  %s9889_s9 = smov 17   ;;  %v5451_v1 = vld [vmem:[#allocation11 + $0x8] sm:$0xff]  ;;  %s9887_s4 = smov 15   ;;  %v255_v2 = vlaneseq  ;;  %vm753_vm8 = vcmask 1041408  }
  0x4f   :  { %251 = vrot.lane.b32.xlu0 %v5445_v0, %s9889_s9  ;;  %273 = vrot.lane.b32.xlu1 %v5445_v0, %s9885_s21  ;;  %s9883_s10 = smov 1   ;;  %s9881_s0 = smov 127   ;;  %v234_v4 = vld [vmem:[#allocation10] ss:$8 sm:$0x3] }
  0x50   :  { %s9879_s11 = smov 113   ;;  %s9877_s12 = smov 112   ;;  %v262_v3 = vshrl.u32 %v255_v2, 7  ;;  %v236_v5 = vld [vmem:[#allocation10 + $0x1] ss:$8 sm:$0x3] }
  0x51   :  { %s9875_s13 = smov 111   ;;  %s5481_s14 = sld [smem:[#allocation2]]  ;;  %v238_v8 = vld [vmem:[#allocation10 + $0x2] ss:$8 sm:$0x3]  ;;  %v5557_v13 = vand.u32 127, %v255_v2 }
  0x52   :  { %s5483_s15 = sld [smem:[#allocation2 + $0x4]]  ;;  %s5485_s16 = sld [smem:[#allocation2 + $0x8]]  ;;  %v263_v6 = vsub.s32 0, %v262_v3  ;;  %v267_v7 = vsub.s32 1, %v262_v3 }
  0x53   :  { %253 = vrot.lane.b32.xlu0 %v5451_v1, %s9889_s9  ;;  %275 = vrot.lane.b32.xlu1 %v5451_v1, %s9885_s21  ;;  %s5487_s17 = sld [smem:[#allocation2 + $0xc]]  ;;  %s5489_s2 = sld [smem:[#allocation2 + $0x10]]  ;;  %v240_v9 = vld [vmem:[#allocation10 + $0x3] ss:$8 sm:$0x3]  ;;  %10464 = vst [vmem:[#allocation34_spill] sm:$0xff] %v5557_v13 }
  0x54   :  { %s5491_s18 = sld [smem:[#allocation2 + $0x14]]  ;;  %s5493_s19 = sld [smem:[#allocation2 + $0x18]]  ;;  %v242_v10 = vld [vmem:[#allocation10 + $0x5] ss:$8 sm:$0x3]  ;;  %v5559_v14 = vrot.slane %v234_v4, %v263_v6  ;;  %v5561_v15 = vrot.slane %v234_v4, %v267_v7  ;;  %v5563_v16 = vrot.slane %v236_v5, %v263_v6  ;;  %v5569_v17 = vrot.slane %v236_v5, %v267_v7 }
  0x55   :  { %s5495_s20 = sld [smem:[#allocation2 + $0x1c]]  ;;  %s5497_s22 = sld [smem:[#allocation2 + $0x20]]  ;;  %v244_v11 = vld [vmem:[#allocation10 + $0x6] ss:$8 sm:$0x3]  ;;  %v5571_v18 = vrot.slane %v238_v8, %v263_v6  ;;  %v5573_v19 = vrot.slane %v238_v8, %v267_v7  ;;  %v5575_v20 = vrot.slane %v240_v9, %v263_v6  ;;  %v5581_v22 = vrot.slane %v240_v9, %v267_v7 }
  0x56   :  { %s5499_s23 = sld [smem:[#allocation2 + $0x24]]  ;;  %s5501_s24 = sld [smem:[#allocation2 + $0x28]]  ;;  %v246_v12 = vld [vmem:[#allocation10 + $0x7] ss:$8 sm:$0x3]  ;;  %10465 = vst [vmem:[#allocation35_spill] sm:$0xff] %v5559_v14  ;;  %v5583_v23 = vrot.slane %v242_v10, %v263_v6  ;;  %v5585_v24 = vrot.slane %v242_v10, %v267_v7  ;;  %v5587_v25 = vrot.slane %v244_v11, %v263_v6  ;;  %v5593_v26 = vrot.slane %v244_v11, %v267_v7 }
  0x57   :  { %295 = vrot.lane.b32.xlu1 %v5451_v1, %s9887_s4  ;;  %293 = vrot.lane.b32.xlu0 %v5445_v0, %s9887_s4  ;;  %s5503_s25 = sld [smem:[#allocation2 + $0x2c]]  ;;  %s5505_s26 = sld [smem:[#allocation2 + $0x30]]  ;;  %10466 = vst [vmem:[#allocation36_spill] sm:$0xff] %v5561_v15  ;;  %10467 = vst [vmem:[#allocation37_spill] sm:$0xff] %v5563_v16  ;;  %v5596_v27 = vstv %s5481_s14  ;;  %v5608_v30 = vrot.slane %v246_v12, %v263_v6  ;;  %v5610_v31 = vrot.slane %v246_v12, %v267_v7 }
  0x58   :  { %s5507_s27 = sld [smem:[#allocation2 + $0x34]]  ;;  %s5509_s28 = sld [smem:[#allocation2 + $0x38]]  ;;  %10469 = vst [vmem:[#allocation39_spill] sm:$0xff] %v5569_v17  ;;  %10470 = vst [vmem:[#allocation40_spill] sm:$0xff] %v5571_v18  ;;  %v5599_v28 = vstv %s5483_s15  ;;  %v5613_v32 = vstv %s5485_s16  ;;  %vm257_vm0 = vcmp.lt.s32.totalorder %v5557_v13, 17  ;;  %vm277_vm1 = vcmp.lt.s32.totalorder %v5557_v13, 16 }
  0x59   :  { %s5511_s29 = sld [smem:[#allocation2 + $0x3c]]  ;;  %s5513_s30 = sld [smem:[#allocation2 + $0x1]]  ;;  %10471 = vst [vmem:[#allocation41_spill] sm:$0xff] %v5573_v19  ;;  %10472 = vst [vmem:[#allocation42_spill] sm:$0xff] %v5575_v20  ;;  %v5623_v34 = vstv %s5487_s17  ;;  %v5626_v35 = vstv %s5489_s2  ;;  %vm297_vm2 = vcmp.lt.s32.totalorder %v5557_v13, 15  ;;  %vm317_vm3 = vcmp.lt.s32.totalorder %v5557_v13, 1 }
  0x5a   :  { %s5515_s1 = sld [smem:[#allocation2 + $0x5]]  ;;  %s5517_s6 = sld [smem:[#allocation2 + $0x40]]  ;;  %v248_v21 = vld [vmem:[#allocation10 + $0x10] ss:$8 sm:$0x3]  ;;  %10473 = vst [vmem:[#allocation43_spill] sm:$0xff] %v5581_v22  ;;  %v5629_v36 = vstv %s5491_s18  ;;  %v5643_v40 = vstv %s5493_s19 }
  0x5b   :  { %315 = vrot.lane.b32.xlu1 %v5451_v1, %s9883_s10  ;;  %313 = vrot.lane.b32.xlu0 %v5445_v0, %s9883_s10  ;;  %s5519_s7 = sld [smem:[#allocation2 + $0x9]]  ;;  %s5521_s3 = sld [smem:[#allocation2 + $0x44]]  ;;  %10474 = vst [vmem:[#allocation44_spill] sm:$0xff] %v5583_v23  ;;  %10475 = vst [vmem:[#allocation45_spill] sm:$0xff] %v5585_v24  ;;  %v5638_v38 = vrot.slane %v248_v21, %v263_v6  ;;  %v5640_v39 = vrot.slane %v248_v21, %v267_v7  ;;  %v5654_v42 = vstv %s5495_s20 }
  0x5c   :  { %s5523_s8 = sld [smem:[#allocation2 + $0x48]]  ;;  %s5533_s10 = sld [smem:[#allocation2 + $0x5c]]  ;;  %10476 = vst [vmem:[#allocation46_spill] sm:$0xff] %v5587_v25  ;;  %10477 = vst [vmem:[#allocation47_spill] sm:$0xff] %v5593_v26  ;;  %v5657_v43 = vstv %s5497_s22  ;;  %v5672_v46 = vstv %s5499_s23  ;;  %v5690_v50 = vstv %s5501_s24  ;;  %vm337_vm4 = vcmp.lt.s32.totalorder %v5557_v13, 127 }
  0x5d   :  { %s5535_s21 = sld [smem:[#allocation2 + $0x60]]  ;;  %s5537_s4 = sld [smem:[#allocation2 + $0x64]]  ;;  %10478 = vst [vmem:[#allocation48_spill] sm:$0xff] %v5596_v27  ;;  %10479 = vst [vmem:[#allocation49_spill] sm:$0xff] %v5599_v28  ;;  %v5693_v51 = vstv %s5503_s25  ;;  %v5696_v52 = vstv %s5505_s26  ;;  %vm357_vm5 = vcmp.lt.s32.totalorder %v5557_v13, 113  ;;  %vm377_vm6 = vcmp.lt.s32.totalorder %v5557_v13, 112 }
  0x5e   :  { %s5539_s9 = sld [smem:[#allocation2 + $0x68]]  ;;  %s5541_s5 = sld [smem:[#allocation2 + $0x6c]]  ;;  %10481 = vst [vmem:[#allocation51_spill] sm:$0xff] %v5608_v30  ;;  %10482 = vst [vmem:[#allocation52_spill] sm:$0xff] %v5610_v31  ;;  %v5707_v54 = vstv %s5507_s27  ;;  %v5710_v55 = vstv %s5509_s28  ;;  %vm397_vm7 = vcmp.lt.s32.totalorder %v5557_v13, 111 }
  0x5f   :  { %335 = vrot.lane.b32.xlu1 %v5451_v1, %s9881_s0  ;;  %333 = vrot.lane.b32.xlu0 %v5445_v0, %s9881_s0  ;;  %s5531_s0 = sld [smem:[#allocation2 + $0x58]]  ;;  %10483 = vst [vmem:[#allocation53_spill] sm:$0xff] %v5613_v32  ;;  %s5618_s14 = sld [smem:[#allocation2 + $0x29]]  ;;  %10485 = vst [vmem:[#allocation55_spill] sm:$0xff] %v5623_v34  ;;  %v5718_v57 = vstv %s5513_s30  ;;  %v5721_v58 = vstv %s5511_s29 }
  0x60   :  { %10450 = sst [smem:[#allocation20_spill]] %s5515_s1  ;;  %s5545_s1 = sld [smem:[#allocation2 + $0x74]]  ;;  %10486 = vst [vmem:[#allocation56_spill] sm:$0xff] %v5626_v35  ;;  %10487 = vst [vmem:[#allocation57_spill] sm:$0xff] %v5629_v36  ;;  %v5675_v47 = vstv %s5517_s6 }
  0x61   :  { %10451 = sst [smem:[#allocation21_spill]] %s5519_s7  ;;  %s5543_s7 = sld [smem:[#allocation2 + $0x70]]  ;;  %v5602_v29 = vstv %s5521_s3  ;;  %10489 = vst [vmem:[#allocation59_spill] sm:$0xff] %v5638_v38  ;;  %10490 = vst [vmem:[#allocation60_spill] sm:$0xff] %v5640_v39  ;;  %v5725_v59 = vmul.f32 %v5675_v47, %v5445_v0  ;;  %v5735_v62 = vmul.f32 %v5675_v47, %v5451_v1 }
  0x62   :  { %10453 = sst [smem:[#allocation23_spill]] %s5533_s10  ;;  %s5547_s10 = sld [smem:[#allocation2 + $0x78]]  ;;  %10480 = vst [vmem:[#allocation50_spill] sm:$0xff] %v5602_v29  ;;  %v5616_v33 = vstv %s5523_s8  ;;  %10491 = vst [vmem:[#allocation61_spill] sm:$0xff] %v5643_v40  ;;  %v5647_v41 = vmul.f32 %v5602_v29, %v5445_v0  ;;  %v5661_v44 = vmul.f32 %v5602_v29, %v5451_v1 }
  0x63   :  { %355 = vrot.lane.b32.xlu1 %v5451_v1, %s9879_s11  ;;  %353 = vrot.lane.b32.xlu0 %v5445_v0, %s9879_s11  ;;  %s5529_s11 = sld [smem:[#allocation2 + $0x54]]  ;;  %10455 = sst [smem:[#allocation25_spill]] %s5537_s4  ;;  %10484 = vst [vmem:[#allocation54_spill] sm:$0xff] %v5616_v33  ;;  %10493 = vst [vmem:[#allocation63_spill] sm:$0xff] %v5654_v42  ;;  %v5665_v45 = vmul.f32 %v5616_v33, %v5445_v0  ;;  %v5679_v48 = vmul.f32 %v5616_v33, %v5451_v1 }
  0x64   :  { %10454 = sst [smem:[#allocation24_spill]] %s5535_s21  ;;  %s5555_s4 = sld [smem:[#allocation2 + $0x88]]  ;;  %10494 = vst [vmem:[#allocation64_spill] sm:$0xff] %v5657_v43  ;;  %10496 = vst [vmem:[#allocation66_spill] sm:$0xff] %v5672_v46  ;;  %v5799_v60 = vstv %s5541_s5 }
  0x65   :  { %10452 = sst [smem:[#allocation22_spill]] %s5531_s0  ;;  %s5549_s21 = sld [smem:[#allocation2 + $0x7c]]  ;;  %10495 = vst [vmem:[#allocation65_spill] sm:$0xff] %v5665_v45  ;;  %10497 = vst [vmem:[#allocation67_spill] sm:$0xff] %v5675_v47 }
  0x66   :  { %10456 = sst [smem:[#allocation26_spill]] %s5539_s9  ;;  %s5551_s0 = sld [smem:[#allocation2 + $0x80]]  ;;  %10498 = vst [vmem:[#allocation68_spill] sm:$0xff] %v5679_v48  ;;  %10500 = vst [vmem:[#allocation70_spill] sm:$0xff] %v5690_v50 }
  0x67   :  { %375 = vrot.lane.b32.xlu1 %v5451_v1, %s9877_s12  ;;  %373 = vrot.lane.b32.xlu0 %v5445_v0, %s9877_s12  ;;  %s5527_s12 = sld [smem:[#allocation2 + $0x50]]  ;;  %10457 = sst [smem:[#allocation27_spill]] %s5543_s7  ;;  %10501 = vst [vmem:[#allocation71_spill] sm:$0xff] %v5693_v51  ;;  %10502 = vst [vmem:[#allocation72_spill] sm:$0xff] %v5696_v52 }
  0x68   :  { %10458 = sst [smem:[#allocation28_spill]] %s5545_s1  ;;  %s5553_s9 = sld [smem:[#allocation2 + $0x84]]  ;;  %10505 = vst [vmem:[#allocation75_spill] sm:$0xff] %v5707_v54  ;;  %10506 = vst [vmem:[#allocation76_spill] sm:$0xff] %v5710_v55 }
  0x69   :  { %10459 = sst [smem:[#allocation29_spill]] %s5547_s10  ;;  %s5565_s1 = sld [smem:[#allocation2 + $0x8c]]  ;;  %10510 = vst [vmem:[#allocation79_spill] sm:$0xff] %v5718_v57  ;;  %10511 = vst [vmem:[#allocation80_spill] sm:$0xff] %v5721_v58  ;;  %v5748_v5 = vstv %s5529_s11 }
  0x6a   :  { %10463 = sst [smem:[#allocation33_spill]] %s5555_s4  ;;  %s5577_s4 = sld [smem:[#allocation2 + $0x11]]  ;;  %10520 = vst [vmem:[#allocation82_spill] sm:$0xff] %v5748_v5  ;;  %10542 = vst [vmem:[#allocation95_spill] sm:$0xff] %v5799_v60 }
  0x6b   :  { %395 = vrot.lane.b32.xlu1 %v5451_v1, %s9875_s13  ;;  %393 = vrot.lane.b32.xlu0 %v5445_v0, %s9875_s13  ;;  %s5525_s13 = sld [smem:[#allocation2 + $0x4c]]  ;;  %10460 = sst [smem:[#allocation30_spill]] %s5549_s21 }
  0x6c   :  { %10461 = sst [smem:[#allocation31_spill]] %s5551_s0  ;;  %s5567_s10 = sld [smem:[#allocation2 + $0xd]] }
  0x6d   :  { %s5591_s0 = sld [smem:[#allocation2 + $0x1d]]  ;;  %s5604_s21 = sld [smem:[#allocation2 + $0x21]]  ;;  %v5740_v3 = vstv %s5527_s12 }
  0x6e   :  { %10462 = sst [smem:[#allocation32_spill]] %s5553_s9  ;;  %s5579_s9 = sld [smem:[#allocation2 + $0x15]]  ;;  %10518 = vst [vmem:[#allocation81_spill] sm:$0xff] %v5740_v3 }
  0x6f   :  { %10468 = sst [smem:[#allocation38_spill]] %s5565_s1  ;;  %s5589_s1 = sld [smem:[#allocation2 + $0x19]] }
  0x70   :  { %s5606_s7 = sld [smem:[#allocation2 + $0x25]]  ;;  %s5634_s16 = sld [smem:[#allocation2 + $0x31]]  ;;  %v5777_v12 = vstv %s5577_s4 }
  0x71   :  { %s5620_s15 = sld [smem:[#allocation2 + $0x2d]]  ;;  %v5632_v37 = vstv %s5525_s13  ;;  %s5649_s17 = sld [smem:[#allocation2 + $0x39]]  ;;  %10533 = vst [vmem:[#allocation89_spill] sm:$0xff] %v5777_v12 }
  0x72   :  { %10488 = vst [vmem:[#allocation58_spill] sm:$0xff] %v5632_v37  ;;  %s5636_s3 = sld [smem:[#allocation2 + $0x35]]  ;;  %s5667_s2 = sld [smem:[#allocation2 + $0x41]]  ;;  %v5683_v49 = vmul.f32 %v5632_v37, %v5445_v0  ;;  %v5700_v53 = vmul.f32 %v5632_v37, %v5451_v1  ;;  %v5774_v11 = vstv %s5567_s10 }
  0x73   :  { %s5651_s13 = sld [smem:[#allocation2 + $0x3d]]  ;;  %s5669_s18 = sld [smem:[#allocation2 + $0x2]]  ;;  %10532 = vst [vmem:[#allocation88_spill] sm:$0xff] %v5774_v11  ;;  %v5802_v56 = vstv %s5591_s0  ;;  %v5841_v12 = vstv %s5604_s21 }
  0x74   :  { %10499 = vst [vmem:[#allocation69_spill] sm:$0xff] %v5683_v49  ;;  %s5685_s19 = sld [smem:[#allocation2 + $0x45]]  ;;  %s5687_s20 = sld [smem:[#allocation2 + $0x49]]  ;;  %10503 = vst [vmem:[#allocation73_spill] sm:$0xff] %v5700_v53  ;;  %v5780_v21 = vstv %s5579_s9 }
  0x75   :  { %s5702_s22 = sld [smem:[#allocation2 + $0x4d]]  ;;  %s5704_s23 = sld [smem:[#allocation2 + $0x51]]  ;;  %10534 = vst [vmem:[#allocation90_spill] sm:$0xff] %v5780_v21  ;;  %v5783_v4 = vstv %s5589_s1  ;;  %10543 = vst [vmem:[#allocation96_spill] sm:$0xff] %v5802_v56 }
  0x76   :  { %s5713_s24 = sld [smem:[#allocation2 + $0x55]]  ;;  %s5715_s25 = sld [smem:[#allocation2 + $0x59]]  ;;  %10535 = vst [vmem:[#allocation91_spill] sm:$0xff] %v5783_v4  ;;  %10553 = vst [vmem:[#allocation105_spill] sm:$0xff] %v5841_v12  ;;  %v5844_v11 = vstv %s5606_s7 }
  0x77   :  { %s10509_s26 = sld [smem:[#allocation22_spill]]  ;;  %s10512_s27 = sld [smem:[#allocation20_spill]]  ;;  %10554 = vst [vmem:[#allocation106_spill] sm:$0xff] %v5844_v11  ;;  %v5915_v48 = vstv %s5649_s17 }
  0x78   :  { %s10513_s28 = sld [smem:[#allocation23_spill]]  ;;  %s10514_s6 = sld [smem:[#allocation24_spill]]  ;;  %10575 = vst [vmem:[#allocation121_spill] sm:$0xff] %v5915_v48 }
  0x79   :  { %10492 = sst [smem:[#allocation62_spill]] %s5651_s13  ;;  %s5729_s8 = sld [smem:[#allocation2 + $0x5d]]  ;;  %v5790_v2 = vstv %s5669_s18 }
  0x7a   :  { %s10517_s29 = sld [smem:[#allocation21_spill]]  ;;  %s5742_s30 = sld [smem:[#allocation2 + $0xa]]  ;;  %10539 = vst [vmem:[#allocation92_spill] sm:$0xff] %v5790_v2  ;;  %v5819_v33 = vstv %s5685_s19  ;;  %v5822_v29 = vstv %s5687_s20 }
  0x7b   :  { %10504 = sst [smem:[#allocation74_spill]] %s5704_s23  ;;  %s10523_s23 = sld [smem:[#allocation26_spill]]  ;;  %10546 = vst [vmem:[#allocation99_spill] sm:$0xff] %v5819_v33  ;;  %10547 = vst [vmem:[#allocation100_spill] sm:$0xff] %v5822_v29  ;;  %v5838_v21 = vstv %s5702_s22  ;;  %v5858_v57 = vmul.f32 %v5819_v33, %v5445_v0  ;;  %v5862_v53 = vmul.f32 %v5819_v33, %v5451_v1  ;;  %v5866_v11 = vmul.f32 %v5822_v29, %v5445_v0 }
  0x7c   :  { %10507 = sst [smem:[#allocation77_spill]] %s5713_s24  ;;  %s5731_s24 = sld [smem:[#allocation2 + $0x6]]  ;;  %10552 = vst [vmem:[#allocation104_spill] sm:$0xff] %v5838_v21  ;;  %v5882_v33 = vstv %s5620_s15  ;;  %v5886_v49 = vmul.f32 %v5838_v21, %v5445_v0 }
  0x7d   :  { %10508 = sst [smem:[#allocation78_spill]] %s5715_s25  ;;  %v5751_v6 = vstv %s10509_s26  ;;  %s5753_s25 = sld [smem:[#allocation2 + $0x61]]  ;;  %v5758_v7 = vstv %s10512_s27  ;;  %10559 = vst [vmem:[#allocation109_spill] sm:$0xff] %v5858_v57  ;;  %10560 = vst [vmem:[#allocation110_spill] sm:$0xff] %v5862_v53 }
  0x7e   :  { %10521 = vst [vmem:[#allocation83_spill] sm:$0xff] %v5751_v6  ;;  %s5755_s13 = sld [smem:[#allocation2 + $0x65]]  ;;  %10524 = vst [vmem:[#allocation84_spill] sm:$0xff] %v5758_v7  ;;  %v5761_v8 = vstv %s10513_s28  ;;  %v5764_v9 = vstv %s10514_s6  ;;  %s5766_s12 = sld [smem:[#allocation2 + $0x69]]  ;;  %v5850_v7 = vstv %s5667_s2 }
  0x7f   :  { %10515 = sst [smem:[#allocation22_spill]] %s5729_s8  ;;  %s5744_s8 = sld [smem:[#allocation2 + $0xe]]  ;;  %10525 = vst [vmem:[#allocation85_spill] sm:$0xff] %v5761_v8  ;;  %10526 = vst [vmem:[#allocation86_spill] sm:$0xff] %v5764_v9 }
  0x80   :  { %s10528_s11 = sld [smem:[#allocation27_spill]]  ;;  %s10530_s26 = sld [smem:[#allocation28_spill]]  ;;  %v5771_v10 = vstv %s10517_s29  ;;  %10556 = vst [vmem:[#allocation108_spill] sm:$0xff] %v5850_v7  ;;  %10561 = vst [vmem:[#allocation111_spill] sm:$0xff] %v5866_v11 }
  0x81   :  { %10531 = vst [vmem:[#allocation87_spill] sm:$0xff] %v5771_v10  ;;  %s10536_s27 = sld [smem:[#allocation29_spill]]  ;;  %s5785_s28 = sld [smem:[#allocation2 + $0x12]]  ;;  %v5796_v61 = vstv %s10523_s23  ;;  %v5847_v10 = vstv %s5618_s14  ;;  %10565 = vst [vmem:[#allocation114_spill] sm:$0xff] %v5882_v33  ;;  %v5907_v33 = vstv %s5634_s16 }
  0x82   :  { %10516 = sst [smem:[#allocation20_spill]] %s5731_s24  ;;  %s10522_s24 = sld [smem:[#allocation25_spill]]  ;;  %10541 = vst [vmem:[#allocation94_spill] sm:$0xff] %v5796_v61  ;;  %10555 = vst [vmem:[#allocation107_spill] sm:$0xff] %v5847_v10  ;;  %v5870_v10 = vmul.f32 %v5822_v29, %v5451_v1  ;;  %v5890_v29 = vmul.f32 %v5838_v21, %v5451_v1  ;;  %v5910_v21 = vstv %s5636_s3 }
  0x83   :  { %s10537_s6 = sld [smem:[#allocation30_spill]]  ;;  %s5806_s4 = sld [smem:[#allocation2 + $0x1e]]  ;;  %10566 = vst [vmem:[#allocation115_spill] sm:$0xff] %v5886_v49  ;;  %10571 = vst [vmem:[#allocation119_spill] sm:$0xff] %v5907_v33 }
  0x84   :  { %10527 = sst [smem:[#allocation24_spill]] %s5766_s12  ;;  %s5787_s12 = sld [smem:[#allocation2 + $0x16]]  ;;  %10562 = vst [vmem:[#allocation112_spill] sm:$0xff] %v5870_v10  ;;  %10567 = vst [vmem:[#allocation116_spill] sm:$0xff] %v5890_v29 }
  0x85   :  { %10519 = sst [smem:[#allocation23_spill]] %s5744_s8  ;;  %s5768_s8 = sld [smem:[#allocation2 + $0x6d]]  ;;  %10573 = vst [vmem:[#allocation120_spill] sm:$0xff] %v5910_v21  ;;  %v5965_v21 = vstv %s5755_s13 }
  0x86   :  { %s5804_s9 = sld [smem:[#allocation2 + $0x1a]]  ;;  %v5809_v47 = vstv %s10528_s11  ;;  %v5812_v37 = vstv %s10530_s26  ;;  %s5814_s10 = sld [smem:[#allocation2 + $0x71]]  ;;  %10592 = vst [vmem:[#allocation132_spill] sm:$0xff] %v5965_v21 }
  0x87   :  { %10544 = vst [vmem:[#allocation97_spill] sm:$0xff] %v5809_v47  ;;  %10545 = vst [vmem:[#allocation98_spill] sm:$0xff] %v5812_v37  ;;  %s5816_s1 = sld [smem:[#allocation2 + $0x75]]  ;;  %v5825_v2 = vstv %s10536_s27  ;;  %s10551_s5 = sld [smem:[#allocation32_spill]]  ;;  %v5981_v11 = vstv %s5785_s28 }
  0x88   :  { %v5793_v63 = vstv %s10522_s24  ;;  %10548 = vst [vmem:[#allocation101_spill] sm:$0xff] %v5825_v2  ;;  %s5833_s0 = sld [smem:[#allocation2 + $0x79]]  ;;  %s5835_s18 = sld [smem:[#allocation2 + $0x7d]]  ;;  %10596 = vst [vmem:[#allocation136_spill] sm:$0xff] %v5981_v11 }
  0x89   :  { %10540 = vst [vmem:[#allocation93_spill] sm:$0xff] %v5793_v63  ;;  %v5828_v56 = vstv %s10537_s6  ;;  %s5852_s19 = sld [smem:[#allocation2 + $0x22]]  ;;  %s10557_s20 = sld [smem:[#allocation33_spill]] }
  0x8a   :  { %10549 = vst [vmem:[#allocation102_spill] sm:$0xff] %v5828_v56  ;;  %s5854_s23 = sld [smem:[#allocation2 + $0x26]]  ;;  %s5872_s21 = sld [smem:[#allocation2 + $0x2a]]  ;;  %v5984_v53 = vstv %s5787_s12 }
  0x8b   :  { %10529 = sst [smem:[#allocation21_spill]] %s5768_s8  ;;  %s10538_s8 = sld [smem:[#allocation31_spill]]  ;;  %10597 = vst [vmem:[#allocation137_spill] sm:$0xff] %v5984_v53 }
  0x8c   :  { %s10558_s24 = sld [smem:[#allocation38_spill]]  ;;  %s10564_s14 = sld [smem:[#allocation62_spill]]  ;;  %v5987_v57 = vstv %s5804_s9 }
  0x8d   :  { %s5874_s7 = sld [smem:[#allocation2 + $0x2e]]  ;;  %v5877_v12 = vstv %s10551_s5  ;;  %s5879_s2 = sld [smem:[#allocation2 + $0x81]]  ;;  %10598 = vst [vmem:[#allocation138_spill] sm:$0xff] %v5987_v57  ;;  %v5993_v21 = vstv %s5816_s1 }
  0x8e   :  { %10563 = vst [vmem:[#allocation113_spill] sm:$0xff] %v5877_v12  ;;  %s5892_s22 = sld [smem:[#allocation2 + $0x3]]  ;;  %s5902_s15 = sld [smem:[#allocation2 + $0x85]]  ;;  %10600 = vst [vmem:[#allocation140_spill] sm:$0xff] %v5993_v21  ;;  %v6006_v11 = vstv %s5835_s18 }
  0x8f   :  { %v5897_v12 = vstv %s10557_s20  ;;  %s10570_s29 = sld [smem:[#allocation74_spill]]  ;;  %s10572_s11 = sld [smem:[#allocation77_spill]]  ;;  %10605 = vst [vmem:[#allocation144_spill] sm:$0xff] %v6006_v11  ;;  %v6021_v21 = vstv %s5852_s19 }
  0x90   :  { %10568 = vst [vmem:[#allocation117_spill] sm:$0xff] %v5897_v12  ;;  %s5912_s26 = sld [smem:[#allocation2 + $0x8d]]  ;;  %s10574_s27 = sld [smem:[#allocation78_spill]]  ;;  %v5926_v12 = vmul.f32 %v5850_v7, %v5451_v1  ;;  %v5959_v1 = vstv %s5742_s30  ;;  %10610 = vst [vmem:[#allocation149_spill] sm:$0xff] %v6021_v21 }
  0x91   :  { %v5831_v4 = vstv %s10538_s8  ;;  %s5904_s8 = sld [smem:[#allocation2 + $0x89]]  ;;  %s10576_s6 = sld [smem:[#allocation22_spill]]  ;;  %10590 = vst [vmem:[#allocation130_spill] sm:$0xff] %v5959_v1 }
  0x92   :  { %10550 = vst [vmem:[#allocation103_spill] sm:$0xff] %v5831_v4  ;;  %v5900_v4 = vstv %s10558_s24  ;;  %v5918_v45 = vstv %s10564_s14  ;;  %10579 = vst [vmem:[#allocation124_spill] sm:$0xff] %v5926_v12  ;;  %s10580_s16 = sld [smem:[#allocation20_spill]]  ;;  %s5928_s5 = sld [smem:[#allocation2 + $0x32]] }
  0x93   :  { %10569 = vst [vmem:[#allocation118_spill] sm:$0xff] %v5900_v4  ;;  %10577 = vst [vmem:[#allocation122_spill] sm:$0xff] %v5918_v45  ;;  %v5922_v4 = vmul.f32 %v5850_v7, %v5445_v0  ;;  %s10581_s3 = sld [smem:[#allocation24_spill]]  ;;  %s5934_s17 = sld [smem:[#allocation2 + $0x36]]  ;;  %v5962_v0 = vstv %s5753_s25  ;;  %v6009_v53 = vstv %s5879_s2  ;;  %v6030_v11 = vstv %s5874_s7 }
  0x94   :  { %s10583_s20 = sld [smem:[#allocation23_spill]]  ;;  %s10586_s24 = sld [smem:[#allocation21_spill]]  ;;  %10591 = vst [vmem:[#allocation131_spill] sm:$0xff] %v5962_v0  ;;  %v5999_v0 = vstv %s5892_s22  ;;  %10606 = vst [vmem:[#allocation145_spill] sm:$0xff] %v6009_v53  ;;  %v6012_v57 = vstv %s5902_s15 }
  0x95   :  { %10578 = vst [vmem:[#allocation123_spill] sm:$0xff] %v5922_v4  ;;  %v5939_v12 = vstv %s10570_s29  ;;  %v5942_v4 = vstv %s10572_s11  ;;  %s5951_s14 = sld [smem:[#allocation2 + $0x3a]]  ;;  %s5972_s11 = sld [smem:[#allocation2 + $0x46]]  ;;  %10603 = vst [vmem:[#allocation142_spill] sm:$0xff] %v5999_v0 }
  0x96   :  { %10584 = vst [vmem:[#allocation125_spill] sm:$0xff] %v5939_v12  ;;  %10585 = vst [vmem:[#allocation126_spill] sm:$0xff] %v5942_v4  ;;  %v5946_v48 = vstv %s10574_s27  ;;  %s5970_s29 = sld [smem:[#allocation2 + $0x42]]  ;;  %s6764_s30 = sld [smem:[#allocation2 + $0x4e]] }
  0x97   :  { %10587 = vst [vmem:[#allocation127_spill] sm:$0xff] %v5946_v48  ;;  %v5949_v45 = vstv %s10576_s6  ;;  %10607 = vst [vmem:[#allocation146_spill] sm:$0xff] %v6012_v57  ;;  %s6754_s25 = sld [smem:[#allocation2 + $0x4a]]  ;;  %s6788_s28 = sld [smem:[#allocation2 + $0x56]] }
  0x98   :  { %10588 = vst [vmem:[#allocation128_spill] sm:$0xff] %v5949_v45  ;;  %v5956_v7 = vstv %s10580_s16  ;;  %v6018_v45 = vstv %s5912_s26  ;;  %10613 = vst [vmem:[#allocation152_spill] sm:$0xff] %v6030_v11  ;;  %v6033_v53 = vstv %s5928_s5  ;;  %s6766_s12 = sld [smem:[#allocation2 + $0x52]]  ;;  %s6825_s1 = sld [smem:[#allocation2 + $0x66]] }
  0x99   :  { %10582 = sst [smem:[#allocation25_spill]] %s5934_s17  ;;  %s5953_s17 = sld [smem:[#allocation2 + $0x3e]]  ;;  %10589 = vst [vmem:[#allocation129_spill] sm:$0xff] %v5956_v7  ;;  %v5968_v29 = vstv %s10581_s3  ;;  %10609 = vst [vmem:[#allocation148_spill] sm:$0xff] %v6018_v45 }
  0x9a   :  { %10593 = vst [vmem:[#allocation133_spill] sm:$0xff] %v5968_v29  ;;  %v5975_v49 = vstv %s10583_s20  ;;  %v5978_v10 = vstv %s10586_s24  ;;  %v5990_v29 = vstv %s5814_s10  ;;  %s10602_s13 = sld [smem:[#allocation25_spill]]  ;;  %10614 = vst [vmem:[#allocation153_spill] sm:$0xff] %v6033_v53  ;;  %s6790_s9 = sld [smem:[#allocation2 + $0x5a]] }
  0x9b   :  { %10594 = vst [vmem:[#allocation134_spill] sm:$0xff] %v5975_v49  ;;  %10595 = vst [vmem:[#allocation135_spill] sm:$0xff] %v5978_v10  ;;  %v5996_v49 = vstv %s5806_s4  ;;  %v6003_v10 = vstv %s5833_s0  ;;  %s6804_s4 = sld [smem:[#allocation2 + $0x5e]]  ;;  %s6806_s10 = sld [smem:[#allocation2 + $0x62]] }
  0x9c   :  { %10599 = vst [vmem:[#allocation139_spill] sm:$0xff] %v5990_v29  ;;  %10601 = vst [vmem:[#allocation141_spill] sm:$0xff] %v5996_v49  ;;  %v6015_v29 = vstv %s5904_s8  ;;  %v6024_v49 = vstv %s5854_s23  ;;  %v6066_v4 = vstv %s5970_s29  ;;  %s6827_s0 = sld [smem:[#allocation2 + $0x6a]]  ;;  %s6843_s18 = sld [smem:[#allocation2 + $0x6e]] }
  0x9d   :  { %10604 = vst [vmem:[#allocation143_spill] sm:$0xff] %v6003_v10  ;;  %10608 = vst [vmem:[#allocation147_spill] sm:$0xff] %v6015_v29  ;;  %v6027_v10 = vstv %s5872_s21  ;;  %s6845_s19 = sld [smem:[#allocation2 + $0x72]]  ;;  %s6861_s23 = sld [smem:[#allocation2 + $0x76]] }
  0x9e   :  { %10611 = vst [vmem:[#allocation150_spill] sm:$0xff] %v6024_v49  ;;  %10612 = vst [vmem:[#allocation151_spill] sm:$0xff] %v6027_v10  ;;  %s6863_s21 = sld [smem:[#allocation2 + $0x7a]]  ;;  %s6879_s7 = sld [smem:[#allocation2 + $0x7e]] }
  0x9f   :  { %v6057_v53 = vstv %s5953_s17  ;;  %10622 = vst [vmem:[#allocation161_spill] sm:$0xff] %v6066_v4  ;;  %s6881_s2 = sld [smem:[#allocation2 + $0x82]]  ;;  %s6897_s22 = sld [smem:[#allocation2 + $0x86]] }
  0xa0   :  { %v6036_v57 = vstv %s10602_s13  ;;  %10619 = vst [vmem:[#allocation158_spill] sm:$0xff] %v6057_v53  ;;  %s6899_s15 = sld [smem:[#allocation2 + $0x8a]]  ;;  %s6919_s8 = sld [smem:[#allocation2 + $0x8e]] }
  0xa1   :  { %10615 = vst [vmem:[#allocation154_spill] sm:$0xff] %v6036_v57  ;;  %v6054_v57 = vstv %s5951_s14  ;;  %s6963_s26 = sld [smem:[#allocation2 + $0x7]]  ;;  %s6971_s27 = sld [smem:[#allocation2 + $0xb]] }
  0xa2   :  { %10618 = vst [vmem:[#allocation157_spill] sm:$0xff] %v6054_v57  ;;  %s6983_s6 = sld [smem:[#allocation2 + $0xf]]  ;;  %s6985_s16 = sld [smem:[#allocation2 + $0x13]] }
  0xa3   :  { %s7015_s5 = sld [smem:[#allocation2 + $0x17]]  ;;  %s7024_s3 = sld [smem:[#allocation2 + $0x1b]] }
  0xa4   :  { %s7052_s17 = sld [smem:[#allocation2 + $0x1f]]  ;;  %s7054_s20 = sld [smem:[#allocation2 + $0x23]] }
  0xa5   :  { %s7068_s24 = sld [smem:[#allocation2 + $0x27]]  ;;  %s7070_s14 = sld [smem:[#allocation2 + $0x2b]] }
  0xa6   :  { %s7084_s29 = sld [smem:[#allocation2 + $0x2f]] }
  0xa7   :  { %s7095_s13 = sld [smem:[#allocation2 + $0x37]] }
  0xc1   :  { %v252_v7 = vpop.permute.xlu0 %251  ;;  %v274_v1 = vpop.permute.xlu1 %273 }
  0xc5   :  { %v254_v0 = vpop.permute.xlu0 %253  ;;  %v276_v48 = vpop.permute.xlu1 %275 }
  0xc6   :  { %v258_v45 = vsel %vm257_vm0, %v252_v7, %v254_v0  ;;  %v259_v21 = vsel %vm257_vm0, %v254_v0, %v252_v7  ;;  %v278_v49 = vsel %vm277_vm1, %v274_v1, %v276_v48  ;;  %v279_v29 = vsel %vm277_vm1, %v276_v48, %v274_v1 }
  0xc7   :  { %v6047_v10 = vmul.f32 %v5559_v14, %v259_v21  ;;  %v6050_v11 = vmul.f32 %v5561_v15, %v258_v45  ;;  %v6060_v7 = vmul.f32 %v5563_v16, %v279_v29  ;;  %v6063_v0 = vmul.f32 %v5569_v17, %v278_v49 }
  0xc8   :  { %v6069_v48 = vstv %s5972_s11  ;;  %s7093_s11 = sld [smem:[#allocation2 + $0x33]] }
  0xc9   :  { %10616 = vst [vmem:[#allocation155_spill] sm:$0xff] %v6047_v10  ;;  %10617 = vst [vmem:[#allocation156_spill] sm:$0xff] %v6050_v11  ;;  %v296_v21 = vpop.permute.xlu1 %295  ;;  %v294_v1 = vpop.permute.xlu0 %293  ;;  %v414_v45 = vmul.f32 %v5596_v27, %v6047_v10  ;;  %v415_v15 = vmul.f32 %v5596_v27, %v6050_v11  ;;  %v417_v14 = vmul.f32 %v5599_v28, %v6047_v10 }
  0xca   :  { %10620 = vst [vmem:[#allocation159_spill] sm:$0xff] %v6060_v7  ;;  %10621 = vst [vmem:[#allocation160_spill] sm:$0xff] %v6063_v0  ;;  %v418_v29 = vmul.f32 %v5599_v28, %v6050_v11  ;;  %v298_v49 = vsel %vm297_vm2, %v294_v1, %v296_v21  ;;  %v299_v17 = vsel %vm297_vm2, %v296_v21, %v294_v1 }
  0xcb   :  { %10623 = vst [vmem:[#allocation162_spill] sm:$0xff] %v6069_v48  ;;  %v428_v16 = vmul.f32 %v5613_v32, %v6047_v10  ;;  %v429_v48 = vmul.f32 %v5613_v32, %v6050_v11  ;;  %v6088_v27 = vmul.f32 %v5571_v18, %v299_v17  ;;  %v6091_v4 = vmul.f32 %v5573_v19, %v298_v49 }
  0xcc   :  { %v421_v28 = vrot.slane %v417_v14, 2  ;;  %v422_v53 = vrot.slane %v418_v29, 2  ;;  %v439_v21 = vmul.f32 %v5623_v34, %v6047_v10  ;;  %v440_v1 = vmul.f32 %v5623_v34, %v6050_v11 }
  0xcd   :  { %v432_v57 = vrot.slane %v428_v16, 4  ;;  %v433_v12 = vrot.slane %v429_v48, 4  ;;  %v316_v33 = vpop.permute.xlu1 %315  ;;  %v314_v32 = vpop.permute.xlu0 %313  ;;  %v450_v49 = vmul.f32 %v5626_v35, %v6060_v7  ;;  %v451_v19 = vmul.f32 %v5626_v35, %v6063_v0 }
  0xce   :  { %v425_v56 = vadd.f32 %v421_v28, %v414_v45  ;;  %v426_v17 = vadd.f32 %v422_v53, %v415_v15  ;;  %v318_v14 = vsel %vm317_vm3, %v314_v32, %v316_v33  ;;  %v319_v16 = vsel %vm317_vm3, %v316_v33, %v314_v32 }
  0xcf   :  { %v443_v48 = vrot.slane %v439_v21, 6  ;;  %v444_v29 = vrot.slane %v440_v1, 6  ;;  %v6107_v18 = vmul.f32 %v5575_v20, %v319_v16  ;;  %v6110_v28 = vmul.f32 %v5581_v22, %v318_v14 }
  0xd0   :  { %v436_v15 = vadd.f32 %v432_v57, %v425_v56  ;;  %v437_v53 = vadd.f32 %v433_v12, %v426_v17  ;;  %v455_v45 = vmul.f32 %v5629_v36, %v6060_v7  ;;  %v456_v35 = vmul.f32 %v5629_v36, %v6063_v0 }
  0xd1   :  { %v466_v32 = vmul.f32 %v5643_v40, %v6060_v7  ;;  %v467_v33 = vmul.f32 %v5643_v40, %v6063_v0  ;;  %v336_v21 = vpop.permute.xlu1 %335  ;;  %v334_v1 = vpop.permute.xlu0 %333  ;;  %v477_v56 = vmul.f32 %v5654_v42, %v6060_v7  ;;  %v478_v57 = vmul.f32 %v5654_v42, %v6063_v0 }
  0xd2   :  { %v447_v14 = vadd.f32 %v443_v48, %v436_v15  ;;  %v448_v16 = vadd.f32 %v444_v29, %v437_v53  ;;  %v338_v12 = vsel %vm337_vm4, %v334_v1, %v336_v21  ;;  %v339_v17 = vsel %vm337_vm4, %v336_v21, %v334_v1 }
  0xd3   :  { %v459_v22 = vrot.slane %v455_v45, 2  ;;  %v460_v20 = vrot.slane %v456_v35, 2  ;;  %v6130_v40 = vmul.f32 %v5583_v23, %v338_v12  ;;  %v6133_v48 = vmul.f32 %v5585_v24, %v339_v17 }
  0xd4   :  { %v452_v29 = vadd.f32 %v450_v49, %v447_v14  ;;  %v453_v15 = vadd.f32 %v451_v19, %v448_v16  ;;  %v470_v53 = vrot.slane %v466_v32, 4  ;;  %v471_v42 = vrot.slane %v467_v33, 4 }
  0xd5   :  { %v481_v36 = vrot.slane %v477_v56, 6  ;;  %v482_v34 = vrot.slane %v478_v57, 6  ;;  %v356_v0 = vpop.permute.xlu1 %355  ;;  %v354_v7 = vpop.permute.xlu0 %353  ;;  %v488_v35 = vmul.f32 %v5657_v43, %v6088_v27  ;;  %v489_v45 = vmul.f32 %v5657_v43, %v6091_v4 }
  0xd6   :  { %v463_v11 = vadd.f32 %v459_v22, %v452_v29  ;;  %v464_v21 = vadd.f32 %v460_v20, %v453_v15  ;;  %v358_v1 = vsel %vm357_vm5, %v354_v7, %v356_v0  ;;  %v359_v19 = vsel %vm357_vm5, %v356_v0, %v354_v7 }
  0xd7   :  { %v493_v49 = vmul.f32 %v5672_v46, %v6088_v27  ;;  %v494_v32 = vmul.f32 %v5672_v46, %v6091_v4  ;;  %v6149_v20 = vmul.f32 %v5587_v25, %v358_v1  ;;  %v6152_v22 = vmul.f32 %v5593_v26, %v359_v19 }
  0xd8   :  { %v474_v33 = vadd.f32 %v470_v53, %v463_v11  ;;  %v475_v14 = vadd.f32 %v471_v42, %v464_v21  ;;  %v504_v57 = vmul.f32 %v5690_v50, %v6088_v27  ;;  %v505_v7 = vmul.f32 %v5690_v50, %v6091_v4 }
  0xd9   :  { %v497_v16 = vrot.slane %v493_v49, 2  ;;  %v498_v56 = vrot.slane %v494_v32, 2  ;;  %v376_v0 = vpop.permute.xlu1 %375  ;;  %v374_v12 = vpop.permute.xlu0 %373  ;;  %v515_v15 = vmul.f32 %v5693_v51, %v6088_v27  ;;  %v516_v1 = vmul.f32 %v5693_v51, %v6091_v4 }
  0xda   :  { %v485_v17 = vadd.f32 %v481_v36, %v474_v33  ;;  %v486_v29 = vadd.f32 %v482_v34, %v475_v14  ;;  %v378_v42 = vsel %vm377_vm6, %v374_v12, %v376_v0  ;;  %v379_v11 = vsel %vm377_vm6, %v376_v0, %v374_v12 }
  0xdb   :  { %v508_v53 = vrot.slane %v504_v57, 4  ;;  %v509_v21 = vrot.slane %v505_v7, 4  ;;  %v6167_v19 = vmul.f32 %v5608_v30, %v378_v42  ;;  %v6170_v36 = vmul.f32 %v5610_v31, %v379_v11 }
  0xdc   :  { %v490_v34 = vadd.f32 %v488_v35, %v485_v17  ;;  %v491_v49 = vadd.f32 %v489_v45, %v486_v29  ;;  %v519_v32 = vrot.slane %v515_v15, 6  ;;  %v520_v33 = vrot.slane %v516_v1, 6 }
  0xdd   :  { %v526_v14 = vmul.f32 %v5696_v52, %v6107_v18  ;;  %v527_v26 = vmul.f32 %v5696_v52, %v6110_v28  ;;  %v396_v25 = vpop.permute.xlu1 %395  ;;  %v394_v0 = vpop.permute.xlu0 %393  ;;  %v531_v12 = vmul.f32 %v5707_v54, %v6107_v18  ;;  %v532_v42 = vmul.f32 %v5707_v54, %v6110_v28  ;;  %v10646_v54 = vld [vmem:[#allocation87_spill] sm:$0xff] }
  0xde   :  { %v501_v57 = vadd.f32 %v497_v16, %v490_v34  ;;  %v502_v7 = vadd.f32 %v498_v56, %v491_v49  ;;  %v398_v35 = vsel %vm397_vm7, %v394_v0, %v396_v25  ;;  %v399_v45 = vsel %vm397_vm7, %v396_v25, %v394_v0 }
  0xdf   :  { %v542_v17 = vmul.f32 %v5710_v55, %v6107_v18  ;;  %v543_v29 = vmul.f32 %v5710_v55, %v6110_v28  ;;  %v6189_v16 = vmul.f32 %v5638_v38, %v398_v35  ;;  %v6192_v56 = vmul.f32 %v5640_v39, %v399_v45  ;;  %v10633_v38 = vld [vmem:[#allocation103_spill] sm:$0xff] }
  0xe0   :  { %v512_v15 = vadd.f32 %v508_v53, %v501_v57  ;;  %v513_v1 = vadd.f32 %v509_v21, %v502_v7  ;;  %v535_v11 = vrot.slane %v531_v12, 2  ;;  %v536_v34 = vrot.slane %v532_v42, 2  ;;  %v10638_v42 = vld [vmem:[#allocation113_spill] sm:$0xff] }
  0xe1   :  { %10624 = vst [vmem:[#allocation163_spill] sm:$0xff] %v6189_v16  ;;  %10625 = vst [vmem:[#allocation164_spill] sm:$0xff] %v6192_v56  ;;  %v546_v49 = vrot.slane %v542_v17, 4  ;;  %v547_v31 = vrot.slane %v543_v29, 4  ;;  %v553_v0 = vmul.f32 %v5721_v58, %v6107_v18  ;;  %v554_v55 = vmul.f32 %v5721_v58, %v6110_v28 }
  0xe2   :  { %v523_v30 = vadd.f32 %v519_v32, %v512_v15  ;;  %v524_v25 = vadd.f32 %v520_v33, %v513_v1  ;;  %v6200_v35 = vmul.f32 %v5740_v3, %v6130_v40  ;;  %v6204_v53 = vmul.f32 %v5740_v3, %v6133_v48 }
  0xe3   :  { %v6208_v21 = vmul.f32 %v5748_v5, %v6130_v40  ;;  %v6212_v32 = vmul.f32 %v5748_v5, %v6133_v48  ;;  %v557_v7 = vrot.slane %v553_v0, 6  ;;  %v558_v12 = vrot.slane %v554_v55, 6  ;;  %v10645_v5 = vld [vmem:[#allocation84_spill] sm:$0xff] }
  0xe4   :  { %v528_v33 = vadd.f32 %v526_v14, %v523_v30  ;;  %v529_v57 = vadd.f32 %v527_v26, %v524_v25  ;;  %v6218_v17 = vmul.f32 %v5751_v6, %v6130_v40  ;;  %v6222_v29 = vmul.f32 %v5751_v6, %v6133_v48 }
  0xe5   :  { %v6226_v30 = vmul.f32 %v5761_v8, %v6130_v40  ;;  %v6230_v26 = vmul.f32 %v5761_v8, %v6133_v48  ;;  %v6236_v25 = vmul.f32 %v5764_v9, %v6149_v20  ;;  %v6246_v45 = vmul.f32 %v5793_v63, %v6149_v20 }
  0xe6   :  { %v539_v15 = vadd.f32 %v535_v11, %v528_v33  ;;  %v540_v1 = vadd.f32 %v536_v34, %v529_v57  ;;  %v6240_v11 = vmul.f32 %v5764_v9, %v6152_v22  ;;  %v6250_v14 = vmul.f32 %v5793_v63, %v6152_v22 }
  0xe7   :  { %v6254_v55 = vmul.f32 %v5796_v61, %v6149_v20  ;;  %v6266_v57 = vmul.f32 %v5799_v60, %v6152_v22  ;;  %v6282_v33 = vmul.f32 %v5809_v47, %v6170_v36  ;;  %v6286_v9 = vmul.f32 %v5812_v37, %v6167_v19 }
  0xe8   :  { %v550_v34 = vadd.f32 %v546_v49, %v539_v15  ;;  %v551_v0 = vadd.f32 %v547_v31, %v540_v1  ;;  %v6258_v49 = vmul.f32 %v5796_v61, %v6152_v22  ;;  %v6262_v1 = vmul.f32 %v5799_v60, %v6149_v20 }
  0xe9   :  { %v6302_v63 = vmul.f32 %v5825_v2, %v6170_v36  ;;  %v6324_v6 = vmul.f32 %v10633_v38, %v6189_v16  ;;  %v6340_v39 = vmul.f32 %v10638_v42, %v6192_v56  ;;  %v10641_v52 = vrot.slane %v6208_v21, 2 }
  0xea   :  { %v561_v31 = vadd.f32 %v557_v7, %v550_v34  ;;  %v562_v15 = vadd.f32 %v558_v12, %v551_v0  ;;  %v6278_v0 = vmul.f32 %v5809_v47, %v6167_v19  ;;  %v6298_v12 = vmul.f32 %v5825_v2, %v6167_v19  ;;  %v10639_v47 = vld [vmem:[#allocation117_spill] sm:$0xff] }
  0xeb   :  { %v6336_v2 = vmul.f32 %v10638_v42, %v6189_v16  ;;  %v6344_v3 = vmul.f32 %v10639_v47, %v6189_v16  ;;  %v10642_v24 = vrot.slane %v6212_v32, 2  ;;  %v10648_v32 = vrot.slane %v6222_v29, 4 }
  0xec   :  { %v566_v61 = vadd.f32 %v5725_v59, %v561_v31  ;;  %v567_v7 = vadd.f32 %v5735_v62, %v562_v15  ;;  %v6290_v59 = vmul.f32 %v5812_v37, %v6170_v36  ;;  %v10626_v62 = vrot.slane %v5647_v41, 2  ;;  %v10628_v37 = vld [vmem:[#allocation102_spill] sm:$0xff] }
  0xed   :  { %v10627_v15 = vrot.slane %v5661_v44, 2  ;;  %v6308_v60 = vmul.f32 %v10628_v37, %v6167_v19  ;;  %v6312_v41 = vmul.f32 %v10628_v37, %v6170_v36  ;;  %v10629_v44 = vld [vmem:[#allocation65_spill] sm:$0xff]  ;;  %v6328_v37 = vmul.f32 %v10633_v38, %v6192_v56 }
  0xee   :  { %v577_v31 = vadd.f32 %v10626_v62, %v566_v61  ;;  %v10630_v61 = vrot.slane %v10629_v44, 4  ;;  %v10631_v62 = vld [vmem:[#allocation68_spill] sm:$0xff]  ;;  %v6348_v38 = vmul.f32 %v10639_v47, %v6192_v56  ;;  %v816_v47 = vmul.f32 %v10646_v54, %v6047_v10 }
  0xef   :  { %v578_v34 = vadd.f32 %v10627_v15, %v567_v7  ;;  %v10632_v15 = vrot.slane %v10631_v62, 4 }
  0xf0   :  { %v588_v7 = vadd.f32 %v10630_v61, %v577_v31  ;;  %v10634_v31 = vld [vmem:[#allocation69_spill] sm:$0xff]  ;;  %v820_v43 = vrot.slane %v816_v47, 4 }
  0xf1   :  { %v589_v8 = vadd.f32 %v10632_v15, %v578_v34  ;;  %v10635_v44 = vrot.slane %v10634_v31, 6  ;;  %v10636_v34 = vld [vmem:[#allocation73_spill] sm:$0xff] }
  0xf2   :  { %v10637_v62 = vrot.slane %v10636_v34, 6 }
  0xf3   :  { %v599_v61 = vadd.f32 %v10635_v44, %v588_v7  ;;  %v10640_v7 = vld [vmem:[#allocation118_spill] sm:$0xff] }
  0xf4   :  { %v600_v15 = vadd.f32 %v10637_v62, %v589_v8  ;;  %v6352_v31 = vmul.f32 %v10640_v7, %v6189_v16  ;;  %v6356_v8 = vmul.f32 %v10640_v7, %v6192_v56  ;;  %v805_v62 = vmul.f32 %v10645_v5, %v6047_v10  ;;  %v10653_v56 = vld [vmem:[#allocation89_spill] sm:$0xff]  ;;  %v10654_v16 = vld [vmem:[#allocation160_spill] sm:$0xff] }
  0xf5   :  { %v604_v44 = vadd.f32 %v6200_v35, %v599_v61 }
  0xf6   :  { %v605_v34 = vadd.f32 %v6204_v53, %v600_v15  ;;  %v10643_v53 = vld [vmem:[#allocation79_spill] sm:$0xff]  ;;  %v10644_v15 = vld [vmem:[#allocation156_spill] sm:$0xff]  ;;  %v809_v50 = vrot.slane %v805_v62, 2 }
  0xf7   :  { %v615_v7 = vadd.f32 %v10641_v52, %v604_v44  ;;  %v802_v61 = vmul.f32 %v10643_v53, %v6047_v10  ;;  %v803_v42 = vmul.f32 %v10643_v53, %v10644_v15  ;;  %v806_v58 = vmul.f32 %v10645_v5, %v10644_v15 }
  0xf8   :  { %v616_v35 = vadd.f32 %v10642_v24, %v605_v34  ;;  %v817_v52 = vmul.f32 %v10646_v54, %v10644_v15  ;;  %v10647_v24 = vrot.slane %v6218_v17, 4  ;;  %v10649_v34 = vld [vmem:[#allocation88_spill] sm:$0xff]  ;;  %v10650_v53 = vrot.slane %v6226_v30, 6  ;;  %v10655_v30 = vld [vmem:[#allocation90_spill] sm:$0xff] }
  0xf9   :  { %v827_v23 = vmul.f32 %v10649_v34, %v6047_v10  ;;  %v828_v51 = vmul.f32 %v10649_v34, %v10644_v15  ;;  %v810_v46 = vrot.slane %v806_v58, 2  ;;  %v10651_v54 = vrot.slane %v6230_v26, 6 }
  0xfa   :  { %v626_v21 = vadd.f32 %v10647_v24, %v615_v7  ;;  %v627_v44 = vadd.f32 %v10648_v32, %v616_v35  ;;  %v821_v5 = vrot.slane %v817_v52, 4  ;;  %v813_v29 = vadd.f32 %v809_v50, %v802_v61  ;;  %v10652_v32 = vld [vmem:[#allocation159_spill] sm:$0xff] }
  0xfb   :  { %v831_v7 = vrot.slane %v827_v23, 6  ;;  %v832_v24 = vrot.slane %v828_v51, 6  ;;  %v814_v35 = vadd.f32 %v810_v46, %v803_v42  ;;  %v838_v10 = vmul.f32 %v10653_v56, %v10652_v32  ;;  %v10656_v46 = vld [vmem:[#allocation91_spill] sm:$0xff] }
  0xfc   :  { %v637_v13 = vadd.f32 %v10650_v53, %v626_v21  ;;  %v638_v17 = vadd.f32 %v10651_v54, %v627_v44  ;;  %v839_v34 = vmul.f32 %v10653_v56, %v10654_v16  ;;  %v843_v62 = vmul.f32 %v10655_v30, %v10652_v32 }
  0xfd   :  { %v844_v54 = vmul.f32 %v10655_v30, %v10654_v16  ;;  %v824_v23 = vadd.f32 %v820_v43, %v813_v29  ;;  %v825_v51 = vadd.f32 %v821_v5, %v814_v35  ;;  %v854_v50 = vmul.f32 %v10656_v46, %v10652_v32 }
  0xfe   :  { %v642_v58 = vadd.f32 %v6236_v25, %v637_v13  ;;  %v643_v47 = vadd.f32 %v6240_v11, %v638_v17  ;;  %v855_v42 = vmul.f32 %v10656_v46, %v10654_v16  ;;  %v10657_v26 = vrot.slane %v6246_v45, 2  ;;  %v10661_v46 = vld [vmem:[#allocation96_spill] sm:$0xff] }
  0xff   :  { %v10658_v13 = vrot.slane %v6250_v14, 2  ;;  %v847_v11 = vrot.slane %v843_v62, 2  ;;  %v848_v61 = vrot.slane %v844_v54, 2  ;;  %v835_v52 = vadd.f32 %v831_v7, %v824_v23 }
 0x100   :  { %v653_v53 = vadd.f32 %v10657_v26, %v642_v58  ;;  %v836_v21 = vadd.f32 %v832_v24, %v825_v51  ;;  %v858_v44 = vrot.slane %v854_v50, 4  ;;  %v859_v17 = vrot.slane %v855_v42, 4  ;;  %v10665_v26 = vld [vmem:[#allocation106_spill] sm:$0xff] }
 0x101   :  { %v654_v25 = vadd.f32 %v10658_v13, %v643_v47  ;;  %v10659_v43 = vrot.slane %v6254_v55, 4  ;;  %v10660_v29 = vrot.slane %v6258_v49, 4  ;;  %v865_v30 = vmul.f32 %v10661_v46, %v10652_v32  ;;  %v10662_v47 = vld [vmem:[#allocation105_spill] sm:$0xff] }
 0x102   :  { %v866_v45 = vmul.f32 %v10661_v46, %v10654_v16  ;;  %v840_v14 = vadd.f32 %v838_v10, %v835_v52  ;;  %v841_v58 = vadd.f32 %v839_v34, %v836_v21  ;;  %v876_v7 = vmul.f32 %v10662_v47, %v6088_v27 }
 0x103   :  { %v664_v5 = vadd.f32 %v10659_v43, %v653_v53  ;;  %v665_v35 = vadd.f32 %v10660_v29, %v654_v25  ;;  %v877_v24 = vmul.f32 %v10662_v47, %v6091_v4  ;;  %v10663_v55 = vrot.slane %v6262_v1, 6  ;;  %v10666_v1 = vld [vmem:[#allocation107_spill] sm:$0xff] }
 0x104   :  { %v10664_v49 = vrot.slane %v6266_v57, 6  ;;  %v869_v23 = vrot.slane %v865_v30, 6  ;;  %v870_v51 = vrot.slane %v866_v45, 6  ;;  %v851_v50 = vadd.f32 %v847_v11, %v840_v14  ;;  %v10669_v14 = vld [vmem:[#allocation114_spill] sm:$0xff] }
 0x105   :  { %v675_v62 = vadd.f32 %v10663_v55, %v664_v5  ;;  %v852_v42 = vadd.f32 %v848_v61, %v841_v58  ;;  %v881_v10 = vmul.f32 %v10665_v26, %v6088_v27  ;;  %v882_v34 = vmul.f32 %v10665_v26, %v6091_v4 }
 0x106   :  { %v676_v54 = vadd.f32 %v10664_v49, %v665_v35  ;;  %v892_v25 = vmul.f32 %v10666_v1, %v6088_v27  ;;  %v893_v57 = vmul.f32 %v10666_v1, %v6091_v4  ;;  %v862_v30 = vadd.f32 %v858_v44, %v851_v50  ;;  %v10672_v49 = vld [vmem:[#allocation119_spill] sm:$0xff] }
 0x107   :  { %v680_v53 = vadd.f32 %v6278_v0, %v675_v62  ;;  %v863_v52 = vadd.f32 %v859_v17, %v852_v42  ;;  %v885_v11 = vrot.slane %v881_v10, 2  ;;  %v886_v61 = vrot.slane %v882_v34, 2 }
 0x108   :  { %v681_v13 = vadd.f32 %v6282_v33, %v676_v54  ;;  %v10667_v21 = vrot.slane %v6286_v9, 2  ;;  %v10668_v5 = vrot.slane %v6290_v59, 2  ;;  %v896_v35 = vrot.slane %v892_v25, 4 }
 0x109   :  { %v897_v0 = vrot.slane %v893_v57, 4  ;;  %v873_v45 = vadd.f32 %v869_v23, %v862_v30  ;;  %v874_v33 = vadd.f32 %v870_v51, %v863_v52  ;;  %v903_v58 = vmul.f32 %v10669_v14, %v6088_v27  ;;  %v10676_v52 = vld [vmem:[#allocation121_spill] sm:$0xff] }
 0x10a   :  { %v691_v43 = vadd.f32 %v10667_v21, %v680_v53  ;;  %v692_v29 = vadd.f32 %v10668_v5, %v681_v13  ;;  %v904_v55 = vmul.f32 %v10669_v14, %v6091_v4  ;;  %v10670_v44 = vrot.slane %v6298_v12, 4 }
 0x10b   :  { %v10671_v62 = vrot.slane %v6302_v63, 4  ;;  %v914_v59 = vmul.f32 %v10672_v49, %v6107_v18  ;;  %v915_v54 = vmul.f32 %v10672_v49, %v6110_v28  ;;  %v878_v23 = vadd.f32 %v876_v7, %v873_v45  ;;  %v10675_v63 = vld [vmem:[#allocation120_spill] sm:$0xff] }
 0x10c   :  { %v702_v17 = vadd.f32 %v10670_v44, %v691_v43  ;;  %v879_v51 = vadd.f32 %v877_v24, %v874_v33  ;;  %v907_v50 = vrot.slane %v903_v58, 6  ;;  %v908_v42 = vrot.slane %v904_v55, 6  ;;  %v10679_v44 = vld [vmem:[#allocation122_spill] sm:$0xff] }
 0x10d   :  { %v703_v9 = vadd.f32 %v10671_v62, %v692_v29  ;;  %v10673_v10 = vrot.slane %v6308_v60, 6  ;;  %v10674_v12 = vrot.slane %v6312_v41, 6  ;;  %v919_v13 = vmul.f32 %v10675_v63, %v6107_v18 }
 0x10e   :  { %v920_v25 = vmul.f32 %v10675_v63, %v6110_v28  ;;  %v889_v57 = vadd.f32 %v885_v11, %v878_v23  ;;  %v890_v30 = vadd.f32 %v886_v61, %v879_v51  ;;  %v930_v7 = vmul.f32 %v10676_v52, %v6107_v18 }
 0x10f   :  { %v713_v34 = vadd.f32 %v10673_v10, %v702_v17  ;;  %v714_v53 = vadd.f32 %v10674_v12, %v703_v9  ;;  %v931_v24 = vmul.f32 %v10676_v52, %v6110_v28  ;;  %v923_v41 = vrot.slane %v919_v13, 2  ;;  %v10680_v9 = vld [vmem:[#allocation125_spill] sm:$0xff]  ;;  %v10722_v52 = vld [vmem:[#allocation92_spill] sm:$0xff] }
 0x110   :  { %v924_v43 = vrot.slane %v920_v25, 2  ;;  %v900_v5 = vadd.f32 %v896_v35, %v889_v57  ;;  %v901_v29 = vadd.f32 %v897_v0, %v890_v30  ;;  %v934_v45 = vrot.slane %v930_v7, 4  ;;  %v10688_v30 = vld [vmem:[#allocation127_spill] sm:$0xff] }
 0x111   :  { %v718_v60 = vadd.f32 %v6324_v6, %v713_v34  ;;  %v719_v21 = vadd.f32 %v6328_v37, %v714_v53  ;;  %v935_v33 = vrot.slane %v931_v24, 4  ;;  %v10677_v58 = vrot.slane %v6336_v2, 2 }
 0x112   :  { %v10678_v61 = vrot.slane %v6340_v39, 2  ;;  %v941_v17 = vmul.f32 %v10679_v44, %v6107_v18  ;;  %v942_v6 = vmul.f32 %v10679_v44, %v6110_v28  ;;  %v911_v62 = vadd.f32 %v907_v50, %v900_v5  ;;  %v10683_v50 = vld [vmem:[#allocation126_spill] sm:$0xff] }
 0x113   :  { %v729_v11 = vadd.f32 %v10677_v58, %v718_v60  ;;  %v912_v37 = vadd.f32 %v908_v42, %v901_v29  ;;  %v6478_v35 = vmul.f32 %v10680_v9, %v6130_v40  ;;  %v6482_v0 = vmul.f32 %v10680_v9, %v6133_v48  ;;  %v10725_v9 = vld [vmem:[#allocation134_spill] sm:$0xff] }
 0x114   :  { %v730_v55 = vadd.f32 %v10678_v61, %v719_v21  ;;  %v10681_v2 = vrot.slane %v6344_v3, 4  ;;  %v10682_v23 = vrot.slane %v6348_v38, 4  ;;  %v945_v10 = vrot.slane %v941_v17, 6 }
 0x115   :  { %v946_v34 = vrot.slane %v942_v6, 6  ;;  %v916_v12 = vadd.f32 %v914_v59, %v911_v62  ;;  %v917_v53 = vadd.f32 %v915_v54, %v912_v37  ;;  %v6490_v42 = vmul.f32 %v10683_v50, %v6130_v40  ;;  %v10689_v6 = vld [vmem:[#allocation128_spill] sm:$0xff] }
 0x116   :  { %v740_v39 = vadd.f32 %v10681_v2, %v729_v11  ;;  %v741_v51 = vadd.f32 %v10682_v23, %v730_v55  ;;  %v6494_v13 = vmul.f32 %v10683_v50, %v6133_v48  ;;  %v10684_v25 = vrot.slane %v6352_v31, 6  ;;  %v10690_v23 = vld [vmem:[#allocation131_spill] sm:$0xff]  ;;  %v10714_v50 = vld [vmem:[#allocation164_spill] sm:$0xff] }
 0x117   :  { %v10686_v3 = vrot.slane %v6356_v8, 6  ;;  %v6506_v59 = vmul.f32 %v10688_v30, %v6130_v40  ;;  %v6510_v54 = vmul.f32 %v10688_v30, %v6133_v48  ;;  %v927_v7 = vadd.f32 %v923_v41, %v916_v12  ;;  %v10713_v30 = vld [vmem:[#allocation145_spill] sm:$0xff] }
 0x118   :  { %v6498_v57 = vadd.f32 %v10684_v25, %v740_v39  ;;  %v928_v24 = vadd.f32 %v924_v43, %v917_v53  ;;  %v6528_v62 = vmul.f32 %v10689_v6, %v6130_v40  ;;  %v6541_v12 = vmul.f32 %v10690_v23, %v6152_v22  ;;  %v10691_v53 = vld [vmem:[#allocation132_spill] sm:$0xff]  ;;  %v10700_v43 = vld [vmem:[#allocation139_spill] sm:$0xff] }
 0x119   :  { %v6502_v38 = vadd.f32 %v10686_v3, %v741_v51  ;;  %v938_v11 = vadd.f32 %v934_v45, %v927_v7  ;;  %v1011_v17 = vrot.slane %v6510_v54, 4  ;;  %v6532_v45 = vmul.f32 %v10689_v6, %v6133_v48  ;;  %v10693_v3 = vld [vmem:[#allocation124_spill] sm:$0xff] }
 0x11a   :  { %10685 = vst [vmem:[#allocation65_spill] sm:$0xff] %v6498_v57  ;;  %v754_v21 = vsel %vm753_vm8, %v6498_v57, 0.0  ;;  %v767_v5 = vmul.f32 %v6498_v57, %v6498_v57  ;;  %v939_v41 = vadd.f32 %v935_v33, %v928_v24  ;;  %v1021_v33 = vrot.slane %v6528_v62, 6  ;;  %v10698_v62 = vld [vmem:[#allocation110_spill] sm:$0xff] }
 0x11b   :  { %10687 = vst [vmem:[#allocation68_spill] sm:$0xff] %v6502_v38  ;;  %v755_v8 = vsel %vm753_vm8, %v6502_v38, 0.0  ;;  %v768_v29 = vmul.f32 %v6502_v38, %v6502_v38  ;;  %v949_v2 = vadd.f32 %v945_v10, %v938_v11  ;;  %v6537_v51 = vmul.f32 %v10690_v23, %v6149_v20  ;;  %v10692_v10 = vld [vmem:[#allocation123_spill] sm:$0xff]  ;;  %v10711_v23 = vld [vmem:[#allocation144_spill] sm:$0xff] }
 0x11c   :  { %v756_v58 = vadd.f32 %v755_v8, %v754_v21  ;;  %v769_v61 = vsel %vm753_vm8, %v767_v5, 0.0  ;;  %v950_v39 = vadd.f32 %v946_v34, %v939_v41  ;;  %v6545_v25 = vmul.f32 %v10691_v53, %v6149_v20  ;;  %v10694_v8 = vld [vmem:[#allocation133_spill] sm:$0xff] }
 0x11d   :  { %v770_v55 = vsel %vm753_vm8, %v768_v29, 0.0  ;;  %v954_v34 = vadd.f32 %v10692_v10, %v949_v2  ;;  %v1022_v7 = vrot.slane %v6532_v45, 6  ;;  %v6552_v24 = vmul.f32 %v10691_v53, %v6152_v22  ;;  %v10696_v41 = vld [vmem:[#allocation109_spill] sm:$0xff] }
 0x11e   :  { %757 = vadd.xlane.f32.xlu0 %v756_v58  ;;  %v771_v37 = vadd.f32 %v770_v55, %v769_v61  ;;  %v955_v54 = vadd.f32 %v10693_v3, %v950_v39  ;;  %v6557_v5 = vmul.f32 %v10694_v8, %v6149_v20  ;;  %v6561_v29 = vmul.f32 %v10694_v8, %v6152_v22  ;;  %v10695_v58 = vld [vmem:[#allocation135_spill] sm:$0xff]  ;;  %v10705_v3 = vld [vmem:[#allocation140_spill] sm:$0xff] }
 0x11f   :  { %v6565_v11 = vmul.f32 %v10695_v58, %v6149_v20  ;;  %v10697_v61 = vrot.slane %v10696_v41, 2  ;;  %v6574_v45 = vmul.f32 %v10695_v58, %v6152_v22  ;;  %v6581_v31 = vmul.f32 %v10700_v43, %v6167_v19  ;;  %v10709_v39 = vld [vmem:[#allocation116_spill] sm:$0xff] }
 0x120   :  { %772 = vadd.xlane.f32.xlu1 %v771_v37  ;;  %v10699_v37 = vrot.slane %v10698_v62, 2  ;;  %v6590_v60 = vmul.f32 %v10700_v43, %v6170_v36  ;;  %v6594_v10 = vmul.f32 %v10705_v3, %v6167_v19  ;;  %v6598_v21 = vmul.f32 %v10705_v3, %v6170_v36 }
 0x121   :  { %v965_v55 = vadd.f32 %v10697_v61, %v954_v34  ;;  %v10701_v34 = vld [vmem:[#allocation111_spill] sm:$0xff]  ;;  %v10710_v43 = vrot.slane %v10709_v39, 6  ;;  %v6614_v8 = vmul.f32 %v10711_v23, %v6167_v19  ;;  %v6618_v3 = vmul.f32 %v10711_v23, %v6170_v36 }
 0x122   :  { %v966_v2 = vadd.f32 %v10699_v37, %v955_v54  ;;  %v10702_v41 = vrot.slane %v10701_v34, 4  ;;  %v10703_v54 = vld [vmem:[#allocation112_spill] sm:$0xff]  ;;  %v10706_v34 = vld [vmem:[#allocation143_spill] sm:$0xff]  ;;  %v6634_v53 = vmul.f32 %v10713_v30, %v10714_v50  ;;  %v1196_v14 = vmul.f32 %v10722_v52, %v10644_v15 }
 0x123   :  { %v10704_v62 = vrot.slane %v10703_v54, 4  ;;  %v10718_v39 = vld [vmem:[#allocation147_spill] sm:$0xff]  ;;  %v10726_v46 = vrot.slane %v6545_v25, 2  ;;  %v10730_v25 = vrot.slane %v6557_v5, 4 }
 0x124   :  { %v976_v61 = vadd.f32 %v10702_v41, %v965_v55  ;;  %v6602_v55 = vmul.f32 %v10706_v34, %v6167_v19  ;;  %v10707_v41 = vld [vmem:[#allocation115_spill] sm:$0xff] }
 0x125   :  { %v977_v37 = vadd.f32 %v10704_v62, %v966_v2  ;;  %v6606_v2 = vmul.f32 %v10706_v34, %v6170_v36  ;;  %v10708_v54 = vrot.slane %v10707_v41, 6  ;;  %v10715_v34 = vld [vmem:[#allocation146_spill] sm:$0xff] }
 0x127   :  { %v987_v62 = vadd.f32 %v10708_v54, %v976_v61  ;;  %v988_v58 = vadd.f32 %v10710_v43, %v977_v37  ;;  %v10712_v54 = vld [vmem:[#allocation163_spill] sm:$0xff] }
 0x128   :  { %v6630_v23 = vmul.f32 %v10713_v30, %v10712_v54  ;;  %v6638_v6 = vmul.f32 %v10715_v34, %v10712_v54  ;;  %v6650_v41 = vmul.f32 %v10718_v39, %v10712_v54  ;;  %v6654_v30 = vmul.f32 %v10718_v39, %v10714_v50  ;;  %v10721_v39 = vld [vmem:[#allocation155_spill] sm:$0xff] }
 0x129   :  { %v992_v61 = vadd.f32 %v6478_v35, %v987_v62  ;;  %v993_v43 = vadd.f32 %v6482_v0, %v988_v58  ;;  %v6642_v35 = vmul.f32 %v10715_v34, %v10714_v50  ;;  %v10716_v0 = vrot.slane %v6490_v42, 2  ;;  %v10719_v34 = vld [vmem:[#allocation148_spill] sm:$0xff] }
 0x12a   :  { %v10717_v62 = vrot.slane %v6494_v13, 2  ;;  %v6660_v49 = vmul.f32 %v10719_v34, %v10712_v54  ;;  %v6664_v42 = vmul.f32 %v10719_v34, %v10714_v50  ;;  %v10720_v13 = vrot.slane %v6506_v59, 4  ;;  %v10723_v59 = vld [vmem:[#allocation129_spill] sm:$0xff] }
 0x12b   :  { %v1003_v58 = vadd.f32 %v10716_v0, %v992_v61  ;;  %v1195_v63 = vmul.f32 %v10722_v52, %v10721_v39  ;;  %v1221_v0 = vmul.f32 %v10725_v9, %v10644_v15 }
 0x12c   :  { %v1004_v37 = vadd.f32 %v10717_v62, %v993_v43  ;;  %v1220_v62 = vmul.f32 %v10725_v9, %v10721_v39  ;;  %v10728_v9 = vld [vmem:[#allocation136_spill] sm:$0xff] }
 0x12d   :  { %v1014_v61 = vadd.f32 %v10720_v13, %v1003_v58  ;;  %v1198_v58 = vmul.f32 %v10723_v59, %v10721_v39  ;;  %v1225_v26 = vrot.slane %v1221_v0, 6 }
 0x12e   :  { %v1015_v43 = vadd.f32 %v1011_v17, %v1004_v37  ;;  %v1199_v17 = vmul.f32 %v10723_v59, %v10644_v15  ;;  %v10724_v37 = vld [vmem:[#allocation130_spill] sm:$0xff]  ;;  %v1224_v47 = vrot.slane %v1220_v62, 6 }
 0x12f   :  { %v1025_v34 = vadd.f32 %v1021_v33, %v1014_v61  ;;  %v1209_v13 = vmul.f32 %v10724_v37, %v10721_v39  ;;  %v1210_v44 = vmul.f32 %v10724_v37, %v10644_v15  ;;  %v1202_v61 = vrot.slane %v1198_v58, 2  ;;  %v10732_v58 = vld [vmem:[#allocation138_spill] sm:$0xff] }
 0x130   :  { %v1026_v1 = vadd.f32 %v1022_v7, %v1015_v43  ;;  %v1203_v43 = vrot.slane %v1199_v17, 2  ;;  %v10727_v37 = vrot.slane %v6552_v24, 2  ;;  %v1231_v15 = vmul.f32 %v10728_v9, %v10652_v32 }
 0x131   :  { %v1030_v33 = vadd.f32 %v6537_v51, %v1025_v34  ;;  %v1213_v52 = vrot.slane %v1209_v13, 4  ;;  %v1214_v59 = vrot.slane %v1210_v44, 4  ;;  %v1206_v57 = vadd.f32 %v1202_v61, %v1195_v63  ;;  %v10729_v51 = vld [vmem:[#allocation137_spill] sm:$0xff] }
 0x132   :  { %v1031_v7 = vadd.f32 %v6541_v12, %v1026_v1  ;;  %v1207_v39 = vadd.f32 %v1203_v43, %v1196_v14  ;;  %v1232_v1 = vmul.f32 %v10728_v9, %v10654_v16  ;;  %v1236_v12 = vmul.f32 %v10729_v51, %v10652_v32 }
 0x133   :  { %v1041_v56 = vadd.f32 %v10726_v46, %v1030_v33  ;;  %v1237_v44 = vmul.f32 %v10729_v51, %v10654_v16  ;;  %v10731_v24 = vrot.slane %v6561_v29, 4  ;;  %v1217_v63 = vadd.f32 %v1213_v52, %v1206_v57  ;;  %v10735_v52 = vld [vmem:[#allocation141_spill] sm:$0xff] }
 0x134   :  { %v1042_v38 = vadd.f32 %v10727_v37, %v1031_v7  ;;  %v1218_v14 = vadd.f32 %v1214_v59, %v1207_v39  ;;  %v1240_v0 = vrot.slane %v1236_v12, 2  ;;  %v1247_v17 = vmul.f32 %v10732_v58, %v10652_v32 }
 0x135   :  { %v1052_v46 = vadd.f32 %v10730_v25, %v1041_v56  ;;  %v1241_v62 = vrot.slane %v1237_v44, 2  ;;  %v1248_v37 = vmul.f32 %v10732_v58, %v10654_v16  ;;  %v10733_v13 = vrot.slane %v6565_v11, 6 }
 0x136   :  { %v1053_v34 = vadd.f32 %v10731_v24, %v1042_v38  ;;  %v10734_v7 = vrot.slane %v6574_v45, 6  ;;  %v1228_v56 = vadd.f32 %v1224_v47, %v1217_v63  ;;  %v1229_v61 = vadd.f32 %v1225_v26, %v1218_v14  ;;  %v10736_v45 = vld [vmem:[#allocation149_spill] sm:$0xff] }
 0x137   :  { %v1063_v33 = vadd.f32 %v10733_v13, %v1052_v46  ;;  %v1251_v29 = vrot.slane %v1247_v17, 4  ;;  %v1252_v38 = vrot.slane %v1248_v37, 4  ;;  %v1258_v57 = vmul.f32 %v10735_v52, %v10652_v32  ;;  %v10740_v17 = vld [vmem:[#allocation151_spill] sm:$0xff] }
 0x138   :  { %v1064_v5 = vadd.f32 %v10734_v7, %v1053_v34  ;;  %v1259_v39 = vmul.f32 %v10735_v52, %v10654_v16  ;;  %v1233_v12 = vadd.f32 %v1231_v15, %v1228_v56  ;;  %v1234_v11 = vadd.f32 %v1232_v1, %v1229_v61 }
 0x139   :  { %v1068_v59 = vadd.f32 %v6581_v31, %v1063_v33  ;;  %v1262_v44 = vrot.slane %v1258_v57, 6  ;;  %v1269_v47 = vmul.f32 %v10736_v45, %v6088_v27  ;;  %v1270_v26 = vmul.f32 %v10736_v45, %v6091_v4 }
 0x13a   :  { %v1069_v43 = vadd.f32 %v6590_v60, %v1064_v5  ;;  %v1263_v25 = vrot.slane %v1259_v39, 6  ;;  %v10737_v46 = vrot.slane %v6594_v10, 2  ;;  %v10738_v34 = vrot.slane %v6598_v21, 2  ;;  %v10739_v60 = vld [vmem:[#allocation150_spill] sm:$0xff] }
 0x13b   :  { %v1244_v14 = vadd.f32 %v1240_v0, %v1233_v12  ;;  %v1245_v31 = vadd.f32 %v1241_v62, %v1234_v11  ;;  %v1274_v15 = vmul.f32 %v10739_v60, %v6088_v27  ;;  %v1275_v1 = vmul.f32 %v10739_v60, %v6091_v4 }
 0x13c   :  { %v1079_v24 = vadd.f32 %v10737_v46, %v1068_v59  ;;  %v1080_v63 = vadd.f32 %v10738_v34, %v1069_v43  ;;  %v1285_v37 = vmul.f32 %v10740_v17, %v6088_v27  ;;  %v1286_v13 = vmul.f32 %v10740_v17, %v6091_v4 }
 0x13d   :  { %v10741_v10 = vrot.slane %v6602_v55, 4  ;;  %v10742_v21 = vrot.slane %v6606_v2, 4  ;;  %v1255_v0 = vadd.f32 %v1251_v29, %v1244_v14  ;;  %v1256_v62 = vadd.f32 %v1252_v38, %v1245_v31  ;;  %v10745_v55 = vld [vmem:[#allocation152_spill] sm:$0xff]  ;;  %v10746_v29 = vld [vmem:[#allocation153_spill] sm:$0xff]  ;;  %v10747_v31 = vld [vmem:[#allocation154_spill] sm:$0xff] }
 0x13e   :  { %v1278_v5 = vrot.slane %v1274_v15, 2  ;;  %v1279_v56 = vrot.slane %v1275_v1, 2  ;;  %v1289_v61 = vrot.slane %v1285_v37, 4  ;;  %v1290_v57 = vrot.slane %v1286_v13, 4 }
 0x13f   :  { %v1090_v33 = vadd.f32 %v10741_v10, %v1079_v24  ;;  %v1091_v7 = vadd.f32 %v10742_v21, %v1080_v63  ;;  %v10743_v39 = vrot.slane %v6614_v8, 6  ;;  %v10744_v43 = vrot.slane %v6618_v3, 6  ;;  %v10750_v21 = vld [vmem:[#allocation157_spill] sm:$0xff] }
 0x140   :  { %v1266_v11 = vadd.f32 %v1262_v44, %v1255_v0  ;;  %v1267_v46 = vadd.f32 %v1263_v25, %v1256_v62  ;;  %v1296_v24 = vmul.f32 %v10745_v55, %v6088_v27  ;;  %v1297_v2 = vmul.f32 %v10745_v55, %v6091_v4 }
 0x141   :  { %v1101_v59 = vadd.f32 %v10743_v39, %v1090_v33  ;;  %v1102_v12 = vadd.f32 %v10744_v43, %v1091_v7  ;;  %v1307_v38 = vmul.f32 %v10746_v29, %v6107_v18  ;;  %v1308_v34 = vmul.f32 %v10746_v29, %v6110_v28 }
 0x142   :  { %v1271_v3 = vadd.f32 %v1269_v47, %v1266_v11  ;;  %v1272_v14 = vadd.f32 %v1270_v26, %v1267_v46  ;;  %v1300_v44 = vrot.slane %v1296_v24, 6  ;;  %v1301_v25 = vrot.slane %v1297_v2, 6 }
 0x143   :  { %v1106_v8 = vadd.f32 %v6630_v23, %v1101_v59  ;;  %v1107_v63 = vadd.f32 %v6634_v53, %v1102_v12  ;;  %v1312_v15 = vmul.f32 %v10747_v31, %v6107_v18  ;;  %v1313_v1 = vmul.f32 %v10747_v31, %v6110_v28  ;;  %v10753_v12 = vld [vmem:[#allocation158_spill] sm:$0xff] }
 0x144   :  { %v10748_v37 = vrot.slane %v6638_v6, 2  ;;  %v10749_v10 = vrot.slane %v6642_v35, 2  ;;  %v1282_v33 = vadd.f32 %v1278_v5, %v1271_v3  ;;  %v1283_v53 = vadd.f32 %v1279_v56, %v1272_v14  ;;  %v6792_v3 = vld [vmem:[#allocation11] sm:$0xff]  ;;  %v10756_v14 = vld [vmem:[#allocation161_spill] sm:$0xff] }
 0x145   :  { %v1316_v47 = vrot.slane %v1312_v15, 2  ;;  %v1317_v26 = vrot.slane %v1313_v1, 2  ;;  %v1323_v7 = vmul.f32 %v10750_v21, %v6107_v18  ;;  %v1324_v0 = vmul.f32 %v10750_v21, %v6110_v28  ;;  %v6796_v15 = vld [vmem:[#allocation11 + $0x8] sm:$0xff] }
 0x146   :  { %v1117_v13 = vadd.f32 %v10748_v37, %v1106_v8  ;;  %v1118_v23 = vadd.f32 %v10749_v10, %v1107_v63  ;;  %v10751_v6 = vrot.slane %v6650_v41, 4  ;;  %v10752_v35 = vrot.slane %v6654_v30, 4  ;;  %v10757_v10 = vld [vmem:[#allocation162_spill] sm:$0xff] }
 0x147   :  { %v1293_v5 = vadd.f32 %v1289_v61, %v1282_v33  ;;  %v1294_v56 = vadd.f32 %v1290_v57, %v1283_v53  ;;  %v1327_v59 = vrot.slane %v1323_v7, 4  ;;  %v1328_v43 = vrot.slane %v1324_v0, 4 }
 0x148   :  { %v1128_v62 = vadd.f32 %v10751_v6, %v1117_v13  ;;  %v1129_v39 = vadd.f32 %v10752_v35, %v1118_v23  ;;  %v1334_v11 = vmul.f32 %v10753_v12, %v6107_v18  ;;  %v1335_v46 = vmul.f32 %v10753_v12, %v6110_v28 }
 0x149   :  { %v10754_v24 = vrot.slane %v6660_v49, 6  ;;  %v10755_v41 = vrot.slane %v6664_v42, 6  ;;  %v1304_v30 = vadd.f32 %v1300_v44, %v1293_v5  ;;  %v1305_v61 = vadd.f32 %v1301_v25, %v1294_v56 }
 0x14a   :  { %v1338_v57 = vrot.slane %v1334_v11, 6  ;;  %v1339_v63 = vrot.slane %v1335_v46, 6  ;;  %v1345_v49 = vmul.f32 %v6792_v3, %v10756_v14  ;;  %v1346_v42 = vmul.f32 %v6796_v15, %v10756_v14 }
 0x14b   :  { %v6782_v2 = vadd.f32 %v10754_v24, %v1128_v62  ;;  %v6786_v8 = vadd.f32 %v10755_v41, %v1129_v39  ;;  %v1309_v25 = vadd.f32 %v1307_v38, %v1304_v30  ;;  %v1310_v37 = vadd.f32 %v1308_v34, %v1305_v61 }
 0x14c   :  { %v1350_v23 = vmul.f32 %v6792_v3, %v10757_v10  ;;  %v1351_v33 = vmul.f32 %v6796_v15, %v10757_v10  ;;  %v6813_v53 = vstv %s6754_s25  ;;  %v6820_v35 = vstv %s6764_s30  ;;  %s7114_s25 = sld [smem:[#allocation2 + $0x3b]]  ;;  %s7122_s30 = sld [smem:[#allocation2 + $0x3f]] }
 0x14d   :  { %v1141_v1 = vsel %vm753_vm8, %v6782_v2, 0.0  ;;  %v1142_v44 = vsel %vm753_vm8, %v6786_v8, 0.0  ;;  %10758 = vst [vmem:[#allocation69_spill] sm:$0xff] %v6813_v53  ;;  %v1320_v7 = vadd.f32 %v1316_v47, %v1309_v25  ;;  %v1321_v0 = vadd.f32 %v1317_v26, %v1310_v37  ;;  %10759 = vst [vmem:[#allocation73_spill] sm:$0xff] %v6820_v35 }
 0x14e   :  { %v1143_v13 = vadd.f32 %v1142_v44, %v1141_v1  ;;  %v1361_v38 = vmul.f32 %v6792_v3, %v6813_v53  ;;  %v1362_v34 = vmul.f32 %v6796_v15, %v6813_v53  ;;  %v1354_v6 = vrot.slane %v1350_v23, 2 }
 0x14f   :  { %v1355_v62 = vrot.slane %v1351_v33, 2  ;;  %v6823_v39 = vstv %s6766_s12  ;;  %v1331_v47 = vadd.f32 %v1327_v59, %v1320_v7  ;;  %v1332_v26 = vadd.f32 %v1328_v43, %v1321_v0  ;;  %s7141_s12 = sld [smem:[#allocation2 + $0x47]] }
 0x150   :  { %1144 = vadd.xlane.f32.xlu0 %v1143_v13  ;;  %10760 = vst [vmem:[#allocation159_spill] sm:$0xff] %v6823_v39  ;;  %v1365_v5 = vrot.slane %v1361_v38, 4  ;;  %v1366_v56 = vrot.slane %v1362_v34, 4  ;;  %v1372_v11 = vmul.f32 %v6792_v3, %v6820_v35  ;;  %v1373_v46 = vmul.f32 %v6796_v15, %v6820_v35 }
 0x151   :  { %v1383_v24 = vmul.f32 %v6823_v39, %v6130_v40  ;;  %v1384_v41 = vmul.f32 %v6823_v39, %v6133_v48  ;;  %v1342_v30 = vadd.f32 %v1338_v57, %v1331_v47  ;;  %v1343_v61 = vadd.f32 %v1339_v63, %v1332_v26 }
 0x152   :  { %v6838_v59 = vstv %s6788_s28  ;;  %v6841_v43 = vstv %s6790_s9  ;;  %v1376_v1 = vrot.slane %v1372_v11, 6  ;;  %v1377_v44 = vrot.slane %v1373_v46, 6  ;;  %s7145_s28 = sld [smem:[#allocation2 + $0x43]] }
 0x153   :  { %10761 = vst [vmem:[#allocation160_spill] sm:$0xff] %v6838_v59  ;;  %10762 = vst [vmem:[#allocation123_spill] sm:$0xff] %v6841_v43  ;;  %v1388_v25 = vmul.f32 %v6838_v59, %v6130_v40  ;;  %v1389_v37 = vmul.f32 %v6838_v59, %v6133_v48  ;;  %v1347_v57 = vadd.f32 %v1345_v49, %v1342_v30  ;;  %v6856_v0 = vstv %s6804_s4  ;;  %s7149_s9 = sld [smem:[#allocation2 + $0x4b]]  ;;  %s7157_s4 = sld [smem:[#allocation2 + $0x4f]] }
 0x154   :  { %v1348_v13 = vadd.f32 %v1346_v42, %v1343_v61  ;;  %v1399_v63 = vmul.f32 %v6841_v43, %v6130_v40  ;;  %v1400_v23 = vmul.f32 %v6841_v43, %v6133_v48  ;;  %10763 = vst [vmem:[#allocation124_spill] sm:$0xff] %v6856_v0  ;;  %v6859_v38 = vstv %s6806_s10  ;;  %s7175_s10 = sld [smem:[#allocation2 + $0x57]] }
 0x155   :  { %v1392_v33 = vrot.slane %v1388_v25, 2  ;;  %v1393_v7 = vrot.slane %v1389_v37, 2  ;;  %10764 = vst [vmem:[#allocation109_spill] sm:$0xff] %v6859_v38  ;;  %v1358_v49 = vadd.f32 %v1354_v6, %v1347_v57  ;;  %v1410_v26 = vmul.f32 %v6856_v0, %v6130_v40 }
 0x156   :  { %v1359_v42 = vadd.f32 %v1355_v62, %v1348_v13  ;;  %v1403_v34 = vrot.slane %v1399_v63, 4  ;;  %v1404_v47 = vrot.slane %v1400_v23, 4  ;;  %v1411_v11 = vmul.f32 %v6856_v0, %v6133_v48 }
 0x157   :  { %v1421_v46 = vmul.f32 %v6859_v38, %v6149_v20  ;;  %v1422_v30 = vmul.f32 %v6859_v38, %v6152_v22  ;;  %v1369_v61 = vadd.f32 %v1365_v5, %v1358_v49  ;;  %v6874_v6 = vstv %s6825_s1  ;;  %s7184_s1 = sld [smem:[#allocation2 + $0x53]] }
 0x158   :  { %v1370_v25 = vadd.f32 %v1366_v56, %v1359_v42  ;;  %10765 = vst [vmem:[#allocation110_spill] sm:$0xff] %v6874_v6  ;;  %v6877_v62 = vstv %s6827_s0  ;;  %v1414_v37 = vrot.slane %v1410_v26, 6  ;;  %v1415_v57 = vrot.slane %v1411_v11, 6  ;;  %s7196_s0 = sld [smem:[#allocation2 + $0x5b]] }
 0x159   :  { %10766 = vst [vmem:[#allocation111_spill] sm:$0xff] %v6877_v62  ;;  %v1426_v13 = vmul.f32 %v6874_v6, %v6149_v20  ;;  %v1427_v63 = vmul.f32 %v6874_v6, %v6152_v22  ;;  %v1380_v5 = vadd.f32 %v1376_v1, %v1369_v61  ;;  %v1437_v56 = vmul.f32 %v6877_v62, %v6149_v20 }
 0x15a   :  { %v1381_v23 = vadd.f32 %v1377_v44, %v1370_v25  ;;  %v1438_v49 = vmul.f32 %v6877_v62, %v6152_v22  ;;  %v6892_v26 = vstv %s6843_s18  ;;  %v6895_v11 = vstv %s6845_s19  ;;  %s7207_s18 = sld [smem:[#allocation2 + $0x5f]] }
 0x15b   :  { %v1430_v42 = vrot.slane %v1426_v13, 2  ;;  %v1431_v38 = vrot.slane %v1427_v63, 2  ;;  %10767 = vst [vmem:[#allocation112_spill] sm:$0xff] %v6892_v26  ;;  %10768 = vst [vmem:[#allocation115_spill] sm:$0xff] %v6895_v11  ;;  %v1385_v1 = vadd.f32 %v1383_v24, %v1380_v5  ;;  %v1441_v61 = vrot.slane %v1437_v56, 4  ;;  %s7215_s19 = sld [smem:[#allocation2 + $0x67]] }
 0x15c   :  { %v1386_v44 = vadd.f32 %v1384_v41, %v1381_v23  ;;  %v1442_v25 = vrot.slane %v1438_v49, 4  ;;  %v1448_v6 = vmul.f32 %v6892_v26, %v6149_v20  ;;  %v1449_v13 = vmul.f32 %v6892_v26, %v6152_v22 }
 0x15d   :  { %v6907_v63 = vmul.f32 %v6895_v11, %v6167_v19  ;;  %v6911_v62 = vmul.f32 %v6895_v11, %v6170_v36  ;;  %v1396_v0 = vadd.f32 %v1392_v33, %v1385_v1  ;;  %v6914_v41 = vstv %s6861_s23  ;;  %s7222_s23 = sld [smem:[#allocation2 + $0x63]] }
 0x15e   :  { %v1397_v24 = vadd.f32 %v1393_v7, %v1386_v44  ;;  %10769 = vst [vmem:[#allocation116_spill] sm:$0xff] %v6914_v41  ;;  %v6917_v5 = vstv %s6863_s21  ;;  %v1452_v23 = vrot.slane %v1448_v6, 6  ;;  %v1453_v56 = vrot.slane %v1449_v13, 6  ;;  %s7229_s21 = sld [smem:[#allocation2 + $0x6b]] }
 0x15f   :  { %10770 = vst [vmem:[#allocation163_spill] sm:$0xff] %v6917_v5  ;;  %v6923_v49 = vmul.f32 %v6914_v41, %v6167_v19  ;;  %v6927_v11 = vmul.f32 %v6914_v41, %v6170_v36  ;;  %v1407_v26 = vadd.f32 %v1403_v34, %v1396_v0  ;;  %v6931_v7 = vmul.f32 %v6917_v5, %v6167_v19 }
 0x160   :  { %v1408_v33 = vadd.f32 %v1404_v47, %v1397_v24  ;;  %v6935_v1 = vmul.f32 %v6917_v5, %v6170_v36  ;;  %v6940_v13 = vstv %s6879_s7  ;;  %v6943_v41 = vstv %s6881_s2  ;;  %s7238_s7 = sld [smem:[#allocation2 + $0x6f]] }
 0x161   :  { %v1468_v6 = vrot.slane %v6923_v49, 2  ;;  %v1469_v44 = vrot.slane %v6927_v11, 2  ;;  %10771 = vst [vmem:[#allocation164_spill] sm:$0xff] %v6940_v13  ;;  %10772 = vst [vmem:[#allocation165_spill] sm:$0xff] %v6943_v41  ;;  %v1418_v0 = vadd.f32 %v1414_v37, %v1407_v26  ;;  %v1479_v47 = vrot.slane %v6931_v7, 4  ;;  %s7247_s2 = sld [smem:[#allocation2 + $0x77]] }
 0x162   :  { %v1419_v34 = vadd.f32 %v1415_v57, %v1408_v33  ;;  %v1480_v24 = vrot.slane %v6935_v1, 4  ;;  %v6949_v5 = vmul.f32 %v6940_v13, %v6167_v19  ;;  %v6953_v49 = vmul.f32 %v6940_v13, %v6170_v36 }
 0x163   :  { %v6957_v11 = vmul.f32 %v6943_v41, %v10712_v54  ;;  %v6961_v37 = vmul.f32 %v6943_v41, %v10714_v50  ;;  %v1423_v57 = vadd.f32 %v1421_v46, %v1418_v0  ;;  %v6966_v33 = vstv %s6897_s22  ;;  %s7256_s22 = sld [smem:[#allocation2 + $0x73]] }
 0x164   :  { %v1424_v26 = vadd.f32 %v1422_v30, %v1419_v34  ;;  %10773 = vst [vmem:[#allocation166_spill] sm:$0xff] %v6966_v33  ;;  %v6969_v7 = vstv %s6899_s15  ;;  %v1490_v1 = vrot.slane %v6949_v5, 6  ;;  %v1491_v13 = vrot.slane %v6953_v49, 6  ;;  %s7263_s15 = sld [smem:[#allocation2 + $0x7b]] }
 0x165   :  { %10774 = vst [vmem:[#allocation167_spill] sm:$0xff] %v6969_v7  ;;  %v6977_v39 = vmul.f32 %v6966_v33, %v10712_v54  ;;  %v6981_v41 = vmul.f32 %v6966_v33, %v10714_v50  ;;  %v1434_v46 = vadd.f32 %v1430_v42, %v1423_v57  ;;  %v6989_v0 = vmul.f32 %v6969_v7, %v10712_v54 }
 0x166   :  { %v1435_v30 = vadd.f32 %v1431_v38, %v1424_v26  ;;  %v6993_v5 = vmul.f32 %v6969_v7, %v10714_v50  ;;  %v6998_v33 = vstv %s6919_s8  ;;  %v1154_v43 = vmul.f32 %v6782_v2, %v6782_v2  ;;  %v10778_v38 = vld [vmem:[#allocation156_spill] sm:$0xff]  ;;  %s7274_s8 = sld [smem:[#allocation2 + $0x7f]] }
 0x167   :  { %10775 = vst [vmem:[#allocation168_spill] sm:$0xff] %v6998_v33  ;;  %v1445_v59 = vadd.f32 %v1441_v61, %v1434_v46  ;;  %v7006_v26 = vmul.f32 %v6998_v33, %v10712_v54  ;;  %v7010_v34 = vmul.f32 %v6998_v33, %v10714_v50  ;;  %v1155_v49 = vmul.f32 %v6786_v8, %v6786_v8  ;;  %v10776_v46 = vld [vmem:[#allocation155_spill] sm:$0xff] }
 0x168   :  { %v1446_v42 = vadd.f32 %v1442_v25, %v1435_v30  ;;  %v1156_v7 = vsel %vm753_vm8, %v1154_v43, 0.0  ;;  %v10777_v30 = vld [vmem:[#allocation142_spill] sm:$0xff]  ;;  %v7036_v33 = vstv %s6971_s27  ;;  %v7039_v21 = vstv %s6983_s6  ;;  %s7294_s27 = sld [smem:[#allocation2 + $0x83]] }
 0x169   :  { %v1456_v61 = vadd.f32 %v1452_v23, %v1445_v59  ;;  %v1588_v57 = vmul.f32 %v10777_v30, %v10776_v46  ;;  %v1589_v12 = vmul.f32 %v10777_v30, %v10778_v38  ;;  %v1157_v29 = vsel %vm753_vm8, %v1155_v49, 0.0  ;;  %10780 = vst [vmem:[#allocation156_spill] sm:$0xff] %v7036_v33  ;;  %10781 = vst [vmem:[#allocation169_spill] sm:$0xff] %v7039_v21  ;;  %s7304_s6 = sld [smem:[#allocation2 + $0x8b]] }
 0x16a   :  { %v1457_v25 = vadd.f32 %v1453_v56, %v1446_v42  ;;  %v7027_v59 = vstv %s6963_s26  ;;  %v1158_v56 = vadd.f32 %v1157_v29, %v1156_v7  ;;  %v7042_v49 = vstv %s6985_s16  ;;  %s7283_s26 = sld [smem:[#allocation2 + $0x87]] }
 0x16b   :  { %10779 = vst [vmem:[#allocation155_spill] sm:$0xff] %v7027_v59  ;;  %v1461_v43 = vadd.f32 %v6907_v63, %v1456_v61  ;;  %v1591_v42 = vmul.f32 %v7027_v59, %v10776_v46  ;;  %v1592_v30 = vmul.f32 %v7027_v59, %v10778_v38  ;;  %10782 = vst [vmem:[#allocation170_spill] sm:$0xff] %v7042_v49  ;;  %s7310_s16 = sld [smem:[#allocation2 + $0x8f]] }
 0x16c   :  { %v1462_v23 = vadd.f32 %v6911_v62, %v1457_v25  ;;  %1159 = vadd.xlane.f32.xlu0 %v1158_v56  ;;  %v1602_v62 = vmul.f32 %v7036_v33, %v10776_v46  ;;  %v1603_v63 = vmul.f32 %v7036_v33, %v10778_v38  ;;  %v1613_v7 = vmul.f32 %v7039_v21, %v10776_v46 }
 0x16d   :  { %v1472_v31 = vadd.f32 %v1468_v6, %v1461_v43  ;;  %v1595_v17 = vrot.slane %v1591_v42, 2  ;;  %v1596_v29 = vrot.slane %v1592_v30, 2  ;;  %v1614_v61 = vmul.f32 %v7039_v21, %v10778_v38 }
 0x16e   :  { %v1473_v55 = vadd.f32 %v1469_v44, %v1462_v23  ;;  %v1606_v44 = vrot.slane %v1602_v62, 4  ;;  %v1607_v43 = vrot.slane %v1603_v63, 4  ;;  %v1617_v23 = vrot.slane %v1613_v7, 6 }
 0x16f   :  { %v1483_v25 = vadd.f32 %v1479_v47, %v1472_v31  ;;  %v1599_v6 = vadd.f32 %v1595_v17, %v1588_v57  ;;  %v1600_v30 = vadd.f32 %v1596_v29, %v1589_v12  ;;  %v1618_v56 = vrot.slane %v1614_v61, 6 }
 0x170   :  { %v1484_v59 = vadd.f32 %v1480_v24, %v1473_v55  ;;  %v1624_v38 = vmul.f32 %v7042_v49, %v10652_v32  ;;  %v1625_v55 = vmul.f32 %v7042_v49, %v10654_v16  ;;  %v7061_v47 = vstv %s7015_s5  ;;  %v10871_v49 = vld [vmem:[#allocation61_spill] sm:$0xff] }
 0x171   :  { %v1494_v42 = vadd.f32 %v1490_v1, %v1483_v25  ;;  %v1610_v46 = vadd.f32 %v1606_v44, %v1599_v6  ;;  %v1611_v31 = vadd.f32 %v1607_v43, %v1600_v30  ;;  %10783 = vst [vmem:[#allocation171_spill] sm:$0xff] %v7061_v47  ;;  %v7064_v17 = vstv %s7024_s3 }
 0x172   :  { %v1495_v33 = vadd.f32 %v1491_v13, %v1484_v59  ;;  %10784 = vst [vmem:[#allocation172_spill] sm:$0xff] %v7064_v17  ;;  %v1629_v1 = vmul.f32 %v7061_v47, %v10652_v32  ;;  %v1630_v59 = vmul.f32 %v7061_v47, %v10654_v16  ;;  %v1640_v62 = vmul.f32 %v7064_v17, %v10652_v32 }
 0x173   :  { %v1499_v24 = vadd.f32 %v6957_v11, %v1494_v42  ;;  %v1621_v13 = vadd.f32 %v1617_v23, %v1610_v46  ;;  %v1622_v57 = vadd.f32 %v1618_v56, %v1611_v31  ;;  %v1641_v11 = vmul.f32 %v7064_v17, %v10654_v16 }
 0x174   :  { %v1500_v12 = vadd.f32 %v6961_v37, %v1495_v33  ;;  %v10785_v37 = vrot.slane %v6977_v39, 2  ;;  %v10786_v29 = vrot.slane %v6981_v41, 2  ;;  %v1633_v61 = vrot.slane %v1629_v1, 2 }
 0x175   :  { %v1626_v7 = vadd.f32 %v1624_v38, %v1621_v13  ;;  %v1627_v25 = vadd.f32 %v1625_v55, %v1622_v57  ;;  %v1634_v6 = vrot.slane %v1630_v59, 2  ;;  %v1644_v44 = vrot.slane %v1640_v62, 4 }
 0x176   :  { %v1510_v33 = vadd.f32 %v10785_v37, %v1499_v24  ;;  %v1511_v63 = vadd.f32 %v10786_v29, %v1500_v12  ;;  %v1645_v30 = vrot.slane %v1641_v11, 4  ;;  %v10787_v43 = vrot.slane %v6989_v0, 4 }
 0x177   :  { %v10788_v56 = vrot.slane %v6993_v5, 4  ;;  %v1637_v39 = vadd.f32 %v1633_v61, %v1626_v7  ;;  %v7091_v46 = vstv %s7052_s17  ;;  %v1638_v41 = vadd.f32 %v1634_v6, %v1627_v25 }
 0x178   :  { %v1521_v23 = vadd.f32 %v10787_v43, %v1510_v33  ;;  %10789 = vst [vmem:[#allocation173_spill] sm:$0xff] %v7091_v46  ;;  %v1651_v38 = vmul.f32 %v7091_v46, %v10652_v32  ;;  %v1652_v0 = vmul.f32 %v7091_v46, %v10654_v16  ;;  %v7102_v31 = vstv %s7054_s20 }
 0x179   :  { %v1522_v42 = vadd.f32 %v10788_v56, %v1511_v63  ;;  %10790 = vst [vmem:[#allocation174_spill] sm:$0xff] %v7102_v31  ;;  %v10791_v5 = vrot.slane %v7006_v26, 6  ;;  %v10792_v24 = vrot.slane %v7010_v34, 6  ;;  %v1648_v13 = vadd.f32 %v1644_v44, %v1637_v39 }
 0x17a   :  { %v1662_v1 = vmul.f32 %v7102_v31, %v6088_v27  ;;  %v1649_v32 = vadd.f32 %v1645_v30, %v1638_v41  ;;  %v1655_v57 = vrot.slane %v1651_v38, 6  ;;  %v1656_v16 = vrot.slane %v1652_v0, 6 }
 0x17b   :  { %v7106_v55 = vadd.f32 %v10791_v5, %v1521_v23  ;;  %v7110_v12 = vadd.f32 %v10792_v24, %v1522_v42  ;;  %v1663_v59 = vmul.f32 %v7102_v31, %v6091_v4  ;;  %v7125_v62 = vstv %s7068_s24 }
 0x17c   :  { %10793 = vst [vmem:[#allocation175_spill] sm:$0xff] %v7125_v62  ;;  %v7128_v11 = vstv %s7070_s14  ;;  %v1659_v33 = vadd.f32 %v1655_v57, %v1648_v13  ;;  %v1660_v29 = vadd.f32 %v1656_v16, %v1649_v32  ;;  %v1667_v63 = vmul.f32 %v7125_v62, %v6088_v27 }
 0x17d   :  { %v1534_v26 = vsel %vm753_vm8, %v7106_v55, 0.0  ;;  %v1535_v34 = vsel %vm753_vm8, %v7110_v12, 0.0  ;;  %10794 = vst [vmem:[#allocation176_spill] sm:$0xff] %v7128_v11  ;;  %v1668_v7 = vmul.f32 %v7125_v62, %v6091_v4  ;;  %v1678_v61 = vmul.f32 %v7128_v11, %v6088_v27  ;;  %v10863_v62 = vld [vmem:[#allocation37_spill] sm:$0xff] }
 0x17e   :  { %v1536_v37 = vadd.f32 %v1535_v34, %v1534_v26  ;;  %v1679_v25 = vmul.f32 %v7128_v11, %v6091_v4  ;;  %v7139_v6 = vstv %s7084_s29  ;;  %v1664_v44 = vadd.f32 %v1662_v1, %v1659_v33 }
 0x17f   :  { %10795 = vst [vmem:[#allocation177_spill] sm:$0xff] %v7139_v6  ;;  %v1665_v30 = vadd.f32 %v1663_v59, %v1660_v29  ;;  %v1671_v43 = vrot.slane %v1667_v63, 2  ;;  %v1689_v23 = vmul.f32 %v7139_v6, %v6088_v27  ;;  %v1672_v56 = vrot.slane %v1668_v7, 2 }
 0x180   :  { %1537 = vadd.xlane.f32.xlu1 %v1536_v37  ;;  %v1690_v42 = vmul.f32 %v7139_v6, %v6091_v4  ;;  %v1682_v41 = vrot.slane %v1678_v61, 4  ;;  %v7152_v38 = vstv %s7093_s11  ;;  %v7155_v0 = vstv %s7095_s13  ;;  %s7377_s11 = sld [smem:[#allocation7]] }
 0x181   :  { %v1675_v39 = vadd.f32 %v1671_v43, %v1664_v44  ;;  %10796 = vst [vmem:[#allocation178_spill] sm:$0xff] %v7152_v38  ;;  %10797 = vst [vmem:[#allocation179_spill] sm:$0xff] %v7155_v0  ;;  %v1676_v5 = vadd.f32 %v1672_v56, %v1665_v30  ;;  %v1683_v27 = vrot.slane %v1679_v25, 4  ;;  %v1693_v24 = vrot.slane %v1689_v23, 6  ;;  %s7379_s13 = sld [smem:[#allocation8]] }
 0x182   :  { %v1700_v13 = vmul.f32 %v7152_v38, %v6107_v18  ;;  %v1705_v4 = vmul.f32 %v7155_v0, %v6107_v18  ;;  %v1706_v32 = vmul.f32 %v7155_v0, %v6110_v28  ;;  %v7166_v57 = vstv %s7114_s25 }
 0x183   :  { %v1686_v1 = vadd.f32 %v1682_v41, %v1675_v39  ;;  %10798 = vst [vmem:[#allocation180_spill] sm:$0xff] %v7166_v57  ;;  %v1687_v16 = vadd.f32 %v1683_v27, %v1676_v5  ;;  %v1694_v59 = vrot.slane %v1690_v42, 6  ;;  %v1701_v26 = vmul.f32 %v7152_v38, %v6110_v28 }
 0x184   :  { %v7171_v34 = vstv %s7122_s30  ;;  %v1709_v33 = vrot.slane %v1705_v4, 2  ;;  %v1716_v29 = vmul.f32 %v7166_v57, %v6107_v18  ;;  %v1710_v7 = vrot.slane %v1706_v32, 2 }
 0x185   :  { %10799 = vst [vmem:[#allocation181_spill] sm:$0xff] %v7171_v34  ;;  %v1697_v37 = vadd.f32 %v1693_v24, %v1686_v1  ;;  %v1698_v63 = vadd.f32 %v1694_v59, %v1687_v16  ;;  %v1717_v61 = vmul.f32 %v7166_v57, %v6110_v28  ;;  %v1727_v44 = vmul.f32 %v7171_v34, %v6107_v18 }
 0x186   :  { %v7182_v30 = vstv %s7141_s12  ;;  %v1728_v23 = vmul.f32 %v7171_v34, %v6110_v28  ;;  %v7189_v56 = vstv %s7145_s28  ;;  %v1720_v39 = vrot.slane %v1716_v29, 4 }
 0x187   :  { %v1702_v25 = vadd.f32 %v1700_v13, %v1697_v37  ;;  %10800 = vst [vmem:[#allocation182_spill] sm:$0xff] %v7182_v30  ;;  %v1703_v43 = vadd.f32 %v1701_v26, %v1698_v63  ;;  %10801 = vst [vmem:[#allocation183_spill] sm:$0xff] %v7189_v56  ;;  %v1743_v41 = vmul.f32 %v6792_v3, %v7182_v30  ;;  %v7194_v5 = vstv %s7149_s9 }
 0x188   :  { %10802 = vst [vmem:[#allocation184_spill] sm:$0xff] %v7194_v5  ;;  %v1721_v27 = vrot.slane %v1717_v61, 4  ;;  %v1744_v24 = vmul.f32 %v6796_v15, %v7182_v30  ;;  %v7201_v13 = vstv %s7157_s4  ;;  %v1731_v28 = vrot.slane %v1727_v44, 6  ;;  %v10864_v30 = vld [vmem:[#allocation39_spill] sm:$0xff] }
 0x189   :  { %v1713_v42 = vadd.f32 %v1709_v33, %v1702_v25  ;;  %v1714_v18 = vadd.f32 %v1710_v7, %v1703_v43  ;;  %10803 = vst [vmem:[#allocation185_spill] sm:$0xff] %v7201_v13  ;;  %v1738_v4 = vmul.f32 %v6792_v3, %v7189_v56  ;;  %v1754_v32 = vmul.f32 %v6792_v3, %v7194_v5 }
 0x18a   :  { %v1732_v59 = vrot.slane %v1728_v23, 6  ;;  %v1739_v26 = vmul.f32 %v6796_v15, %v7189_v56  ;;  %v1755_v37 = vmul.f32 %v6796_v15, %v7194_v5  ;;  %v1747_v29 = vrot.slane %v1743_v41, 2  ;;  %v10861_v5 = vld [vmem:[#allocation48_spill] sm:$0xff] }
 0x18b   :  { %v1724_v1 = vadd.f32 %v1720_v39, %v1713_v42  ;;  %v1725_v16 = vadd.f32 %v1721_v27, %v1714_v18  ;;  %v1765_v63 = vmul.f32 %v6792_v3, %v7201_v13  ;;  %v1748_v61 = vrot.slane %v1744_v24, 2 }
 0x18c   :  { %v1766_v25 = vmul.f32 %v6796_v15, %v7201_v13  ;;  %v7220_v44 = vstv %s7175_s10  ;;  %v1758_v23 = vrot.slane %v1754_v32, 4  ;;  %v1759_v39 = vrot.slane %v1755_v37, 4 }
 0x18d   :  { %v1735_v33 = vadd.f32 %v1731_v28, %v1724_v1  ;;  %v1736_v7 = vadd.f32 %v1732_v59, %v1725_v16  ;;  %10804 = vst [vmem:[#allocation186_spill] sm:$0xff] %v7220_v44  ;;  %v7225_v41 = vstv %s7184_s1  ;;  %v1769_v18 = vrot.slane %v1765_v63, 6 }
 0x18e   :  { %10805 = vst [vmem:[#allocation187_spill] sm:$0xff] %v7225_v41  ;;  %v1781_v27 = vmul.f32 %v7220_v44, %v6130_v40  ;;  %v1770_v15 = vrot.slane %v1766_v25, 6  ;;  %v1782_v1 = vmul.f32 %v7220_v44, %v6133_v48  ;;  %v7234_v28 = vstv %s7196_s0 }
 0x18f   :  { %v1740_v43 = vadd.f32 %v1738_v4, %v1735_v33  ;;  %v1741_v42 = vadd.f32 %v1739_v26, %v1736_v7  ;;  %10806 = vst [vmem:[#allocation188_spill] sm:$0xff] %v7234_v28  ;;  %v1776_v32 = vmul.f32 %v7225_v41, %v6130_v40  ;;  %v1777_v59 = vmul.f32 %v7225_v41, %v6133_v48 }
 0x190   :  { %v7243_v26 = vstv %s7207_s18  ;;  %v1785_v33 = vrot.slane %v1781_v27, 2  ;;  %v1786_v7 = vrot.slane %v1782_v1, 2  ;;  %v7252_v25 = vstv %s7215_s19 }
 0x191   :  { %v1751_v3 = vadd.f32 %v1747_v29, %v1740_v43  ;;  %v1752_v24 = vadd.f32 %v1748_v61, %v1741_v42  ;;  %10807 = vst [vmem:[#allocation189_spill] sm:$0xff] %v7243_v26  ;;  %v1792_v29 = vmul.f32 %v7234_v28, %v6130_v40  ;;  %v1793_v61 = vmul.f32 %v7234_v28, %v6133_v48 }
 0x192   :  { %10808 = vst [vmem:[#allocation190_spill] sm:$0xff] %v7252_v25 }
 0x193   :  { %v1762_v4 = vadd.f32 %v1758_v23, %v1751_v3  ;;  %v1763_v16 = vadd.f32 %v1759_v39, %v1752_v24  ;;  %v1803_v23 = vmul.f32 %v7243_v26, %v6130_v40  ;;  %v1804_v39 = vmul.f32 %v7243_v26, %v6133_v48 }
 0x194   :  { %v7261_v3 = vstv %s7222_s23  ;;  %v1796_v27 = vrot.slane %v1792_v29, 4  ;;  %v1819_v24 = vmul.f32 %v7252_v25, %v6149_v20  ;;  %v1797_v1 = vrot.slane %v1793_v61, 4  ;;  %s7390_s23 = sld [smem:[#allocation7 + $0x1]] }
 0x195   :  { %v1773_v37 = vadd.f32 %v1769_v18, %v1762_v4  ;;  %v1774_v63 = vadd.f32 %v1770_v15, %v1763_v16  ;;  %10809 = vst [vmem:[#allocation191_spill] sm:$0xff] %v7261_v3  ;;  %v1820_v40 = vmul.f32 %v7252_v25, %v6152_v22  ;;  %v7270_v4 = vstv %s7229_s21  ;;  %s7392_s21 = sld [smem:[#allocation8 + $0x1]] }
 0x196   :  { %10810 = vst [vmem:[#allocation192_spill] sm:$0xff] %v7270_v4  ;;  %v1807_v48 = vrot.slane %v1803_v23, 6  ;;  %v1814_v16 = vmul.f32 %v7261_v3, %v6149_v20  ;;  %v7279_v29 = vstv %s7238_s7  ;;  %v1830_v61 = vmul.f32 %v7270_v4, %v6149_v20 }
 0x197   :  { %v1778_v43 = vadd.f32 %v1776_v32, %v1773_v37  ;;  %v1779_v42 = vadd.f32 %v1777_v59, %v1774_v63  ;;  %v1808_v37 = vrot.slane %v1804_v39, 6  ;;  %10811 = vst [vmem:[#allocation193_spill] sm:$0xff] %v7279_v29  ;;  %v1824_v23 = vrot.slane %v1820_v40, 2 }
 0x198   :  { %v7288_v39 = vstv %s7247_s2  ;;  %v1834_v40 = vrot.slane %v1830_v61, 4 }
 0x199   :  { %v1789_v18 = vadd.f32 %v1785_v33, %v1778_v43  ;;  %v1790_v15 = vadd.f32 %v1786_v7, %v1779_v42  ;;  %v1815_v33 = vmul.f32 %v7261_v3, %v6152_v22  ;;  %v1823_v7 = vrot.slane %v1819_v24, 2  ;;  %10812 = vst [vmem:[#allocation194_spill] sm:$0xff] %v7288_v39  ;;  %v10852_v3 = vld [vmem:[#allocation36_spill] sm:$0xff] }
 0x19a   :  { %v1831_v42 = vmul.f32 %v7270_v4, %v6152_v22  ;;  %v1842_v24 = vmul.f32 %v7279_v29, %v6152_v22  ;;  %v1858_v22 = vmul.f32 %v7288_v39, %v6170_v36 }
 0x19b   :  { %v1800_v32 = vadd.f32 %v1796_v27, %v1789_v18  ;;  %v1801_v59 = vadd.f32 %v1797_v1, %v1790_v15  ;;  %v1841_v27 = vmul.f32 %v7279_v29, %v6149_v20  ;;  %v7297_v1 = vstv %s7256_s22 }
 0x19c   :  { %10813 = vst [vmem:[#allocation195_spill] sm:$0xff] %v7297_v1  ;;  %v1835_v20 = vrot.slane %v1831_v42, 4  ;;  %v7317_v42 = vstv %s7274_s8 }
 0x19d   :  { %v1811_v63 = vadd.f32 %v1807_v48, %v1800_v32  ;;  %v1812_v43 = vadd.f32 %v1808_v37, %v1801_v59  ;;  %v1857_v48 = vmul.f32 %v7288_v39, %v6167_v19  ;;  %v7302_v59 = vstv %s7263_s15  ;;  %10815 = vst [vmem:[#allocation197_spill] sm:$0xff] %v7317_v42 }
 0x19e   :  { %10814 = vst [vmem:[#allocation196_spill] sm:$0xff] %v7302_v59  ;;  %v1879_v39 = vmul.f32 %v7317_v42, %v6167_v19  ;;  %v1880_v29 = vmul.f32 %v7317_v42, %v6170_v36 }
 0x19f   :  { %v1816_v18 = vadd.f32 %v1814_v16, %v1811_v63  ;;  %v1817_v15 = vadd.f32 %v1815_v33, %v1812_v43  ;;  %v1845_v33 = vrot.slane %v1841_v27, 6  ;;  %v1846_v63 = vrot.slane %v1842_v24, 6 }
 0x1a0   :  { %v1853_v43 = vmul.f32 %v7297_v1, %v6170_v36  ;;  %v1547_v27 = vmul.f32 %v7106_v55, %v7106_v55  ;;  %v1548_v24 = vmul.f32 %v7110_v12, %v7110_v12 }
 0x1a1   :  { %v1827_v32 = vadd.f32 %v1823_v7, %v1816_v18  ;;  %v1828_v16 = vadd.f32 %v1824_v23, %v1817_v15  ;;  %v1852_v7 = vmul.f32 %v7297_v1, %v6167_v19  ;;  %v1868_v23 = vmul.f32 %v7302_v59, %v6167_v19 }
 0x1a2   :  { %v1861_v15 = vrot.slane %v1857_v48, 2  ;;  %v1549_v48 = vsel %vm753_vm8, %v1547_v27, 0.0  ;;  %v7342_v27 = vstv %s7304_s6 }
 0x1a3   :  { %v1838_v37 = vadd.f32 %v1834_v40, %v1827_v32  ;;  %v1839_v61 = vadd.f32 %v1835_v20, %v1828_v16  ;;  %v1862_v40 = vrot.slane %v1858_v22, 2  ;;  %v1869_v16 = vmul.f32 %v7302_v59, %v6170_v36  ;;  %10818 = vst [vmem:[#allocation200_spill] sm:$0xff] %v7342_v27 }
 0x1a4   :  { %v7326_v20 = vstv %s7283_s26  ;;  %v1872_v59 = vrot.slane %v1868_v23, 4  ;;  %v7349_v23 = vstv %s7310_s16 }
 0x1a5   :  { %v1849_v18 = vadd.f32 %v1845_v33, %v1838_v37  ;;  %v1850_v32 = vadd.f32 %v1846_v63, %v1839_v61  ;;  %10816 = vst [vmem:[#allocation198_spill] sm:$0xff] %v7326_v20  ;;  %v1550_v37 = vsel %vm753_vm8, %v1548_v24, 0.0  ;;  %v7335_v63 = vstv %s7294_s27  ;;  %10819 = vst [vmem:[#allocation201_spill] sm:$0xff] %v7349_v23 }
 0x1a6   :  { %10817 = vst [vmem:[#allocation199_spill] sm:$0xff] %v7335_v63  ;;  %v1551_v22 = vadd.f32 %v1550_v37, %v1549_v48  ;;  %v1873_v4 = vrot.slane %v1869_v16, 4  ;;  %v1896_v19 = vmul.f32 %v7326_v20, %v10714_v50  ;;  %v1883_v24 = vrot.slane %v1879_v39, 6 }
 0x1a7   :  { %v1854_v1 = vadd.f32 %v1852_v7, %v1849_v18  ;;  %v1855_v33 = vadd.f32 %v1853_v43, %v1850_v32  ;;  %v1895_v7 = vmul.f32 %v7326_v20, %v10712_v54  ;;  %v1890_v36 = vmul.f32 %v7335_v63, %v10712_v54 }
 0x1a8   :  { %1552 = vadd.xlane.f32.xlu0 %v1551_v22  ;;  %v1884_v48 = vrot.slane %v1880_v29, 6  ;;  %v1906_v16 = vmul.f32 %v7342_v27, %v10712_v54  ;;  %v1907_v39 = vmul.f32 %v7342_v27, %v10714_v50  ;;  %v1918_v22 = vmul.f32 %v7349_v23, %v10714_v50  ;;  %v10850_v27 = vld [vmem:[#allocation35_spill] sm:$0xff] }
 0x1a9   :  { %v1865_v61 = vadd.f32 %v1861_v15, %v1854_v1  ;;  %v1866_v18 = vadd.f32 %v1862_v40, %v1855_v33  ;;  %v1891_v1 = vmul.f32 %v7335_v63, %v10714_v50  ;;  %v1899_v40 = vrot.slane %v1895_v7, 2 }
 0x1aa   :  { %v1900_v33 = vrot.slane %v1896_v19, 2  ;;  %v1911_v7 = vrot.slane %v1907_v39, 4 }
 0x1ab   :  { %v1876_v43 = vadd.f32 %v1872_v59, %v1865_v61  ;;  %v1877_v32 = vadd.f32 %v1873_v4, %v1866_v18  ;;  %v1917_v4 = vmul.f32 %v7349_v23, %v10712_v54  ;;  %v1910_v18 = vrot.slane %v1906_v16, 4  ;;  %v758_v16 = vpop.xlane.xlu0 %757  ;;  %v10858_v23 = vld [vmem:[#allocation49_spill] sm:$0xff] }
 0x1ad   :  { %v1887_v15 = vadd.f32 %v1883_v24, %v1876_v43  ;;  %v1888_v37 = vadd.f32 %v1884_v48, %v1877_v32  ;;  %v1921_v63 = vrot.slane %v1917_v4, 6  ;;  %v1922_v32 = vrot.slane %v1918_v22, 6 }
 0x1af   :  { %v1892_v59 = vadd.f32 %v1890_v36, %v1887_v15  ;;  %v1893_v29 = vadd.f32 %v1891_v1, %v1888_v37  ;;  %v773_v37 = vpop.xlane.xlu1 %772 }
 0x1b0   :  { %v774_v39 = vrot.slane %v773_v37, 4 }
 0x1b1   :  { %v1903_v61 = vadd.f32 %v1899_v40, %v1892_v59  ;;  %v1904_v43 = vadd.f32 %v1900_v33, %v1893_v29  ;;  %v759_v33 = vrot.slane %v758_v16, 4 }
 0x1b2   :  { %v775_v4 = vadd.f32 %v774_v39, %v773_v37 }
 0x1b3   :  { %v1914_v24 = vadd.f32 %v1910_v18, %v1903_v61  ;;  %v1915_v20 = vadd.f32 %v1911_v7, %v1904_v43  ;;  %v760_v59 = vadd.f32 %v759_v33, %v758_v16 }
 0x1b4   :  { %v776_v22 = vrot.slane %v775_v4, 2 }
 0x1b5   :  { %v7359_v19 = vadd.f32 %v1921_v63, %v1914_v24  ;;  %v7361_v48 = vadd.f32 %v1922_v32, %v1915_v20  ;;  %v761_v29 = vrot.slane %v760_v59, 2 }
 0x1b6   :  { %v777_v18 = vadd.f32 %v776_v22, %v775_v4 }
 0x1b7   :  { %v1927_v36 = vsel %vm753_vm8, %v7359_v19, 0.0  ;;  %v1940_v54 = vmul.f32 %v7359_v19, %v7359_v19  ;;  %v1928_v50 = vsel %vm753_vm8, %v7361_v48, 0.0  ;;  %v1941_v1 = vmul.f32 %v7361_v48, %v7361_v48 }
 0x1b8   :  { %v1929_v15 = vadd.f32 %v1928_v50, %v1927_v36  ;;  %v762_v61 = vadd.f32 %v761_v29, %v760_v59  ;;  %v778_v7 = vrot.slane %v777_v18, 1 }
 0x1b9   :  { %v1942_v40 = vsel %vm753_vm8, %v1940_v54, 0.0  ;;  %v1943_v63 = vsel %vm753_vm8, %v1941_v1, 0.0 }
 0x1ba   :  { %1930 = vadd.xlane.f32.xlu1 %v1929_v15  ;;  %v1944_v20 = vadd.f32 %v1943_v63, %v1942_v40  ;;  %v763_v43 = vrot.slane %v762_v61, 1  ;;  %v779_v32 = vadd.f32 %v778_v7, %v777_v18 }
 0x1bc   :  { %1945 = vadd.xlane.f32.xlu0 %v1944_v20  ;;  %v764_v24 = vadd.f32 %v763_v43, %v762_v61 }
 0x1be   :  { %5128 = vpush %v764_v24 }
 0x1bf   :  { %5130 = vpush %v779_v32 }
 0x1dd   :  { %v1145_v36 = vpop.xlane.xlu0 %1144 }
 0x1de   :  { %v1146_v50 = vrot.slane %v1145_v36, 4 }
 0x1e0   :  { %v1147_v15 = vadd.f32 %v1146_v50, %v1145_v36  ;;  %v10820_v36 = vld [vmem:[#allocation65_spill] sm:$0xff]  ;;  %v10821_v50 = vld [vmem:[#allocation68_spill] sm:$0xff] }
 0x1e2   :  { %v1148_v63 = vrot.slane %v1147_v15, 2 }
 0x1e4   :  { %v1149_v37 = vadd.f32 %v1148_v63, %v1147_v15 }
 0x1e6   :  { %v1150_v39 = vrot.slane %v1149_v37, 1 }
 0x1e8   :  { %v1151_v29 = vadd.f32 %v1150_v39, %v1149_v37 }
 0x1ef   :  { %s5129_s5 = spop %5128 }
 0x1f0   :  { %s7373_s3 = smul.f32 0.001953125, %s5129_s5  ;;  %s5131_s17 = spop %5130 }
 0x1f1   :  { %s781_s20 = smul.f32 0.001953125, %s5131_s17  ;;  %s7403_s17 = sld [smem:[#allocation7 + $0x2]] }
 0x1f2   :  { %s782_s24 = smul.f32 %s7373_s3, %s7373_s3 }
 0x1f4   :  { %s783_s14 = ssub.f32 %s781_s20, %s782_s24  ;;  %s7405_s20 = sld [smem:[#allocation8 + $0x2]] }
 0x1f6   :  { %s784_s29 = sadd.f32 1e-05, %s783_s14 }
 0x1f8   :  { %v785_v16 = vstv %s784_s29 }
 0x1f9   :  { %v1160_v54 = vpop.xlane.xlu0 %1159  ;;  %5215 = vrsqrt.f32 %v785_v16 }
 0x1fa   :  { %v1161_v1 = vrot.slane %v1160_v54, 4 }
 0x1fc   :  { %v1162_v40 = vadd.f32 %v1161_v1, %v1160_v54 }
 0x1fe   :  { %v1163_v20 = vrot.slane %v1162_v40, 2 }
 0x200   :  { %v1164_v33 = vadd.f32 %v1163_v20, %v1162_v40 }
 0x202   :  { %v1165_v59 = vrot.slane %v1164_v33, 1 }
 0x203   :  { %v5216_v4 = vpop.eup %5215 }
 0x204   :  { %5132 = vpush %v5216_v4  ;;  %v1166_v22 = vadd.f32 %v1165_v59, %v1164_v33 }
 0x205   :  { %5134 = vpush %v1151_v29 }
 0x206   :  { %5136 = vpush %v1166_v22 }
 0x20d   :  { %v1538_v61 = vpop.xlane.xlu1 %1537 }
 0x20e   :  { %v1539_v43 = vrot.slane %v1538_v61, 4 }
 0x210   :  { %v1540_v32 = vadd.f32 %v1539_v43, %v1538_v61 }
 0x212   :  { %v1541_v16 = vrot.slane %v1540_v32, 2 }
 0x214   :  { %v1542_v4 = vadd.f32 %v1541_v16, %v1540_v32 }
 0x216   :  { %v1543_v22 = vrot.slane %v1542_v4, 1 }
 0x235   :  { %v1553_v18 = vpop.xlane.xlu0 %1552  ;;  %s5133_s25 = spop %5132 }
 0x236   :  { %s788_s30 = smul.f32 %s5133_s25, %s7377_s11  ;;  %s5135_s12 = spop %5134  ;;  %v1554_v7 = vrot.slane %v1553_v18, 4 }
 0x237   :  { %s7382_s28 = smul.f32 0.001953125, %s5135_s12  ;;  %s5137_s9 = spop %5136 }
 0x238   :  { %s789_s4 = smul.f32 %s788_s30, %s7373_s3  ;;  %v791_v24 = vstv %s788_s30  ;;  %v1555_v15 = vadd.f32 %v1554_v7, %v1553_v18 }
 0x239   :  { %s1169_s10 = smul.f32 %s7382_s28, %s7382_s28  ;;  %v792_v54 = vmul.f32 %v791_v24, %v10820_v36  ;;  %v793_v1 = vmul.f32 %v791_v24, %v10821_v50  ;;  %v1544_v24 = vadd.f32 %v1543_v22, %v1542_v4 }
 0x23a   :  { %s790_s1 = ssub.f32 %s7379_s13, %s789_s4  ;;  %s1168_s0 = smul.f32 0.001953125, %s5137_s9  ;;  %v1556_v39 = vrot.slane %v1555_v15, 2 }
 0x23c   :  { %v794_v40 = vstv %s790_s1  ;;  %s1170_s18 = ssub.f32 %s1168_s0, %s1169_s10  ;;  %v1557_v29 = vadd.f32 %v1556_v39, %v1555_v15  ;;  %s7416_s0 = sld [smem:[#allocation7 + $0x3]] }
 0x23d   :  { %v795_v63 = vadd.f32 %v794_v40, %v792_v54  ;;  %v796_v20 = vadd.f32 %v794_v40, %v793_v1 }
 0x23e   :  { %s1171_s19 = sadd.f32 1e-05, %s1170_s18  ;;  %v1558_v61 = vrot.slane %v1557_v29, 1  ;;  %s7418_s18 = sld [smem:[#allocation8 + $0x3]] }
 0x23f   :  { %v797_v37 = vmax.f32 %v795_v63, 0.0  ;;  %v798_v33 = vmax.f32 %v796_v20, 0.0 }
 0x240   :  { %v1172_v59 = vstv %s1171_s19  ;;  %v1559_v18 = vadd.f32 %v1558_v61, %v1557_v29 }
 0x241   :  { %799 = vst [vmem:[#allocation13] sm:$0x3] %v797_v37  ;;  %800 = vst [vmem:[#allocation13 + $0x8] sm:$0x3] %v798_v33  ;;  %5217 = vrsqrt.f32 %v1172_v59 }
 0x247   :  { %v1931_v7 = vpop.xlane.xlu1 %1930 }
 0x248   :  { %v1932_v32 = vrot.slane %v1931_v7, 4 }
 0x249   :  { %v1946_v36 = vpop.xlane.xlu0 %1945 }
 0x24a   :  { %v1947_v54 = vrot.slane %v1946_v36, 4  ;;  %v1933_v1 = vadd.f32 %v1932_v32, %v1931_v7 }
 0x24b   :  { %v5218_v43 = vpop.eup %5217 }
 0x24c   :  { %5138 = vpush %v5218_v43  ;;  %v1948_v63 = vadd.f32 %v1947_v54, %v1946_v36  ;;  %v1934_v33 = vrot.slane %v1933_v1, 2 }
 0x24d   :  { %5140 = vpush %v1544_v24 }
 0x24e   :  { %5142 = vpush %v1559_v18  ;;  %v1949_v4 = vrot.slane %v1948_v63, 2  ;;  %v1935_v43 = vadd.f32 %v1934_v33, %v1933_v1 }
 0x27d   :  { %s5139_s7 = spop %5138 }
 0x27e   :  { %s1175_s2 = smul.f32 %s5139_s7, %s7390_s23  ;;  %s5141_s22 = spop %5140 }
 0x27f   :  { %s7395_s15 = smul.f32 0.001953125, %s5141_s22  ;;  %s5143_s8 = spop %5142 }
 0x280   :  { %s1176_s26 = smul.f32 %s1175_s2, %s7382_s28  ;;  %v1178_v50 = vstv %s1175_s2 }
 0x281   :  { %s1562_s27 = smul.f32 %s7395_s15, %s7395_s15  ;;  %v1179_v15 = vmul.f32 %v1178_v50, %v6782_v2  ;;  %v1180_v40 = vmul.f32 %v1178_v50, %v6786_v8  ;;  %v1950_v2 = vadd.f32 %v1949_v4, %v1948_v63  ;;  %v1936_v8 = vrot.slane %v1935_v43, 1 }
 0x282   :  { %s1177_s6 = ssub.f32 %s7392_s21, %s1176_s26  ;;  %s1561_s16 = smul.f32 0.001953125, %s5143_s8 }
 0x283   :  { %v1951_v24 = vrot.slane %v1950_v2, 1  ;;  %v1937_v7 = vadd.f32 %v1936_v8, %v1935_v43  ;;  %s10825_s8 = smov 15   ;;  %s10826_s26 = smov 16  }
 0x284   :  { %v1181_v20 = vstv %s1177_s6  ;;  %s1563_s5 = ssub.f32 %s1561_s16, %s1562_s27  ;;  %s10827_s27 = smov 1  }
 0x285   :  { %v1182_v16 = vadd.f32 %v1181_v20, %v1179_v15  ;;  %v1183_v37 = vadd.f32 %v1181_v20, %v1180_v40  ;;  %v1952_v36 = vadd.f32 %v1951_v24, %v1950_v2  ;;  %s10828_s6 = smov 127   ;;  %s10829_s16 = smov 113  }
 0x286   :  { %s1564_s3 = sadd.f32 1e-05, %s1563_s5  ;;  %s10830_s5 = smov 112  }
 0x287   :  { %v1184_v39 = vmax.f32 %v1182_v16, 0.0  ;;  %v1185_v59 = vmax.f32 %v1183_v37, 0.0 }
 0x288   :  { %v1565_v29 = vstv %s1564_s3  ;;  %s10831_s3 = smov 111  }
 0x289   :  { %v1188_v22 = vrot.slane %v1184_v39, 6  ;;  %v1189_v61 = vrot.slane %v1185_v59, 6  ;;  %5219 = vrsqrt.f32 %v1565_v29 }
 0x28b   :  { %1192 = vst [vmem:[#allocation13] sm:$0xc] %v1188_v22  ;;  %1193 = vst [vmem:[#allocation13 + $0x8] sm:$0xc] %v1189_v61 }
 0x293   :  { %v5220_v18 = vpop.eup %5219 }
 0x294   :  { %5144 = vpush %v5220_v18 }
 0x295   :  { %5146 = vpush %v1937_v7  ;;  %v5241_v7 = vld [vmem:[#allocation11] sm:$0xff] }
 0x296   :  { %5148 = vpush %v1952_v36 }
 0x2c5   :  { %s5145_s24 = spop %5144 }
 0x2c6   :  { %s1568_s14 = smul.f32 %s5145_s24, %s7403_s17  ;;  %s5147_s29 = spop %5146 }
 0x2c7   :  { %s7408_s25 = smul.f32 0.001953125, %s5147_s29  ;;  %s5149_s30 = spop %5148 }
 0x2c8   :  { %s1569_s12 = smul.f32 %s1568_s14, %s7395_s15  ;;  %v1571_v32 = vstv %s1568_s14  ;;  %s10824_s15 = smov 17  }
 0x2c9   :  { %s1955_s28 = smul.f32 %s7408_s25, %s7408_s25  ;;  %v1572_v54 = vmul.f32 %v1571_v32, %v7106_v55  ;;  %v1573_v50 = vmul.f32 %v1571_v32, %v7110_v12  ;;  %v5242_v32 = vld [vmem:[#allocation11 + $0x8] sm:$0xff] }
 0x2ca   :  { %s1570_s9 = ssub.f32 %s7405_s20, %s1569_s12  ;;  %s1954_s4 = smul.f32 0.001953125, %s5149_s30 }
 0x2cc   :  { %v1574_v1 = vstv %s1570_s9  ;;  %s1956_s10 = ssub.f32 %s1954_s4, %s1955_s28 }
 0x2cd   :  { %v1575_v15 = vadd.f32 %v1574_v1, %v1572_v54  ;;  %v1576_v40 = vadd.f32 %v1574_v1, %v1573_v50  ;;  %v10833_v1 = vld [vmem:[#allocation54_spill] sm:$0xff] }
 0x2ce   :  { %s1957_s1 = sadd.f32 1e-05, %s1956_s10 }
 0x2cf   :  { %v1577_v63 = vmax.f32 %v1575_v15, 0.0  ;;  %v1578_v20 = vmax.f32 %v1576_v40, 0.0 }
 0x2d0   :  { %v1958_v16 = vstv %s1957_s1 }
 0x2d1   :  { %v1581_v37 = vrot.slane %v1577_v63, 4  ;;  %v1582_v33 = vrot.slane %v1578_v20, 4  ;;  %5221 = vrsqrt.f32 %v1958_v16  ;;  %v10834_v63 = vld [vmem:[#allocation58_spill] sm:$0xff] }
 0x2d2   :  { %v10835_v16 = vld [vmem:[#allocation67_spill] sm:$0xff] }
 0x2d3   :  { %1585 = vst [vmem:[#allocation13] sm:$0x30] %v1581_v37  ;;  %1586 = vst [vmem:[#allocation13 + $0x8] sm:$0x30] %v1582_v33 }
 0x2db   :  { %v5222_v39 = vpop.eup %5221 }
 0x2dc   :  { %5150 = vpush %v5222_v39  ;;  %v10836_v39 = vld [vmem:[#allocation99_spill] sm:$0xff] }
 0x30d   :  { %s5151_s19 = spop %5150 }
 0x30e   :  { %s1961_s7 = smul.f32 %s5151_s19, %s7416_s0 }
 0x310   :  { %s1962_s2 = smul.f32 %s1961_s7, %s7408_s25  ;;  %v1964_v55 = vstv %s1961_s7 }
 0x311   :  { %v1965_v12 = vmul.f32 %v1964_v55, %v7359_v19  ;;  %v1966_v59 = vmul.f32 %v1964_v55, %v7361_v48  ;;  %v10832_v19 = vld [vmem:[#allocation50_spill] sm:$0xff] }
 0x312   :  { %s1963_s22 = ssub.f32 %s7418_s18, %s1962_s2 }
 0x314   :  { %v1967_v4 = vstv %s1963_s22 }
 0x315   :  { %v1968_v29 = vadd.f32 %v1967_v4, %v1965_v12  ;;  %v1969_v22 = vadd.f32 %v1967_v4, %v1966_v59 }
 0x317   :  { %v1970_v61 = vmax.f32 %v1968_v29, 0.0  ;;  %v1971_v43 = vmax.f32 %v1969_v22, 0.0  ;;  %v10838_v22 = vld [vmem:[#allocation100_spill] sm:$0xff] }
 0x319   :  { %v1974_v2 = vrot.slane %v1970_v61, 2  ;;  %v1975_v8 = vrot.slane %v1971_v43, 2 }
 0x31b   :  { %1978 = vst [vmem:[#allocation13] sm:$0xc0] %v1974_v2  ;;  %1979 = vst [vmem:[#allocation13 + $0x8] sm:$0xc0] %v1975_v8  ;;  %v10840_v2 = vld [vmem:[#allocation108_spill] sm:$0xff] }
 0x322   :  { %v1980_v24 = vld [vmem:[#allocation13] sm:$0xff]  ;;  %v1981_v18 = vld [vmem:[#allocation13 + $0x8] sm:$0xff] }
 0x323   :  { %v7425_v36 = vadd.f32 %v5241_v7, %v1980_v24  ;;  %v7427_v54 = vadd.f32 %v5242_v32, %v1981_v18  ;;  %v10842_v18 = vld [vmem:[#allocation104_spill] sm:$0xff] }
 0x325   :  { %10822 = vst [vmem:[#allocation65_spill] sm:$0xff] %v7425_v36  ;;  %10823 = vst [vmem:[#allocation68_spill] sm:$0xff] %v7427_v54  ;;  %1986 = vrot.lane.b32.xlu0 %v7427_v54, %s10824_s15  ;;  %1984 = vrot.lane.b32.xlu1 %v7425_v36, %s10824_s15  ;;  %v7463_v48 = vmul.f32 %v7425_v36, %v10832_v19  ;;  %v7467_v50 = vmul.f32 %v7427_v54, %v10832_v19 }
 0x326   :  { %v7471_v15 = vmul.f32 %v7425_v36, %v10833_v1  ;;  %v7475_v40 = vmul.f32 %v7427_v54, %v10833_v1  ;;  %v7479_v20 = vmul.f32 %v7425_v36, %v10834_v63  ;;  %v7483_v37 = vmul.f32 %v7425_v36, %v10835_v16 }
 0x327   :  { %v7487_v33 = vmul.f32 %v7427_v54, %v10834_v63  ;;  %v7491_v55 = vmul.f32 %v7425_v36, %v10836_v39  ;;  %v7495_v12 = vmul.f32 %v7427_v54, %v10836_v39  ;;  %v7499_v59 = vmul.f32 %v7427_v54, %v10835_v16 }
 0x328   :  { %v7505_v61 = vmul.f32 %v7425_v36, %v10838_v22  ;;  %v7510_v8 = vmul.f32 %v7425_v36, %v10840_v2  ;;  %v7514_v24 = vmul.f32 %v7427_v54, %v10838_v22  ;;  %v7518_v7 = vmul.f32 %v7425_v36, %v10842_v18 }
 0x329   :  { %2000 = vrot.lane.b32.xlu0 %v7425_v36, %s10825_s8  ;;  %1992 = vrot.lane.b32.xlu1 %v7425_v36, %s10826_s26  ;;  %10837 = vst [vmem:[#allocation202_spill] sm:$0xff] %v7495_v12  ;;  %v7524_v4 = vmul.f32 %v7427_v54, %v10840_v2  ;;  %v7528_v43 = vmul.f32 %v7427_v54, %v10842_v18  ;;  %v10924_v12 = vld [vmem:[#allocation91_spill] sm:$0xff] }
 0x32a   :  { %10839 = vst [vmem:[#allocation203_spill] sm:$0xff] %v7505_v61  ;;  %10841 = vst [vmem:[#allocation204_spill] sm:$0xff] %v7514_v24  ;;  %v7535_v63 = vmul.f32 %v7425_v36, %v10757_v10  ;;  %v7540_v2 = vmul.f32 %v7425_v36, %v10756_v14  ;;  %v7544_v18 = vmul.f32 %v7427_v54, %v10757_v10  ;;  %v10920_v61 = vld [vmem:[#allocation89_spill] sm:$0xff] }
 0x32b   :  { %10843 = vst [vmem:[#allocation205_spill] sm:$0xff] %v7518_v7  ;;  %10844 = vst [vmem:[#allocation206_spill] sm:$0xff] %v7528_v43  ;;  %v7548_v22 = vmul.f32 %v7425_v36, %v6813_v53  ;;  %v7565_v26 = vmul.f32 %v7427_v54, %v10756_v14 }
 0x32c   :  { %10845 = vst [vmem:[#allocation207_spill] sm:$0xff] %v7535_v63  ;;  %10846 = vst [vmem:[#allocation208_spill] sm:$0xff] %v7540_v2  ;;  %v10877_v63 = vld [vmem:[#allocation43_spill] sm:$0xff] }
 0x32d   :  { %2008 = vrot.lane.b32.xlu0 %v7425_v36, %s10827_s27  ;;  %1994 = vrot.lane.b32.xlu1 %v7427_v54, %s10826_s26  ;;  %10847 = vst [vmem:[#allocation209_spill] sm:$0xff] %v7544_v18  ;;  %10848 = vst [vmem:[#allocation210_spill] sm:$0xff] %v7548_v22 }
 0x32e   :  { %10854 = vst [vmem:[#allocation213_spill] sm:$0xff] %v7565_v26  ;;  %v10879_v26 = vld [vmem:[#allocation44_spill] sm:$0xff] }
 0x331   :  { %2016 = vrot.lane.b32.xlu0 %v7425_v36, %s10828_s6  ;;  %2002 = vrot.lane.b32.xlu1 %v7427_v54, %s10825_s8 }
 0x335   :  { %2024 = vrot.lane.b32.xlu0 %v7425_v36, %s10829_s16  ;;  %2010 = vrot.lane.b32.xlu1 %v7427_v54, %s10827_s27 }
 0x339   :  { %2032 = vrot.lane.b32.xlu0 %v7425_v36, %s10830_s5  ;;  %2018 = vrot.lane.b32.xlu1 %v7427_v54, %s10828_s6 }
 0x33d   :  { %2040 = vrot.lane.b32.xlu0 %v7425_v36, %s10831_s3  ;;  %2026 = vrot.lane.b32.xlu1 %v7427_v54, %s10829_s16 }
 0x341   :  { %2034 = vrot.lane.b32.xlu1 %v7427_v54, %s10830_s5 }
 0x345   :  { %2042 = vrot.lane.b32.xlu1 %v7427_v54, %s10831_s3 }
 0x397   :  { %v1987_v32 = vpop.permute.xlu0 %1986  ;;  %v1985_v29 = vpop.permute.xlu1 %1984 }
 0x398   :  { %v1988_v39 = vsel %vm257_vm0, %v1985_v29, %v1987_v32  ;;  %v1989_v19 = vsel %vm257_vm0, %v1987_v32, %v1985_v29  ;;  %v7570_v29 = vmul.f32 %v7427_v54, %v6813_v53  ;;  %v7574_v32 = vmul.f32 %v7425_v36, %v6820_v35  ;;  %v10859_v53 = vld [vmem:[#allocation53_spill] sm:$0xff] }
 0x399   :  { %v7557_v42 = vmul.f32 %v1989_v19, %v10850_v27  ;;  %v7560_v10 = vmul.f32 %v1988_v39, %v10852_v3  ;;  %v7578_v19 = vmul.f32 %v7427_v54, %v6820_v35  ;;  %v10860_v35 = vld [vmem:[#allocation55_spill] sm:$0xff] }
 0x39a   :  { %10855 = vst [vmem:[#allocation214_spill] sm:$0xff] %v7570_v29  ;;  %10856 = vst [vmem:[#allocation215_spill] sm:$0xff] %v7574_v32  ;;  %v10862_v54 = vld [vmem:[#allocation79_spill] sm:$0xff]  ;;  %v10875_v29 = vld [vmem:[#allocation42_spill] sm:$0xff] }
 0x39b   :  { %10851 = vst [vmem:[#allocation211_spill] sm:$0xff] %v7557_v42  ;;  %10853 = vst [vmem:[#allocation212_spill] sm:$0xff] %v7560_v10  ;;  %v2001_v39 = vpop.permute.xlu0 %2000  ;;  %v1993_v25 = vpop.permute.xlu1 %1992  ;;  %v2050_v1 = vmul.f32 %v7557_v42, %v10858_v23  ;;  %v2051_v28 = vmul.f32 %v7560_v10, %v10858_v23  ;;  %v2060_v14 = vmul.f32 %v7557_v42, %v10859_v53 }
 0x39c   :  { %10857 = vst [vmem:[#allocation216_spill] sm:$0xff] %v7578_v19  ;;  %v2061_v41 = vmul.f32 %v7560_v10, %v10859_v53  ;;  %v2070_v44 = vmul.f32 %v7557_v42, %v10860_v35  ;;  %v2071_v13 = vmul.f32 %v7560_v10, %v10860_v35  ;;  %v2048_v56 = vmul.f32 %v7557_v42, %v10861_v5  ;;  %v10872_v19 = vld [vmem:[#allocation63_spill] sm:$0xff] }
 0x39d   :  { %v2049_v3 = vmul.f32 %v7560_v10, %v10861_v5  ;;  %v2054_v23 = vrot.slane %v2050_v1, 2  ;;  %v2055_v27 = vrot.slane %v2051_v28, 2  ;;  %v7600_v36 = vmul.f32 %v7557_v42, %v10862_v54 }
 0x39e   :  { %v2064_v6 = vrot.slane %v2060_v14, 4  ;;  %v2065_v11 = vrot.slane %v2061_v41, 4  ;;  %v2074_v5 = vrot.slane %v2070_v44, 6  ;;  %v2075_v31 = vrot.slane %v2071_v13, 6  ;;  %v10866_v13 = vld [vmem:[#allocation87_spill] sm:$0xff] }
 0x39f   :  { %v2009_v57 = vpop.permute.xlu0 %2008  ;;  %v1995_v35 = vpop.permute.xlu1 %1994  ;;  %v2058_v38 = vadd.f32 %v2054_v23, %v2048_v56  ;;  %v2059_v0 = vadd.f32 %v2055_v27, %v2049_v3  ;;  %v7617_v14 = vmul.f32 %v7560_v10, %v10862_v54  ;;  %v10865_v56 = vld [vmem:[#allocation84_spill] sm:$0xff]  ;;  %v7629_v44 = vmul.f32 %v7557_v42, %v10866_v13 }
 0x3a0   :  { %v1996_v1 = vsel %vm277_vm1, %v1993_v25, %v1995_v35  ;;  %v1997_v28 = vsel %vm277_vm1, %v1995_v35, %v1993_v25  ;;  %v7621_v41 = vmul.f32 %v7557_v42, %v10865_v56  ;;  %v7625_v35 = vmul.f32 %v7560_v10, %v10865_v56 }
 0x3a1   :  { %v7610_v53 = vmul.f32 %v1997_v28, %v10863_v62  ;;  %v7613_v46 = vmul.f32 %v1996_v1, %v10864_v30  ;;  %v2068_v34 = vadd.f32 %v2064_v6, %v2058_v38  ;;  %v2069_v17 = vadd.f32 %v2065_v11, %v2059_v0  ;;  %v10867_v11 = vld [vmem:[#allocation56_spill] sm:$0xff]  ;;  %v10868_v1 = vld [vmem:[#allocation57_spill] sm:$0xff] }
 0x3a3   :  { %v2003_v25 = vpop.permute.xlu1 %2002  ;;  %v2078_v3 = vadd.f32 %v2074_v5, %v2068_v34  ;;  %v2079_v6 = vadd.f32 %v2075_v31, %v2069_v17  ;;  %v2080_v38 = vmul.f32 %v7610_v53, %v10867_v11  ;;  %v2081_v0 = vmul.f32 %v7613_v46, %v10867_v11  ;;  %v2017_v34 = vpop.permute.xlu0 %2016  ;;  %v10869_v17 = vld [vmem:[#allocation40_spill] sm:$0xff]  ;;  %v10870_v5 = vld [vmem:[#allocation41_spill] sm:$0xff] }
 0x3a4   :  { %v2004_v27 = vsel %vm297_vm2, %v2001_v39, %v2003_v25  ;;  %v2005_v23 = vsel %vm297_vm2, %v2003_v25, %v2001_v39  ;;  %v2084_v28 = vmul.f32 %v7610_v53, %v10868_v1  ;;  %v2085_v56 = vmul.f32 %v7613_v46, %v10868_v1 }
 0x3a5   :  { %v7644_v31 = vmul.f32 %v2005_v23, %v10869_v17  ;;  %v7647_v30 = vmul.f32 %v2004_v27, %v10870_v5  ;;  %v2082_v11 = vadd.f32 %v2080_v38, %v2078_v3  ;;  %v2083_v62 = vadd.f32 %v2081_v0, %v2079_v6  ;;  %v10873_v17 = vld [vmem:[#allocation64_spill] sm:$0xff] }
 0x3a6   :  { %v2088_v54 = vrot.slane %v2084_v28, 2  ;;  %v2089_v47 = vrot.slane %v2085_v56, 2  ;;  %v2094_v39 = vmul.f32 %v7610_v53, %v10871_v49  ;;  %v2095_v25 = vmul.f32 %v7613_v46, %v10871_v49 }
 0x3a7   :  { %v2011_v21 = vpop.permute.xlu1 %2010  ;;  %v2104_v1 = vmul.f32 %v7610_v53, %v10872_v19  ;;  %v2105_v23 = vmul.f32 %v7613_v46, %v10872_v19  ;;  %v7660_v3 = vmul.f32 %v7560_v10, %v10866_v13  ;;  %v2114_v19 = vmul.f32 %v7644_v31, %v10873_v17 }
 0x3a8   :  { %v2092_v56 = vadd.f32 %v2088_v54, %v2082_v11  ;;  %v2093_v6 = vadd.f32 %v2089_v47, %v2083_v62  ;;  %v2013_v28 = vsel %vm317_vm3, %v2011_v21, %v2009_v57  ;;  %v2098_v49 = vrot.slane %v2094_v39, 4  ;;  %v10874_v54 = vld [vmem:[#allocation66_spill] sm:$0xff]  ;;  %v2025_v11 = vpop.permute.xlu0 %2024 }
 0x3a9   :  { %v2099_v5 = vrot.slane %v2095_v25, 4  ;;  %v2012_v27 = vsel %vm317_vm3, %v2009_v57, %v2011_v21  ;;  %v2115_v13 = vmul.f32 %v7647_v30, %v10873_v17  ;;  %v2118_v47 = vmul.f32 %v7644_v31, %v10874_v54  ;;  %v10876_v57 = vld [vmem:[#allocation70_spill] sm:$0xff] }
 0x3aa   :  { %v2119_v62 = vmul.f32 %v7647_v30, %v10874_v54  ;;  %v2102_v38 = vadd.f32 %v2098_v49, %v2092_v56  ;;  %v2108_v25 = vrot.slane %v2104_v1, 6  ;;  %v2109_v32 = vrot.slane %v2105_v23, 6 }
 0x3ab   :  { %v2019_v0 = vpop.permute.xlu1 %2018  ;;  %v2103_v39 = vadd.f32 %v2099_v5, %v2093_v6  ;;  %v7677_v22 = vmul.f32 %v2013_v28, %v10875_v29  ;;  %v2128_v17 = vmul.f32 %v7644_v31, %v10876_v57  ;;  %v2129_v18 = vmul.f32 %v7647_v30, %v10876_v57  ;;  %v10878_v6 = vld [vmem:[#allocation71_spill] sm:$0xff] }
 0x3ac   :  { %v2020_v21 = vsel %vm337_vm4, %v2017_v34, %v2019_v0  ;;  %v7686_v54 = vmul.f32 %v2012_v27, %v10877_v63  ;;  %v2021_v49 = vsel %vm337_vm4, %v2019_v0, %v2017_v34  ;;  %v2112_v1 = vadd.f32 %v2108_v25, %v2102_v38  ;;  %v10880_v63 = vld [vmem:[#allocation45_spill] sm:$0xff]  ;;  %v10881_v0 = vld [vmem:[#allocation72_spill] sm:$0xff] }
 0x3ad   :  { %v2113_v5 = vadd.f32 %v2109_v32, %v2103_v39  ;;  %v2122_v23 = vrot.slane %v2118_v47, 2  ;;  %v2123_v56 = vrot.slane %v2119_v62, 2  ;;  %v2138_v28 = vmul.f32 %v7644_v31, %v10878_v6  ;;  %v2033_v62 = vpop.permute.xlu0 %2032 }
 0x3ae   :  { %v7694_v2 = vmul.f32 %v2020_v21, %v10879_v26  ;;  %v2116_v57 = vadd.f32 %v2114_v19, %v2112_v1  ;;  %v2139_v27 = vmul.f32 %v7647_v30, %v10878_v6  ;;  %v7699_v34 = vmul.f32 %v2021_v49, %v10880_v63  ;;  %v10882_v49 = vld [vmem:[#allocation75_spill] sm:$0xff]  ;;  %v10883_v6 = vld [vmem:[#allocation76_spill] sm:$0xff] }
 0x3af   :  { %v2027_v45 = vpop.permute.xlu1 %2026  ;;  %v2117_v60 = vadd.f32 %v2115_v13, %v2113_v5  ;;  %v2132_v32 = vrot.slane %v2128_v17, 4  ;;  %v2133_v38 = vrot.slane %v2129_v18, 4  ;;  %v2148_v47 = vmul.f32 %v7677_v22, %v10881_v0 }
 0x3b0   :  { %v2028_v39 = vsel %vm357_vm5, %v2025_v11, %v2027_v45  ;;  %v2126_v25 = vadd.f32 %v2122_v23, %v2116_v57  ;;  %v2149_v19 = vmul.f32 %v7686_v54, %v10881_v0  ;;  %v2029_v13 = vsel %vm357_vm5, %v2027_v45, %v2025_v11  ;;  %v10884_v23 = vld [vmem:[#allocation80_spill] sm:$0xff] }
 0x3b1   :  { %v2127_v21 = vadd.f32 %v2123_v56, %v2117_v60  ;;  %v2142_v1 = vrot.slane %v2138_v28, 6  ;;  %v2152_v17 = vmul.f32 %v7677_v22, %v10882_v49  ;;  %v2153_v18 = vmul.f32 %v7686_v54, %v10882_v49  ;;  %v10885_v28 = vld [vmem:[#allocation46_spill] sm:$0xff] }
 0x3b2   :  { %v2136_v29 = vadd.f32 %v2132_v32, %v2126_v25  ;;  %v2143_v26 = vrot.slane %v2139_v27, 6  ;;  %v2162_v60 = vmul.f32 %v7677_v22, %v10883_v6  ;;  %v2163_v11 = vmul.f32 %v7686_v54, %v10883_v6  ;;  %v10886_v32 = vld [vmem:[#allocation47_spill] sm:$0xff]  ;;  %v10889_v6 = vld [vmem:[#allocation52_spill] sm:$0xff] }
 0x3b3   :  { %v2035_v5 = vpop.permute.xlu1 %2034  ;;  %v2137_v63 = vadd.f32 %v2133_v38, %v2127_v21  ;;  %v2172_v56 = vmul.f32 %v7677_v22, %v10884_v23  ;;  %v7724_v49 = vmul.f32 %v2028_v39, %v10885_v28  ;;  %v7727_v27 = vmul.f32 %v2029_v13, %v10886_v32  ;;  %v10887_v21 = vld [vmem:[#allocation51_spill] sm:$0xff]  ;;  %v10891_v13 = vld [vmem:[#allocation82_spill] sm:$0xff] }
 0x3b4   :  { %v2036_v57 = vsel %vm377_vm6, %v2033_v62, %v2035_v5  ;;  %v2037_v45 = vsel %vm377_vm6, %v2035_v5, %v2033_v62  ;;  %v2146_v38 = vadd.f32 %v2142_v1, %v2136_v29  ;;  %v2156_v52 = vrot.slane %v2152_v17, 2  ;;  %v2041_v5 = vpop.permute.xlu0 %2040  ;;  %v10905_v32 = vld [vmem:[#allocation98_spill] sm:$0xff] }
 0x3b5   :  { %v2147_v25 = vadd.f32 %v2143_v26, %v2137_v63  ;;  %v7730_v0 = vmul.f32 %v2036_v57, %v10887_v21  ;;  %v2157_v58 = vrot.slane %v2153_v18, 2  ;;  %v2173_v62 = vmul.f32 %v7686_v54, %v10884_v23 }
 0x3b6   :  { %v7735_v51 = vmul.f32 %v2037_v45, %v10889_v6  ;;  %v2150_v39 = vadd.f32 %v2148_v47, %v2146_v38  ;;  %v2166_v43 = vrot.slane %v2162_v60, 4  ;;  %v2167_v26 = vrot.slane %v2163_v11, 4  ;;  %v10893_v38 = vld [vmem:[#allocation83_spill] sm:$0xff] }
 0x3b7   :  { %10888 = vst [vmem:[#allocation217_spill] sm:$0xff] %v7730_v0  ;;  %v2043_v9 = vpop.permute.xlu1 %2042  ;;  %v2151_v28 = vadd.f32 %v2149_v19, %v2147_v25  ;;  %v2176_v63 = vrot.slane %v2172_v56, 6  ;;  %v7741_v1 = vmul.f32 %v7694_v2, %v10891_v13  ;;  %v7747_v45 = vmul.f32 %v7699_v34, %v10891_v13  ;;  %v10892_v19 = vld [vmem:[#allocation81_spill] sm:$0xff]  ;;  %v10894_v25 = vld [vmem:[#allocation59_spill] sm:$0xff] }
 0x3b8   :  { %10890 = vst [vmem:[#allocation218_spill] sm:$0xff] %v7735_v51  ;;  %v2044_v29 = vsel %vm397_vm7, %v2041_v5, %v2043_v9  ;;  %v2045_v17 = vsel %vm397_vm7, %v2043_v9, %v2041_v5  ;;  %v2160_v18 = vadd.f32 %v2156_v52, %v2150_v39  ;;  %v2177_v47 = vrot.slane %v2173_v62, 6  ;;  %v10896_v62 = vld [vmem:[#allocation60_spill] sm:$0xff]  ;;  %v10898_v13 = vld [vmem:[#allocation85_spill] sm:$0xff] }
 0x3b9   :  { %v2161_v57 = vadd.f32 %v2157_v58, %v2151_v28  ;;  %v2216_v60 = vmul.f32 %v7694_v2, %v10892_v19  ;;  %v7753_v11 = vmul.f32 %v7694_v2, %v10893_v38  ;;  %v7757_v56 = vmul.f32 %v7699_v34, %v10893_v38 }
 0x3ba   :  { %v7760_v9 = vmul.f32 %v2044_v29, %v10894_v25  ;;  %v2170_v58 = vadd.f32 %v2166_v43, %v2160_v18  ;;  %v2217_v28 = vmul.f32 %v7699_v34, %v10892_v19  ;;  %v7765_v5 = vmul.f32 %v2045_v17, %v10896_v62  ;;  %v10899_v17 = vld [vmem:[#allocation93_spill] sm:$0xff]  ;;  %v10900_v62 = vld [vmem:[#allocation94_spill] sm:$0xff]  ;;  %v10902_v19 = vld [vmem:[#allocation95_spill] sm:$0xff] }
 0x3bb   :  { %v2171_v52 = vadd.f32 %v2167_v26, %v2161_v57  ;;  %v2224_v39 = vrot.slane %v7741_v1, 2  ;;  %v7770_v6 = vmul.f32 %v7694_v2, %v10898_v13  ;;  %v7774_v38 = vmul.f32 %v7699_v34, %v10898_v13 }
 0x3bc   :  { %10895 = vst [vmem:[#allocation219_spill] sm:$0xff] %v7760_v9  ;;  %10897 = vst [vmem:[#allocation220_spill] sm:$0xff] %v7765_v5  ;;  %v2180_v29 = vadd.f32 %v2176_v63, %v2170_v58  ;;  %v2225_v43 = vrot.slane %v7747_v45, 2  ;;  %v2234_v26 = vrot.slane %v7753_v11, 4  ;;  %v2235_v18 = vrot.slane %v7757_v56, 4 }
 0x3bd   :  { %v2181_v25 = vadd.f32 %v2177_v47, %v2171_v52  ;;  %v7781_v57 = vmul.f32 %v7724_v49, %v10899_v17  ;;  %v7785_v1 = vmul.f32 %v7727_v27, %v10899_v17  ;;  %v7789_v13 = vmul.f32 %v7724_v49, %v10900_v62  ;;  %v10901_v47 = vld [vmem:[#allocation86_spill] sm:$0xff] }
 0x3be   :  { %v2184_v63 = vadd.f32 %v7483_v37, %v2180_v29  ;;  %v2250_v11 = vmul.f32 %v7724_v49, %v10901_v47  ;;  %v2251_v56 = vmul.f32 %v7727_v27, %v10901_v47  ;;  %v2244_v58 = vrot.slane %v7770_v6, 6 }
 0x3bf   :  { %v2185_v45 = vadd.f32 %v7499_v59, %v2181_v25  ;;  %v2245_v52 = vrot.slane %v7774_v38, 6  ;;  %v7801_v17 = vmul.f32 %v7727_v27, %v10900_v62  ;;  %v7805_v21 = vmul.f32 %v7724_v49, %v10902_v19 }
 0x3c0   :  { %v10903_v37 = vrot.slane %v7463_v48, 2  ;;  %v10904_v25 = vrot.slane %v7467_v50, 2  ;;  %v2258_v47 = vrot.slane %v7781_v57, 2  ;;  %v7814_v6 = vmul.f32 %v7727_v27, %v10902_v19 }
 0x3c1   :  { %v2259_v38 = vrot.slane %v7785_v1, 2  ;;  %v7820_v23 = vmul.f32 %v7730_v0, %v10905_v32  ;;  %v7824_v48 = vmul.f32 %v7735_v51, %v10905_v32  ;;  %v10906_v50 = vrot.slane %v7471_v15, 4  ;;  %v10909_v32 = vld [vmem:[#allocation102_spill] sm:$0xff] }
 0x3c2   :  { %v2194_v59 = vadd.f32 %v10903_v37, %v2184_v63  ;;  %v2195_v29 = vadd.f32 %v10904_v25, %v2185_v45  ;;  %v10907_v57 = vrot.slane %v7475_v40, 4  ;;  %v10908_v37 = vld [vmem:[#allocation101_spill] sm:$0xff]  ;;  %v2269_v62 = vrot.slane %v7801_v17, 4 }
 0x3c3   :  { %v7832_v25 = vmul.f32 %v7730_v0, %v10908_v37  ;;  %v7836_v1 = vmul.f32 %v7735_v51, %v10908_v37  ;;  %v7842_v16 = vmul.f32 %v7730_v0, %v10909_v32  ;;  %v7846_v15 = vmul.f32 %v7735_v51, %v10909_v32  ;;  %v10912_v37 = vld [vmem:[#allocation97_spill] sm:$0xff] }
 0x3c4   :  { %v2204_v63 = vadd.f32 %v10906_v50, %v2194_v59  ;;  %v2205_v45 = vadd.f32 %v10907_v57, %v2195_v29  ;;  %v10910_v40 = vrot.slane %v7479_v20, 6  ;;  %v10911_v29 = vrot.slane %v7487_v33, 6  ;;  %v10916_v20 = vld [vmem:[#allocation118_spill] sm:$0xff] }
 0x3c5   :  { %v7855_v17 = vmul.f32 %v7730_v0, %v10912_v37  ;;  %v7859_v19 = vmul.f32 %v7735_v51, %v10912_v37  ;;  %v10914_v37 = vld [vmem:[#allocation103_spill] sm:$0xff]  ;;  %v7894_v7 = vmul.f32 %v7760_v9, %v10916_v20  ;;  %v10918_v0 = vrot.slane %v7625_v35, 2 }
 0x3c6   :  { %v2214_v59 = vadd.f32 %v10910_v40, %v2204_v63  ;;  %v2215_v50 = vadd.f32 %v10911_v29, %v2205_v45  ;;  %v10913_v45 = vld [vmem:[#allocation113_spill] sm:$0xff]  ;;  %v7873_v51 = vmul.f32 %v7760_v9, %v10914_v37  ;;  %v7877_v32 = vmul.f32 %v7765_v5, %v10914_v37 }
 0x3c7   :  { %v7867_v29 = vmul.f32 %v7760_v9, %v10913_v45  ;;  %v10922_v35 = vrot.slane %v7660_v3, 4 }
 0x3c8   :  { %v2218_v63 = vadd.f32 %v2216_v60, %v2214_v59  ;;  %v2219_v40 = vadd.f32 %v2217_v28, %v2215_v50  ;;  %v7881_v59 = vmul.f32 %v7765_v5, %v10913_v45  ;;  %v10915_v50 = vld [vmem:[#allocation117_spill] sm:$0xff]  ;;  %v2410_v45 = vadd.f32 %v10918_v0, %v7617_v14 }
 0x3c9   :  { %v7885_v33 = vmul.f32 %v7760_v9, %v10915_v50  ;;  %v7890_v57 = vmul.f32 %v7765_v5, %v10915_v50  ;;  %v10919_v50 = vld [vmem:[#allocation88_spill] sm:$0xff] }
 0x3ca   :  { %v2228_v60 = vadd.f32 %v2224_v39, %v2218_v63  ;;  %v2229_v28 = vadd.f32 %v2225_v43, %v2219_v40  ;;  %v7898_v39 = vmul.f32 %v7765_v5, %v10916_v20  ;;  %v10917_v40 = vrot.slane %v7621_v41, 2 }
 0x3cb   :  { %v2421_v24 = vmul.f32 %v7557_v42, %v10919_v50  ;;  %v2422_v9 = vmul.f32 %v7560_v10, %v10919_v50  ;;  %v2431_v20 = vmul.f32 %v7610_v53, %v10920_v61  ;;  %v2420_v14 = vadd.f32 %v10922_v35, %v2410_v45 }
 0x3cc   :  { %v2238_v43 = vadd.f32 %v2234_v26, %v2228_v60  ;;  %v2239_v63 = vadd.f32 %v2235_v18, %v2229_v28  ;;  %v2409_v37 = vadd.f32 %v10917_v40, %v7600_v36  ;;  %v2432_v26 = vmul.f32 %v7613_v46, %v10920_v61  ;;  %v10923_v40 = vld [vmem:[#allocation90_spill] sm:$0xff] }
 0x3cd   :  { %v10921_v36 = vrot.slane %v7629_v44, 4  ;;  %v2425_v0 = vrot.slane %v2421_v24, 6  ;;  %v2426_v28 = vrot.slane %v2422_v9, 6  ;;  %v2435_v42 = vmul.f32 %v7610_v53, %v10923_v40 }
 0x3ce   :  { %v2248_v18 = vadd.f32 %v2244_v58, %v2238_v43  ;;  %v2249_v60 = vadd.f32 %v2245_v52, %v2239_v63  ;;  %v2436_v50 = vmul.f32 %v7613_v46, %v10923_v40  ;;  %v2445_v58 = vmul.f32 %v7610_v53, %v10924_v12 }
 0x3cf   :  { %v2419_v41 = vadd.f32 %v10921_v36, %v2409_v37  ;;  %v2446_v44 = vmul.f32 %v7613_v46, %v10924_v12  ;;  %v2430_v37 = vadd.f32 %v2426_v28, %v2420_v14  ;;  %v2439_v3 = vrot.slane %v2435_v42, 2 }
 0x3d0   :  { %v2252_v10 = vadd.f32 %v2250_v11, %v2248_v18  ;;  %v2253_v5 = vadd.f32 %v2251_v56, %v2249_v60  ;;  %v2440_v45 = vrot.slane %v2436_v50, 2  ;;  %v2327_v43 = vrot.slane %v7881_v59, 2  ;;  %v10925_v11 = vld [vmem:[#allocation96_spill] sm:$0xff] }
 0x3d1   :  { %v2429_v52 = vadd.f32 %v2425_v0, %v2419_v41  ;;  %v2434_v35 = vadd.f32 %v2432_v26, %v2430_v37  ;;  %v2455_v56 = vmul.f32 %v7610_v53, %v10925_v11  ;;  %v2456_v18 = vmul.f32 %v7613_v46, %v10925_v11 }
 0x3d2   :  { %v2262_v24 = vadd.f32 %v2258_v47, %v2252_v10  ;;  %v2263_v9 = vadd.f32 %v2259_v38, %v2253_v5  ;;  %v10926_v60 = vrot.slane %v7789_v13, 4  ;;  %v2337_v42 = vrot.slane %v7890_v57, 4 }
 0x3d3   :  { %v2433_v36 = vadd.f32 %v2431_v20, %v2429_v52  ;;  %v2346_v10 = vrot.slane %v7894_v7, 6  ;;  %v2444_v47 = vadd.f32 %v2440_v45, %v2434_v35  ;;  %v2449_v38 = vrot.slane %v2445_v58, 4  ;;  %v10931_v45 = vld [vmem:[#allocation107_spill] sm:$0xff] }
 0x3d4   :  { %v2272_v41 = vadd.f32 %v10926_v60, %v2262_v24  ;;  %v2273_v14 = vadd.f32 %v2269_v62, %v2263_v9  ;;  %v2450_v50 = vrot.slane %v2446_v44, 4  ;;  %v10927_v20 = vrot.slane %v7805_v21, 6  ;;  %v10929_v24 = vld [vmem:[#allocation106_spill] sm:$0xff]  ;;  %v10930_v44 = vld [vmem:[#allocation105_spill] sm:$0xff] }
 0x3d5   :  { %v2443_v5 = vadd.f32 %v2439_v3, %v2433_v36  ;;  %v10928_v0 = vrot.slane %v7814_v6, 6  ;;  %v2459_v52 = vrot.slane %v2455_v56, 6  ;;  %v2460_v37 = vrot.slane %v2456_v18, 6 }
 0x3d6   :  { %v2282_v26 = vadd.f32 %v10927_v20, %v2272_v41  ;;  %v2454_v13 = vadd.f32 %v2450_v50, %v2444_v47  ;;  %v2469_v62 = vmul.f32 %v7644_v31, %v10929_v24  ;;  %v2470_v9 = vmul.f32 %v7647_v30, %v10929_v24 }
 0x3d7   :  { %v2283_v28 = vadd.f32 %v10928_v0, %v2273_v14  ;;  %v2453_v63 = vadd.f32 %v2449_v38, %v2443_v5  ;;  %v2465_v21 = vmul.f32 %v7644_v31, %v10930_v44  ;;  %v2479_v6 = vmul.f32 %v7644_v31, %v10931_v45  ;;  %v10934_v14 = vld [vmem:[#allocation114_spill] sm:$0xff] }
 0x3d8   :  { %v2286_v3 = vadd.f32 %v7855_v17, %v2282_v26  ;;  %v2464_v35 = vadd.f32 %v2460_v37, %v2454_v13  ;;  %v2466_v56 = vmul.f32 %v7647_v30, %v10930_v44  ;;  %v2480_v18 = vmul.f32 %v7647_v30, %v10931_v45  ;;  %v10983_v45 = vld [vmem:[#allocation134_spill] sm:$0xff] }
 0x3d9   :  { %v2287_v58 = vadd.f32 %v7859_v19, %v2283_v28  ;;  %v2463_v36 = vadd.f32 %v2459_v52, %v2453_v63  ;;  %v10932_v60 = vrot.slane %v7820_v23, 2  ;;  %v10933_v17 = vrot.slane %v7824_v48, 2 }
 0x3da   :  { %v2489_v5 = vmul.f32 %v7644_v31, %v10934_v14  ;;  %v2490_v47 = vmul.f32 %v7647_v30, %v10934_v14  ;;  %v2468_v38 = vadd.f32 %v2466_v56, %v2464_v35  ;;  %v2473_v50 = vrot.slane %v2469_v62, 2 }
 0x3db   :  { %v2296_v41 = vadd.f32 %v10932_v60, %v2286_v3  ;;  %v2297_v19 = vadd.f32 %v10933_v17, %v2287_v58  ;;  %v2467_v63 = vadd.f32 %v2465_v21, %v2463_v36  ;;  %v2474_v20 = vrot.slane %v2470_v9, 2  ;;  %v10939_v36 = vld [vmem:[#allocation120_spill] sm:$0xff] }
 0x3dc   :  { %v10935_v26 = vrot.slane %v7832_v25, 4  ;;  %v10936_v28 = vrot.slane %v7836_v1, 4  ;;  %v2347_v52 = vrot.slane %v7898_v39, 6  ;;  %v2483_v48 = vrot.slane %v2479_v6, 4  ;;  %v10940_v6 = vld [vmem:[#allocation121_spill] sm:$0xff] }
 0x3dd   :  { %v2477_v37 = vadd.f32 %v2473_v50, %v2467_v63  ;;  %v2478_v13 = vadd.f32 %v2474_v20, %v2468_v38  ;;  %v2484_v3 = vrot.slane %v2480_v18, 4  ;;  %v2493_v58 = vrot.slane %v2489_v5, 6  ;;  %v10942_v38 = vld [vmem:[#allocation122_spill] sm:$0xff] }
 0x3de   :  { %v2306_v0 = vadd.f32 %v10935_v26, %v2296_v41  ;;  %v2307_v23 = vadd.f32 %v10936_v28, %v2297_v19  ;;  %v10937_v60 = vrot.slane %v7842_v16, 6  ;;  %v10938_v21 = vrot.slane %v7846_v15, 6  ;;  %v10941_v41 = vld [vmem:[#allocation119_spill] sm:$0xff] }
 0x3df   :  { %v2494_v9 = vrot.slane %v2490_v47, 6  ;;  %v2503_v25 = vmul.f32 %v7677_v22, %v10939_v36  ;;  %v2487_v35 = vadd.f32 %v2483_v48, %v2477_v37  ;;  %v2488_v1 = vadd.f32 %v2484_v3, %v2478_v13 }
 0x3e0   :  { %v2316_v17 = vadd.f32 %v10937_v60, %v2306_v0  ;;  %v2317_v62 = vadd.f32 %v10938_v21, %v2307_v23  ;;  %v2504_v39 = vmul.f32 %v7686_v54, %v10939_v36  ;;  %v2513_v56 = vmul.f32 %v7677_v22, %v10940_v6 }
 0x3e1   :  { %v2499_v15 = vmul.f32 %v7677_v22, %v10941_v41  ;;  %v2514_v19 = vmul.f32 %v7686_v54, %v10940_v6  ;;  %v2497_v5 = vadd.f32 %v2493_v58, %v2487_v35  ;;  %v2498_v47 = vadd.f32 %v2494_v9, %v2488_v1  ;;  %v10948_v35 = vld [vmem:[#allocation126_spill] sm:$0xff] }
 0x3e2   :  { %v2320_v18 = vadd.f32 %v7873_v51, %v2316_v17  ;;  %v2321_v16 = vadd.f32 %v7877_v32, %v2317_v62  ;;  %v2500_v63 = vmul.f32 %v7686_v54, %v10941_v41  ;;  %v2523_v50 = vmul.f32 %v7677_v22, %v10942_v38 }
 0x3e3   :  { %v10943_v20 = vrot.slane %v7867_v29, 2  ;;  %v2507_v32 = vrot.slane %v2503_v25, 2  ;;  %v2524_v0 = vmul.f32 %v7686_v54, %v10942_v38  ;;  %v2501_v28 = vadd.f32 %v2499_v15, %v2497_v5  ;;  %v10945_v29 = vld [vmem:[#allocation125_spill] sm:$0xff]  ;;  %v10980_v38 = vld [vmem:[#allocation212_spill] sm:$0xff] }
 0x3e4   :  { %v2331_v51 = vadd.f32 %v2327_v43, %v2321_v16  ;;  %v2502_v23 = vadd.f32 %v2500_v63, %v2498_v47  ;;  %v2508_v48 = vrot.slane %v2504_v39, 2  ;;  %v2517_v37 = vrot.slane %v2513_v56, 4  ;;  %v10949_v56 = vld [vmem:[#allocation127_spill] sm:$0xff] }
 0x3e5   :  { %v2330_v26 = vadd.f32 %v10943_v20, %v2320_v18  ;;  %v10944_v13 = vrot.slane %v7885_v33, 4  ;;  %v2518_v60 = vrot.slane %v2514_v19, 4  ;;  %v2567_v17 = vmul.f32 %v7694_v2, %v10945_v29  ;;  %v10950_v20 = vld [vmem:[#allocation128_spill] sm:$0xff] }
 0x3e6   :  { %v2341_v58 = vadd.f32 %v2337_v42, %v2331_v51  ;;  %v2511_v59 = vadd.f32 %v2507_v32, %v2501_v28  ;;  %v2512_v43 = vadd.f32 %v2508_v48, %v2502_v23  ;;  %v2527_v21 = vrot.slane %v2523_v50, 6 }
 0x3e7   :  { %v2340_v3 = vadd.f32 %v10944_v13, %v2330_v26  ;;  %v2568_v62 = vmul.f32 %v7699_v34, %v10945_v29  ;;  %v2528_v33 = vrot.slane %v2524_v0, 6  ;;  %v2571_v57 = vmul.f32 %v7694_v2, %v10948_v35  ;;  %v10951_v13 = vld [vmem:[#allocation132_spill] sm:$0xff]  ;;  %v10974_v29 = vld [vmem:[#allocation145_spill] sm:$0xff] }
 0x3e8   :  { %v8005_v25 = vadd.f32 %v2347_v52, %v2341_v58  ;;  %v2521_v42 = vadd.f32 %v2517_v37, %v2511_v59  ;;  %v2522_v1 = vadd.f32 %v2518_v60, %v2512_v43  ;;  %v2572_v39 = vmul.f32 %v7699_v34, %v10948_v35  ;;  %v10953_v43 = vld [vmem:[#allocation202_spill] sm:$0xff] }
 0x3e9   :  { %v8003_v9 = vadd.f32 %v2346_v10, %v2340_v3  ;;  %v8013_v18 = vmul.f32 %v7694_v2, %v10949_v56  ;;  %v2582_v47 = vmul.f32 %v7699_v34, %v10949_v56  ;;  %v2591_v26 = vmul.f32 %v7694_v2, %v10950_v20 }
 0x3ea   :  { %10947 = vst [vmem:[#allocation222_spill] sm:$0xff] %v8005_v25  ;;  %v2353_v10 = vsel %vm753_vm8, %v8005_v25, 0.0  ;;  %v2366_v16 = vmul.f32 %v8005_v25, %v8005_v25  ;;  %v2531_v19 = vadd.f32 %v2527_v21, %v2521_v42  ;;  %v2532_v5 = vadd.f32 %v2528_v33, %v2522_v1  ;;  %v10955_v33 = vld [vmem:[#allocation133_spill] sm:$0xff]  ;;  %v10984_v25 = vld [vmem:[#allocation136_spill] sm:$0xff] }
 0x3eb   :  { %10946 = vst [vmem:[#allocation221_spill] sm:$0xff] %v8003_v9  ;;  %v2352_v7 = vsel %vm753_vm8, %v8003_v9, 0.0  ;;  %v2365_v52 = vmul.f32 %v8003_v9, %v8003_v9  ;;  %v2592_v51 = vmul.f32 %v7699_v34, %v10950_v20  ;;  %v2575_v23 = vrot.slane %v2571_v57, 2 }
 0x3ec   :  { %v2354_v15 = vadd.f32 %v2353_v10, %v2352_v7  ;;  %v2368_v50 = vsel %vm753_vm8, %v2366_v16, 0.0  ;;  %v2535_v0 = vadd.f32 %v7510_v8, %v2531_v19  ;;  %v2536_v28 = vadd.f32 %v7524_v4, %v2532_v5  ;;  %v10957_v10 = vld [vmem:[#allocation203_spill] sm:$0xff]  ;;  %v10959_v16 = vld [vmem:[#allocation204_spill] sm:$0xff] }
 0x3ed   :  { %v2367_v63 = vsel %vm753_vm8, %v2365_v52, 0.0  ;;  %v2576_v48 = vrot.slane %v2572_v39, 2  ;;  %v2585_v37 = vrot.slane %v8013_v18, 4  ;;  %v8036_v3 = vmul.f32 %v7724_v49, %v10951_v13  ;;  %v10956_v39 = vld [vmem:[#allocation131_spill] sm:$0xff] }
 0x3ee   :  { %2355 = vadd.xlane.f32.xlu0 %v2354_v15  ;;  %v2369_v32 = vadd.f32 %v2368_v50, %v2367_v63  ;;  %v8040_v58 = vmul.f32 %v7727_v27, %v10951_v13  ;;  %v10952_v60 = vrot.slane %v7491_v55, 2  ;;  %v10954_v8 = vrot.slane %v10953_v43, 2  ;;  %v10978_v13 = vld [vmem:[#allocation92_spill] sm:$0xff] }
 0x3ef   :  { %v2586_v4 = vrot.slane %v2582_v47, 4  ;;  %v8048_v57 = vmul.f32 %v7724_v49, %v10955_v33  ;;  %v2595_v42 = vrot.slane %v2591_v26, 6  ;;  %v2596_v1 = vrot.slane %v2592_v51, 6  ;;  %v10961_v47 = vld [vmem:[#allocation135_spill] sm:$0xff] }
 0x3f0   :  { %2370 = vadd.xlane.f32.xlu1 %v2369_v32  ;;  %v2545_v59 = vadd.f32 %v10952_v60, %v2535_v0  ;;  %v2546_v21 = vadd.f32 %v10954_v8, %v2536_v28  ;;  %v2601_v18 = vmul.f32 %v7724_v49, %v10956_v39  ;;  %v2602_v7 = vmul.f32 %v7727_v27, %v10956_v39  ;;  %v10962_v0 = vld [vmem:[#allocation205_spill] sm:$0xff]  ;;  %v10971_v39 = vld [vmem:[#allocation139_spill] sm:$0xff] }
 0x3f1   :  { %v10958_v52 = vrot.slane %v10957_v10, 4  ;;  %v10960_v15 = vrot.slane %v10959_v16, 4  ;;  %v8060_v5 = vmul.f32 %v7727_v27, %v10955_v33  ;;  %v8064_v63 = vmul.f32 %v7724_v49, %v10961_v47  ;;  %v10967_v10 = vld [vmem:[#allocation217_spill] sm:$0xff] }
 0x3f2   :  { %v2609_v50 = vrot.slane %v8036_v3, 2  ;;  %v2610_v26 = vrot.slane %v8040_v58, 2  ;;  %v2619_v51 = vrot.slane %v8048_v57, 4  ;;  %v8071_v32 = vmul.f32 %v7727_v27, %v10961_v47  ;;  %v10968_v3 = vld [vmem:[#allocation218_spill] sm:$0xff]  ;;  %v10969_v58 = vld [vmem:[#allocation143_spill] sm:$0xff] }
 0x3f3   :  { %v2555_v55 = vadd.f32 %v10958_v52, %v2545_v59  ;;  %v2556_v19 = vadd.f32 %v10960_v15, %v2546_v21  ;;  %v10963_v28 = vrot.slane %v10962_v0, 6  ;;  %v10964_v59 = vld [vmem:[#allocation206_spill] sm:$0xff]  ;;  %v10966_v21 = vld [vmem:[#allocation140_spill] sm:$0xff]  ;;  %v8087_v57 = vmul.f32 %v10967_v10, %v10969_v58 }
 0x3f4   :  { %v10965_v43 = vrot.slane %v10964_v59, 6  ;;  %v8079_v52 = vmul.f32 %v10967_v10, %v10966_v21  ;;  %v8083_v16 = vmul.f32 %v10968_v3, %v10966_v21  ;;  %v8091_v15 = vmul.f32 %v10968_v3, %v10969_v58 }
 0x3f5   :  { %v2565_v60 = vadd.f32 %v10963_v28, %v2555_v55  ;;  %v10970_v55 = vld [vmem:[#allocation144_spill] sm:$0xff]  ;;  %v2629_v21 = vrot.slane %v8064_v63, 6  ;;  %v2630_v47 = vrot.slane %v8071_v32, 6  ;;  %v2635_v58 = vmul.f32 %v10967_v10, %v10971_v39  ;;  %v10972_v32 = vld [vmem:[#allocation146_spill] sm:$0xff] }
 0x3f6   :  { %v2566_v8 = vadd.f32 %v10965_v43, %v2556_v19  ;;  %v8095_v0 = vmul.f32 %v10967_v10, %v10970_v55  ;;  %v8099_v19 = vmul.f32 %v10968_v3, %v10970_v55  ;;  %v2620_v43 = vrot.slane %v8060_v5, 4  ;;  %v10976_v5 = vld [vmem:[#allocation147_spill] sm:$0xff] }
 0x3f7   :  { %v2569_v28 = vadd.f32 %v2567_v17, %v2565_v60  ;;  %v2636_v33 = vmul.f32 %v10968_v3, %v10971_v39  ;;  %v10973_v60 = vld [vmem:[#allocation219_spill] sm:$0xff]  ;;  %v2757_v41 = vmul.f32 %v10980_v38, %v10978_v13 }
 0x3f8   :  { %v2570_v59 = vadd.f32 %v2568_v62, %v2566_v8  ;;  %v8116_v8 = vmul.f32 %v10973_v60, %v10972_v32  ;;  %v8132_v63 = vmul.f32 %v10973_v60, %v10976_v5 }
 0x3f9   :  { %v2579_v20 = vadd.f32 %v2575_v23, %v2569_v28  ;;  %v8120_v23 = vmul.f32 %v10973_v60, %v10974_v29 }
 0x3fa   :  { %v2580_v56 = vadd.f32 %v2576_v48, %v2570_v59  ;;  %v10975_v48 = vld [vmem:[#allocation220_spill] sm:$0xff] }
 0x3fb   :  { %v2589_v35 = vadd.f32 %v2585_v37, %v2579_v20  ;;  %v8124_v28 = vmul.f32 %v10975_v48, %v10974_v29  ;;  %v8128_v59 = vmul.f32 %v10975_v48, %v10972_v32  ;;  %v8136_v20 = vmul.f32 %v10975_v48, %v10976_v5  ;;  %v10979_v29 = vld [vmem:[#allocation211_spill] sm:$0xff]  ;;  %v10981_v5 = vld [vmem:[#allocation129_spill] sm:$0xff] }
 0x3fc   :  { %v2590_v39 = vadd.f32 %v2586_v4, %v2580_v56  ;;  %v10977_v56 = vld [vmem:[#allocation148_spill] sm:$0xff]  ;;  %v2756_v32 = vmul.f32 %v10979_v29, %v10978_v13  ;;  %v2758_v6 = vmul.f32 %v10979_v29, %v10981_v5  ;;  %v2759_v36 = vmul.f32 %v10980_v38, %v10981_v5 }
 0x3fd   :  { %v8140_v37 = vmul.f32 %v10973_v60, %v10977_v56  ;;  %v2599_v4 = vadd.f32 %v2595_v42, %v2589_v35  ;;  %v8145_v55 = vmul.f32 %v10975_v48, %v10977_v56  ;;  %v2778_v44 = vmul.f32 %v10979_v29, %v10983_v45 }
 0x3fe   :  { %v2600_v62 = vadd.f32 %v2596_v1, %v2590_v39  ;;  %v10982_v1 = vld [vmem:[#allocation130_spill] sm:$0xff]  ;;  %v2762_v56 = vrot.slane %v2758_v6, 2  ;;  %v2763_v14 = vrot.slane %v2759_v36, 2  ;;  %v2779_v13 = vmul.f32 %v10980_v38, %v10983_v45 }
 0x3ff   :  { %v2603_v35 = vadd.f32 %v2601_v18, %v2599_v4  ;;  %v2768_v39 = vmul.f32 %v10979_v29, %v10982_v1  ;;  %v2769_v17 = vmul.f32 %v10980_v38, %v10982_v1  ;;  %v2788_v6 = vmul.f32 %v7610_v53, %v10984_v25  ;;  %v10985_v29 = vld [vmem:[#allocation137_spill] sm:$0xff] }
 0x400   :  { %v2604_v42 = vadd.f32 %v2602_v7, %v2600_v62  ;;  %v2766_v18 = vadd.f32 %v2762_v56, %v2756_v32  ;;  %v2767_v7 = vadd.f32 %v2763_v14, %v2757_v41  ;;  %v2782_v62 = vrot.slane %v2778_v44, 6  ;;  %v10986_v44 = vld [vmem:[#allocation138_spill] sm:$0xff] }
 0x401   :  { %v2613_v24 = vadd.f32 %v2609_v50, %v2603_v35  ;;  %v2772_v12 = vrot.slane %v2768_v39, 4  ;;  %v2773_v5 = vrot.slane %v2769_v17, 4  ;;  %v2783_v4 = vrot.slane %v2779_v13, 6 }
 0x402   :  { %v2614_v11 = vadd.f32 %v2610_v26, %v2604_v42  ;;  %v2789_v36 = vmul.f32 %v7613_v46, %v10984_v25  ;;  %v2792_v50 = vmul.f32 %v7610_v53, %v10985_v29  ;;  %v2793_v26 = vmul.f32 %v7613_v46, %v10985_v29 }
 0x403   :  { %v2623_v40 = vadd.f32 %v2619_v51, %v2613_v24  ;;  %v2776_v1 = vadd.f32 %v2772_v12, %v2766_v18  ;;  %v2777_v9 = vadd.f32 %v2773_v5, %v2767_v7  ;;  %v2802_v24 = vmul.f32 %v7610_v53, %v10986_v44 }
 0x404   :  { %v2624_v61 = vadd.f32 %v2620_v43, %v2614_v11  ;;  %v2803_v11 = vmul.f32 %v7613_v46, %v10986_v44  ;;  %v2796_v51 = vrot.slane %v2792_v50, 2  ;;  %v2797_v43 = vrot.slane %v2793_v26, 2  ;;  %v10992_v50 = vld [vmem:[#allocation150_spill] sm:$0xff]  ;;  %v11038_v44 = vld [vmem:[#allocation156_spill] sm:$0xff] }
 0x405   :  { %v2633_v17 = vadd.f32 %v2629_v21, %v2623_v40  ;;  %v2786_v41 = vadd.f32 %v2782_v62, %v2776_v1  ;;  %v2787_v13 = vadd.f32 %v2783_v4, %v2777_v9  ;;  %v2678_v32 = vrot.slane %v8128_v59, 2  ;;  %v10987_v40 = vld [vmem:[#allocation141_spill] sm:$0xff] }
 0x406   :  { %v2634_v14 = vadd.f32 %v2630_v47, %v2624_v61  ;;  %v2687_v56 = vrot.slane %v8132_v63, 4  ;;  %v2812_v61 = vmul.f32 %v7610_v53, %v10987_v40  ;;  %v2813_v47 = vmul.f32 %v7613_v46, %v10987_v40 }
 0x407   :  { %v2637_v12 = vadd.f32 %v2635_v58, %v2633_v17  ;;  %v2790_v35 = vadd.f32 %v2788_v6, %v2786_v41  ;;  %v2791_v42 = vadd.f32 %v2789_v36, %v2787_v13  ;;  %v10988_v21 = vrot.slane %v8079_v52, 2  ;;  %v10995_v41 = vld [vmem:[#allocation149_spill] sm:$0xff]  ;;  %v10996_v13 = vld [vmem:[#allocation151_spill] sm:$0xff] }
 0x408   :  { %v2638_v5 = vadd.f32 %v2636_v33, %v2634_v14  ;;  %v10989_v9 = vrot.slane %v8083_v16, 2  ;;  %v2688_v33 = vrot.slane %v8136_v20, 4  ;;  %v2697_v58 = vrot.slane %v8140_v37, 6 }
 0x409   :  { %v2647_v1 = vadd.f32 %v10988_v21, %v2637_v12  ;;  %v2800_v59 = vadd.f32 %v2796_v51, %v2790_v35  ;;  %v2801_v63 = vadd.f32 %v2797_v43, %v2791_v42  ;;  %v2806_v18 = vrot.slane %v2802_v24, 4 }
 0x40a   :  { %v2648_v39 = vadd.f32 %v10989_v9, %v2638_v5  ;;  %v2807_v7 = vrot.slane %v2803_v11, 4  ;;  %v10990_v62 = vrot.slane %v8087_v57, 4  ;;  %v10991_v6 = vrot.slane %v8091_v15, 4 }
 0x40b   :  { %v2826_v52 = vmul.f32 %v7644_v31, %v10992_v50  ;;  %v2827_v16 = vmul.f32 %v7647_v30, %v10992_v50  ;;  %v2810_v26 = vadd.f32 %v2806_v18, %v2800_v59  ;;  %v2816_v17 = vrot.slane %v2812_v61, 6 }
 0x40c   :  { %v2657_v4 = vadd.f32 %v10990_v62, %v2647_v1  ;;  %v2658_v36 = vadd.f32 %v10991_v6, %v2648_v39  ;;  %v2811_v20 = vadd.f32 %v2807_v7, %v2801_v63  ;;  %v2817_v37 = vrot.slane %v2813_v47, 6  ;;  %v10997_v1 = vld [vmem:[#allocation152_spill] sm:$0xff]  ;;  %v10999_v6 = vld [vmem:[#allocation154_spill] sm:$0xff] }
 0x40d   :  { %v10993_v14 = vrot.slane %v8095_v0, 6  ;;  %v10994_v11 = vrot.slane %v8099_v19, 6  ;;  %v2822_v15 = vmul.f32 %v7644_v31, %v10995_v41  ;;  %v2836_v51 = vmul.f32 %v7644_v31, %v10996_v13 }
 0x40e   :  { %v2820_v43 = vadd.f32 %v2816_v17, %v2810_v26  ;;  %v2821_v12 = vadd.f32 %v2817_v37, %v2811_v20  ;;  %v2823_v5 = vmul.f32 %v7647_v30, %v10995_v41  ;;  %v2837_v35 = vmul.f32 %v7647_v30, %v10996_v13  ;;  %v11000_v26 = vld [vmem:[#allocation153_spill] sm:$0xff]  ;;  %v11035_v13 = vld [vmem:[#allocation142_spill] sm:$0xff]  ;;  %v11036_v41 = vld [vmem:[#allocation211_spill] sm:$0xff] }
 0x40f   :  { %v2667_v24 = vadd.f32 %v10993_v14, %v2657_v4  ;;  %v2668_v57 = vadd.f32 %v10994_v11, %v2658_v36  ;;  %v2830_v19 = vrot.slane %v2826_v52, 2  ;;  %v2831_v61 = vrot.slane %v2827_v16, 2 }
 0x410   :  { %v2824_v47 = vadd.f32 %v2822_v15, %v2820_v43  ;;  %v2825_v21 = vadd.f32 %v2823_v5, %v2821_v12  ;;  %v2846_v9 = vmul.f32 %v7644_v31, %v10997_v1  ;;  %v2847_v39 = vmul.f32 %v7647_v30, %v10997_v1 }
 0x411   :  { %v2671_v0 = vadd.f32 %v8120_v23, %v2667_v24  ;;  %v2672_v42 = vadd.f32 %v8124_v28, %v2668_v57  ;;  %v10998_v59 = vrot.slane %v8116_v8, 2  ;;  %v2698_v7 = vrot.slane %v8145_v55, 6  ;;  %v11003_v57 = vld [vmem:[#allocation157_spill] sm:$0xff] }
 0x412   :  { %v2840_v62 = vrot.slane %v2836_v51, 4  ;;  %v2834_v23 = vadd.f32 %v2830_v19, %v2824_v47  ;;  %v2835_v4 = vadd.f32 %v2831_v61, %v2825_v21  ;;  %v2841_v28 = vrot.slane %v2837_v35, 4  ;;  %v11004_v35 = vld [vmem:[#allocation158_spill] sm:$0xff] }
 0x413   :  { %v2681_v63 = vadd.f32 %v10998_v59, %v2671_v0  ;;  %v2682_v18 = vadd.f32 %v2678_v32, %v2672_v42  ;;  %v2860_v36 = vmul.f32 %v7677_v22, %v10999_v6  ;;  %v2856_v20 = vmul.f32 %v7677_v22, %v11000_v26 }
 0x414   :  { %v2861_v17 = vmul.f32 %v7686_v54, %v10999_v6  ;;  %v2844_v8 = vadd.f32 %v2840_v62, %v2834_v23  ;;  %v2845_v37 = vadd.f32 %v2841_v28, %v2835_v4  ;;  %v2850_v32 = vrot.slane %v2846_v9, 6  ;;  %v11005_v9 = vld [vmem:[#allocation160_spill] sm:$0xff]  ;;  %v11007_v4 = vld [vmem:[#allocation159_spill] sm:$0xff]  ;;  %v11031_v6 = vld [vmem:[#allocation166_spill] sm:$0xff] }
 0x415   :  { %v2691_v52 = vadd.f32 %v2687_v56, %v2681_v63  ;;  %v2692_v16 = vadd.f32 %v2688_v33, %v2682_v18  ;;  %v2851_v14 = vrot.slane %v2847_v39, 6  ;;  %v2857_v11 = vmul.f32 %v7686_v54, %v11000_v26  ;;  %v11006_v63 = vld [vmem:[#allocation123_spill] sm:$0xff] }
 0x416   :  { %v2870_v56 = vmul.f32 %v7677_v22, %v11003_v57  ;;  %v2854_v33 = vadd.f32 %v2850_v32, %v2844_v8  ;;  %v2864_v51 = vrot.slane %v2860_v36, 2  ;;  %v2871_v43 = vmul.f32 %v7686_v54, %v11003_v57 }
 0x417   :  { %v8222_v55 = vadd.f32 %v2697_v58, %v2691_v52  ;;  %v8224_v24 = vadd.f32 %v2698_v7, %v2692_v16  ;;  %v2855_v15 = vadd.f32 %v2851_v14, %v2845_v37  ;;  %v2865_v5 = vrot.slane %v2861_v17, 2  ;;  %v11008_v16 = vld [vmem:[#allocation124_spill] sm:$0xff] }
 0x418   :  { %v2880_v0 = vmul.f32 %v7677_v22, %v11004_v35  ;;  %v2858_v19 = vadd.f32 %v2856_v20, %v2854_v33  ;;  %v2881_v47 = vmul.f32 %v7686_v54, %v11004_v35  ;;  %v2874_v21 = vrot.slane %v2870_v56, 4 }
 0x419   :  { %11001 = vst [vmem:[#allocation202_spill] sm:$0xff] %v8222_v55  ;;  %11002 = vst [vmem:[#allocation203_spill] sm:$0xff] %v8224_v24  ;;  %v2703_v12 = vsel %vm753_vm8, %v8222_v55, 0.0  ;;  %v2704_v58 = vsel %vm753_vm8, %v8224_v24, 0.0  ;;  %v2859_v61 = vadd.f32 %v2857_v11, %v2855_v15  ;;  %v8242_v39 = vmul.f32 %v7694_v2, %v11005_v9  ;;  %v11009_v15 = vld [vmem:[#allocation110_spill] sm:$0xff] }
 0x41a   :  { %v2705_v42 = vadd.f32 %v2704_v58, %v2703_v12  ;;  %v8246_v59 = vmul.f32 %v7699_v34, %v11005_v9  ;;  %v8250_v18 = vmul.f32 %v7694_v2, %v11006_v63  ;;  %v2868_v7 = vadd.f32 %v2864_v51, %v2858_v19  ;;  %v11033_v9 = vld [vmem:[#allocation167_spill] sm:$0xff] }
 0x41b   :  { %v2869_v62 = vadd.f32 %v2865_v5, %v2859_v61  ;;  %v2875_v23 = vrot.slane %v2871_v43, 4  ;;  %v2924_v28 = vmul.f32 %v7694_v2, %v11007_v4  ;;  %v2925_v36 = vmul.f32 %v7699_v34, %v11007_v4  ;;  %v11010_v5 = vld [vmem:[#allocation111_spill] sm:$0xff]  ;;  %v11025_v4 = vld [vmem:[#allocation164_spill] sm:$0xff] }
 0x41c   :  { %2706 = vadd.xlane.f32.xlu0 %v2705_v42  ;;  %v8258_v52 = vmul.f32 %v7699_v34, %v11006_v63  ;;  %v8262_v20 = vmul.f32 %v7694_v2, %v11008_v16  ;;  %v8266_v17 = vmul.f32 %v7699_v34, %v11008_v16  ;;  %v2878_v8 = vadd.f32 %v2874_v21, %v2868_v7  ;;  %v11011_v21 = vld [vmem:[#allocation208_spill] sm:$0xff]  ;;  %v11013_v7 = vld [vmem:[#allocation109_spill] sm:$0xff] }
 0x41d   :  { %v2879_v37 = vadd.f32 %v2875_v23, %v2869_v62  ;;  %v2884_v32 = vrot.slane %v2880_v0, 6  ;;  %v2885_v14 = vrot.slane %v2881_v47, 6  ;;  %v2932_v11 = vrot.slane %v8242_v39, 2 }
 0x41e   :  { %v2933_v56 = vrot.slane %v8246_v59, 2  ;;  %v2942_v33 = vrot.slane %v8250_v18, 4  ;;  %v8273_v51 = vmul.f32 %v7724_v49, %v11009_v15  ;;  %v8277_v58 = vmul.f32 %v7727_v27, %v11009_v15  ;;  %v11012_v59 = vld [vmem:[#allocation213_spill] sm:$0xff] }
 0x41f   :  { %v2888_v43 = vadd.f32 %v2884_v32, %v2878_v8  ;;  %v2889_v12 = vadd.f32 %v2885_v14, %v2879_v37  ;;  %v8281_v0 = vmul.f32 %v7724_v49, %v11010_v5  ;;  %v2943_v42 = vrot.slane %v8258_v52, 4  ;;  %v11014_v8 = vld [vmem:[#allocation112_spill] sm:$0xff]  ;;  %v11015_v32 = vld [vmem:[#allocation207_spill] sm:$0xff] }
 0x420   :  { %v2952_v19 = vrot.slane %v8262_v20, 6  ;;  %v2953_v61 = vrot.slane %v8266_v17, 6  ;;  %v8288_v47 = vmul.f32 %v7727_v27, %v11010_v5  ;;  %v2958_v62 = vmul.f32 %v7724_v49, %v11013_v7  ;;  %v11019_v5 = vld [vmem:[#allocation116_spill] sm:$0xff] }
 0x421   :  { %v2892_v39 = vadd.f32 %v11011_v21, %v2888_v43  ;;  %v2893_v18 = vadd.f32 %v11012_v59, %v2889_v12  ;;  %v2959_v23 = vmul.f32 %v7727_v27, %v11013_v7  ;;  %v8300_v17 = vmul.f32 %v7724_v49, %v11014_v8  ;;  %v11017_v12 = vld [vmem:[#allocation209_spill] sm:$0xff] }
 0x422   :  { %v8304_v37 = vmul.f32 %v7727_v27, %v11014_v8  ;;  %v11016_v14 = vrot.slane %v11015_v32, 2  ;;  %v11018_v21 = vrot.slane %v11017_v12, 2  ;;  %v8313_v52 = vmul.f32 %v10967_v10, %v11019_v5  ;;  %v11020_v8 = vld [vmem:[#allocation163_spill] sm:$0xff]  ;;  %v11023_v12 = vld [vmem:[#allocation214_spill] sm:$0xff] }
 0x423   :  { %v8318_v15 = vmul.f32 %v10968_v3, %v11019_v5  ;;  %v8322_v16 = vmul.f32 %v10967_v10, %v11020_v8  ;;  %v8334_v20 = vmul.f32 %v10967_v10, %v11025_v4  ;;  %v8338_v5 = vmul.f32 %v10968_v3, %v11025_v4 }
 0x424   :  { %v2902_v43 = vadd.f32 %v11016_v14, %v2892_v39  ;;  %v2903_v59 = vadd.f32 %v11018_v21, %v2893_v18  ;;  %v8326_v39 = vmul.f32 %v10968_v3, %v11020_v8  ;;  %v11021_v18 = vld [vmem:[#allocation210_spill] sm:$0xff]  ;;  %v11024_v21 = vrot.slane %v11023_v12, 4  ;;  %v11026_v8 = vld [vmem:[#allocation115_spill] sm:$0xff]  ;;  %v11029_v12 = vld [vmem:[#allocation216_spill] sm:$0xff] }
 0x425   :  { %v11022_v32 = vrot.slane %v11021_v18, 4  ;;  %v8344_v35 = vmul.f32 %v10967_v10, %v11026_v8  ;;  %v8360_v1 = vmul.f32 %v10973_v60, %v11031_v6  ;;  %v8378_v63 = vmul.f32 %v10973_v60, %v11033_v9 }
 0x426   :  { %v2913_v7 = vadd.f32 %v11024_v21, %v2903_v59  ;;  %v11027_v59 = vld [vmem:[#allocation215_spill] sm:$0xff]  ;;  %v11030_v21 = vrot.slane %v11029_v12, 6  ;;  %v11032_v12 = vld [vmem:[#allocation165_spill] sm:$0xff]  ;;  %v3125_v29 = vmul.f32 %v11036_v41, %v11038_v44 }
 0x427   :  { %v2912_v14 = vadd.f32 %v11022_v32, %v2902_v43  ;;  %v8348_v43 = vmul.f32 %v10968_v3, %v11026_v8  ;;  %v11028_v18 = vrot.slane %v11027_v59, 6  ;;  %v8364_v8 = vmul.f32 %v10975_v48, %v11031_v6 }
 0x428   :  { %v2923_v57 = vadd.f32 %v11030_v21, %v2913_v7  ;;  %v8370_v21 = vmul.f32 %v10973_v60, %v11032_v12  ;;  %v8374_v26 = vmul.f32 %v10975_v48, %v11032_v12  ;;  %v2716_v12 = vmul.f32 %v8222_v55, %v8222_v55 }
 0x429   :  { %v2922_v32 = vadd.f32 %v11028_v18, %v2912_v14  ;;  %v11034_v18 = vld [vmem:[#allocation168_spill] sm:$0xff]  ;;  %v2717_v6 = vmul.f32 %v8224_v24, %v8224_v24  ;;  %v11039_v24 = vld [vmem:[#allocation169_spill] sm:$0xff] }
 0x42a   :  { %v2927_v59 = vadd.f32 %v2925_v36, %v2923_v57  ;;  %v8387_v7 = vmul.f32 %v10973_v60, %v11034_v18 }
 0x42b   :  { %v2926_v14 = vadd.f32 %v2924_v28, %v2922_v32  ;;  %v8382_v28 = vmul.f32 %v10975_v48, %v11033_v9  ;;  %v3113_v9 = vmul.f32 %v11036_v41, %v11035_v13  ;;  %v2718_v32 = vsel %vm753_vm8, %v2716_v12, 0.0 }
 0x42c   :  { %v2937_v36 = vadd.f32 %v2933_v56, %v2927_v59  ;;  %v3114_v56 = vmul.f32 %v10980_v38, %v11035_v13  ;;  %v2719_v4 = vsel %vm753_vm8, %v2717_v6, 0.0  ;;  %v3129_v13 = vrot.slane %v3125_v29, 4 }
 0x42d   :  { %v2936_v57 = vadd.f32 %v2932_v11, %v2926_v14  ;;  %v11037_v14 = vld [vmem:[#allocation155_spill] sm:$0xff]  ;;  %v3135_v12 = vmul.f32 %v11036_v41, %v11039_v24  ;;  %v11042_v29 = vrot.slane %v8277_v58, 2 }
 0x42e   :  { %v2947_v11 = vadd.f32 %v2943_v42, %v2937_v36  ;;  %v3115_v59 = vmul.f32 %v11036_v41, %v11037_v14  ;;  %v3116_v40 = vmul.f32 %v10980_v38, %v11037_v14  ;;  %v3126_v36 = vmul.f32 %v10980_v38, %v11038_v44 }
 0x42f   :  { %v2946_v50 = vadd.f32 %v2942_v33, %v2936_v57  ;;  %v2720_v33 = vadd.f32 %v2719_v4, %v2718_v32  ;;  %v3136_v14 = vmul.f32 %v10980_v38, %v11039_v24  ;;  %v11040_v4 = vld [vmem:[#allocation170_spill] sm:$0xff] }
 0x430   :  { %v2957_v45 = vadd.f32 %v2953_v61, %v2947_v11  ;;  %v3119_v42 = vrot.slane %v3115_v59, 2  ;;  %v3120_v57 = vrot.slane %v3116_v40, 2  ;;  %v3145_v40 = vmul.f32 %v7610_v53, %v11040_v4 }
 0x431   :  { %v2956_v25 = vadd.f32 %v2952_v19, %v2946_v50  ;;  %2721 = vadd.xlane.f32.xlu0 %v2720_v33  ;;  %v3130_v50 = vrot.slane %v3126_v36, 4  ;;  %v3139_v19 = vrot.slane %v3135_v12, 6  ;;  %v11041_v61 = vrot.slane %v8273_v51, 2  ;;  %v11046_v33 = vld [vmem:[#allocation172_spill] sm:$0xff] }
 0x432   :  { %v2961_v6 = vadd.f32 %v2959_v23, %v2957_v45  ;;  %v3123_v60 = vadd.f32 %v3119_v42, %v3113_v9  ;;  %v3124_v3 = vadd.f32 %v3120_v57, %v3114_v56  ;;  %v3146_v9 = vmul.f32 %v7613_v46, %v11040_v4  ;;  %v11143_v4 = vld [vmem:[#allocation42_spill] sm:$0xff] }
 0x433   :  { %v2960_v55 = vadd.f32 %v2958_v62, %v2956_v25  ;;  %v3140_v25 = vrot.slane %v3136_v14, 6  ;;  %v11043_v62 = vld [vmem:[#allocation171_spill] sm:$0xff]  ;;  %v11044_v56 = vrot.slane %v8281_v0, 4  ;;  %v3160_v42 = vmul.f32 %v7613_v46, %v11046_v33 }
 0x434   :  { %v2971_v11 = vadd.f32 %v11042_v29, %v2961_v6  ;;  %v3133_v41 = vadd.f32 %v3129_v13, %v3123_v60  ;;  %v3134_v45 = vadd.f32 %v3130_v50, %v3124_v3  ;;  %v3149_v38 = vmul.f32 %v7610_v53, %v11043_v62 }
 0x435   :  { %v2970_v32 = vadd.f32 %v11041_v61, %v2960_v55  ;;  %v3150_v23 = vmul.f32 %v7613_v46, %v11043_v62  ;;  %v11045_v55 = vrot.slane %v8288_v47, 4  ;;  %v3159_v60 = vmul.f32 %v7610_v53, %v11046_v33  ;;  %v11049_v61 = vld [vmem:[#allocation173_spill] sm:$0xff]  ;;  %v11140_v33 = vld [vmem:[#allocation63_spill] sm:$0xff] }
 0x436   :  { %v3143_v58 = vadd.f32 %v3139_v19, %v3133_v41  ;;  %v3144_v3 = vadd.f32 %v3140_v25, %v3134_v45  ;;  %v3153_v13 = vrot.slane %v3149_v38, 2  ;;  %v11047_v57 = vrot.slane %v8300_v17, 6 }
 0x437   :  { %v2980_v59 = vadd.f32 %v11044_v56, %v2970_v32  ;;  %v2981_v51 = vadd.f32 %v11045_v55, %v2971_v11  ;;  %v3154_v14 = vrot.slane %v3150_v23, 2  ;;  %v11048_v12 = vrot.slane %v8304_v37, 6 }
 0x438   :  { %v3044_v6 = vrot.slane %v8378_v63, 4  ;;  %v3147_v47 = vadd.f32 %v3145_v40, %v3143_v58  ;;  %v3051_v50 = vmul.f32 %v10975_v48, %v11034_v18  ;;  %v3148_v19 = vadd.f32 %v3146_v9, %v3144_v3  ;;  %v11145_v18 = vld [vmem:[#allocation43_spill] sm:$0xff] }
 0x439   :  { %v2990_v36 = vadd.f32 %v11047_v57, %v2980_v59  ;;  %v2991_v0 = vadd.f32 %v11048_v12, %v2981_v51  ;;  %v3169_v32 = vmul.f32 %v7610_v53, %v11049_v61  ;;  %v3170_v29 = vmul.f32 %v7613_v46, %v11049_v61  ;;  %v11052_v59 = vld [vmem:[#allocation175_spill] sm:$0xff] }
 0x43a   :  { %v3157_v41 = vadd.f32 %v3153_v13, %v3147_v47  ;;  %v3163_v37 = vrot.slane %v3159_v60, 4  ;;  %v3045_v25 = vrot.slane %v8382_v28, 4  ;;  %v3158_v63 = vadd.f32 %v3154_v14, %v3148_v19  ;;  %v11056_v13 = vld [vmem:[#allocation176_spill] sm:$0xff] }
 0x43b   :  { %v2994_v11 = vadd.f32 %v8344_v35, %v2990_v36  ;;  %v2995_v17 = vadd.f32 %v8348_v43, %v2991_v0  ;;  %v3164_v40 = vrot.slane %v3160_v42, 4  ;;  %v3173_v45 = vrot.slane %v3169_v32, 6  ;;  %v11053_v43 = vld [vmem:[#allocation174_spill] sm:$0xff]  ;;  %v11059_v32 = vld [vmem:[#allocation177_spill] sm:$0xff] }
 0x43c   :  { %v11050_v38 = vrot.slane %v8313_v52, 2  ;;  %v11051_v23 = vrot.slane %v8318_v15, 2  ;;  %v3167_v56 = vadd.f32 %v3163_v37, %v3157_v41  ;;  %v3183_v46 = vmul.f32 %v7644_v31, %v11052_v59 }
 0x43d   :  { %v3168_v35 = vadd.f32 %v3164_v40, %v3158_v63  ;;  %v3174_v55 = vrot.slane %v3170_v29, 6  ;;  %v3179_v51 = vmul.f32 %v7644_v31, %v11053_v43  ;;  %v3184_v28 = vmul.f32 %v7647_v30, %v11052_v59  ;;  %v11139_v59 = vld [vmem:[#allocation61_spill] sm:$0xff] }
 0x43e   :  { %v3004_v9 = vadd.f32 %v11050_v38, %v2994_v11  ;;  %v3005_v53 = vadd.f32 %v11051_v23, %v2995_v17  ;;  %v11054_v58 = vrot.slane %v8322_v16, 4  ;;  %v11055_v52 = vrot.slane %v8326_v39, 4  ;;  %v11060_v23 = vld [vmem:[#allocation179_spill] sm:$0xff] }
 0x43f   :  { %v3177_v15 = vadd.f32 %v3173_v45, %v3167_v56  ;;  %v3193_v14 = vmul.f32 %v7644_v31, %v11056_v13  ;;  %v3178_v42 = vadd.f32 %v3174_v55, %v3168_v35  ;;  %v3180_v57 = vmul.f32 %v7647_v30, %v11053_v43 }
 0x440   :  { %v3014_v60 = vadd.f32 %v11054_v58, %v3004_v9  ;;  %v3015_v3 = vadd.f32 %v11055_v52, %v3005_v53  ;;  %v3187_v36 = vrot.slane %v3183_v46, 2  ;;  %v3194_v12 = vmul.f32 %v7647_v30, %v11056_v13  ;;  %v11064_v52 = vld [vmem:[#allocation180_spill] sm:$0xff] }
 0x441   :  { %v11057_v0 = vrot.slane %v8334_v20, 6  ;;  %v11058_v16 = vrot.slane %v8338_v5, 6  ;;  %v3181_v39 = vadd.f32 %v3179_v51, %v3177_v15  ;;  %v3203_v29 = vmul.f32 %v7644_v31, %v11059_v32  ;;  %v11063_v51 = vld [vmem:[#allocation178_spill] sm:$0xff] }
 0x442   :  { %v3054_v11 = vrot.slane %v8387_v7, 6  ;;  %v3182_v17 = vadd.f32 %v3180_v57, %v3178_v42  ;;  %v3188_v41 = vrot.slane %v3184_v28, 2  ;;  %v3204_v37 = vmul.f32 %v7647_v30, %v11059_v32 }
 0x443   :  { %v3024_v47 = vadd.f32 %v11057_v0, %v3014_v60  ;;  %v3025_v19 = vadd.f32 %v11058_v16, %v3015_v3  ;;  %v3191_v20 = vadd.f32 %v3187_v36, %v3181_v39  ;;  %v3197_v45 = vrot.slane %v3193_v14, 4 }
 0x444   :  { %v3055_v38 = vrot.slane %v3051_v50, 6  ;;  %v3192_v5 = vadd.f32 %v3188_v41, %v3182_v17  ;;  %v3198_v9 = vrot.slane %v3194_v12, 4  ;;  %v3217_v53 = vmul.f32 %v7677_v22, %v11060_v23  ;;  %v11065_v12 = vld [vmem:[#allocation181_spill] sm:$0xff] }
 0x445   :  { %v3028_v63 = vadd.f32 %v8370_v21, %v3024_v47  ;;  %v3029_v40 = vadd.f32 %v8374_v26, %v3025_v19  ;;  %v11061_v31 = vrot.slane %v8360_v1, 2  ;;  %v11062_v56 = vrot.slane %v8364_v8, 2 }
 0x446   :  { %v3201_v35 = vadd.f32 %v3197_v45, %v3191_v20  ;;  %v3207_v30 = vrot.slane %v3203_v29, 6  ;;  %v3202_v55 = vadd.f32 %v3198_v9, %v3192_v5  ;;  %v3208_v21 = vrot.slane %v3204_v37, 6 }
 0x447   :  { %v3038_v7 = vadd.f32 %v11061_v31, %v3028_v63  ;;  %v3039_v46 = vadd.f32 %v11062_v56, %v3029_v40  ;;  %v3213_v26 = vmul.f32 %v7677_v22, %v11063_v51  ;;  %v3218_v50 = vmul.f32 %v7686_v54, %v11060_v23  ;;  %v11066_v40 = vld [vmem:[#allocation182_spill] sm:$0xff] }
 0x448   :  { %v3211_v60 = vadd.f32 %v3207_v30, %v3201_v35  ;;  %v3227_v1 = vmul.f32 %v7677_v22, %v11064_v52  ;;  %v3212_v3 = vadd.f32 %v3208_v21, %v3202_v55  ;;  %v3214_v8 = vmul.f32 %v7686_v54, %v11063_v51  ;;  %v11131_v23 = vld [vmem:[#allocation37_spill] sm:$0xff] }
 0x449   :  { %v3048_v28 = vadd.f32 %v3044_v6, %v3038_v7  ;;  %v3049_v58 = vadd.f32 %v3045_v25, %v3039_v46  ;;  %v3221_v15 = vrot.slane %v3217_v53, 2  ;;  %v3228_v14 = vmul.f32 %v7686_v54, %v11064_v52  ;;  %v11069_v53 = vld [vmem:[#allocation183_spill] sm:$0xff]  ;;  %v11070_v7 = vld [vmem:[#allocation184_spill] sm:$0xff] }
 0x44a   :  { %v3215_v36 = vadd.f32 %v3213_v26, %v3211_v60  ;;  %v3237_v6 = vmul.f32 %v7677_v22, %v11065_v12  ;;  %v3216_v25 = vadd.f32 %v3214_v8, %v3212_v3  ;;  %v3222_v0 = vrot.slane %v3218_v50, 2  ;;  %v11067_v22 = vld [vmem:[#allocation65_spill] sm:$0xff]  ;;  %v11071_v26 = vld [vmem:[#allocation185_spill] sm:$0xff] }
 0x44b   :  { %v8493_v42 = vadd.f32 %v3054_v11, %v3048_v28  ;;  %v8495_v57 = vadd.f32 %v3055_v38, %v3049_v58  ;;  %v3238_v47 = vmul.f32 %v7686_v54, %v11065_v12  ;;  %v3231_v29 = vrot.slane %v3227_v1, 4  ;;  %v11068_v54 = vld [vmem:[#allocation68_spill] sm:$0xff] }
 0x44c   :  { %v3225_v39 = vadd.f32 %v3221_v15, %v3215_v36  ;;  %v3226_v17 = vadd.f32 %v3222_v0, %v3216_v25  ;;  %v3232_v41 = vrot.slane %v3228_v14, 4  ;;  %v3241_v63 = vrot.slane %v3237_v6, 6  ;;  %v11072_v6 = vld [vmem:[#allocation186_spill] sm:$0xff] }
 0x44d   :  { %v3060_v16 = vsel %vm753_vm8, %v8493_v42, 0.0  ;;  %v3061_v19 = vsel %vm753_vm8, %v8495_v57, 0.0  ;;  %v3251_v20 = vmul.f32 %v11067_v22, %v11066_v40  ;;  %v3242_v38 = vrot.slane %v3238_v47, 6 }
 0x44e   :  { %v3062_v11 = vadd.f32 %v3061_v19, %v3060_v16  ;;  %v3235_v37 = vadd.f32 %v3231_v29, %v3225_v39  ;;  %v3236_v45 = vadd.f32 %v3232_v41, %v3226_v17  ;;  %v3252_v5 = vmul.f32 %v11068_v54, %v11066_v40  ;;  %v11073_v39 = vld [vmem:[#allocation187_spill] sm:$0xff] }
 0x44f   :  { %v3247_v31 = vmul.f32 %v11067_v22, %v11069_v53  ;;  %v3261_v56 = vmul.f32 %v11067_v22, %v11070_v7  ;;  %v3248_v35 = vmul.f32 %v11068_v54, %v11069_v53  ;;  %v3262_v30 = vmul.f32 %v11068_v54, %v11070_v7  ;;  %v11132_v7 = vld [vmem:[#allocation39_spill] sm:$0xff] }
 0x450   :  { %3063 = vadd.xlane.f32.xlu1 %v3062_v11  ;;  %v3245_v9 = vadd.f32 %v3241_v63, %v3235_v37  ;;  %v3246_v46 = vadd.f32 %v3242_v38, %v3236_v45  ;;  %v3255_v21 = vrot.slane %v3251_v20, 2  ;;  %v3271_v50 = vmul.f32 %v11067_v22, %v11071_v26  ;;  %v11074_v11 = vld [vmem:[#allocation188_spill] sm:$0xff]  ;;  %v11075_v45 = vld [vmem:[#allocation189_spill] sm:$0xff] }
 0x451   :  { %v3256_v58 = vrot.slane %v3252_v5, 2  ;;  %v3272_v60 = vmul.f32 %v11068_v54, %v11071_v26  ;;  %v3265_v3 = vrot.slane %v3261_v56, 4  ;;  %v3266_v15 = vrot.slane %v3262_v30, 4 }
 0x452   :  { %v3249_v55 = vadd.f32 %v3247_v31, %v3245_v9  ;;  %v3250_v28 = vadd.f32 %v3248_v35, %v3246_v46  ;;  %v3275_v36 = vrot.slane %v3271_v50, 6  ;;  %v3285_v25 = vmul.f32 %v7694_v2, %v11072_v6  ;;  %v11076_v50 = vld [vmem:[#allocation190_spill] sm:$0xff] }
 0x453   :  { %v3276_v47 = vrot.slane %v3272_v60, 6  ;;  %v3286_v16 = vmul.f32 %v7699_v34, %v11072_v6  ;;  %v3281_v29 = vmul.f32 %v7694_v2, %v11073_v39  ;;  %v3295_v17 = vmul.f32 %v7694_v2, %v11074_v11  ;;  %v11130_v6 = vld [vmem:[#allocation79_spill] sm:$0xff] }
 0x454   :  { %v3259_v1 = vadd.f32 %v3255_v21, %v3249_v55  ;;  %v3260_v8 = vadd.f32 %v3256_v58, %v3250_v28  ;;  %v3282_v37 = vmul.f32 %v7699_v34, %v11073_v39  ;;  %v3296_v63 = vmul.f32 %v7699_v34, %v11074_v11  ;;  %v11129_v11 = vld [vmem:[#allocation48_spill] sm:$0xff] }
 0x455   :  { %v3289_v20 = vrot.slane %v3285_v25, 2  ;;  %v3305_v38 = vmul.f32 %v7694_v2, %v11075_v45  ;;  %v3306_v54 = vmul.f32 %v7699_v34, %v11075_v45  ;;  %v3290_v9 = vrot.slane %v3286_v16, 2 }
 0x456   :  { %v3269_v14 = vadd.f32 %v3265_v3, %v3259_v1  ;;  %v3270_v0 = vadd.f32 %v3266_v15, %v3260_v8  ;;  %v3299_v56 = vrot.slane %v3295_v17, 4  ;;  %v3300_v35 = vrot.slane %v3296_v63, 4  ;;  %v11077_v3 = vld [vmem:[#allocation191_spill] sm:$0xff]  ;;  %v11079_v17 = vld [vmem:[#allocation193_spill] sm:$0xff] }
 0x457   :  { %v3309_v55 = vrot.slane %v3305_v38, 6  ;;  %v3310_v21 = vrot.slane %v3306_v54, 6  ;;  %v3319_v28 = vmul.f32 %v7724_v49, %v11076_v50  ;;  %v3320_v60 = vmul.f32 %v7727_v27, %v11076_v50 }
 0x458   :  { %v3279_v19 = vadd.f32 %v3275_v36, %v3269_v14  ;;  %v3280_v41 = vadd.f32 %v3276_v47, %v3270_v0  ;;  %v3073_v2 = vmul.f32 %v8493_v42, %v8493_v42  ;;  %v3074_v34 = vmul.f32 %v8495_v57, %v8495_v57  ;;  %v11078_v14 = vld [vmem:[#allocation192_spill] sm:$0xff] }
 0x459   :  { %v3315_v8 = vmul.f32 %v7724_v49, %v11077_v3  ;;  %v3316_v15 = vmul.f32 %v7727_v27, %v11077_v3  ;;  %v3329_v36 = vmul.f32 %v7724_v49, %v11078_v14  ;;  %v3330_v0 = vmul.f32 %v7727_v27, %v11078_v14 }
 0x45a   :  { %v3283_v22 = vadd.f32 %v3281_v29, %v3279_v19  ;;  %v3284_v5 = vadd.f32 %v3282_v37, %v3280_v41  ;;  %v3075_v47 = vsel %vm753_vm8, %v3073_v2, 0.0  ;;  %v3076_v16 = vsel %vm753_vm8, %v3074_v34, 0.0 }
 0x45b   :  { %v3323_v29 = vrot.slane %v3319_v28, 2  ;;  %v3339_v41 = vmul.f32 %v7724_v49, %v11079_v17  ;;  %v3077_v37 = vadd.f32 %v3076_v16, %v3075_v47  ;;  %v3333_v54 = vrot.slane %v3329_v36, 4  ;;  %v11081_v49 = vld [vmem:[#allocation218_spill] sm:$0xff] }
 0x45c   :  { %v3293_v31 = vadd.f32 %v3289_v20, %v3283_v22  ;;  %v3294_v46 = vadd.f32 %v3290_v9, %v3284_v5  ;;  %v3324_v22 = vrot.slane %v3320_v60, 2  ;;  %v3340_v20 = vmul.f32 %v7727_v27, %v11079_v17  ;;  %v11083_v27 = vld [vmem:[#allocation196_spill] sm:$0xff] }
 0x45d   :  { %3078 = vadd.xlane.f32.xlu0 %v3077_v37  ;;  %v3334_v9 = vrot.slane %v3330_v0, 4  ;;  %v3363_v2 = vmul.f32 %v10967_v10, %v11083_v27 }
 0x45e   :  { %v3303_v30 = vadd.f32 %v3299_v56, %v3293_v31  ;;  %v3304_v58 = vadd.f32 %v3300_v35, %v3294_v46  ;;  %v3343_v56 = vrot.slane %v3339_v41, 6  ;;  %v11080_v46 = vld [vmem:[#allocation194_spill] sm:$0xff] }
 0x45f   :  { %v3353_v35 = vmul.f32 %v10967_v10, %v11080_v46  ;;  %v3367_v41 = vrot.slane %v3363_v2, 4 }
 0x460   :  { %v3313_v1 = vadd.f32 %v3309_v55, %v3303_v30  ;;  %v3314_v25 = vadd.f32 %v3310_v21, %v3304_v58  ;;  %v3344_v55 = vrot.slane %v3340_v20, 6  ;;  %v3354_v21 = vmul.f32 %v11081_v49, %v11080_v46  ;;  %v11082_v58 = vld [vmem:[#allocation195_spill] sm:$0xff] }
 0x461   :  { %v3349_v60 = vmul.f32 %v10967_v10, %v11082_v58  ;;  %v3357_v36 = vrot.slane %v3353_v35, 2  ;;  %v11087_v35 = vld [vmem:[#allocation199_spill] sm:$0xff] }
 0x462   :  { %v3317_v19 = vadd.f32 %v3315_v8, %v3313_v1  ;;  %v3318_v63 = vadd.f32 %v3316_v15, %v3314_v25  ;;  %v3350_v1 = vmul.f32 %v11081_v49, %v11082_v58  ;;  %v3364_v8 = vmul.f32 %v11081_v49, %v11083_v27  ;;  %v11084_v25 = vld [vmem:[#allocation197_spill] sm:$0xff] }
 0x463   :  { %v3373_v0 = vmul.f32 %v10967_v10, %v11084_v25  ;;  %v3358_v16 = vrot.slane %v3354_v21, 2  ;;  %v11119_v27 = vld [vmem:[#allocation36_spill] sm:$0xff] }
 0x464   :  { %v3327_v38 = vadd.f32 %v3323_v29, %v3317_v19  ;;  %v3328_v5 = vadd.f32 %v3324_v22, %v3318_v63  ;;  %v3374_v19 = vmul.f32 %v11081_v49, %v11084_v25  ;;  %v3368_v63 = vrot.slane %v3364_v8, 4 }
 0x465   :  { %v3377_v20 = vrot.slane %v3373_v0, 6 }
 0x466   :  { %v3337_v31 = vadd.f32 %v3333_v54, %v3327_v38  ;;  %v3338_v30 = vadd.f32 %v3334_v9, %v3328_v5  ;;  %v11085_v38 = vld [vmem:[#allocation198_spill] sm:$0xff]  ;;  %v11086_v54 = vld [vmem:[#allocation219_spill] sm:$0xff] }
 0x467   :  { %v3387_v5 = vmul.f32 %v11086_v54, %v11085_v38 }
 0x468   :  { %v3347_v28 = vadd.f32 %v3343_v56, %v3337_v31  ;;  %v3348_v34 = vadd.f32 %v3344_v55, %v3338_v30  ;;  %v3378_v31 = vrot.slane %v3374_v19, 6  ;;  %v3388_v56 = vmul.f32 %v10975_v48, %v11085_v38  ;;  %v11088_v55 = vld [vmem:[#allocation200_spill] sm:$0xff] }
 0x469   :  { %v3383_v30 = vmul.f32 %v11086_v54, %v11087_v35  ;;  %v3397_v49 = vmul.f32 %v11086_v54, %v11088_v55  ;;  %v11117_v38 = vld [vmem:[#allocation35_spill] sm:$0xff] }
 0x46a   :  { %v3351_v15 = vadd.f32 %v3349_v60, %v3347_v28  ;;  %v3352_v47 = vadd.f32 %v3350_v1, %v3348_v34  ;;  %v3384_v28 = vmul.f32 %v10975_v48, %v11087_v35  ;;  %v3398_v60 = vmul.f32 %v10975_v48, %v11088_v55  ;;  %v11089_v1 = vld [vmem:[#allocation201_spill] sm:$0xff] }
 0x46b   :  { %v3391_v34 = vrot.slane %v3387_v5, 2  ;;  %v3407_v8 = vmul.f32 %v11086_v54, %v11089_v1  ;;  %v3408_v0 = vmul.f32 %v10975_v48, %v11089_v1 }
 0x46c   :  { %v3361_v29 = vadd.f32 %v3357_v36, %v3351_v15  ;;  %v3362_v37 = vadd.f32 %v3358_v16, %v3352_v47  ;;  %v3392_v36 = vrot.slane %v3388_v56, 2  ;;  %v3401_v16 = vrot.slane %v3397_v49, 4 }
 0x46e   :  { %v3371_v22 = vadd.f32 %v3367_v41, %v3361_v29  ;;  %v3372_v9 = vadd.f32 %v3368_v63, %v3362_v37  ;;  %v3402_v29 = vrot.slane %v3398_v60, 4  ;;  %v3411_v37 = vrot.slane %v3407_v8, 6 }
 0x470   :  { %v3381_v10 = vadd.f32 %v3377_v20, %v3371_v22  ;;  %v3382_v21 = vadd.f32 %v3378_v31, %v3372_v9  ;;  %v3412_v22 = vrot.slane %v3408_v0, 6 }
 0x472   :  { %v3385_v2 = vadd.f32 %v3383_v30, %v3381_v10  ;;  %v3386_v15 = vadd.f32 %v3384_v28, %v3382_v21 }
 0x474   :  { %v3395_v47 = vadd.f32 %v3391_v34, %v3385_v2  ;;  %v3396_v19 = vadd.f32 %v3392_v36, %v3386_v15 }
 0x476   :  { %v3405_v41 = vadd.f32 %v3401_v16, %v3395_v47  ;;  %v3406_v63 = vadd.f32 %v3402_v29, %v3396_v19 }
 0x478   :  { %v8591_v20 = vadd.f32 %v3411_v37, %v3405_v41  ;;  %v8593_v9 = vadd.f32 %v3412_v22, %v3406_v63 }
 0x47a   :  { %v3417_v54 = vsel %vm753_vm8, %v8591_v20, 0.0  ;;  %v3430_v5 = vmul.f32 %v8591_v20, %v8591_v20  ;;  %v3418_v48 = vsel %vm753_vm8, %v8593_v9, 0.0  ;;  %v3431_v31 = vmul.f32 %v8593_v9, %v8593_v9 }
 0x47b   :  { %v3419_v56 = vadd.f32 %v3418_v48, %v3417_v54  ;;  %v2356_v21 = vpop.xlane.xlu0 %2355 }
 0x47c   :  { %v3432_v10 = vsel %vm753_vm8, %v3430_v5, 0.0  ;;  %v3433_v30 = vsel %vm753_vm8, %v3431_v31, 0.0  ;;  %v2357_v60 = vrot.slane %v2356_v21, 4 }
 0x47d   :  { %3420 = vadd.xlane.f32.xlu1 %v3419_v56  ;;  %v3434_v49 = vadd.f32 %v3433_v30, %v3432_v10  ;;  %v2371_v28 = vpop.xlane.xlu1 %2370 }
 0x47e   :  { %v2372_v2 = vrot.slane %v2371_v28, 4  ;;  %v2358_v34 = vadd.f32 %v2357_v60, %v2356_v21 }
 0x47f   :  { %3435 = vadd.xlane.f32.xlu0 %v3434_v49 }
 0x480   :  { %v2373_v8 = vadd.f32 %v2372_v2, %v2371_v28  ;;  %v2359_v15 = vrot.slane %v2358_v34, 2 }
 0x482   :  { %v2374_v36 = vrot.slane %v2373_v8, 2  ;;  %v2360_v0 = vadd.f32 %v2359_v15, %v2358_v34 }
 0x484   :  { %v2375_v47 = vadd.f32 %v2374_v36, %v2373_v8  ;;  %v2361_v16 = vrot.slane %v2360_v0, 1 }
 0x486   :  { %v2376_v19 = vrot.slane %v2375_v47, 1  ;;  %v2362_v29 = vadd.f32 %v2361_v16, %v2360_v0 }
 0x488   :  { %v2377_v41 = vadd.f32 %v2376_v19, %v2375_v47  ;;  %5152 = vpush %v2362_v29  ;;  %v11090_v19 = vld [vmem:[#allocation221_spill] sm:$0xff] }
 0x48a   :  { %5154 = vpush %v2377_v41  ;;  %v11091_v41 = vld [vmem:[#allocation222_spill] sm:$0xff] }
 0x4a9   :  { %v2707_v37 = vpop.xlane.xlu0 %2706 }
 0x4aa   :  { %v2708_v22 = vrot.slane %v2707_v37, 4 }
 0x4ac   :  { %v2709_v5 = vadd.f32 %v2708_v22, %v2707_v37 }
 0x4ae   :  { %v2710_v31 = vrot.slane %v2709_v5, 2 }
 0x4b0   :  { %v2711_v30 = vadd.f32 %v2710_v31, %v2709_v5 }
 0x4b2   :  { %v2712_v21 = vrot.slane %v2711_v30, 1 }
 0x4b4   :  { %v2713_v2 = vadd.f32 %v2712_v21, %v2711_v30 }
 0x4b9   :  { %s5153_s24 = spop %5152 }
 0x4ba   :  { %s8605_s14 = smul.f32 0.001953125, %s5153_s24 }
 0x4bb   :  { %s5155_s29 = spop %5154 }
 0x4bc   :  { %s2379_s25 = smul.f32 0.001953125, %s5155_s29 }
 0x4bd   :  { %s2380_s30 = smul.f32 %s8605_s14, %s8605_s14 }
 0x4be   :  { %v2722_v63 = vpop.xlane.xlu0 %2721 }
 0x4bf   :  { %v2723_v54 = vrot.slane %v2722_v63, 4  ;;  %s2381_s12 = ssub.f32 %s2379_s25, %s2380_s30 }
 0x4c1   :  { %v2724_v48 = vadd.f32 %v2723_v54, %v2722_v63  ;;  %s2382_s28 = sadd.f32 1e-05, %s2381_s12 }
 0x4c3   :  { %v2725_v56 = vrot.slane %v2724_v48, 2  ;;  %v2383_v10 = vstv %s2382_s28 }
 0x4c4   :  { %5223 = vrsqrt.f32 %v2383_v10 }
 0x4c5   :  { %v2726_v49 = vadd.f32 %v2725_v56, %v2724_v48 }
 0x4c7   :  { %v2727_v28 = vrot.slane %v2726_v49, 1 }
 0x4c9   :  { %v2728_v34 = vadd.f32 %v2727_v28, %v2726_v49 }
 0x4ce   :  { %v5224_v60 = vpop.eup %5223 }
 0x4cf   :  { %5156 = vpush %v5224_v60 }
 0x4d0   :  { %5158 = vpush %v2713_v2 }
 0x4d1   :  { %5160 = vpush %v2728_v34 }
 0x4dd   :  { %v3064_v8 = vpop.xlane.xlu1 %3063 }
 0x4de   :  { %v3065_v36 = vrot.slane %v3064_v8, 4 }
 0x4e0   :  { %v3066_v16 = vadd.f32 %v3065_v36, %v3064_v8 }
 0x4e2   :  { %v3067_v48 = vrot.slane %v3066_v16, 2 }
 0x4e4   :  { %v3068_v49 = vadd.f32 %v3067_v48, %v3066_v16 }
 0x4e6   :  { %v3069_v28 = vrot.slane %v3068_v49, 1 }
 0x4e8   :  { %v3070_v34 = vadd.f32 %v3069_v28, %v3068_v49 }
 0x4ea   :  { %v3079_v15 = vpop.xlane.xlu0 %3078 }
 0x4eb   :  { %v3080_v0 = vrot.slane %v3079_v15, 4 }
 0x4ed   :  { %v3081_v63 = vadd.f32 %v3080_v0, %v3079_v15 }
 0x4ef   :  { %v3082_v10 = vrot.slane %v3081_v63, 2 }
 0x4f1   :  { %v3083_v21 = vadd.f32 %v3082_v10, %v3081_v63 }
 0x4f3   :  { %v3084_v60 = vrot.slane %v3083_v21, 1 }
 0x4f5   :  { %v3085_v8 = vadd.f32 %v3084_v60, %v3083_v21 }
 0x500   :  { %s5157_s9 = spop %5156 }
 0x501   :  { %s2386_s4 = smul.f32 %s5157_s9, %s7377_s11  ;;  %s5159_s10 = spop %5158 }
 0x502   :  { %s8610_s1 = smul.f32 0.001953125, %s5159_s10  ;;  %s5161_s19 = spop %5160 }
 0x503   :  { %s2387_s7 = smul.f32 %s2386_s4, %s8605_s14  ;;  %v2389_v47 = vstv %s2386_s4 }
 0x504   :  { %s2731_s2 = smul.f32 %s8610_s1, %s8610_s1  ;;  %v2390_v29 = vmul.f32 %v2389_v47, %v11090_v19  ;;  %v2391_v37 = vmul.f32 %v2389_v47, %v11091_v41 }
 0x505   :  { %s2388_s22 = ssub.f32 %s7379_s13, %s2387_s7  ;;  %s2730_s24 = smul.f32 0.001953125, %s5161_s19 }
 0x507   :  { %v2392_v22 = vstv %s2388_s22  ;;  %s2732_s29 = ssub.f32 %s2730_s24, %s2731_s2 }
 0x508   :  { %v2393_v54 = vadd.f32 %v2392_v22, %v2390_v29  ;;  %v2394_v5 = vadd.f32 %v2392_v22, %v2391_v37  ;;  %v11092_v29 = vld [vmem:[#allocation202_spill] sm:$0xff]  ;;  %v11093_v37 = vld [vmem:[#allocation203_spill] sm:$0xff] }
 0x509   :  { %s2733_s25 = sadd.f32 1e-05, %s2732_s29 }
 0x50a   :  { %v2395_v31 = vmax.f32 %v2393_v54, 0.0  ;;  %v2396_v56 = vmax.f32 %v2394_v5, 0.0  ;;  %v3421_v15 = vpop.xlane.xlu1 %3420 }
 0x50b   :  { %v2734_v30 = vstv %s2733_s25  ;;  %v3422_v0 = vrot.slane %v3421_v15, 4 }
 0x50c   :  { %2397 = vst [vmem:[#allocation13] sm:$0x3] %v2395_v31  ;;  %2398 = vst [vmem:[#allocation13 + $0x8] sm:$0x3] %v2396_v56  ;;  %5225 = vrsqrt.f32 %v2734_v30  ;;  %v3436_v36 = vpop.xlane.xlu0 %3435 }
 0x50d   :  { %v3437_v47 = vrot.slane %v3436_v36, 4  ;;  %v3423_v19 = vadd.f32 %v3422_v0, %v3421_v15 }
 0x50f   :  { %v3438_v22 = vadd.f32 %v3437_v47, %v3436_v36  ;;  %v3424_v31 = vrot.slane %v3423_v19, 2 }
 0x511   :  { %v3439_v30 = vrot.slane %v3438_v22, 2  ;;  %v3425_v60 = vadd.f32 %v3424_v31, %v3423_v19 }
 0x516   :  { %v5226_v2 = vpop.eup %5225 }
 0x517   :  { %5162 = vpush %v5226_v2  ;;  %v3440_v2 = vadd.f32 %v3439_v30, %v3438_v22 }
 0x518   :  { %5164 = vpush %v3070_v34  ;;  %v3426_v34 = vrot.slane %v3425_v60, 1 }
 0x519   :  { %5166 = vpush %v3085_v8  ;;  %v3441_v8 = vrot.slane %v3440_v2, 1 }
 0x51a   :  { %v3427_v36 = vadd.f32 %v3426_v34, %v3425_v60 }
 0x51b   :  { %v3442_v0 = vadd.f32 %v3441_v8, %v3440_v2 }
 0x548   :  { %s5163_s14 = spop %5162 }
 0x549   :  { %s2737_s30 = smul.f32 %s5163_s14, %s7390_s23  ;;  %s5165_s12 = spop %5164 }
 0x54a   :  { %s8619_s28 = smul.f32 0.001953125, %s5165_s12  ;;  %s5167_s9 = spop %5166 }
 0x54b   :  { %s2738_s4 = smul.f32 %s2737_s30, %s8610_s1  ;;  %v2740_v16 = vstv %s2737_s30 }
 0x54c   :  { %s3088_s10 = smul.f32 %s8619_s28, %s8619_s28  ;;  %v2741_v41 = vmul.f32 %v2740_v16, %v11092_v29  ;;  %v2742_v63 = vmul.f32 %v2740_v16, %v11093_v37 }
 0x54d   :  { %s2739_s19 = ssub.f32 %s7392_s21, %s2738_s4  ;;  %s3087_s7 = smul.f32 0.001953125, %s5167_s9 }
 0x54f   :  { %v2743_v54 = vstv %s2739_s19  ;;  %s3089_s2 = ssub.f32 %s3087_s7, %s3088_s10 }
 0x550   :  { %v2744_v5 = vadd.f32 %v2743_v54, %v2741_v41  ;;  %v2745_v48 = vadd.f32 %v2743_v54, %v2742_v63 }
 0x551   :  { %s3090_s22 = sadd.f32 1e-05, %s3089_s2 }
 0x552   :  { %v2746_v56 = vmax.f32 %v2744_v5, 0.0  ;;  %v2747_v10 = vmax.f32 %v2745_v48, 0.0 }
 0x553   :  { %v3091_v49 = vstv %s3090_s22 }
 0x554   :  { %v2750_v21 = vrot.slane %v2746_v56, 6  ;;  %v2751_v28 = vrot.slane %v2747_v10, 6  ;;  %5227 = vrsqrt.f32 %v3091_v49 }
 0x556   :  { %2754 = vst [vmem:[#allocation13] sm:$0xc] %v2750_v21  ;;  %2755 = vst [vmem:[#allocation13 + $0x8] sm:$0xc] %v2751_v28 }
 0x55e   :  { %v5228_v15 = vpop.eup %5227 }
 0x55f   :  { %5168 = vpush %v5228_v15  ;;  %v5243_v15 = vld [vmem:[#allocation11] sm:$0xff] }
 0x560   :  { %5170 = vpush %v3427_v36 }
 0x561   :  { %5172 = vpush %v3442_v0  ;;  %v5244_v0 = vld [vmem:[#allocation11 + $0x8] sm:$0xff] }
 0x590   :  { %s5169_s1 = spop %5168 }
 0x591   :  { %s3094_s24 = smul.f32 %s5169_s1, %s7403_s17  ;;  %s5171_s29 = spop %5170 }
 0x592   :  { %s8628_s25 = smul.f32 0.001953125, %s5171_s29  ;;  %s5173_s14 = spop %5172 }
 0x593   :  { %s3095_s30 = smul.f32 %s3094_s24, %s8619_s28  ;;  %v3097_v47 = vstv %s3094_s24 }
 0x594   :  { %s3445_s12 = smul.f32 %s8628_s25, %s8628_s25  ;;  %v3098_v16 = vmul.f32 %v3097_v47, %v8493_v42  ;;  %v3099_v19 = vmul.f32 %v3097_v47, %v8495_v57 }
 0x595   :  { %s3096_s9 = ssub.f32 %s7405_s20, %s3095_s30  ;;  %s3444_s4 = smul.f32 0.001953125, %s5173_s14 }
 0x597   :  { %v3100_v29 = vstv %s3096_s9  ;;  %s3446_s10 = ssub.f32 %s3444_s4, %s3445_s12 }
 0x598   :  { %v3101_v41 = vadd.f32 %v3100_v29, %v3098_v16  ;;  %v3102_v37 = vadd.f32 %v3100_v29, %v3099_v19  ;;  %v11097_v19 = vld [vmem:[#allocation54_spill] sm:$0xff] }
 0x599   :  { %s3447_s19 = sadd.f32 1e-05, %s3446_s10 }
 0x59a   :  { %v3103_v63 = vmax.f32 %v3101_v41, 0.0  ;;  %v3104_v22 = vmax.f32 %v3102_v37, 0.0  ;;  %v11098_v37 = vld [vmem:[#allocation58_spill] sm:$0xff] }
 0x59b   :  { %v3448_v54 = vstv %s3447_s19 }
 0x59c   :  { %v3107_v5 = vrot.slane %v3103_v63, 4  ;;  %v3108_v48 = vrot.slane %v3104_v22, 4  ;;  %5229 = vrsqrt.f32 %v3448_v54  ;;  %v11099_v22 = vld [vmem:[#allocation67_spill] sm:$0xff] }
 0x59e   :  { %3111 = vst [vmem:[#allocation13] sm:$0x30] %v3107_v5  ;;  %3112 = vst [vmem:[#allocation13 + $0x8] sm:$0x30] %v3108_v48  ;;  %v11100_v48 = vld [vmem:[#allocation99_spill] sm:$0xff] }
 0x5a6   :  { %v5230_v31 = vpop.eup %5229 }
 0x5a7   :  { %5174 = vpush %v5230_v31 }
 0x5d8   :  { %s5175_s28 = spop %5174 }
 0x5d9   :  { %s3451_s7 = smul.f32 %s5175_s28, %s7416_s0 }
 0x5db   :  { %s3452_s2 = smul.f32 %s3451_s7, %s8628_s25  ;;  %v3454_v42 = vstv %s3451_s7 }
 0x5dc   :  { %v3455_v57 = vmul.f32 %v3454_v42, %v8591_v20  ;;  %v3456_v56 = vmul.f32 %v3454_v42, %v8593_v9  ;;  %v11096_v20 = vld [vmem:[#allocation50_spill] sm:$0xff] }
 0x5dd   :  { %s3453_s22 = ssub.f32 %s7418_s18, %s3452_s2 }
 0x5df   :  { %v3457_v10 = vstv %s3453_s22 }
 0x5e0   :  { %v3458_v30 = vadd.f32 %v3457_v10, %v3455_v57  ;;  %v3459_v49 = vadd.f32 %v3457_v10, %v3456_v56  ;;  %v11127_v10 = vld [vmem:[#allocation53_spill] sm:$0xff] }
 0x5e2   :  { %v3460_v21 = vmax.f32 %v3458_v30, 0.0  ;;  %v3461_v28 = vmax.f32 %v3459_v49, 0.0  ;;  %v11102_v30 = vld [vmem:[#allocation100_spill] sm:$0xff] }
 0x5e4   :  { %v3464_v60 = vrot.slane %v3460_v21, 2  ;;  %v3465_v2 = vrot.slane %v3461_v28, 2  ;;  %v11104_v28 = vld [vmem:[#allocation108_spill] sm:$0xff] }
 0x5e6   :  { %3468 = vst [vmem:[#allocation13] sm:$0xc0] %v3464_v60  ;;  %3469 = vst [vmem:[#allocation13 + $0x8] sm:$0xc0] %v3465_v2 }
 0x5ed   :  { %v3470_v34 = vld [vmem:[#allocation13] sm:$0xff]  ;;  %v3471_v8 = vld [vmem:[#allocation13 + $0x8] sm:$0xff] }
 0x5ee   :  { %v8641_v36 = vadd.f32 %v5243_v15, %v3470_v34  ;;  %v8643_v47 = vadd.f32 %v5244_v0, %v3471_v8  ;;  %v11106_v34 = vld [vmem:[#allocation104_spill] sm:$0xff] }
 0x5f0   :  { %11094 = vst [vmem:[#allocation204_spill] sm:$0xff] %v8641_v36  ;;  %11095 = vst [vmem:[#allocation205_spill] sm:$0xff] %v8643_v47  ;;  %3476 = vrot.lane.b32.xlu0 %v8643_v47, %s10824_s15  ;;  %3474 = vrot.lane.b32.xlu1 %v8641_v36, %s10824_s15  ;;  %v8679_v9 = vmul.f32 %v8641_v36, %v11096_v20  ;;  %v8683_v16 = vmul.f32 %v8643_v47, %v11096_v20 }
 0x5f1   :  { %v8687_v29 = vmul.f32 %v8641_v36, %v11097_v19  ;;  %v8691_v41 = vmul.f32 %v8643_v47, %v11097_v19  ;;  %v8695_v63 = vmul.f32 %v8641_v36, %v11098_v37  ;;  %v8699_v54 = vmul.f32 %v8641_v36, %v11099_v22 }
 0x5f2   :  { %v8703_v5 = vmul.f32 %v8643_v47, %v11098_v37  ;;  %v8707_v31 = vmul.f32 %v8641_v36, %v11100_v48  ;;  %v8711_v42 = vmul.f32 %v8643_v47, %v11100_v48  ;;  %v8715_v57 = vmul.f32 %v8643_v47, %v11099_v22  ;;  %v11114_v37 = vld [vmem:[#allocation69_spill] sm:$0xff]  ;;  %v11162_v48 = vld [vmem:[#allocation59_spill] sm:$0xff] }
 0x5f3   :  { %v8721_v49 = vmul.f32 %v8641_v36, %v11102_v30  ;;  %v8726_v60 = vmul.f32 %v8641_v36, %v11104_v28  ;;  %v8730_v2 = vmul.f32 %v8643_v47, %v11102_v30  ;;  %v8734_v8 = vmul.f32 %v8641_v36, %v11106_v34  ;;  %v11109_v30 = vld [vmem:[#allocation162_spill] sm:$0xff] }
 0x5f4   :  { %3490 = vrot.lane.b32.xlu0 %v8641_v36, %s10825_s8  ;;  %3482 = vrot.lane.b32.xlu1 %v8641_v36, %s10826_s26  ;;  %11101 = vst [vmem:[#allocation206_spill] sm:$0xff] %v8711_v42  ;;  %v8740_v20 = vmul.f32 %v8643_v47, %v11104_v28  ;;  %v8744_v19 = vmul.f32 %v8643_v47, %v11106_v34  ;;  %v11111_v28 = vld [vmem:[#allocation161_spill] sm:$0xff]  ;;  %v11192_v42 = vld [vmem:[#allocation91_spill] sm:$0xff] }
 0x5f5   :  { %11103 = vst [vmem:[#allocation217_spill] sm:$0xff] %v8721_v49  ;;  %11105 = vst [vmem:[#allocation220_spill] sm:$0xff] %v8730_v2  ;;  %v8751_v21 = vmul.f32 %v8641_v36, %v11109_v30  ;;  %v8756_v56 = vmul.f32 %v8641_v36, %v11111_v28  ;;  %v8760_v34 = vmul.f32 %v8643_v47, %v11109_v30  ;;  %v11188_v49 = vld [vmem:[#allocation89_spill] sm:$0xff] }
 0x5f6   :  { %11107 = vst [vmem:[#allocation212_spill] sm:$0xff] %v8734_v8  ;;  %11108 = vst [vmem:[#allocation208_spill] sm:$0xff] %v8744_v19  ;;  %v8764_v22 = vmul.f32 %v8641_v36, %v11114_v37  ;;  %v8781_v46 = vmul.f32 %v8643_v47, %v11111_v28 }
 0x5f7   :  { %11110 = vst [vmem:[#allocation213_spill] sm:$0xff] %v8751_v21  ;;  %11112 = vst [vmem:[#allocation207_spill] sm:$0xff] %v8756_v56 }
 0x5f8   :  { %3498 = vrot.lane.b32.xlu0 %v8641_v36, %s10827_s27  ;;  %3484 = vrot.lane.b32.xlu1 %v8643_v47, %s10826_s26  ;;  %11113 = vst [vmem:[#allocation209_spill] sm:$0xff] %v8760_v34  ;;  %11115 = vst [vmem:[#allocation210_spill] sm:$0xff] %v8764_v22 }
 0x5f9   :  { %11121 = vst [vmem:[#allocation216_spill] sm:$0xff] %v8781_v46 }
 0x5fc   :  { %3506 = vrot.lane.b32.xlu0 %v8641_v36, %s10828_s6  ;;  %3492 = vrot.lane.b32.xlu1 %v8643_v47, %s10825_s8 }
 0x600   :  { %3514 = vrot.lane.b32.xlu0 %v8641_v36, %s10829_s16  ;;  %3500 = vrot.lane.b32.xlu1 %v8643_v47, %s10827_s27 }
 0x604   :  { %3522 = vrot.lane.b32.xlu0 %v8641_v36, %s10830_s5  ;;  %3508 = vrot.lane.b32.xlu1 %v8643_v47, %s10828_s6 }
 0x608   :  { %3530 = vrot.lane.b32.xlu0 %v8641_v36, %s10831_s3  ;;  %3516 = vrot.lane.b32.xlu1 %v8643_v47, %s10829_s16 }
 0x60c   :  { %3524 = vrot.lane.b32.xlu1 %v8643_v47, %s10830_s5 }
 0x610   :  { %3532 = vrot.lane.b32.xlu1 %v8643_v47, %s10831_s3 }
 0x662   :  { %v3477_v15 = vpop.permute.xlu0 %3476  ;;  %v3475_v0 = vpop.permute.xlu1 %3474 }
 0x663   :  { %v3478_v1 = vsel %vm257_vm0, %v3475_v0, %v3477_v15  ;;  %v3479_v55 = vsel %vm257_vm0, %v3477_v15, %v3475_v0  ;;  %v8786_v15 = vmul.f32 %v8643_v47, %v11114_v37  ;;  %v11123_v0 = vld [vmem:[#allocation73_spill] sm:$0xff] }
 0x664   :  { %v8773_v25 = vmul.f32 %v3479_v55, %v11117_v38  ;;  %v8776_v30 = vmul.f32 %v3478_v1, %v11119_v27  ;;  %v8790_v35 = vmul.f32 %v8641_v36, %v11123_v0  ;;  %v8794_v27 = vmul.f32 %v8643_v47, %v11123_v0  ;;  %v11126_v1 = vld [vmem:[#allocation49_spill] sm:$0xff]  ;;  %v11128_v0 = vld [vmem:[#allocation55_spill] sm:$0xff] }
 0x665   :  { %11122 = vst [vmem:[#allocation211_spill] sm:$0xff] %v8786_v15 }
 0x666   :  { %11118 = vst [vmem:[#allocation214_spill] sm:$0xff] %v8773_v25  ;;  %11120 = vst [vmem:[#allocation215_spill] sm:$0xff] %v8776_v30  ;;  %v3491_v38 = vpop.permute.xlu0 %3490  ;;  %v3483_v55 = vpop.permute.xlu1 %3482  ;;  %v3540_v28 = vmul.f32 %v8773_v25, %v11126_v1  ;;  %v3541_v17 = vmul.f32 %v8776_v30, %v11126_v1  ;;  %v3550_v14 = vmul.f32 %v8773_v25, %v11127_v10 }
 0x667   :  { %11124 = vst [vmem:[#allocation65_spill] sm:$0xff] %v8790_v35  ;;  %11125 = vst [vmem:[#allocation68_spill] sm:$0xff] %v8794_v27  ;;  %v3551_v3 = vmul.f32 %v8776_v30, %v11127_v10  ;;  %v3560_v50 = vmul.f32 %v8773_v25, %v11128_v0  ;;  %v3561_v45 = vmul.f32 %v8776_v30, %v11128_v0  ;;  %v11147_v27 = vld [vmem:[#allocation44_spill] sm:$0xff] }
 0x668   :  { %v3538_v39 = vmul.f32 %v8773_v25, %v11129_v11  ;;  %v3539_v1 = vmul.f32 %v8776_v30, %v11129_v11  ;;  %v3544_v58 = vrot.slane %v3540_v28, 2  ;;  %v3545_v37 = vrot.slane %v3541_v17, 2 }
 0x669   :  { %v8816_v26 = vmul.f32 %v8773_v25, %v11130_v6  ;;  %v3554_v12 = vrot.slane %v3550_v14, 4  ;;  %v3555_v52 = vrot.slane %v3551_v3, 4  ;;  %v3564_v28 = vrot.slane %v3560_v50, 6  ;;  %v11133_v3 = vld [vmem:[#allocation84_spill] sm:$0xff] }
 0x66a   :  { %v3499_v47 = vpop.permute.xlu0 %3498  ;;  %v3485_v0 = vpop.permute.xlu1 %3484  ;;  %v3548_v36 = vadd.f32 %v3544_v58, %v3538_v39  ;;  %v3549_v40 = vadd.f32 %v3545_v37, %v3539_v1  ;;  %v3565_v51 = vrot.slane %v3561_v45, 6  ;;  %v8833_v39 = vmul.f32 %v8776_v30, %v11130_v6  ;;  %v11134_v45 = vld [vmem:[#allocation87_spill] sm:$0xff]  ;;  %v11136_v37 = vld [vmem:[#allocation57_spill] sm:$0xff] }
 0x66b   :  { %v3486_v11 = vsel %vm277_vm1, %v3483_v55, %v3485_v0  ;;  %v3487_v17 = vsel %vm277_vm1, %v3485_v0, %v3483_v55  ;;  %v8837_v14 = vmul.f32 %v8773_v25, %v11133_v3  ;;  %v8841_v50 = vmul.f32 %v8776_v30, %v11133_v3 }
 0x66c   :  { %v8826_v10 = vmul.f32 %v3487_v17, %v11131_v23  ;;  %v8829_v32 = vmul.f32 %v3486_v11, %v11132_v7  ;;  %v3558_v53 = vadd.f32 %v3554_v12, %v3548_v36  ;;  %v3559_v13 = vadd.f32 %v3555_v52, %v3549_v40  ;;  %v11135_v52 = vld [vmem:[#allocation56_spill] sm:$0xff]  ;;  %v11138_v11 = vld [vmem:[#allocation41_spill] sm:$0xff] }
 0x66d   :  { %v8845_v23 = vmul.f32 %v8773_v25, %v11134_v45 }
 0x66e   :  { %v3493_v7 = vpop.permute.xlu1 %3492  ;;  %v3568_v58 = vadd.f32 %v3564_v28, %v3558_v53  ;;  %v3569_v12 = vadd.f32 %v3565_v51, %v3559_v13  ;;  %v3570_v40 = vmul.f32 %v8826_v10, %v11135_v52  ;;  %v3571_v6 = vmul.f32 %v8829_v32, %v11135_v52  ;;  %v3507_v53 = vpop.permute.xlu0 %3506  ;;  %v11137_v13 = vld [vmem:[#allocation40_spill] sm:$0xff] }
 0x66f   :  { %v3494_v36 = vsel %vm297_vm2, %v3491_v38, %v3493_v7  ;;  %v3495_v55 = vsel %vm297_vm2, %v3493_v7, %v3491_v38  ;;  %v3574_v1 = vmul.f32 %v8826_v10, %v11136_v37  ;;  %v3575_v0 = vmul.f32 %v8829_v32, %v11136_v37 }
 0x670   :  { %v8860_v51 = vmul.f32 %v3495_v55, %v11137_v13  ;;  %v8863_v17 = vmul.f32 %v3494_v36, %v11138_v11  ;;  %v3572_v28 = vadd.f32 %v3570_v40, %v3568_v58  ;;  %v3573_v3 = vadd.f32 %v3571_v6, %v3569_v12  ;;  %v11141_v11 = vld [vmem:[#allocation64_spill] sm:$0xff] }
 0x671   :  { %v3578_v52 = vrot.slane %v3574_v1, 2  ;;  %v3579_v43 = vrot.slane %v3575_v0, 2  ;;  %v3584_v38 = vmul.f32 %v8826_v10, %v11139_v59  ;;  %v3585_v7 = vmul.f32 %v8829_v32, %v11139_v59 }
 0x672   :  { %v3501_v61 = vpop.permute.xlu1 %3500  ;;  %v3594_v37 = vmul.f32 %v8826_v10, %v11140_v33  ;;  %v3595_v55 = vmul.f32 %v8829_v32, %v11140_v33  ;;  %v8876_v58 = vmul.f32 %v8776_v30, %v11134_v45  ;;  %v3604_v33 = vmul.f32 %v8860_v51, %v11141_v11 }
 0x673   :  { %v3582_v12 = vadd.f32 %v3578_v52, %v3572_v28  ;;  %v3583_v40 = vadd.f32 %v3579_v43, %v3573_v3  ;;  %v3503_v59 = vsel %vm317_vm3, %v3501_v61, %v3499_v47  ;;  %v3588_v0 = vrot.slane %v3584_v38, 4  ;;  %v11142_v28 = vld [vmem:[#allocation66_spill] sm:$0xff]  ;;  %v3515_v52 = vpop.permute.xlu0 %3514 }
 0x674   :  { %v3589_v13 = vrot.slane %v3585_v7, 4  ;;  %v3502_v36 = vsel %vm317_vm3, %v3499_v47, %v3501_v61  ;;  %v3605_v45 = vmul.f32 %v8863_v17, %v11141_v11  ;;  %v3608_v43 = vmul.f32 %v8860_v51, %v11142_v28  ;;  %v11144_v47 = vld [vmem:[#allocation70_spill] sm:$0xff] }
 0x675   :  { %v3609_v3 = vmul.f32 %v8863_v17, %v11142_v28  ;;  %v3592_v6 = vadd.f32 %v3588_v0, %v3582_v12  ;;  %v3598_v7 = vrot.slane %v3594_v37, 6  ;;  %v3599_v62 = vrot.slane %v3595_v55, 6 }
 0x676   :  { %v3509_v1 = vpop.permute.xlu1 %3508  ;;  %v3593_v38 = vadd.f32 %v3589_v13, %v3583_v40  ;;  %v8893_v24 = vmul.f32 %v3503_v59, %v11143_v4  ;;  %v3618_v11 = vmul.f32 %v8860_v51, %v11144_v47  ;;  %v3619_v44 = vmul.f32 %v8863_v17, %v11144_v47  ;;  %v11146_v59 = vld [vmem:[#allocation71_spill] sm:$0xff] }
 0x677   :  { %v3510_v61 = vsel %vm337_vm4, %v3507_v53, %v3509_v1  ;;  %v8902_v28 = vmul.f32 %v3502_v36, %v11145_v18  ;;  %v3511_v12 = vsel %vm337_vm4, %v3509_v1, %v3507_v53  ;;  %v3602_v37 = vadd.f32 %v3598_v7, %v3592_v6  ;;  %v11148_v36 = vld [vmem:[#allocation45_spill] sm:$0xff]  ;;  %v11149_v1 = vld [vmem:[#allocation72_spill] sm:$0xff]  ;;  %v11151_v13 = vld [vmem:[#allocation76_spill] sm:$0xff] }
 0x678   :  { %v3603_v55 = vadd.f32 %v3599_v62, %v3593_v38  ;;  %v3612_v40 = vrot.slane %v3608_v43, 2  ;;  %v3613_v4 = vrot.slane %v3609_v3, 2  ;;  %v3628_v0 = vmul.f32 %v8860_v51, %v11146_v59  ;;  %v3523_v3 = vpop.permute.xlu0 %3522 }
 0x679   :  { %v8910_v35 = vmul.f32 %v3510_v61, %v11147_v27  ;;  %v3606_v47 = vadd.f32 %v3604_v33, %v3602_v37  ;;  %v3629_v18 = vmul.f32 %v8863_v17, %v11146_v59  ;;  %v8915_v53 = vmul.f32 %v3511_v12, %v11148_v36  ;;  %v11150_v12 = vld [vmem:[#allocation75_spill] sm:$0xff] }
 0x67a   :  { %v3517_v15 = vpop.permute.xlu1 %3516  ;;  %v3607_v22 = vadd.f32 %v3605_v45, %v3603_v55  ;;  %v3622_v62 = vrot.slane %v3618_v11, 4  ;;  %v3623_v6 = vrot.slane %v3619_v44, 4  ;;  %v3638_v43 = vmul.f32 %v8893_v24, %v11149_v1 }
 0x67b   :  { %v3518_v38 = vsel %vm357_vm5, %v3515_v52, %v3517_v15  ;;  %v3616_v27 = vadd.f32 %v3612_v40, %v3606_v47  ;;  %v3639_v33 = vmul.f32 %v8902_v28, %v11149_v1  ;;  %v3519_v45 = vsel %vm357_vm5, %v3517_v15, %v3515_v52  ;;  %v11153_v47 = vld [vmem:[#allocation46_spill] sm:$0xff] }
 0x67c   :  { %v3617_v7 = vadd.f32 %v3613_v4, %v3607_v22  ;;  %v3632_v61 = vrot.slane %v3628_v0, 6  ;;  %v3642_v11 = vmul.f32 %v8893_v24, %v11150_v12  ;;  %v3643_v44 = vmul.f32 %v8902_v28, %v11150_v12  ;;  %v11152_v4 = vld [vmem:[#allocation80_spill] sm:$0xff] }
 0x67d   :  { %v3626_v55 = vadd.f32 %v3622_v62, %v3616_v27  ;;  %v3633_v36 = vrot.slane %v3629_v18, 6  ;;  %v3652_v22 = vmul.f32 %v8893_v24, %v11151_v13  ;;  %v3653_v52 = vmul.f32 %v8902_v28, %v11151_v13  ;;  %v11154_v62 = vld [vmem:[#allocation47_spill] sm:$0xff]  ;;  %v3531_v13 = vpop.permute.xlu0 %3530 }
 0x67e   :  { %v3525_v37 = vpop.permute.xlu1 %3524  ;;  %v3627_v59 = vadd.f32 %v3623_v6, %v3617_v7  ;;  %v3662_v0 = vmul.f32 %v8893_v24, %v11152_v4  ;;  %v8940_v1 = vmul.f32 %v3518_v38, %v11153_v47  ;;  %v8943_v18 = vmul.f32 %v3519_v45, %v11154_v62  ;;  %v11155_v7 = vld [vmem:[#allocation51_spill] sm:$0xff] }
 0x67f   :  { %v3526_v40 = vsel %vm377_vm6, %v3523_v3, %v3525_v37  ;;  %v3527_v15 = vsel %vm377_vm6, %v3525_v37, %v3523_v3  ;;  %v3636_v6 = vadd.f32 %v3632_v61, %v3626_v55  ;;  %v3646_v34 = vrot.slane %v3642_v11, 2  ;;  %v11157_v37 = vld [vmem:[#allocation52_spill] sm:$0xff] }
 0x680   :  { %v3637_v27 = vadd.f32 %v3633_v36, %v3627_v59  ;;  %v8946_v12 = vmul.f32 %v3526_v40, %v11155_v7  ;;  %v3647_v21 = vrot.slane %v3643_v44, 2  ;;  %v3663_v3 = vmul.f32 %v8902_v28, %v11152_v4  ;;  %v11159_v59 = vld [vmem:[#allocation82_spill] sm:$0xff]  ;;  %v11161_v4 = vld [vmem:[#allocation83_spill] sm:$0xff] }
 0x681   :  { %v8951_v46 = vmul.f32 %v3527_v15, %v11157_v37  ;;  %v3640_v38 = vadd.f32 %v3638_v43, %v3636_v6  ;;  %v3656_v19 = vrot.slane %v3652_v22, 4  ;;  %v3657_v61 = vrot.slane %v3653_v52, 4  ;;  %v11164_v6 = vld [vmem:[#allocation60_spill] sm:$0xff] }
 0x682   :  { %11156 = vst [vmem:[#allocation218_spill] sm:$0xff] %v8946_v12  ;;  %v3533_v56 = vpop.permute.xlu1 %3532  ;;  %v3641_v47 = vadd.f32 %v3639_v33, %v3637_v27  ;;  %v3666_v55 = vrot.slane %v3662_v0, 6  ;;  %v8957_v11 = vmul.f32 %v8910_v35, %v11159_v59  ;;  %v8963_v15 = vmul.f32 %v8915_v53, %v11159_v59  ;;  %v11160_v33 = vld [vmem:[#allocation81_spill] sm:$0xff] }
 0x683   :  { %11158 = vst [vmem:[#allocation219_spill] sm:$0xff] %v8951_v46  ;;  %v3534_v45 = vsel %vm397_vm7, %v3531_v13, %v3533_v56  ;;  %v3535_v44 = vsel %vm397_vm7, %v3533_v56, %v3531_v13  ;;  %v3650_v36 = vadd.f32 %v3646_v34, %v3640_v38  ;;  %v3667_v43 = vrot.slane %v3663_v3, 6  ;;  %v11166_v3 = vld [vmem:[#allocation85_spill] sm:$0xff] }
 0x684   :  { %v3651_v40 = vadd.f32 %v3647_v21, %v3641_v47  ;;  %v3706_v22 = vmul.f32 %v8910_v35, %v11160_v33  ;;  %v8969_v52 = vmul.f32 %v8910_v35, %v11161_v4  ;;  %v8973_v0 = vmul.f32 %v8915_v53, %v11161_v4  ;;  %v11167_v59 = vld [vmem:[#allocation93_spill] sm:$0xff] }
 0x685   :  { %v8976_v56 = vmul.f32 %v3534_v45, %v11162_v48  ;;  %v3660_v21 = vadd.f32 %v3656_v19, %v3650_v36  ;;  %v3707_v62 = vmul.f32 %v8915_v53, %v11160_v33  ;;  %v8981_v27 = vmul.f32 %v3535_v44, %v11164_v6  ;;  %v11168_v36 = vld [vmem:[#allocation94_spill] sm:$0xff] }
 0x686   :  { %v3661_v34 = vadd.f32 %v3657_v61, %v3651_v40  ;;  %v3714_v7 = vrot.slane %v8957_v11, 2  ;;  %v8986_v13 = vmul.f32 %v8910_v35, %v11166_v3  ;;  %v8990_v37 = vmul.f32 %v8915_v53, %v11166_v3 }
 0x687   :  { %11163 = vst [vmem:[#allocation221_spill] sm:$0xff] %v8976_v56  ;;  %11165 = vst [vmem:[#allocation222_spill] sm:$0xff] %v8981_v27  ;;  %v3670_v38 = vadd.f32 %v3666_v55, %v3660_v21  ;;  %v3715_v19 = vrot.slane %v8963_v15, 2  ;;  %v3724_v45 = vrot.slane %v8969_v52, 4  ;;  %v3725_v61 = vrot.slane %v8973_v0, 4  ;;  %v11170_v21 = vld [vmem:[#allocation95_spill] sm:$0xff] }
 0x688   :  { %v3671_v47 = vadd.f32 %v3667_v43, %v3661_v34  ;;  %v8997_v44 = vmul.f32 %v8940_v1, %v11167_v59  ;;  %v9001_v11 = vmul.f32 %v8943_v18, %v11167_v59  ;;  %v9005_v40 = vmul.f32 %v8940_v1, %v11168_v36  ;;  %v11169_v43 = vld [vmem:[#allocation86_spill] sm:$0xff] }
 0x689   :  { %v3674_v55 = vadd.f32 %v8699_v54, %v3670_v38  ;;  %v3740_v33 = vmul.f32 %v8940_v1, %v11169_v43  ;;  %v3741_v4 = vmul.f32 %v8943_v18, %v11169_v43  ;;  %v3734_v52 = vrot.slane %v8986_v13, 6  ;;  %v11173_v59 = vld [vmem:[#allocation98_spill] sm:$0xff]  ;;  %v11176_v43 = vld [vmem:[#allocation101_spill] sm:$0xff] }
 0x68a   :  { %v3675_v15 = vadd.f32 %v8715_v57, %v3671_v47  ;;  %v3735_v0 = vrot.slane %v8990_v37, 6  ;;  %v9017_v48 = vmul.f32 %v8943_v18, %v11168_v36  ;;  %v9021_v34 = vmul.f32 %v8940_v1, %v11170_v21 }
 0x68b   :  { %v11171_v54 = vrot.slane %v8679_v9, 2  ;;  %v11172_v6 = vrot.slane %v8683_v16, 2  ;;  %v3748_v38 = vrot.slane %v8997_v44, 2  ;;  %v9030_v13 = vmul.f32 %v8943_v18, %v11170_v21 }
 0x68c   :  { %v3749_v37 = vrot.slane %v9001_v11, 2  ;;  %v9036_v36 = vmul.f32 %v8946_v12, %v11173_v59  ;;  %v9040_v9 = vmul.f32 %v8951_v46, %v11173_v59  ;;  %v11174_v16 = vrot.slane %v8687_v29, 4  ;;  %v11177_v59 = vld [vmem:[#allocation102_spill] sm:$0xff] }
 0x68d   :  { %v3684_v57 = vadd.f32 %v11171_v54, %v3674_v55  ;;  %v3685_v3 = vadd.f32 %v11172_v6, %v3675_v15  ;;  %v11175_v44 = vrot.slane %v8691_v41, 4  ;;  %v9048_v21 = vmul.f32 %v8946_v12, %v11176_v43 }
 0x68e   :  { %v9052_v11 = vmul.f32 %v8951_v46, %v11176_v43  ;;  %v3759_v54 = vrot.slane %v9017_v48, 4  ;;  %v9058_v47 = vmul.f32 %v8946_v12, %v11177_v59  ;;  %v9062_v29 = vmul.f32 %v8951_v46, %v11177_v59  ;;  %v11180_v43 = vld [vmem:[#allocation97_spill] sm:$0xff] }
 0x68f   :  { %v3694_v55 = vadd.f32 %v11174_v16, %v3684_v57  ;;  %v3695_v15 = vadd.f32 %v11175_v44, %v3685_v3  ;;  %v11178_v41 = vrot.slane %v8695_v63, 6  ;;  %v11179_v3 = vrot.slane %v8703_v5, 6  ;;  %v11184_v63 = vld [vmem:[#allocation118_spill] sm:$0xff] }
 0x690   :  { %v9071_v48 = vmul.f32 %v8946_v12, %v11180_v43  ;;  %v9075_v6 = vmul.f32 %v8951_v46, %v11180_v43  ;;  %v11182_v43 = vld [vmem:[#allocation103_spill] sm:$0xff]  ;;  %v11186_v12 = vrot.slane %v8841_v50, 2  ;;  %v11190_v50 = vrot.slane %v8876_v58, 4 }
 0x691   :  { %v3704_v57 = vadd.f32 %v11178_v41, %v3694_v55  ;;  %v3705_v16 = vadd.f32 %v11179_v3, %v3695_v15  ;;  %v11181_v15 = vld [vmem:[#allocation113_spill] sm:$0xff]  ;;  %v9089_v46 = vmul.f32 %v8976_v56, %v11182_v43  ;;  %v9093_v59 = vmul.f32 %v8981_v27, %v11182_v43 }
 0x692   :  { %v9083_v3 = vmul.f32 %v8976_v56, %v11181_v15  ;;  %v9110_v43 = vmul.f32 %v8976_v56, %v11184_v63  ;;  %v3900_v8 = vadd.f32 %v11186_v12, %v8833_v39 }
 0x693   :  { %v3708_v55 = vadd.f32 %v3706_v22, %v3704_v57  ;;  %v3709_v41 = vadd.f32 %v3707_v62, %v3705_v16  ;;  %v9097_v57 = vmul.f32 %v8981_v27, %v11181_v15  ;;  %v11183_v16 = vld [vmem:[#allocation117_spill] sm:$0xff] }
 0x694   :  { %v9101_v5 = vmul.f32 %v8976_v56, %v11183_v16  ;;  %v9106_v44 = vmul.f32 %v8981_v27, %v11183_v16  ;;  %v11187_v16 = vld [vmem:[#allocation88_spill] sm:$0xff]  ;;  %v3910_v39 = vadd.f32 %v11190_v50, %v3900_v8 }
 0x695   :  { %v3718_v22 = vadd.f32 %v3714_v7, %v3708_v55  ;;  %v3719_v62 = vadd.f32 %v3715_v19, %v3709_v41  ;;  %v9114_v7 = vmul.f32 %v8981_v27, %v11184_v63  ;;  %v11185_v41 = vrot.slane %v8837_v14, 2 }
 0x696   :  { %v3911_v2 = vmul.f32 %v8773_v25, %v11187_v16  ;;  %v3912_v56 = vmul.f32 %v8776_v30, %v11187_v16  ;;  %v3921_v63 = vmul.f32 %v8826_v10, %v11188_v49 }
 0x697   :  { %v3728_v19 = vadd.f32 %v3724_v45, %v3718_v22  ;;  %v3729_v55 = vadd.f32 %v3725_v61, %v3719_v62  ;;  %v3899_v15 = vadd.f32 %v11185_v41, %v8816_v26  ;;  %v3922_v45 = vmul.f32 %v8829_v32, %v11188_v49  ;;  %v11191_v41 = vld [vmem:[#allocation90_spill] sm:$0xff] }
 0x698   :  { %v11189_v26 = vrot.slane %v8845_v23, 4  ;;  %v3915_v12 = vrot.slane %v3911_v2, 6  ;;  %v3916_v62 = vrot.slane %v3912_v56, 6  ;;  %v3925_v25 = vmul.f32 %v8826_v10, %v11191_v41 }
 0x699   :  { %v3738_v61 = vadd.f32 %v3734_v52, %v3728_v19  ;;  %v3739_v22 = vadd.f32 %v3735_v0, %v3729_v55  ;;  %v3926_v16 = vmul.f32 %v8829_v32, %v11191_v41  ;;  %v3935_v49 = vmul.f32 %v8826_v10, %v11192_v42 }
 0x69a   :  { %v3909_v14 = vadd.f32 %v11189_v26, %v3899_v15  ;;  %v3936_v23 = vmul.f32 %v8829_v32, %v11192_v42  ;;  %v3920_v0 = vadd.f32 %v3916_v62, %v3910_v39  ;;  %v3929_v58 = vrot.slane %v3925_v25, 2 }
 0x69b   :  { %v3742_v30 = vadd.f32 %v3740_v33, %v3738_v61  ;;  %v3743_v27 = vadd.f32 %v3741_v4, %v3739_v22  ;;  %v3930_v8 = vrot.slane %v3926_v16, 2  ;;  %v3817_v19 = vrot.slane %v9097_v57, 2  ;;  %v11193_v33 = vld [vmem:[#allocation96_spill] sm:$0xff] }
 0x69c   :  { %v3919_v52 = vadd.f32 %v3915_v12, %v3909_v14  ;;  %v3826_v55 = vrot.slane %v9101_v5, 4  ;;  %v3924_v26 = vadd.f32 %v3922_v45, %v3920_v0  ;;  %v3945_v4 = vmul.f32 %v8826_v10, %v11193_v33 }
 0x69d   :  { %v3752_v2 = vadd.f32 %v3748_v38, %v3742_v30  ;;  %v3753_v56 = vadd.f32 %v3749_v37, %v3743_v27  ;;  %v3946_v61 = vmul.f32 %v8829_v32, %v11193_v33  ;;  %v11194_v42 = vrot.slane %v9005_v40, 4 }
 0x69e   :  { %v3923_v15 = vadd.f32 %v3921_v63, %v3919_v52  ;;  %v3827_v25 = vrot.slane %v9106_v44, 4  ;;  %v3836_v30 = vrot.slane %v9110_v43, 6  ;;  %v3934_v38 = vadd.f32 %v3930_v8, %v3924_v26  ;;  %v11197_v52 = vld [vmem:[#allocation106_spill] sm:$0xff]  ;;  %v11199_v8 = vld [vmem:[#allocation107_spill] sm:$0xff] }
 0x69f   :  { %v3762_v22 = vadd.f32 %v11194_v42, %v3752_v2  ;;  %v3763_v14 = vadd.f32 %v3759_v54, %v3753_v56  ;;  %v3939_v37 = vrot.slane %v3935_v49, 4  ;;  %v3940_v50 = vrot.slane %v3936_v23, 4  ;;  %v11198_v23 = vld [vmem:[#allocation105_spill] sm:$0xff] }
 0x6a0   :  { %v3933_v27 = vadd.f32 %v3929_v58, %v3923_v15  ;;  %v11195_v63 = vrot.slane %v9021_v34, 6  ;;  %v11196_v39 = vrot.slane %v9030_v13, 6  ;;  %v3949_v62 = vrot.slane %v3945_v4, 6 }
 0x6a1   :  { %v3950_v41 = vrot.slane %v3946_v61, 6  ;;  %v3944_v40 = vadd.f32 %v3940_v50, %v3934_v38  ;;  %v3959_v54 = vmul.f32 %v8860_v51, %v11197_v52  ;;  %v3960_v0 = vmul.f32 %v8863_v17, %v11197_v52  ;;  %v11202_v61 = vld [vmem:[#allocation114_spill] sm:$0xff] }
 0x6a2   :  { %v3772_v45 = vadd.f32 %v11195_v63, %v3762_v22  ;;  %v3773_v12 = vadd.f32 %v11196_v39, %v3763_v14  ;;  %v3943_v16 = vadd.f32 %v3939_v37, %v3933_v27  ;;  %v3955_v34 = vmul.f32 %v8860_v51, %v11198_v23 }
 0x6a3   :  { %v3969_v13 = vmul.f32 %v8860_v51, %v11199_v8  ;;  %v3954_v56 = vadd.f32 %v3950_v41, %v3944_v40  ;;  %v3956_v15 = vmul.f32 %v8863_v17, %v11198_v23  ;;  %v3970_v26 = vmul.f32 %v8863_v17, %v11199_v8 }
 0x6a4   :  { %v3776_v58 = vadd.f32 %v9071_v48, %v3772_v45  ;;  %v3777_v49 = vadd.f32 %v9075_v6, %v3773_v12  ;;  %v3953_v2 = vadd.f32 %v3949_v62, %v3943_v16  ;;  %v11200_v33 = vrot.slane %v9036_v36, 2 }
 0x6a5   :  { %v11201_v48 = vrot.slane %v9040_v9, 2  ;;  %v3979_v42 = vmul.f32 %v8860_v51, %v11202_v61  ;;  %v3980_v22 = vmul.f32 %v8863_v17, %v11202_v61  ;;  %v3958_v27 = vadd.f32 %v3956_v15, %v3954_v56 }
 0x6a6   :  { %v3786_v4 = vadd.f32 %v11200_v33, %v3776_v58  ;;  %v3957_v14 = vadd.f32 %v3955_v34, %v3953_v2  ;;  %v3963_v38 = vrot.slane %v3959_v54, 2  ;;  %v3964_v37 = vrot.slane %v3960_v0, 2  ;;  %v11208_v34 = vld [vmem:[#allocation121_spill] sm:$0xff]  ;;  %v11209_v2 = vld [vmem:[#allocation119_spill] sm:$0xff] }
 0x6a7   :  { %v3787_v6 = vadd.f32 %v11201_v48, %v3777_v49  ;;  %v11203_v50 = vrot.slane %v9048_v21, 4  ;;  %v11204_v45 = vrot.slane %v9052_v11, 4  ;;  %v3837_v39 = vrot.slane %v9114_v7, 6  ;;  %v11207_v49 = vld [vmem:[#allocation120_spill] sm:$0xff] }
 0x6a8   :  { %v3973_v9 = vrot.slane %v3969_v13, 4  ;;  %v3967_v12 = vadd.f32 %v3963_v38, %v3957_v14  ;;  %v3968_v62 = vadd.f32 %v3964_v37, %v3958_v27  ;;  %v3974_v41 = vrot.slane %v3970_v26, 4 }
 0x6a9   :  { %v3796_v63 = vadd.f32 %v11203_v50, %v3786_v4  ;;  %v3797_v36 = vadd.f32 %v11204_v45, %v3787_v6  ;;  %v3983_v16 = vrot.slane %v3979_v42, 6  ;;  %v11205_v40 = vrot.slane %v9058_v47, 6  ;;  %v11210_v4 = vld [vmem:[#allocation122_spill] sm:$0xff] }
 0x6aa   :  { %v11206_v58 = vrot.slane %v9062_v29, 6  ;;  %v3984_v0 = vrot.slane %v3980_v22, 6  ;;  %v3993_v21 = vmul.f32 %v8893_v24, %v11207_v49  ;;  %v3977_v23 = vadd.f32 %v3973_v9, %v3967_v12 }
 0x6ab   :  { %v3806_v52 = vadd.f32 %v11205_v40, %v3796_v63  ;;  %v3978_v11 = vadd.f32 %v3974_v41, %v3968_v62  ;;  %v3994_v7 = vmul.f32 %v8902_v28, %v11207_v49  ;;  %v4003_v8 = vmul.f32 %v8893_v24, %v11208_v34  ;;  %v11216_v40 = vld [vmem:[#allocation127_spill] sm:$0xff] }
 0x6ac   :  { %v3807_v54 = vadd.f32 %v11206_v58, %v3797_v36  ;;  %v3989_v29 = vmul.f32 %v8893_v24, %v11209_v2  ;;  %v4004_v56 = vmul.f32 %v8902_v28, %v11208_v34  ;;  %v3987_v15 = vadd.f32 %v3983_v16, %v3977_v23 }
 0x6ad   :  { %v3810_v13 = vadd.f32 %v9089_v46, %v3806_v52  ;;  %v3988_v26 = vadd.f32 %v3984_v0, %v3978_v11  ;;  %v3990_v33 = vmul.f32 %v8902_v28, %v11209_v2  ;;  %v4013_v48 = vmul.f32 %v8893_v24, %v11210_v4 }
 0x6ae   :  { %v3811_v47 = vadd.f32 %v9093_v59, %v3807_v54  ;;  %v11211_v6 = vrot.slane %v9083_v3, 2  ;;  %v3997_v59 = vrot.slane %v3993_v21, 2  ;;  %v4014_v42 = vmul.f32 %v8902_v28, %v11210_v4  ;;  %v11212_v3 = vld [vmem:[#allocation125_spill] sm:$0xff] }
 0x6af   :  { %v3991_v22 = vadd.f32 %v3989_v29, %v3987_v15  ;;  %v3992_v14 = vadd.f32 %v3990_v33, %v3988_v26  ;;  %v3998_v27 = vrot.slane %v3994_v7, 2  ;;  %v4007_v38 = vrot.slane %v4003_v8, 4  ;;  %v11217_v7 = vld [vmem:[#allocation128_spill] sm:$0xff] }
 0x6b0   :  { %v3820_v61 = vadd.f32 %v11211_v6, %v3810_v13  ;;  %v3821_v46 = vadd.f32 %v3817_v19, %v3811_v47  ;;  %v4008_v63 = vrot.slane %v4004_v56, 4  ;;  %v4057_v45 = vmul.f32 %v8910_v35, %v11212_v3  ;;  %v11218_v26 = vld [vmem:[#allocation132_spill] sm:$0xff] }
 0x6b1   :  { %v4001_v57 = vadd.f32 %v3997_v59, %v3991_v22  ;;  %v4002_v19 = vadd.f32 %v3998_v27, %v3992_v14  ;;  %v4017_v36 = vrot.slane %v4013_v48, 6  ;;  %v4058_v9 = vmul.f32 %v8915_v53, %v11212_v3  ;;  %v11222_v59 = vld [vmem:[#allocation133_spill] sm:$0xff]  ;;  %v11223_v27 = vld [vmem:[#allocation131_spill] sm:$0xff]  ;;  %v11226_v3 = vld [vmem:[#allocation220_spill] sm:$0xff] }
 0x6b2   :  { %v3830_v37 = vadd.f32 %v3826_v55, %v3820_v61  ;;  %v3831_v50 = vadd.f32 %v3827_v25, %v3821_v46  ;;  %v4018_v5 = vrot.slane %v4014_v42, 6  ;;  %v11215_v55 = vld [vmem:[#allocation126_spill] sm:$0xff]  ;;  %v9229_v52 = vmul.f32 %v8910_v35, %v11216_v40 }
 0x6b3   :  { %v4061_v44 = vmul.f32 %v8910_v35, %v11215_v55  ;;  %v4011_v25 = vadd.f32 %v4007_v38, %v4001_v57  ;;  %v4012_v41 = vadd.f32 %v4008_v63, %v4002_v19  ;;  %v4062_v16 = vmul.f32 %v8915_v53, %v11215_v55  ;;  %v11220_v61 = vld [vmem:[#allocation206_spill] sm:$0xff] }
 0x6b4   :  { %v9219_v12 = vadd.f32 %v3836_v30, %v3830_v37  ;;  %v9221_v62 = vadd.f32 %v3837_v39, %v3831_v50  ;;  %v4072_v21 = vmul.f32 %v8915_v53, %v11216_v40  ;;  %v4081_v34 = vmul.f32 %v8910_v35, %v11217_v7  ;;  %v11224_v50 = vld [vmem:[#allocation217_spill] sm:$0xff]  ;;  %v11229_v40 = vld [vmem:[#allocation212_spill] sm:$0xff] }
 0x6b5   :  { %v4021_v0 = vadd.f32 %v4017_v36, %v4011_v25  ;;  %v4022_v49 = vadd.f32 %v4018_v5, %v4012_v41  ;;  %v4082_v8 = vmul.f32 %v8915_v53, %v11217_v7  ;;  %v4065_v29 = vrot.slane %v4061_v44, 2  ;;  %v11228_v5 = vld [vmem:[#allocation135_spill] sm:$0xff] }
 0x6b6   :  { %11213 = vst [vmem:[#allocation202_spill] sm:$0xff] %v9219_v12  ;;  %11214 = vst [vmem:[#allocation203_spill] sm:$0xff] %v9221_v62  ;;  %v3842_v43 = vsel %vm753_vm8, %v9219_v12, 0.0  ;;  %v3843_v30 = vsel %vm753_vm8, %v9221_v62, 0.0  ;;  %v3855_v39 = vmul.f32 %v9219_v12, %v9219_v12  ;;  %v3856_v58 = vmul.f32 %v9221_v62, %v9221_v62  ;;  %v11251_v62 = vld [vmem:[#allocation136_spill] sm:$0xff] }
 0x6b7   :  { %v3844_v54 = vadd.f32 %v3843_v30, %v3842_v43  ;;  %v4025_v47 = vadd.f32 %v8726_v60, %v4021_v0  ;;  %v4026_v2 = vadd.f32 %v8740_v20, %v4022_v49  ;;  %v4066_v56 = vrot.slane %v4062_v16, 2  ;;  %v11231_v30 = vld [vmem:[#allocation208_spill] sm:$0xff]  ;;  %v11234_v0 = vld [vmem:[#allocation218_spill] sm:$0xff] }
 0x6b8   :  { %v3857_v23 = vsel %vm753_vm8, %v3855_v39, 0.0  ;;  %v3858_v11 = vsel %vm753_vm8, %v3856_v58, 0.0  ;;  %v4075_v15 = vrot.slane %v9229_v52, 4  ;;  %v9252_v33 = vmul.f32 %v8940_v1, %v11218_v26 }
 0x6b9   :  { %3845 = vadd.xlane.f32.xlu0 %v3844_v54  ;;  %v3859_v13 = vadd.f32 %v3858_v11, %v3857_v23  ;;  %v9256_v4 = vmul.f32 %v8943_v18, %v11218_v26  ;;  %v11219_v48 = vrot.slane %v8707_v31, 2  ;;  %v11221_v60 = vrot.slane %v11220_v61, 2  ;;  %v11233_v54 = vld [vmem:[#allocation140_spill] sm:$0xff]  ;;  %v11236_v11 = vld [vmem:[#allocation143_spill] sm:$0xff] }
 0x6ba   :  { %v4076_v20 = vrot.slane %v4072_v21, 4  ;;  %v9264_v42 = vmul.f32 %v8940_v1, %v11222_v59  ;;  %v4085_v22 = vrot.slane %v4081_v34, 6  ;;  %v4086_v14 = vrot.slane %v4082_v8, 6  ;;  %v11235_v21 = vld [vmem:[#allocation219_spill] sm:$0xff]  ;;  %v11237_v8 = vld [vmem:[#allocation144_spill] sm:$0xff] }
 0x6bb   :  { %3860 = vadd.xlane.f32.xlu1 %v3859_v13  ;;  %v4035_v6 = vadd.f32 %v11219_v48, %v4025_v47  ;;  %v4036_v46 = vadd.f32 %v11221_v60, %v4026_v2  ;;  %v4091_v38 = vmul.f32 %v8940_v1, %v11223_v27  ;;  %v4092_v37 = vmul.f32 %v8943_v18, %v11223_v27 }
 0x6bc   :  { %v11225_v63 = vrot.slane %v11224_v50, 4  ;;  %v11227_v57 = vrot.slane %v11226_v3, 4  ;;  %v9276_v36 = vmul.f32 %v8943_v18, %v11222_v59  ;;  %v9280_v55 = vmul.f32 %v8940_v1, %v11228_v5  ;;  %v11240_v3 = vld [vmem:[#allocation221_spill] sm:$0xff] }
 0x6bd   :  { %v4099_v44 = vrot.slane %v9252_v33, 2  ;;  %v4100_v25 = vrot.slane %v9256_v4, 2  ;;  %v4109_v41 = vrot.slane %v9264_v42, 4  ;;  %v9287_v16 = vmul.f32 %v8943_v18, %v11228_v5  ;;  %v11241_v5 = vld [vmem:[#allocation145_spill] sm:$0xff] }
 0x6be   :  { %v4045_v31 = vadd.f32 %v11225_v63, %v4035_v6  ;;  %v4046_v19 = vadd.f32 %v11227_v57, %v4036_v46  ;;  %v11230_v52 = vrot.slane %v11229_v40, 6  ;;  %v11232_v39 = vrot.slane %v11231_v30, 6  ;;  %v11238_v6 = vld [vmem:[#allocation139_spill] sm:$0xff] }
 0x6bf   :  { %v9295_v49 = vmul.f32 %v11234_v0, %v11233_v54  ;;  %v9299_v23 = vmul.f32 %v11235_v21, %v11233_v54  ;;  %v9303_v7 = vmul.f32 %v11234_v0, %v11236_v11  ;;  %v9307_v34 = vmul.f32 %v11235_v21, %v11236_v11  ;;  %v11243_v40 = vld [vmem:[#allocation147_spill] sm:$0xff]  ;;  %v11245_v11 = vld [vmem:[#allocation92_spill] sm:$0xff] }
 0x6c0   :  { %v4055_v43 = vadd.f32 %v11230_v52, %v4045_v31  ;;  %v4056_v58 = vadd.f32 %v11232_v39, %v4046_v19  ;;  %v9311_v13 = vmul.f32 %v11234_v0, %v11237_v8  ;;  %v9315_v47 = vmul.f32 %v11235_v21, %v11237_v8  ;;  %v11239_v31 = vld [vmem:[#allocation146_spill] sm:$0xff] }
 0x6c1   :  { %v4110_v33 = vrot.slane %v9276_v36, 4  ;;  %v4119_v4 = vrot.slane %v9280_v55, 6  ;;  %v4120_v48 = vrot.slane %v9287_v16, 6  ;;  %v4125_v61 = vmul.f32 %v11234_v0, %v11238_v6  ;;  %v11246_v8 = vld [vmem:[#allocation214_spill] sm:$0xff] }
 0x6c2   :  { %v4059_v2 = vadd.f32 %v4057_v45, %v4055_v43  ;;  %v4060_v26 = vadd.f32 %v4058_v9, %v4056_v58  ;;  %v4126_v60 = vmul.f32 %v11235_v21, %v11238_v6  ;;  %v9332_v57 = vmul.f32 %v11240_v3, %v11239_v31  ;;  %v11250_v58 = vld [vmem:[#allocation134_spill] sm:$0xff] }
 0x6c3   :  { %v9348_v52 = vmul.f32 %v11240_v3, %v11243_v40  ;;  %v4268_v63 = vmul.f32 %v11246_v8, %v11250_v58 }
 0x6c4   :  { %v4069_v59 = vadd.f32 %v4065_v29, %v4059_v2  ;;  %v4070_v42 = vadd.f32 %v4066_v56, %v4060_v26  ;;  %v9336_v29 = vmul.f32 %v11240_v3, %v11241_v5  ;;  %v11242_v56 = vld [vmem:[#allocation222_spill] sm:$0xff]  ;;  %v4246_v2 = vmul.f32 %v11246_v8, %v11245_v11  ;;  %v11247_v26 = vld [vmem:[#allocation215_spill] sm:$0xff] }
 0x6c5   :  { %v9340_v55 = vmul.f32 %v11242_v56, %v11241_v5  ;;  %v9344_v16 = vmul.f32 %v11242_v56, %v11239_v31  ;;  %v4247_v6 = vmul.f32 %v11247_v26, %v11245_v11  ;;  %v4269_v11 = vmul.f32 %v11247_v26, %v11250_v58 }
 0x6c6   :  { %v4079_v19 = vadd.f32 %v4075_v15, %v4069_v59  ;;  %v4080_v36 = vadd.f32 %v4076_v20, %v4070_v42  ;;  %v9352_v15 = vmul.f32 %v11242_v56, %v11243_v40  ;;  %v11244_v20 = vld [vmem:[#allocation148_spill] sm:$0xff]  ;;  %v11248_v59 = vld [vmem:[#allocation129_spill] sm:$0xff] }
 0x6c7   :  { %v9356_v43 = vmul.f32 %v11240_v3, %v11244_v20  ;;  %v9361_v54 = vmul.f32 %v11242_v56, %v11244_v20  ;;  %v4248_v42 = vmul.f32 %v11246_v8, %v11248_v59  ;;  %v4249_v31 = vmul.f32 %v11247_v26, %v11248_v59 }
 0x6c8   :  { %v4089_v30 = vadd.f32 %v4085_v22, %v4079_v19  ;;  %v4090_v39 = vadd.f32 %v4086_v14, %v4080_v36  ;;  %v11249_v19 = vld [vmem:[#allocation130_spill] sm:$0xff] }
 0x6c9   :  { %v4258_v36 = vmul.f32 %v11246_v8, %v11249_v19  ;;  %v4259_v5 = vmul.f32 %v11247_v26, %v11249_v19  ;;  %v4252_v40 = vrot.slane %v4248_v42, 2  ;;  %v4253_v20 = vrot.slane %v4249_v31, 2  ;;  %v11252_v8 = vld [vmem:[#allocation137_spill] sm:$0xff] }
 0x6ca   :  { %v4093_v22 = vadd.f32 %v4091_v38, %v4089_v30  ;;  %v4094_v14 = vadd.f32 %v4092_v37, %v4090_v39  ;;  %v4272_v30 = vrot.slane %v4268_v63, 6  ;;  %v4273_v39 = vrot.slane %v4269_v11, 6  ;;  %v11253_v63 = vld [vmem:[#allocation138_spill] sm:$0xff] }
 0x6cb   :  { %v4262_v45 = vrot.slane %v4258_v36, 4  ;;  %v4263_v59 = vrot.slane %v4259_v5, 4  ;;  %v4256_v38 = vadd.f32 %v4252_v40, %v4246_v2  ;;  %v4257_v37 = vadd.f32 %v4253_v20, %v4247_v6 }
 0x6cc   :  { %v4103_v50 = vadd.f32 %v4099_v44, %v4093_v22  ;;  %v4104_v9 = vadd.f32 %v4100_v25, %v4094_v14  ;;  %v4278_v42 = vmul.f32 %v8826_v10, %v11251_v62  ;;  %v4279_v31 = vmul.f32 %v8829_v32, %v11251_v62 }
 0x6cd   :  { %v4266_v19 = vadd.f32 %v4262_v45, %v4256_v38  ;;  %v4267_v12 = vadd.f32 %v4263_v59, %v4257_v37  ;;  %v4282_v44 = vmul.f32 %v8826_v10, %v11252_v8  ;;  %v4283_v25 = vmul.f32 %v8829_v32, %v11252_v8 }
 0x6ce   :  { %v4113_v27 = vadd.f32 %v4109_v41, %v4103_v50  ;;  %v4114_v46 = vadd.f32 %v4110_v33, %v4104_v9  ;;  %v4292_v41 = vmul.f32 %v8826_v10, %v11253_v63  ;;  %v4293_v33 = vmul.f32 %v8829_v32, %v11253_v63  ;;  %v11263_v63 = vld [vmem:[#allocation151_spill] sm:$0xff] }
 0x6cf   :  { %v4276_v9 = vadd.f32 %v4272_v30, %v4266_v19  ;;  %v4277_v50 = vadd.f32 %v4273_v39, %v4267_v12  ;;  %v4286_v6 = vrot.slane %v4282_v44, 2  ;;  %v4287_v62 = vrot.slane %v4283_v25, 2 }
 0x6d0   :  { %v4123_v58 = vadd.f32 %v4119_v4, %v4113_v27  ;;  %v4124_v2 = vadd.f32 %v4120_v48, %v4114_v46  ;;  %v4168_v14 = vrot.slane %v9344_v16, 2  ;;  %v4177_v36 = vrot.slane %v9348_v52, 4  ;;  %v11254_v4 = vld [vmem:[#allocation141_spill] sm:$0xff] }
 0x6d1   :  { %v4280_v5 = vadd.f32 %v4278_v42, %v4276_v9  ;;  %v4281_v8 = vadd.f32 %v4279_v31, %v4277_v50  ;;  %v4302_v48 = vmul.f32 %v8826_v10, %v11254_v4  ;;  %v4303_v46 = vmul.f32 %v8829_v32, %v11254_v4  ;;  %v11259_v42 = vld [vmem:[#allocation150_spill] sm:$0xff] }
 0x6d2   :  { %v4127_v45 = vadd.f32 %v4125_v61, %v4123_v58  ;;  %v4128_v22 = vadd.f32 %v4126_v60, %v4124_v2  ;;  %v11255_v27 = vrot.slane %v9295_v49, 2  ;;  %v11256_v12 = vrot.slane %v9299_v23, 2  ;;  %v11262_v2 = vld [vmem:[#allocation149_spill] sm:$0xff] }
 0x6d3   :  { %v4178_v61 = vrot.slane %v9352_v15, 4  ;;  %v4187_v60 = vrot.slane %v9356_v43, 6  ;;  %v4290_v16 = vadd.f32 %v4286_v6, %v4280_v5  ;;  %v4291_v52 = vadd.f32 %v4287_v62, %v4281_v8  ;;  %v11264_v8 = vld [vmem:[#allocation152_spill] sm:$0xff] }
 0x6d4   :  { %v4137_v40 = vadd.f32 %v11255_v27, %v4127_v45  ;;  %v4138_v20 = vadd.f32 %v11256_v12, %v4128_v22  ;;  %v4296_v11 = vrot.slane %v4292_v41, 4  ;;  %v4297_v59 = vrot.slane %v4293_v33, 4 }
 0x6d5   :  { %v11257_v38 = vrot.slane %v9303_v7, 4  ;;  %v11258_v30 = vrot.slane %v9307_v34, 4  ;;  %v4316_v49 = vmul.f32 %v8860_v51, %v11259_v42  ;;  %v4317_v23 = vmul.f32 %v8863_v17, %v11259_v42 }
 0x6d6   :  { %v4300_v31 = vadd.f32 %v4296_v11, %v4290_v16  ;;  %v4301_v15 = vadd.f32 %v4297_v59, %v4291_v52  ;;  %v4306_v19 = vrot.slane %v4302_v48, 6  ;;  %v4307_v43 = vrot.slane %v4303_v46, 6  ;;  %v11266_v52 = vld [vmem:[#allocation154_spill] sm:$0xff] }
 0x6d7   :  { %v4147_v37 = vadd.f32 %v11257_v38, %v4137_v40  ;;  %v4148_v39 = vadd.f32 %v11258_v30, %v4138_v20  ;;  %v11260_v44 = vrot.slane %v9311_v13, 6  ;;  %v11261_v58 = vrot.slane %v9315_v47, 6 }
 0x6d8   :  { %v4312_v34 = vmul.f32 %v8860_v51, %v11262_v2  ;;  %v4326_v41 = vmul.f32 %v8860_v51, %v11263_v63  ;;  %v4310_v33 = vadd.f32 %v4306_v19, %v4300_v31  ;;  %v4311_v9 = vadd.f32 %v4307_v43, %v4301_v15  ;;  %v11270_v15 = vld [vmem:[#allocation157_spill] sm:$0xff] }
 0x6d9   :  { %v4157_v25 = vadd.f32 %v11260_v44, %v4147_v37  ;;  %v4158_v7 = vadd.f32 %v11261_v58, %v4148_v39  ;;  %v4313_v50 = vmul.f32 %v8863_v17, %v11262_v2  ;;  %v4327_v6 = vmul.f32 %v8863_v17, %v11263_v63  ;;  %v11267_v37 = vld [vmem:[#allocation153_spill] sm:$0xff] }
 0x6da   :  { %v4320_v47 = vrot.slane %v4316_v49, 2  ;;  %v4321_v45 = vrot.slane %v4317_v23, 2  ;;  %v4314_v22 = vadd.f32 %v4312_v34, %v4310_v33  ;;  %v4336_v4 = vmul.f32 %v8860_v51, %v11264_v8 }
 0x6db   :  { %v4161_v13 = vadd.f32 %v9336_v29, %v4157_v25  ;;  %v4162_v62 = vadd.f32 %v9340_v55, %v4158_v7  ;;  %v4315_v5 = vadd.f32 %v4313_v50, %v4311_v9  ;;  %v4337_v48 = vmul.f32 %v8863_v17, %v11264_v8  ;;  %v11271_v7 = vld [vmem:[#allocation158_spill] sm:$0xff]  ;;  %v11272_v50 = vld [vmem:[#allocation160_spill] sm:$0xff]  ;;  %v11274_v8 = vld [vmem:[#allocation159_spill] sm:$0xff] }
 0x6dc   :  { %v11265_v46 = vrot.slane %v9332_v57, 2  ;;  %v4188_v12 = vrot.slane %v9361_v54, 6  ;;  %v4330_v20 = vrot.slane %v4326_v41, 4  ;;  %v4324_v29 = vadd.f32 %v4320_v47, %v4314_v22 }
 0x6dd   :  { %v4172_v40 = vadd.f32 %v4168_v14, %v4162_v62  ;;  %v4325_v16 = vadd.f32 %v4321_v45, %v4315_v5  ;;  %v4331_v55 = vrot.slane %v4327_v6, 4  ;;  %v4350_v11 = vmul.f32 %v8893_v24, %v11266_v52  ;;  %v11273_v62 = vld [vmem:[#allocation123_spill] sm:$0xff] }
 0x6de   :  { %v4171_v27 = vadd.f32 %v11265_v46, %v4161_v13  ;;  %v4346_v30 = vmul.f32 %v8893_v24, %v11267_v37  ;;  %v4351_v39 = vmul.f32 %v8902_v28, %v11266_v52  ;;  %v4334_v57 = vadd.f32 %v4330_v20, %v4324_v29 }
 0x6df   :  { %v4182_v38 = vadd.f32 %v4178_v61, %v4172_v40  ;;  %v4335_v42 = vadd.f32 %v4331_v55, %v4325_v16  ;;  %v4340_v14 = vrot.slane %v4336_v4, 6  ;;  %v4341_v49 = vrot.slane %v4337_v48, 6 }
 0x6e0   :  { %v4181_v59 = vadd.f32 %v4177_v36, %v4171_v27  ;;  %v4347_v31 = vmul.f32 %v8902_v28, %v11267_v37  ;;  %v4360_v36 = vmul.f32 %v8893_v24, %v11270_v15  ;;  %v4354_v43 = vrot.slane %v4350_v11, 2  ;;  %v11275_v27 = vld [vmem:[#allocation124_spill] sm:$0xff] }
 0x6e1   :  { %v9440_v23 = vadd.f32 %v4188_v12, %v4182_v38  ;;  %v4344_v61 = vadd.f32 %v4340_v14, %v4334_v57  ;;  %v4345_v19 = vadd.f32 %v4341_v49, %v4335_v42  ;;  %v4361_v44 = vmul.f32 %v8902_v28, %v11270_v15  ;;  %v11276_v38 = vld [vmem:[#allocation110_spill] sm:$0xff]  ;;  %v11277_v42 = vld [vmem:[#allocation111_spill] sm:$0xff] }
 0x6e2   :  { %v9438_v54 = vadd.f32 %v4187_v60, %v4181_v59  ;;  %v4355_v58 = vrot.slane %v4351_v39, 2  ;;  %v4370_v2 = vmul.f32 %v8893_v24, %v11271_v7  ;;  %v4371_v33 = vmul.f32 %v8902_v28, %v11271_v7 }
 0x6e3   :  { %11269 = vst [vmem:[#allocation54_spill] sm:$0xff] %v9440_v23  ;;  %v4194_v60 = vsel %vm753_vm8, %v9440_v23, 0.0  ;;  %v4348_v63 = vadd.f32 %v4346_v30, %v4344_v61  ;;  %v4349_v41 = vadd.f32 %v4347_v31, %v4345_v19  ;;  %v4364_v9 = vrot.slane %v4360_v36, 4  ;;  %v11278_v61 = vld [vmem:[#allocation207_spill] sm:$0xff] }
 0x6e4   :  { %11268 = vst [vmem:[#allocation50_spill] sm:$0xff] %v9438_v54  ;;  %v4193_v25 = vsel %vm753_vm8, %v9438_v54, 0.0  ;;  %v9458_v6 = vmul.f32 %v8910_v35, %v11272_v50  ;;  %v9462_v13 = vmul.f32 %v8915_v53, %v11272_v50  ;;  %v9466_v47 = vmul.f32 %v8910_v35, %v11273_v62 }
 0x6e5   :  { %v4195_v34 = vadd.f32 %v4194_v60, %v4193_v25  ;;  %v4358_v45 = vadd.f32 %v4354_v43, %v4348_v63  ;;  %v4359_v22 = vadd.f32 %v4355_v58, %v4349_v41  ;;  %v4365_v5 = vrot.slane %v4361_v44, 4  ;;  %v11279_v43 = vld [vmem:[#allocation216_spill] sm:$0xff]  ;;  %v11280_v25 = vld [vmem:[#allocation109_spill] sm:$0xff] }
 0x6e6   :  { %v4414_v4 = vmul.f32 %v8910_v35, %v11274_v8  ;;  %v4415_v48 = vmul.f32 %v8915_v53, %v11274_v8  ;;  %v9474_v46 = vmul.f32 %v8915_v53, %v11273_v62  ;;  %v9478_v40 = vmul.f32 %v8910_v35, %v11275_v27 }
 0x6e7   :  { %4196 = vadd.xlane.f32.xlu0 %v4195_v34  ;;  %v9482_v12 = vmul.f32 %v8915_v53, %v11275_v27  ;;  %v4368_v20 = vadd.f32 %v4364_v9, %v4358_v45  ;;  %v4369_v29 = vadd.f32 %v4365_v5, %v4359_v22  ;;  %v4374_v16 = vrot.slane %v4370_v2, 6  ;;  %v11281_v34 = vld [vmem:[#allocation112_spill] sm:$0xff] }
 0x6e8   :  { %v4375_v55 = vrot.slane %v4371_v33, 6  ;;  %v4422_v52 = vrot.slane %v9458_v6, 2  ;;  %v4423_v11 = vrot.slane %v9462_v13, 2  ;;  %v4432_v59 = vrot.slane %v9466_v47, 4  ;;  %v11282_v33 = vld [vmem:[#allocation213_spill] sm:$0xff]  ;;  %v11286_v45 = vld [vmem:[#allocation116_spill] sm:$0xff] }
 0x6e9   :  { %v9489_v37 = vmul.f32 %v8940_v1, %v11276_v38  ;;  %v4378_v30 = vadd.f32 %v4374_v16, %v4368_v20  ;;  %v9493_v57 = vmul.f32 %v8943_v18, %v11276_v38  ;;  %v9497_v14 = vmul.f32 %v8940_v1, %v11277_v42  ;;  %v11284_v6 = vld [vmem:[#allocation209_spill] sm:$0xff]  ;;  %v11290_v16 = vld [vmem:[#allocation211_spill] sm:$0xff]  ;;  %v11305_v5 = vld [vmem:[#allocation156_spill] sm:$0xff] }
 0x6ea   :  { %v4379_v39 = vadd.f32 %v4375_v55, %v4369_v29  ;;  %v4433_v49 = vrot.slane %v9474_v46, 4  ;;  %v4442_v31 = vrot.slane %v9478_v40, 6  ;;  %v4443_v15 = vrot.slane %v9482_v12, 6  ;;  %v11287_v46 = vld [vmem:[#allocation163_spill] sm:$0xff]  ;;  %v11288_v12 = vld [vmem:[#allocation210_spill] sm:$0xff] }
 0x6eb   :  { %v9504_v36 = vmul.f32 %v8943_v18, %v11277_v42  ;;  %v4382_v19 = vadd.f32 %v11278_v61, %v4378_v30  ;;  %v4448_v60 = vmul.f32 %v8940_v1, %v11280_v25  ;;  %v4449_v58 = vmul.f32 %v8943_v18, %v11280_v25  ;;  %v11292_v30 = vld [vmem:[#allocation164_spill] sm:$0xff] }
 0x6ec   :  { %v4383_v44 = vadd.f32 %v11279_v43, %v4379_v39  ;;  %v9516_v63 = vmul.f32 %v8940_v1, %v11281_v34  ;;  %v9520_v41 = vmul.f32 %v8943_v18, %v11281_v34  ;;  %v11283_v9 = vrot.slane %v11282_v33, 2  ;;  %v11293_v43 = vld [vmem:[#allocation115_spill] sm:$0xff]  ;;  %v11294_v34 = vld [vmem:[#allocation65_spill] sm:$0xff] }
 0x6ed   :  { %v11285_v13 = vrot.slane %v11284_v6, 2  ;;  %v9529_v22 = vmul.f32 %v11234_v0, %v11286_v45  ;;  %v9534_v8 = vmul.f32 %v11235_v21, %v11286_v45  ;;  %v9538_v27 = vmul.f32 %v11234_v0, %v11287_v46  ;;  %v11302_v45 = vld [vmem:[#allocation142_spill] sm:$0xff] }
 0x6ee   :  { %v4392_v50 = vadd.f32 %v11283_v9, %v4382_v19  ;;  %v9542_v40 = vmul.f32 %v11235_v21, %v11287_v46  ;;  %v11289_v20 = vrot.slane %v11288_v12, 4  ;;  %v11291_v55 = vrot.slane %v11290_v16, 4 }
 0x6ef   :  { %v4393_v62 = vadd.f32 %v11285_v13, %v4383_v44  ;;  %v9550_v39 = vmul.f32 %v11234_v0, %v11292_v30  ;;  %v9554_v42 = vmul.f32 %v11235_v21, %v11292_v30  ;;  %v9560_v44 = vmul.f32 %v11234_v0, %v11293_v43 }
 0x6f0   :  { %v4402_v29 = vadd.f32 %v11289_v20, %v4392_v50  ;;  %v9564_v25 = vmul.f32 %v11235_v21, %v11293_v43  ;;  %v11295_v33 = vrot.slane %v11294_v34, 6  ;;  %v11296_v50 = vld [vmem:[#allocation68_spill] sm:$0xff]  ;;  %v11298_v20 = vld [vmem:[#allocation166_spill] sm:$0xff]  ;;  %v11299_v34 = vld [vmem:[#allocation165_spill] sm:$0xff]  ;;  %v4207_v46 = vmul.f32 %v9440_v23, %v9440_v23 }
 0x6f1   :  { %v4403_v38 = vadd.f32 %v11291_v55, %v4393_v62  ;;  %v11297_v6 = vrot.slane %v11296_v50, 6  ;;  %v9576_v16 = vmul.f32 %v11240_v3, %v11298_v20  ;;  %v9580_v55 = vmul.f32 %v11242_v56, %v11298_v20  ;;  %v11301_v20 = vld [vmem:[#allocation168_spill] sm:$0xff]  ;;  %v11303_v62 = vld [vmem:[#allocation214_spill] sm:$0xff]  ;;  %v11306_v23 = vld [vmem:[#allocation169_spill] sm:$0xff] }
 0x6f2   :  { %v4412_v9 = vadd.f32 %v11295_v33, %v4402_v29  ;;  %v9586_v33 = vmul.f32 %v11240_v3, %v11299_v34  ;;  %v9590_v50 = vmul.f32 %v11242_v56, %v11299_v34  ;;  %v9603_v43 = vmul.f32 %v11240_v3, %v11301_v20 }
 0x6f3   :  { %v4413_v13 = vadd.f32 %v11297_v6, %v4403_v38  ;;  %v11300_v6 = vld [vmem:[#allocation167_spill] sm:$0xff]  ;;  %v4206_v34 = vmul.f32 %v9438_v54, %v9438_v54  ;;  %v4209_v38 = vsel %vm753_vm8, %v4207_v46, 0.0  ;;  %v4615_v47 = vmul.f32 %v11303_v62, %v11305_v5 }
 0x6f4   :  { %v4416_v29 = vadd.f32 %v4414_v4, %v4412_v9  ;;  %v9594_v12 = vmul.f32 %v11240_v3, %v11300_v6  ;;  %v9598_v4 = vmul.f32 %v11242_v56, %v11300_v6  ;;  %v4603_v6 = vmul.f32 %v11303_v62, %v11302_v45 }
 0x6f5   :  { %v4417_v30 = vadd.f32 %v4415_v48, %v4413_v13  ;;  %v4208_v13 = vsel %vm753_vm8, %v4206_v34, 0.0  ;;  %v4625_v34 = vmul.f32 %v11303_v62, %v11306_v23 }
 0x6f6   :  { %v4426_v48 = vadd.f32 %v4422_v52, %v4416_v29  ;;  %v11304_v29 = vld [vmem:[#allocation155_spill] sm:$0xff] }
 0x6f7   :  { %v4427_v9 = vadd.f32 %v4423_v11, %v4417_v30  ;;  %v4604_v11 = vmul.f32 %v11247_v26, %v11302_v45  ;;  %v4605_v30 = vmul.f32 %v11303_v62, %v11304_v29  ;;  %v4606_v61 = vmul.f32 %v11247_v26, %v11304_v29 }
 0x6f8   :  { %v4436_v19 = vadd.f32 %v4432_v59, %v4426_v48  ;;  %v4210_v59 = vadd.f32 %v4209_v38, %v4208_v13  ;;  %v4616_v45 = vmul.f32 %v11247_v26, %v11305_v5  ;;  %v4626_v29 = vmul.f32 %v11247_v26, %v11306_v23 }
 0x6f9   :  { %v4437_v52 = vadd.f32 %v4433_v49, %v4427_v9  ;;  %v4609_v49 = vrot.slane %v4605_v30, 2  ;;  %v4610_v48 = vrot.slane %v4606_v61, 2  ;;  %v4619_v9 = vrot.slane %v4615_v47, 4 }
 0x6fa   :  { %v4446_v2 = vadd.f32 %v4442_v31, %v4436_v19  ;;  %4211 = vadd.xlane.f32.xlu0 %v4210_v59  ;;  %v4620_v31 = vrot.slane %v4616_v45, 4  ;;  %v11307_v19 = vld [vmem:[#allocation170_spill] sm:$0xff]  ;;  %v11308_v38 = vrot.slane %v9489_v37, 2  ;;  %v11309_v47 = vrot.slane %v9493_v57, 2 }
 0x6fb   :  { %v4447_v7 = vadd.f32 %v4443_v15, %v4437_v52  ;;  %v4613_v3 = vadd.f32 %v4609_v49, %v4603_v6  ;;  %v4614_v21 = vadd.f32 %v4610_v48, %v4604_v11  ;;  %v4629_v15 = vrot.slane %v4625_v34, 6  ;;  %v11313_v11 = vld [vmem:[#allocation172_spill] sm:$0xff] }
 0x6fc   :  { %v4450_v54 = vadd.f32 %v4448_v60, %v4446_v2  ;;  %v4635_v61 = vmul.f32 %v8826_v10, %v11307_v19  ;;  %v4630_v60 = vrot.slane %v4626_v29, 6  ;;  %v11310_v2 = vld [vmem:[#allocation171_spill] sm:$0xff]  ;;  %v11311_v6 = vrot.slane %v9497_v14, 4 }
 0x6fd   :  { %v4451_v46 = vadd.f32 %v4449_v58, %v4447_v7  ;;  %v4623_v62 = vadd.f32 %v4619_v9, %v4613_v3  ;;  %v4624_v58 = vadd.f32 %v4620_v31, %v4614_v21  ;;  %v4636_v7 = vmul.f32 %v8829_v32, %v11307_v19  ;;  %v11316_v31 = vld [vmem:[#allocation173_spill] sm:$0xff] }
 0x6fe   :  { %v4460_v5 = vadd.f32 %v11308_v38, %v4450_v54  ;;  %v4639_v26 = vmul.f32 %v8826_v10, %v11310_v2  ;;  %v4640_v23 = vmul.f32 %v8829_v32, %v11310_v2  ;;  %v11312_v54 = vrot.slane %v9504_v36, 4 }
 0x6ff   :  { %v4461_v13 = vadd.f32 %v11309_v47, %v4451_v46  ;;  %v4633_v57 = vadd.f32 %v4629_v15, %v4623_v62  ;;  %v4649_v3 = vmul.f32 %v8826_v10, %v11313_v11  ;;  %v4634_v21 = vadd.f32 %v4630_v60, %v4624_v58 }
 0x700   :  { %v4470_v52 = vadd.f32 %v11311_v6, %v4460_v5  ;;  %v4643_v30 = vrot.slane %v4639_v26, 2  ;;  %v4644_v59 = vrot.slane %v4640_v23, 2  ;;  %v4650_v49 = vmul.f32 %v8829_v32, %v11313_v11 }
 0x701   :  { %v4471_v37 = vadd.f32 %v11312_v54, %v4461_v13  ;;  %v11314_v48 = vrot.slane %v9516_v63, 6  ;;  %v11315_v9 = vrot.slane %v9520_v41, 6  ;;  %v4534_v34 = vrot.slane %v9594_v12, 4  ;;  %v11323_v54 = vld [vmem:[#allocation176_spill] sm:$0xff] }
 0x702   :  { %v4637_v36 = vadd.f32 %v4635_v61, %v4633_v57  ;;  %v4541_v46 = vmul.f32 %v11242_v56, %v11301_v20  ;;  %v4638_v29 = vadd.f32 %v4636_v7, %v4634_v21  ;;  %v4659_v15 = vmul.f32 %v8826_v10, %v11316_v31  ;;  %v11319_v7 = vld [vmem:[#allocation175_spill] sm:$0xff] }
 0x703   :  { %v4480_v45 = vadd.f32 %v11314_v48, %v4470_v52  ;;  %v4481_v14 = vadd.f32 %v11315_v9, %v4471_v37  ;;  %v4660_v19 = vmul.f32 %v8829_v32, %v11316_v31  ;;  %v4653_v41 = vrot.slane %v4649_v3, 4  ;;  %v11326_v48 = vld [vmem:[#allocation177_spill] sm:$0xff] }
 0x704   :  { %v4647_v5 = vadd.f32 %v4643_v30, %v4637_v36  ;;  %v4535_v47 = vrot.slane %v9598_v4, 4  ;;  %v4648_v12 = vadd.f32 %v4644_v59, %v4638_v29  ;;  %v4654_v61 = vrot.slane %v4650_v49, 4 }
 0x705   :  { %v4484_v38 = vadd.f32 %v9560_v44, %v4480_v45  ;;  %v4485_v63 = vadd.f32 %v9564_v25, %v4481_v14  ;;  %v4663_v13 = vrot.slane %v4659_v15, 6  ;;  %v11317_v20 = vrot.slane %v9529_v22, 2  ;;  %v11320_v25 = vld [vmem:[#allocation174_spill] sm:$0xff] }
 0x706   :  { %v11318_v60 = vrot.slane %v9534_v8, 2  ;;  %v4657_v58 = vadd.f32 %v4653_v41, %v4647_v5  ;;  %v4673_v32 = vmul.f32 %v8860_v51, %v11319_v7  ;;  %v4658_v44 = vadd.f32 %v4654_v61, %v4648_v12  ;;  %v11327_v5 = vld [vmem:[#allocation179_spill] sm:$0xff] }
 0x707   :  { %v4494_v62 = vadd.f32 %v11317_v20, %v4484_v38  ;;  %v4664_v2 = vrot.slane %v4660_v19, 6  ;;  %v4669_v26 = vmul.f32 %v8860_v51, %v11320_v25  ;;  %v4674_v4 = vmul.f32 %v8863_v17, %v11319_v7  ;;  %v11331_v7 = vld [vmem:[#allocation180_spill] sm:$0xff] }
 0x708   :  { %v4495_v10 = vadd.f32 %v11318_v60, %v4485_v63  ;;  %v11321_v23 = vrot.slane %v9538_v27, 4  ;;  %v11322_v22 = vrot.slane %v9542_v40, 4  ;;  %v4667_v8 = vadd.f32 %v4663_v13, %v4657_v58 }
 0x709   :  { %v4683_v37 = vmul.f32 %v8860_v51, %v11323_v54  ;;  %v4668_v57 = vadd.f32 %v4664_v2, %v4658_v44  ;;  %v4670_v11 = vmul.f32 %v8863_v17, %v11320_v25  ;;  %v4677_v3 = vrot.slane %v4673_v32, 2 }
 0x70a   :  { %v4504_v6 = vadd.f32 %v11321_v23, %v4494_v62  ;;  %v4505_v52 = vadd.f32 %v11322_v22, %v4495_v10  ;;  %v4684_v21 = vmul.f32 %v8863_v17, %v11323_v54  ;;  %v11324_v30 = vrot.slane %v9550_v39, 6  ;;  %v11330_v62 = vld [vmem:[#allocation178_spill] sm:$0xff]  ;;  %v11332_v23 = vld [vmem:[#allocation181_spill] sm:$0xff] }
 0x70b   :  { %v11325_v27 = vrot.slane %v9554_v42, 6  ;;  %v4671_v40 = vadd.f32 %v4669_v26, %v4667_v8  ;;  %v4693_v45 = vmul.f32 %v8860_v51, %v11326_v48  ;;  %v4544_v9 = vrot.slane %v9603_v43, 6 }
 0x70c   :  { %v4514_v59 = vadd.f32 %v11324_v30, %v4504_v6  ;;  %v4672_v14 = vadd.f32 %v4670_v11, %v4668_v57  ;;  %v4678_v36 = vrot.slane %v4674_v4, 2  ;;  %v4694_v29 = vmul.f32 %v8863_v17, %v11326_v48 }
 0x70d   :  { %v4515_v49 = vadd.f32 %v11325_v27, %v4505_v52  ;;  %v4681_v39 = vadd.f32 %v4677_v3, %v4671_v40  ;;  %v4687_v19 = vrot.slane %v4683_v37, 4  ;;  %v4545_v38 = vrot.slane %v4541_v46, 6 }
 0x70e   :  { %v4518_v31 = vadd.f32 %v9586_v33, %v4514_v59  ;;  %v4682_v42 = vadd.f32 %v4678_v36, %v4672_v14  ;;  %v4688_v63 = vrot.slane %v4684_v21, 4  ;;  %v4707_v41 = vmul.f32 %v8893_v24, %v11327_v5  ;;  %v11333_v59 = vld [vmem:[#allocation182_spill] sm:$0xff]  ;;  %v11337_v36 = vld [vmem:[#allocation184_spill] sm:$0xff] }
 0x70f   :  { %v4519_v15 = vadd.f32 %v9590_v50, %v4515_v49  ;;  %v11328_v51 = vrot.slane %v9576_v16, 2  ;;  %v11329_v12 = vrot.slane %v9580_v55, 2  ;;  %v4691_v13 = vadd.f32 %v4687_v19, %v4681_v39 }
 0x710   :  { %v4697_v17 = vrot.slane %v4693_v45, 6  ;;  %v4692_v20 = vadd.f32 %v4688_v63, %v4682_v42  ;;  %v4698_v33 = vrot.slane %v4694_v29, 6  ;;  %v4703_v50 = vmul.f32 %v8893_v24, %v11330_v62  ;;  %v11338_v42 = vld [vmem:[#allocation185_spill] sm:$0xff] }
 0x711   :  { %v4528_v43 = vadd.f32 %v11328_v51, %v4518_v31  ;;  %v4529_v61 = vadd.f32 %v11329_v12, %v4519_v15  ;;  %v4708_v46 = vmul.f32 %v8902_v28, %v11327_v5  ;;  %v4717_v16 = vmul.f32 %v8893_v24, %v11331_v7 }
 0x712   :  { %v4701_v58 = vadd.f32 %v4697_v17, %v4691_v13  ;;  %v4702_v32 = vadd.f32 %v4698_v33, %v4692_v20  ;;  %v4704_v55 = vmul.f32 %v8902_v28, %v11330_v62  ;;  %v4711_v44 = vrot.slane %v4707_v41, 2  ;;  %v11339_v33 = vld [vmem:[#allocation186_spill] sm:$0xff] }
 0x713   :  { %v4538_v60 = vadd.f32 %v4534_v34, %v4528_v43  ;;  %v4539_v10 = vadd.f32 %v4535_v47, %v4529_v61  ;;  %v4718_v2 = vmul.f32 %v8902_v28, %v11331_v7  ;;  %v4727_v34 = vmul.f32 %v8893_v24, %v11332_v23  ;;  %v11334_v24 = vld [vmem:[#allocation204_spill] sm:$0xff] }
 0x714   :  { %v4705_v4 = vadd.f32 %v4703_v50, %v4701_v58  ;;  %v4706_v47 = vadd.f32 %v4704_v55, %v4702_v32  ;;  %v4712_v6 = vrot.slane %v4708_v46, 2  ;;  %v4728_v22 = vmul.f32 %v8902_v28, %v11332_v23  ;;  %v11335_v28 = vld [vmem:[#allocation205_spill] sm:$0xff]  ;;  %v11340_v58 = vld [vmem:[#allocation187_spill] sm:$0xff] }
 0x715   :  { %v9709_v25 = vadd.f32 %v4544_v9, %v4538_v60  ;;  %v9711_v26 = vadd.f32 %v4545_v38, %v4539_v10  ;;  %v4721_v37 = vrot.slane %v4717_v16, 4  ;;  %v4722_v3 = vrot.slane %v4718_v2, 4  ;;  %v11336_v9 = vld [vmem:[#allocation183_spill] sm:$0xff]  ;;  %v11341_v16 = vld [vmem:[#allocation188_spill] sm:$0xff] }
 0x716   :  { %v4715_v54 = vadd.f32 %v4711_v44, %v4705_v4  ;;  %v4716_v11 = vadd.f32 %v4712_v6, %v4706_v47  ;;  %v4731_v30 = vrot.slane %v4727_v34, 6  ;;  %v4741_v27 = vmul.f32 %v11334_v24, %v11333_v59  ;;  %v11342_v34 = vld [vmem:[#allocation189_spill] sm:$0xff] }
 0x717   :  { %v4550_v52 = vsel %vm753_vm8, %v9709_v25, 0.0  ;;  %v4551_v8 = vsel %vm753_vm8, %v9711_v26, 0.0  ;;  %v4732_v40 = vrot.slane %v4728_v22, 6  ;;  %v4742_v48 = vmul.f32 %v11335_v28, %v11333_v59 }
 0x718   :  { %v4552_v57 = vadd.f32 %v4551_v8, %v4550_v52  ;;  %v4725_v21 = vadd.f32 %v4721_v37, %v4715_v54  ;;  %v4726_v49 = vadd.f32 %v4722_v3, %v4716_v11  ;;  %v4737_v14 = vmul.f32 %v11334_v24, %v11336_v9 }
 0x719   :  { %v4751_v29 = vmul.f32 %v11334_v24, %v11337_v36  ;;  %v4738_v15 = vmul.f32 %v11335_v28, %v11336_v9  ;;  %v4752_v39 = vmul.f32 %v11335_v28, %v11337_v36  ;;  %v4745_v38 = vrot.slane %v4741_v27, 2 }
 0x71a   :  { %4553 = vadd.xlane.f32.xlu1 %v4552_v57  ;;  %v4735_v45 = vadd.f32 %v4731_v30, %v4725_v21  ;;  %v4736_v31 = vadd.f32 %v4732_v40, %v4726_v49  ;;  %v4761_v63 = vmul.f32 %v11334_v24, %v11338_v42  ;;  %v4746_v41 = vrot.slane %v4742_v48, 2  ;;  %v11343_v30 = vld [vmem:[#allocation190_spill] sm:$0xff]  ;;  %v11344_v40 = vld [vmem:[#allocation191_spill] sm:$0xff] }
 0x71b   :  { %v4762_v51 = vmul.f32 %v11335_v28, %v11338_v42  ;;  %v4755_v12 = vrot.slane %v4751_v29, 4  ;;  %v4756_v13 = vrot.slane %v4752_v39, 4  ;;  %v4775_v62 = vmul.f32 %v8910_v35, %v11339_v33 }
 0x71c   :  { %v4739_v19 = vadd.f32 %v4737_v14, %v4735_v45  ;;  %v4740_v5 = vadd.f32 %v4738_v15, %v4736_v31  ;;  %v4765_v20 = vrot.slane %v4761_v63, 6  ;;  %v4776_v60 = vmul.f32 %v8915_v53, %v11339_v33  ;;  %v11345_v45 = vld [vmem:[#allocation192_spill] sm:$0xff] }
 0x71d   :  { %v4766_v46 = vrot.slane %v4762_v51, 6  ;;  %v4771_v7 = vmul.f32 %v8910_v35, %v11340_v58  ;;  %v4785_v32 = vmul.f32 %v8910_v35, %v11341_v16  ;;  %v4772_v44 = vmul.f32 %v8915_v53, %v11340_v58 }
 0x71e   :  { %v4749_v43 = vadd.f32 %v4745_v38, %v4739_v19  ;;  %v4750_v61 = vadd.f32 %v4746_v41, %v4740_v5  ;;  %v4786_v2 = vmul.f32 %v8915_v53, %v11341_v16  ;;  %v4779_v23 = vrot.slane %v4775_v62, 2  ;;  %v11346_v19 = vld [vmem:[#allocation193_spill] sm:$0xff] }
 0x71f   :  { %v4795_v47 = vmul.f32 %v8910_v35, %v11342_v34  ;;  %v4796_v6 = vmul.f32 %v8915_v53, %v11342_v34  ;;  %v4780_v52 = vrot.slane %v4776_v60, 2  ;;  %v4789_v54 = vrot.slane %v4785_v32, 4 }
 0x720   :  { %v4759_v17 = vadd.f32 %v4755_v12, %v4749_v43  ;;  %v4760_v50 = vadd.f32 %v4756_v13, %v4750_v61  ;;  %v4790_v57 = vrot.slane %v4786_v2, 4  ;;  %v4809_v59 = vmul.f32 %v8940_v1, %v11343_v30 }
 0x721   :  { %v4799_v3 = vrot.slane %v4795_v47, 6  ;;  %v4800_v21 = vrot.slane %v4796_v6, 6  ;;  %v4810_v27 = vmul.f32 %v8943_v18, %v11343_v30  ;;  %v4563_v35 = vmul.f32 %v9709_v25, %v9709_v25 }
 0x722   :  { %v4769_v10 = vadd.f32 %v4765_v20, %v4759_v17  ;;  %v4770_v55 = vadd.f32 %v4766_v46, %v4760_v50  ;;  %v4564_v53 = vmul.f32 %v9711_v26, %v9711_v26  ;;  %v4805_v28 = vmul.f32 %v8940_v1, %v11344_v40  ;;  %v11347_v20 = vld [vmem:[#allocation194_spill] sm:$0xff] }
 0x723   :  { %v4806_v48 = vmul.f32 %v8943_v18, %v11344_v40  ;;  %v4819_v9 = vmul.f32 %v8940_v1, %v11345_v45  ;;  %v4820_v36 = vmul.f32 %v8943_v18, %v11345_v45  ;;  %v4565_v29 = vsel %vm753_vm8, %v4563_v35, 0.0 }
 0x724   :  { %v4773_v4 = vadd.f32 %v4771_v7, %v4769_v10  ;;  %v4774_v22 = vadd.f32 %v4772_v44, %v4770_v55  ;;  %v4566_v31 = vsel %vm753_vm8, %v4564_v53, 0.0  ;;  %v4813_v39 = vrot.slane %v4809_v59, 2  ;;  %v11349_v10 = vld [vmem:[#allocation195_spill] sm:$0xff]  ;;  %v11355_v53 = vld [vmem:[#allocation200_spill] sm:$0xff] }
 0x725   :  { %v4829_v38 = vmul.f32 %v8940_v1, %v11346_v19  ;;  %v4567_v42 = vadd.f32 %v4566_v31, %v4565_v29  ;;  %v4814_v5 = vrot.slane %v4810_v27, 2  ;;  %v4830_v41 = vmul.f32 %v8943_v18, %v11346_v19  ;;  %v11348_v1 = vld [vmem:[#allocation219_spill] sm:$0xff]  ;;  %v11350_v18 = vld [vmem:[#allocation196_spill] sm:$0xff] }
 0x726   :  { %v4783_v8 = vadd.f32 %v4779_v23, %v4773_v4  ;;  %v4784_v37 = vadd.f32 %v4780_v52, %v4774_v22  ;;  %v4823_v43 = vrot.slane %v4819_v9, 4  ;;  %v4824_v61 = vrot.slane %v4820_v36, 4  ;;  %v11351_v4 = vld [vmem:[#allocation197_spill] sm:$0xff]  ;;  %v11354_v27 = vld [vmem:[#allocation199_spill] sm:$0xff] }
 0x727   :  { %4568 = vadd.xlane.f32.xlu0 %v4567_v42  ;;  %v4833_v17 = vrot.slane %v4829_v38, 6  ;;  %v4843_v33 = vmul.f32 %v11234_v0, %v11347_v20  ;;  %v4834_v50 = vrot.slane %v4830_v41, 6  ;;  %v4844_v46 = vmul.f32 %v11348_v1, %v11347_v20 }
 0x728   :  { %v4793_v11 = vadd.f32 %v4789_v54, %v4783_v8  ;;  %v4794_v24 = vadd.f32 %v4790_v57, %v4784_v37  ;;  %v4839_v58 = vmul.f32 %v11234_v0, %v11349_v10  ;;  %v4853_v7 = vmul.f32 %v11234_v0, %v11350_v18 }
 0x729   :  { %v4840_v32 = vmul.f32 %v11348_v1, %v11349_v10  ;;  %v4854_v55 = vmul.f32 %v11348_v1, %v11350_v18  ;;  %v4847_v2 = vrot.slane %v4843_v33, 2  ;;  %v4863_v23 = vmul.f32 %v11234_v0, %v11351_v4 }
 0x72a   :  { %v4803_v49 = vadd.f32 %v4799_v3, %v4793_v11  ;;  %v4804_v14 = vadd.f32 %v4800_v21, %v4794_v24  ;;  %v4848_v47 = vrot.slane %v4844_v46, 2  ;;  %v4864_v6 = vmul.f32 %v11348_v1, %v11351_v4  ;;  %v11352_v11 = vld [vmem:[#allocation198_spill] sm:$0xff]  ;;  %v11353_v3 = vld [vmem:[#allocation221_spill] sm:$0xff] }
 0x72b   :  { %v4857_v52 = vrot.slane %v4853_v7, 4  ;;  %v4858_v54 = vrot.slane %v4854_v55, 4  ;;  %v4867_v57 = vrot.slane %v4863_v23, 6  ;;  %v4877_v21 = vmul.f32 %v11353_v3, %v11352_v11 }
 0x72c   :  { %v4807_v15 = vadd.f32 %v4805_v28, %v4803_v49  ;;  %v4808_v63 = vadd.f32 %v4806_v48, %v4804_v14  ;;  %v4868_v59 = vrot.slane %v4864_v6, 6  ;;  %v4878_v24 = vmul.f32 %v11242_v56, %v11352_v11  ;;  %v11356_v14 = vld [vmem:[#allocation201_spill] sm:$0xff] }
 0x72d   :  { %v4873_v35 = vmul.f32 %v11353_v3, %v11354_v27  ;;  %v4887_v49 = vmul.f32 %v11353_v3, %v11355_v53  ;;  %v4874_v28 = vmul.f32 %v11242_v56, %v11354_v27  ;;  %v4888_v48 = vmul.f32 %v11242_v56, %v11355_v53 }
 0x72e   :  { %v4817_v51 = vadd.f32 %v4813_v39, %v4807_v15  ;;  %v4818_v12 = vadd.f32 %v4814_v5, %v4808_v63  ;;  %v4881_v9 = vrot.slane %v4877_v21, 2  ;;  %v4897_v36 = vmul.f32 %v11353_v3, %v11356_v14 }
 0x72f   :  { %v4882_v31 = vrot.slane %v4878_v24, 2  ;;  %v4898_v15 = vmul.f32 %v11242_v56, %v11356_v14  ;;  %v4891_v19 = vrot.slane %v4887_v49, 4  ;;  %v4892_v42 = vrot.slane %v4888_v48, 4  ;;  %v11357_v48 = vld [vmem:[#allocation202_spill] sm:$0xff] }
 0x730   :  { %v4827_v13 = vadd.f32 %v4823_v43, %v4817_v51  ;;  %v4828_v62 = vadd.f32 %v4824_v61, %v4818_v12  ;;  %v4901_v5 = vrot.slane %v4897_v36, 6 }
 0x731   :  { %v4902_v51 = vrot.slane %v4898_v15, 6 }
 0x732   :  { %v4837_v60 = vadd.f32 %v4833_v17, %v4827_v13  ;;  %v4838_v16 = vadd.f32 %v4834_v50, %v4828_v62 }
 0x734   :  { %v4841_v44 = vadd.f32 %v4839_v58, %v4837_v60  ;;  %v4842_v34 = vadd.f32 %v4840_v32, %v4838_v16 }
 0x736   :  { %v4851_v22 = vadd.f32 %v4847_v2, %v4841_v44  ;;  %v4852_v8 = vadd.f32 %v4848_v47, %v4842_v34 }
 0x738   :  { %v4861_v37 = vadd.f32 %v4857_v52, %v4851_v22  ;;  %v4862_v30 = vadd.f32 %v4858_v54, %v4852_v8 }
 0x73a   :  { %v4871_v0 = vadd.f32 %v4867_v57, %v4861_v37  ;;  %v4872_v40 = vadd.f32 %v4868_v59, %v4862_v30 }
 0x73c   :  { %v4875_v45 = vadd.f32 %v4873_v35, %v4871_v0  ;;  %v4876_v29 = vadd.f32 %v4874_v28, %v4872_v40 }
 0x73e   :  { %v4885_v39 = vadd.f32 %v4881_v9, %v4875_v45  ;;  %v4886_v38 = vadd.f32 %v4882_v31, %v4876_v29  ;;  %v11358_v9 = vld [vmem:[#allocation203_spill] sm:$0xff] }
 0x740   :  { %v4895_v63 = vadd.f32 %v4891_v19, %v4885_v39  ;;  %v4896_v41 = vadd.f32 %v4892_v42, %v4886_v38 }
 0x742   :  { %v9807_v43 = vadd.f32 %v4901_v5, %v4895_v63  ;;  %v9809_v12 = vadd.f32 %v4902_v51, %v4896_v41 }
 0x744   :  { %v4907_v61 = vsel %vm753_vm8, %v9807_v43, 0.0  ;;  %v4920_v13 = vmul.f32 %v9807_v43, %v9807_v43  ;;  %v4908_v56 = vsel %vm753_vm8, %v9809_v12, 0.0  ;;  %v4921_v17 = vmul.f32 %v9809_v12, %v9809_v12 }
 0x745   :  { %v4909_v20 = vadd.f32 %v4908_v56, %v4907_v61 }
 0x746   :  { %v4922_v33 = vsel %vm753_vm8, %v4920_v13, 0.0  ;;  %v4923_v62 = vsel %vm753_vm8, %v4921_v17, 0.0  ;;  %v3846_v1 = vpop.xlane.xlu0 %3845 }
 0x747   :  { %4910 = vadd.xlane.f32.xlu1 %v4909_v20  ;;  %v4924_v50 = vadd.f32 %v4923_v62, %v4922_v33  ;;  %v3847_v60 = vrot.slane %v3846_v1, 4 }
 0x748   :  { %v3861_v46 = vpop.xlane.xlu1 %3860 }
 0x749   :  { %4925 = vadd.xlane.f32.xlu0 %v4924_v50  ;;  %v3862_v10 = vrot.slane %v3861_v46, 4  ;;  %v3848_v58 = vadd.f32 %v3847_v60, %v3846_v1  ;;  %v11359_v60 = vld [vmem:[#allocation50_spill] sm:$0xff] }
 0x74b   :  { %v3863_v18 = vadd.f32 %v3862_v10, %v3861_v46  ;;  %v3849_v7 = vrot.slane %v3848_v58, 2 }
 0x74d   :  { %v3864_v16 = vrot.slane %v3863_v18, 2  ;;  %v3850_v32 = vadd.f32 %v3849_v7, %v3848_v58  ;;  %v11360_v58 = vld [vmem:[#allocation54_spill] sm:$0xff] }
 0x74f   :  { %v3865_v55 = vadd.f32 %v3864_v16, %v3863_v18  ;;  %v3851_v44 = vrot.slane %v3850_v32, 1 }
 0x751   :  { %v3866_v2 = vrot.slane %v3865_v55, 1  ;;  %v3852_v4 = vadd.f32 %v3851_v44, %v3850_v32 }
 0x753   :  { %v3867_v23 = vadd.f32 %v3866_v2, %v3865_v55  ;;  %5176 = vpush %v3852_v4 }
 0x755   :  { %5178 = vpush %v3867_v23 }
 0x774   :  { %v4197_v34 = vpop.xlane.xlu0 %4196 }
 0x775   :  { %v4198_v6 = vrot.slane %v4197_v34, 4 }
 0x777   :  { %v4199_v52 = vadd.f32 %v4198_v6, %v4197_v34 }
 0x779   :  { %v4200_v54 = vrot.slane %v4199_v52, 2 }
 0x77b   :  { %v4201_v11 = vadd.f32 %v4200_v54, %v4199_v52 }
 0x77d   :  { %v4202_v21 = vrot.slane %v4201_v11, 1 }
 0x77f   :  { %v4203_v24 = vadd.f32 %v4202_v21, %v4201_v11 }
 0x784   :  { %s5177_s15 = spop %5176 }
 0x785   :  { %s9821_s8 = smul.f32 0.001953125, %s5177_s15 }
 0x786   :  { %s5179_s26 = spop %5178 }
 0x787   :  { %v4212_v47 = vpop.xlane.xlu0 %4211  ;;  %s3869_s27 = smul.f32 0.001953125, %s5179_s26 }
 0x788   :  { %v4213_v22 = vrot.slane %v4212_v47, 4  ;;  %s3870_s6 = smul.f32 %s9821_s8, %s9821_s8 }
 0x78a   :  { %v4214_v8 = vadd.f32 %v4213_v22, %v4212_v47  ;;  %s3871_s16 = ssub.f32 %s3869_s27, %s3870_s6 }
 0x78c   :  { %s3872_s5 = sadd.f32 1e-05, %s3871_s16  ;;  %v4215_v37 = vrot.slane %v4214_v8, 2 }
 0x78e   :  { %v3873_v57 = vstv %s3872_s5  ;;  %v4216_v3 = vadd.f32 %v4215_v37, %v4214_v8 }
 0x78f   :  { %5231 = vrsqrt.f32 %v3873_v57 }
 0x790   :  { %v4217_v30 = vrot.slane %v4216_v3, 1 }
 0x792   :  { %v4218_v0 = vadd.f32 %v4217_v30, %v4216_v3 }
 0x799   :  { %v5232_v59 = vpop.eup %5231 }
 0x79a   :  { %5180 = vpush %v5232_v59 }
 0x79b   :  { %5182 = vpush %v4203_v24 }
 0x79c   :  { %5184 = vpush %v4218_v0 }
 0x7a7   :  { %v4554_v27 = vpop.xlane.xlu1 %4553 }
 0x7a8   :  { %v4555_v53 = vrot.slane %v4554_v27, 4 }
 0x7aa   :  { %v4556_v28 = vadd.f32 %v4555_v53, %v4554_v27 }
 0x7ac   :  { %v4557_v39 = vrot.slane %v4556_v28, 2 }
 0x7ae   :  { %v4558_v5 = vadd.f32 %v4557_v39, %v4556_v28 }
 0x7b0   :  { %v4559_v51 = vrot.slane %v4558_v5, 1 }
 0x7b2   :  { %v4560_v56 = vadd.f32 %v4559_v51, %v4558_v5 }
 0x7b4   :  { %v4569_v35 = vpop.xlane.xlu0 %4568 }
 0x7b5   :  { %v4570_v49 = vrot.slane %v4569_v35, 4 }
 0x7b7   :  { %v4571_v36 = vadd.f32 %v4570_v49, %v4569_v35 }
 0x7b9   :  { %v4572_v42 = vrot.slane %v4571_v36, 2 }
 0x7bb   :  { %v4573_v41 = vadd.f32 %v4572_v42, %v4571_v36 }
 0x7bd   :  { %v4574_v61 = vrot.slane %v4573_v41, 1 }
 0x7bf   :  { %v4575_v17 = vadd.f32 %v4574_v61, %v4573_v41 }
 0x7cb   :  { %s5181_s3 = spop %5180 }
 0x7cc   :  { %s3876_s1 = smul.f32 %s5181_s3, %s7377_s11  ;;  %s5183_s24 = spop %5182 }
 0x7cd   :  { %s9826_s29 = smul.f32 0.001953125, %s5183_s24  ;;  %s5185_s25 = spop %5184 }
 0x7ce   :  { %s3877_s14 = smul.f32 %s3876_s1, %s9821_s8  ;;  %v3879_v40 = vstv %s3876_s1 }
 0x7cf   :  { %s4221_s30 = smul.f32 %s9826_s29, %s9826_s29  ;;  %v3880_v45 = vmul.f32 %v3879_v40, %v11357_v48  ;;  %v3881_v14 = vmul.f32 %v3879_v40, %v11358_v9 }
 0x7d0   :  { %s3878_s12 = ssub.f32 %s7379_s13, %s3877_s14  ;;  %s4220_s9 = smul.f32 0.001953125, %s5185_s25 }
 0x7d2   :  { %v3882_v29 = vstv %s3878_s12  ;;  %s4222_s11 = ssub.f32 %s4220_s9, %s4221_s30  ;;  %s5371_s9 = smov [#allocation13]  }
 0x7d3   :  { %v3883_v31 = vadd.f32 %v3882_v29, %v3880_v45  ;;  %v3884_v15 = vadd.f32 %v3882_v29, %v3881_v14 }
 0x7d4   :  { %s4223_s4 = sadd.f32 1e-05, %s4222_s11  ;;  %v4911_v20 = vpop.xlane.xlu1 %4910  ;;  %s4966_s11 = sshll.u32 %s5371_s9, 4  ;;  %s4967_s11 = int_to_ptr.vmem [resolvable:$true] %s4966_s11 }
 0x7d5   :  { %v3885_v19 = vmax.f32 %v3883_v31, 0.0  ;;  %v3886_v38 = vmax.f32 %v3884_v15, 0.0  ;;  %v4912_v62 = vrot.slane %v4911_v20, 4  ;;  %p5328_p2 = scmp.lt.s32.totalorder %s4967_s11, %s4967_s11 }
 0x7d6   :  { %v4224_v63 = vstv %s4223_s4  ;;  %v4926_v33 = vpop.xlane.xlu0 %4925 }
 0x7d7   :  { %3887 = vst [vmem:[#allocation13] sm:$0x3] %v3885_v19  ;;  %3888 = vst [vmem:[#allocation13 + $0x8] sm:$0x3] %v3886_v38  ;;  %5233 = vrsqrt.f32 %v4224_v63  ;;  %v4927_v50 = vrot.slane %v4926_v33, 4  ;;  %v4913_v46 = vadd.f32 %v4912_v62, %v4911_v20 }
 0x7d9   :  { %v4928_v7 = vadd.f32 %v4927_v50, %v4926_v33  ;;  %v4914_v44 = vrot.slane %v4913_v46, 2 }
 0x7db   :  { %v4929_v23 = vrot.slane %v4928_v7, 2  ;;  %v4915_v22 = vadd.f32 %v4914_v44, %v4913_v46 }
 0x7dd   :  { %v4930_v52 = vadd.f32 %v4929_v23, %v4928_v7  ;;  %v4916_v8 = vrot.slane %v4915_v22, 1 }
 0x7df   :  { %v4931_v54 = vrot.slane %v4930_v52, 1  ;;  %v4917_v57 = vadd.f32 %v4916_v8, %v4915_v22 }
 0x7e1   :  { %v5234_v13 = vpop.eup %5233  ;;  %v4932_v11 = vadd.f32 %v4931_v54, %v4930_v52 }
 0x7e2   :  { %5186 = vpush %v5234_v13 }
 0x7e3   :  { %5188 = vpush %v4560_v56 }
 0x7e4   :  { %5190 = vpush %v4575_v17 }
 0x813   :  { %s5187_s13 = spop %5186 }
 0x814   :  { %s4227_s10 = smul.f32 %s5187_s13, %s7390_s23  ;;  %s5189_s19 = spop %5188 }
 0x815   :  { %s9835_s28 = smul.f32 0.001953125, %s5189_s19  ;;  %s5191_s7 = spop %5190 }
 0x816   :  { %s4228_s2 = smul.f32 %s4227_s10, %s9826_s29  ;;  %v4230_v1 = vstv %s4227_s10 }
 0x817   :  { %s4578_s22 = smul.f32 %s9835_s28, %s9835_s28  ;;  %v4231_v10 = vmul.f32 %v4230_v1, %v11359_v60  ;;  %v4232_v18 = vmul.f32 %v4230_v1, %v11360_v58 }
 0x818   :  { %s4229_s15 = ssub.f32 %s7392_s21, %s4228_s2  ;;  %s4577_s8 = smul.f32 0.001953125, %s5191_s7 }
 0x81a   :  { %v4233_v16 = vstv %s4229_s15  ;;  %s4579_s23 = ssub.f32 %s4577_s8, %s4578_s22 }
 0x81b   :  { %v4234_v32 = vadd.f32 %v4233_v16, %v4231_v10  ;;  %v4235_v55 = vadd.f32 %v4233_v16, %v4232_v18 }
 0x81c   :  { %s4580_s26 = sadd.f32 1e-05, %s4579_s23 }
 0x81d   :  { %v4236_v2 = vmax.f32 %v4234_v32, 0.0  ;;  %v4237_v4 = vmax.f32 %v4235_v55, 0.0 }
 0x81e   :  { %v4581_v34 = vstv %s4580_s26 }
 0x81f   :  { %v4240_v47 = vrot.slane %v4236_v2, 6  ;;  %v4241_v6 = vrot.slane %v4237_v4, 6  ;;  %5235 = vrsqrt.f32 %v4581_v34 }
 0x821   :  { %4244 = vst [vmem:[#allocation13] sm:$0xc] %v4240_v47  ;;  %4245 = vst [vmem:[#allocation13 + $0x8] sm:$0xc] %v4241_v6 }
 0x829   :  { %v5236_v37 = vpop.eup %5235 }
 0x82a   :  { %5192 = vpush %v5236_v37 }
 0x82b   :  { %5194 = vpush %v4917_v57 }
 0x82c   :  { %5196 = vpush %v4932_v11 }
 0x85b   :  { %s5193_s21 = spop %5192 }
 0x85c   :  { %s4584_s27 = smul.f32 %s5193_s21, %s7403_s17  ;;  %s5195_s6 = spop %5194 }
 0x85d   :  { %s9844_s16 = smul.f32 0.001953125, %s5195_s6  ;;  %s5197_s5 = spop %5196 }
 0x85e   :  { %s4585_s3 = smul.f32 %s4584_s27, %s9835_s28  ;;  %v4587_v3 = vstv %s4584_s27 }
 0x85f   :  { %s4935_s1 = smul.f32 %s9844_s16, %s9844_s16  ;;  %v4588_v21 = vmul.f32 %v4587_v3, %v9709_v25  ;;  %v4589_v30 = vmul.f32 %v4587_v3, %v9711_v26 }
 0x860   :  { %s4586_s24 = ssub.f32 %s7405_s20, %s4585_s3  ;;  %s4934_s29 = smul.f32 0.001953125, %s5197_s5 }
 0x862   :  { %v4590_v59 = vstv %s4586_s24  ;;  %s4936_s25 = ssub.f32 %s4934_s29, %s4935_s1 }
 0x863   :  { %v4591_v24 = vadd.f32 %v4590_v59, %v4588_v21  ;;  %v4592_v0 = vadd.f32 %v4590_v59, %v4589_v30 }
 0x864   :  { %s4937_s17 = sadd.f32 1e-05, %s4936_s25 }
 0x865   :  { %v4593_v27 = vmax.f32 %v4591_v24, 0.0  ;;  %v4594_v35 = vmax.f32 %v4592_v0, 0.0 }
 0x866   :  { %v4938_v53 = vstv %s4937_s17 }
 0x867   :  { %v4597_v49 = vrot.slane %v4593_v27, 4  ;;  %v4598_v40 = vrot.slane %v4594_v35, 4  ;;  %5237 = vrsqrt.f32 %v4938_v53 }
 0x869   :  { %4601 = vst [vmem:[#allocation13] sm:$0x30] %v4597_v49  ;;  %4602 = vst [vmem:[#allocation13 + $0x8] sm:$0x30] %v4598_v40 }
 0x871   :  { %v5238_v28 = vpop.eup %5237 }
 0x872   :  { %5198 = vpush %v5238_v28 }
 0x8a3   :  { %s5199_s20 = spop %5198 }
 0x8a4   :  { %s4941_s14 = smul.f32 %s5199_s20, %s7416_s0  ;;  %s5323_s0 = scalar_lea.vmem %s4967_s11, 256 }
 0x8a5   :  { %p5324_p1 = scmp.ne.s32.totalorder %s4967_s11, %s5323_s0  ;;  %p5329_p3 = scmp.lt.s32.totalorder %s5323_s0, %s5323_s0 }
 0x8a6   :  { %s4942_s30 = smul.f32 %s4941_s14, %s9844_s16  ;;  %v4944_v25 = vstv %s4941_s14 }
 0x8a7   :  { %v4945_v26 = vmul.f32 %v4944_v25, %v9807_v43  ;;  %v4946_v48 = vmul.f32 %v4944_v25, %v9809_v12  ;;  %p5330_p4 = por %p5329_p3, %p5328_p2 }
 0x8a8   :  { %s4943_s12 = ssub.f32 %s7418_s18, %s4942_s30 }
 0x8a9   :  { %p5331_p5 = pnand %p5330_p4, %p5324_p1 }
 0x8aa   :  { %v4947_v45 = vstv %s4943_s12 }
 0x8ab   :  { %v4948_v9 = vadd.f32 %v4947_v45, %v4945_v26  ;;  %v4949_v14 = vadd.f32 %v4947_v45, %v4946_v48 }
 0x8ad   :  { %v4950_v36 = vmax.f32 %v4948_v9, 0.0  ;;  %v4951_v29 = vmax.f32 %v4949_v14, 0.0 }
 0x8af   :  { %v4954_v31 = vrot.slane %v4950_v36, 2  ;;  %v4955_v15 = vrot.slane %v4951_v29, 2 }
 0x8b1   :  { %4958 = vst [vmem:[#allocation13] sm:$0xc0] %v4954_v31  ;;  %4959 = vst [vmem:[#allocation13 + $0x8] sm:$0xc0] %v4955_v15 }
 0x8b2   :  { %5334 = shalt.err (!%p5331_p5)
}
 0x8b3   :  { %s11361_s13 = sld [smem:[#allocation223_spill]] }
 0x8b9   :  { %s5335_s10 = scalar_lea.hbm %s11361_s13, 256 }
 0x8ba   :  { %p5336_p6 = scmp.ne.s32.totalorder %s11361_s13, %s5335_s10  ;;  %p5339_p7 = scmp.lt.u32.totalorder %s5335_s10, %s11361_s13 }
 0x8bc   :  { %p5341_p8 = pnand %p5339_p7, %p5336_p6 }
 0x8be   :  { %5344 = shalt.err (!%p5341_p8)
}
 0x8bf   :  { %4969 = dma.vmem_to_hbm [thread:$0]  %s4967_s11, 256, %s11361_s13, [#allocation4]  }
 0x8c0   :  { %5355 = dma.done.wait [#allocation4], 256  }
 0x8c1   :  { %5356 = vsyncadd [#allocation4], 4294967040 }
 0x8c2   :  { %4973 = vsyncpa [#allocation3], 1 }
 0x8c3   :  { %4974 = vsyncpa [#allocation12], 1 }
 0x8c4   :  { %4975 = vsyncpa [#allocation4], 1 }
 0x8c5   :  { %4976 = vsyncpa [#allocation5], 1 }
 0x8c6   :  { %4977 = vsyncpa [#allocation6], 1 }
 0x8c7   :  { %4978 = vsyncpa [#allocation9], 1 }

</bundles_post_ra>
